<compile_context>
chip_gen: v6e
topology: v6e:2x2x1
jax: 0.10.0
libtpu: 0.0.40
codegen_flags: <defaults>
</compile_context>

<pallas_src>
import functools
from collections import namedtuple

import numpy as np
import jax
import jax.numpy as jnp
from jax.experimental import pallas as pl
from jax.experimental.pallas import tpu as pltpu

ACT_DTYPE = jnp.bfloat16                 # activation/weight storage (MXU bf16, f32 accumulate)
_TILE_BYTE_BUDGET = 8 * 1024 * 1024      # per-tile transient budget (window + packed taps + f32 acc)

_VMEM_LIMIT_CACHE = [None]


def _vmem_limit_bytes():
    """Per-generation scoped-VMEM limit (3/4 of physical when queryable)."""
    if _VMEM_LIMIT_CACHE[0] is None:
        lim = 48 * 1024 * 1024                       # safe on v5e/v6e/v7x
        try:
            info = pltpu.get_tpu_info()
            cap = getattr(info, "vmem_capacity_bytes", None)
            if cap:
                lim = int(min(100 * 1024 * 1024, int(cap) * 3 // 4))
        except Exception:
            pass
        _VMEM_LIMIT_CACHE[0] = lim
    return _VMEM_LIMIT_CACHE[0]


def _cparams():
    return pltpu.CompilerParams(
        dimension_semantics=("parallel", "parallel"),
        vmem_limit_bytes=_vmem_limit_bytes(),
    )


def _pick_tile_rows(H, W, cin, cout, pool, max_tile_rows):
    """Largest row-tile TH dividing H whose per-tile transients fit the budget
    and whose multi-tile block shapes satisfy the (8,128) tiling constraints."""
    Wp = W + 2
    if max_tile_rows is None:
        per_row = Wp * (3 * cin * 2 + cin * 2 + cout * 4 + cout * 2)
        max_tile_rows = max(8, _TILE_BYTE_BUDGET // max(per_row, 1))
    if H <= max_tile_rows:
        return H                                  # single tile (blocks = full dims)
    if (4 * Wp) % 8:                              # halo block would break sublane tiling
        return H
    step = 8 if pool else 4
    for th in range(min(int(max_tile_rows), H - 1), step - 1, -1):
        if H % th or th % step or (th * Wp) % 8:
            continue
        if pool and ((th // 2) * (W // 2 + 2)) % 8:
            continue
        return th
    return H


# ----------------------------------------------------------------------------
# Fused conv kernel (3x3 conv [+ pool | + 1x1 head] on one row-tile)
# ----------------------------------------------------------------------------
def _fused_conv_kernel(*refs, mode, cin1, multi, l2, TH, W):
    """One fused SuperPoint block on a row-tile of the padded-flat activation.

    In-VMEM window: [0 | halo row above | TH body rows | halo row below | 0],
    every row Wp = W+2 wide with zero left/right columns.  The 3x3 conv is
    3 tap-packed MXU dots (K = 3*Cin) over shifted flat slices of the window;
    the epilogue fuses bias + ReLU and then pool / 1x1-head / column masking.
    """
    Wp = W + 2
    L = TH * Wp

    idx = 0
    xb = refs[idx]; idx += 1
    if multi:
        xh = refs[idx]; xt = refs[idx + 1]; idx += 2
    w = refs[idx]; b = refs[idx + 1]; idx += 2
    if mode == 'plain':
        msk = refs[idx]; idx += 1
    if mode == 'head':
        wh = refs[idx]; bh = refs[idx + 1]; idx += 2
    out = refs[idx]

    cin = xb.shape[-1]
    cout = b.shape[-1]

    body = xb[0, 0:L, :]
    if multi:
        t = pl.program_id(1)
        nt = pl.num_programs(1)
        zrows = jnp.zeros((Wp, cin), body.dtype)
        # select (not multiply) so uninitialized tail rows can never leak NaNs
        hrow = jnp.where(t > 0, xh[0, 3 * Wp:4 * Wp, :], zrows)
        trow = jnp.where(t < nt - 1, xt[0, 0:Wp, :], zrows)
    else:
        hrow = jnp.zeros((Wp, cin), body.dtype)
        trow = jnp.zeros((Wp, cin), body.dtype)
    zelem = jnp.zeros((1, cin), body.dtype)
    win = jnp.concatenate([zelem, hrow, body, trow, zelem], axis=0)

    acc = jnp.zeros((L, cout), jnp.float32)
    if cin1:
        # grayscale first layer: K=1 -> VPU outer-product path, cast hoisted
        winf = win.astype(jnp.float32)
        for dy in range(3):
            for dx in range(3):
                s = dy * Wp + dx
                acc = acc + winf[s:s + L, :] * w[dy * 3 + dx]
    else:
        # tap-packed MXU path: 3 accumulating dots with K = 3*Cin
        for dy in range(3):
            a = jnp.concatenate(
                [win[dy * Wp + dx: dy * Wp + dx + L, :] for dx in range(3)],
                axis=-1)
            acc = acc + jnp.dot(a, w[dy], preferred_element_type=jnp.float32)

    y = jnp.maximum(acc + b[...], 0.0)           # bias + ReLU (f32)

    if mode == 'plain':
        out[0, 0:L, :] = (y * msk[...]).astype(out.dtype)
    elif mode == 'pool':
        TH2, W2 = TH // 2, W // 2
        Wp2 = W2 + 2
        y4 = y.reshape(TH, Wp, cout)[:, 1:W + 1, :]          # (TH, W, C) interior
        y5 = y4.reshape(TH2, 2, W, cout)
        rmax = jnp.maximum(y5[:, 0, :, :], y5[:, 1, :, :])    # row-pair max
        c5 = rmax.reshape(TH2, W2, 2, cout)
        p = jnp.maximum(c5[:, :, 0, :], c5[:, :, 1, :])       # col-pair max
        zc = jnp.zeros((TH2, 1, cout), jnp.float32)
        po = jnp.concatenate([zc, p, zc], axis=1).reshape(TH2 * Wp2, cout)
        out[0, 0:TH2 * Wp2, :] = po.astype(out.dtype)         # next conv's layout
    else:  # 'head': fused 1x1 conv head (+ optional L2 normalization)
        z = jnp.dot(y.astype(wh.dtype), wh[...],
                    preferred_element_type=jnp.float32) + bh[...]
        if l2:
            # eps guards an all-zero row (torch reference has none -> NaN)
            z = z * jax.lax.rsqrt(jnp.sum(z * z, axis=-1, keepdims=True) + 1e-12)
        out[0, 0:L, :] = z.astype(out.dtype)


def conv_block(x_pf, layer, H, W, *, mode, head=None, l2=False, max_tile_rows=None):
    """x_pf: (N, (H+4)*(W+2), Cin) padded-flat activation (zero L/R columns,
    4 slack rows at the tail for the halo block of the last row-tile)."""
    N, R, Cin = x_pf.shape
    Wp = W + 2
    assert W % 2 == 0 and H >= 1, "even width required"
    assert R == (H + 4) * Wp, "unexpected activation layout"
    if mode == 'pool':
        assert H % 2 == 0 and W % 2 == 0, "2x2 max-pool needs even H and W"

    w, b = layer['w'], layer['b']
    Cout = b.shape[-1]
    cin1 = (Cin == 1)
    TH = _pick_tile_rows(H, W, Cin, Cout, mode == 'pool', max_tile_rows)
    T = H // TH
    multi = T > 1
    L = TH * Wp

    if mode == 'pool':
        Ho, Wo = H // 2, W // 2
        Wpo = Wo + 2
        blk_rows, tot_rows = (TH // 2) * Wpo, (Ho + 4) * Wpo
        out_dtype, out_c = ACT_DTYPE, Cout
    elif mode == 'plain':
        blk_rows, tot_rows = L, (H + 4) * Wp
        out_dtype, out_c = ACT_DTYPE, Cout
    else:  # head
        blk_rows, tot_rows = L, (H + 4) * Wp
        out_dtype, out_c = jnp.float32, head['w'].shape[-1]

    inputs, in_specs = [x_pf], []
    if multi:
        th4 = TH // 4
        # body rows of this tile
        in_specs.append(pl.BlockSpec((1, L, Cin), lambda n, t: (n, t, 0)))
        # 4-row halo blocks: last row = row above the tile, first row = row below
        inputs += [x_pf, x_pf]
        in_specs.append(pl.BlockSpec(
            (1, 4 * Wp, Cin),
            lambda n, t: (n, jnp.maximum(t * th4 - 1, 0), 0)))
        in_specs.append(pl.BlockSpec(
            (1, 4 * Wp, Cin), lambda n, t: (n, (t + 1) * th4, 0)))
    else:
        in_specs.append(pl.BlockSpec((1, R, Cin), lambda n, t: (n, 0, 0)))

    inputs += [w, b]                                       # resident weights / bias
    in_specs += [pl.BlockSpec(w.shape, lambda n, t: (0, 0, 0)),
                 pl.BlockSpec(b.shape, lambda n, t: (0, 0))]
    if mode == 'plain':
        col = np.arange(L) % Wp                            # interior-column mask
        mask = jnp.asarray(((col >= 1) & (col <= W)).astype(np.float32)[:, None])
        inputs.append(mask)
        in_specs.append(pl.BlockSpec((L, 1), lambda n, t: (0, 0)))
    if mode == 'head':
        inputs += [head['w'], head['b']]
        in_specs += [pl.BlockSpec(head['w'].shape, lambda n, t: (0, 0)),
                     pl.BlockSpec(head['b'].shape, lambda n, t: (0, 0))]

    if multi:
        out_spec = pl.BlockSpec((1, blk_rows, out_c), lambda n, t: (n, t, 0))
    else:
        out_spec = pl.BlockSpec((1, tot_rows, out_c), lambda n, t: (n, 0, 0))

    kernel = functools.partial(_fused_conv_kernel, mode=mode, cin1=cin1,
                               multi=multi, l2=l2, TH=TH, W=W)
    return pl.pallas_call(
        kernel,
        out_shape=jax.ShapeDtypeStruct((N, tot_rows, out_c), out_dtype),
        grid=(N, T),
        in_specs=in_specs,
        out_specs=out_spec,
        compiler_params=_cparams(),
    )(*inputs)


# ----------------------------------------------------------------------------
# SuperPoint parameters (real channel widths) + one-time packing
# ----------------------------------------------------------------------------
def init_superpoint_params(key, c1=64, c2=64, c3=128, c4=128, c5=256, d1=256, det=65):
    layer_defs = {
        'conv1a': (c1, 1, 3, 3),  'conv1b': (c1, c1, 3, 3),
        'conv2a': (c2, c1, 3, 3), 'conv2b': (c2, c2, 3, 3),
        'conv3a': (c3, c2, 3, 3), 'conv3b': (c3, c3, 3, 3),
        'conv4a': (c4, c3, 3, 3), 'conv4b': (c4, c4, 3, 3),
        'convPa': (c5, c4, 3, 3), 'convPb': (det, c5, 1, 1),
        'convDa': (c5, c4, 3, 3), 'convDb': (d1, c5, 1, 1),
    }
    params = {}
    for i, (name, shape) in enumerate(layer_defs.items()):
        kw, kb = jax.random.split(jax.random.fold_in(key, i))
        fan_in = shape[1] * shape[2] * shape[3]
        params[name] = {
            'w': jax.random.normal(kw, shape, jnp.float32) * jnp.sqrt(2.0 / fan_in),
            'b': 0.01 * jax.random.normal(kb, (shape[0],), jnp.float32),
        }
    return params


def pack_params(params, det_pad=128):
    """One-time packing: torch (Cout,Cin,kh,kw) -> kernel layouts.
    3x3 layers are tap-packed to (3, 3*Cin, Cout) bf16 (K=3*Cin MXU dots);
    the grayscale first layer stays (9, 1, Cout) f32 (rounded through bf16);
    1x1 heads are (Cin, Cout) bf16 with the 65-ch detector padded to 128."""
    packed = {}
    for name, p in params.items():
        w, b = p['w'], p['b']
        cout, cin, kh, _ = w.shape
        if kh == 3:
            wt = jnp.transpose(w, (2, 3, 1, 0))                   # (3,3,Cin,Cout)
            if cin == 1:
                wp = wt.reshape(9, 1, cout).astype(ACT_DTYPE).astype(jnp.float32)
            else:
                wp = wt.reshape(3, 3 * cin, cout).astype(ACT_DTYPE)
            bp = b.reshape(1, cout).astype(jnp.float32)
        else:                                                     # 1x1 head
            wp = jnp.transpose(w, (2, 3, 1, 0)).reshape(cin, cout)
            bp = b.reshape(1, cout)
            if name == 'convPb':
                wp = jnp.pad(wp, ((0, 0), (0, det_pad - cout)))
                bp = jnp.pad(bp, ((0, 0), (0, det_pad - cout)))
            wp = wp.astype(ACT_DTYPE)
            bp = bp.astype(jnp.float32)
        packed[name] = {'w': wp, 'b': bp}
    return packed


# ----------------------------------------------------------------------------
# SuperPoint forward + ModelWrapper semantics
# ----------------------------------------------------------------------------
def superpoint_forward(packed, x_nchw, max_tile_rows=None):
    """Inner model: returns {'semi': ..., 'desc': ...} (both NCHW, f32)."""
    N, Cimg, H, W = x_nchw.shape
    assert Cimg == 1
    Wp = W + 2
    x = jnp.transpose(x_nchw, (0, 2, 3, 1)).astype(ACT_DTYPE)        # NHWC
    xp = jnp.pad(x, ((0, 0), (0, 0), (1, 1), (0, 0)))                # zero L/R cols
    a = xp.reshape(N, H * Wp, 1)
    a = jnp.pad(a, ((0, 0), (0, 4 * Wp), (0, 0)))                    # halo-tail slack

    def blk(x_, name, mode, head=None, l2=False):
        return conv_block(x_, packed[name], H, W, mode=mode, head=head, l2=l2,
                          max_tile_rows=max_tile_rows)

    # shared VGG-style encoder (pool fused into the conv*b epilogues)
    a = blk(a, 'conv1a', 'plain')
    a = blk(a, 'conv1b', 'pool'); H, W = H // 2, W // 2
    a = blk(a, 'conv2a', 'plain')
    a = blk(a, 'conv2b', 'pool'); H, W = H // 2, W // 2
    a = blk(a, 'conv3a', 'plain')
    a = blk(a, 'conv3b', 'pool'); H, W = H // 2, W // 2
    a = blk(a, 'conv4a', 'plain')
    a = blk(a, 'conv4b', 'plain')

    # heads: convPb / convDb (and the descriptor L2-norm) fused into convPa/convDa
    semi = blk(a, 'convPa', 'head', head=packed['convPb'], l2=False)
    desc = blk(a, 'convDa', 'head', head=packed['convDb'], l2=True)

    Wp = W + 2
    semi = semi[:, :H * Wp, :].reshape(N, H, Wp, -1)[:, :, 1:W + 1, :65]
    desc = desc[:, :H * Wp, :].reshape(N, H, Wp, -1)[:, :, 1:W + 1, :]
    semi = jnp.transpose(semi, (0, 3, 1, 2))                          # NCHW
    desc = jnp.transpose(desc, (0, 3, 1, 2))
    return {'semi': semi, 'desc': desc}


def model_wrapper_forward(model_fn, input_x):
    """Exact ModelWrapper.forward semantics: dict -> namedtuple(sorted keys)."""
    data = model_fn(input_x)
    if isinstance(data, dict):
        ModelEndpoints = namedtuple('ModelEndpoints', sorted(data.keys()))
        data = ModelEndpoints(**data)
    elif isinstance(data, list):
        data = tuple(data)
    return data


# ----------------------------------------------------------------------------
# Pure-JAX reference (same bf16-storage / f32-accumulate numerics)
# ----------------------------------------------------------------------------
def reference_forward(params, x_nchw):
    x = jnp.transpose(x_nchw, (0, 2, 3, 1)).astype(ACT_DTYPE)

    def conv3(x_, name, relu=True):
        w, b = params[name]['w'], params[name]['b']
        wj = jnp.transpose(w, (2, 3, 1, 0)).astype(ACT_DTYPE)
        y = jax.lax.conv_general_dilated(
            x_, wj, (1, 1), 'SAME',
            dimension_numbers=('NHWC', 'HWIO', 'NHWC'),
            preferred_element_type=jnp.float32)
        y = y + b.reshape(1, 1, 1, -1)
        if relu:
            y = jnp.maximum(y, 0.0)
        return y.astype(ACT_DTYPE)

    def pool(x_):
        n, h, w, c_ = x_.shape
        return jnp.max(x_.reshape(n, h // 2, 2, w // 2, 2, c_), axis=(2, 4))

    def head(x_, name, l2=False):
        w, b = params[name]['w'], params[name]['b']
        wj = jnp.transpose(w, (2, 3, 1, 0)).reshape(w.shape[1], w.shape[0]).astype(ACT_DTYPE)
        n, h, wd, c_ = x_.shape
        y = jnp.dot(x_.reshape(-1, c_), wj, preferred_element_type=jnp.float32)
        y = y + b.reshape(1, -1)
        if l2:
            y = y * jax.lax.rsqrt(jnp.sum(y * y, axis=-1, keepdims=True) + 1e-12)
        return y.reshape(n, h, wd, -1)

    a = conv3(x, 'conv1a'); a = conv3(a, 'conv1b'); a = pool(a)
    a = conv3(a, 'conv2a'); a = conv3(a, 'conv2b'); a = pool(a)
    a = conv3(a, 'conv3a'); a = conv3(a, 'conv3b'); a = pool(a)
    a = conv3(a, 'conv4a'); a = conv3(a, 'conv4b')
    pa = conv3(a, 'convPa'); da = conv3(a, 'convDa')
    semi = head(pa, 'convPb')
    desc = head(da, 'convDb', l2=True)
    return (jnp.transpose(semi, (0, 3, 1, 2)),
            jnp.transpose(desc, (0, 3, 1, 2)))


# ----------------------------------------------------------------------------
if __name__ == "__main__":
    key = jax.random.PRNGKey(0)
    pkey, xkey = jax.random.split(key)
    params = init_superpoint_params(pkey)
    packed = pack_params(params)                       # one-time weight packing

    # grayscale NCHW image, small spatial size (divisible by 8)
    x = jax.random.normal(xkey, (2, 1, 16, 16), jnp.float32)

    # max_tile_rows=8 keeps the spatial-halo pipeline exercised even at this
    # toy resolution (conv1a / conv1b run with 2 row-tiles per image).
    model_fn = jax.jit(functools.partial(superpoint_forward, packed, max_tile_rows=8))
    out = model_wrapper_forward(model_fn, x)
    jax.block_until_ready(out.semi)
    jax.block_until_ready(out.desc)

    # ModelWrapper semantics
    assert type(out).__name__ == 'ModelEndpoints'
    assert out._fields == ('desc', 'semi')             # sorted dict keys
    assert out.semi.shape == (2, 65, 2, 2)              # 65-ch detector head @ H/8
    assert out.desc.shape == (2, 256, 2, 2)             # L2-normalized descriptors

    # descriptors are unit-norm along the channel axis
    norms = jnp.sqrt(jnp.sum(out.desc.astype(jnp.float32) ** 2, axis=1))
    assert bool(jnp.allclose(norms, 1.0, atol=1e-3))

    # numerics vs. a pure-JAX reference with matching bf16/f32 mixed precision
    semi_ref, desc_ref = jax.jit(functools.partial(reference_forward, params))(x)
    assert bool(jnp.allclose(out.semi, semi_ref, atol=3e-2, rtol=3e-2))
    assert bool(jnp.allclose(out.desc, desc_ref, atol=3e-2, rtol=3e-2))

    print("KERNEL_OK")
</pallas_src>

<mosaic_0001>
module attributes {stable_mosaic.version = 11 : i64} {
  func.func @_fused_conv_kernel(%arg0: i32, %arg1: i32, %arg2: memref<1x144x64xbf16, #tpu.memory_space<vmem>>, %arg3: memref<1x72x64xbf16, #tpu.memory_space<vmem>>, %arg4: memref<1x72x64xbf16, #tpu.memory_space<vmem>>, %arg5: memref<3x192x64xbf16, #tpu.memory_space<vmem>>, %arg6: memref<1x64xf32, #tpu.memory_space<vmem>>, %arg7: memref<1x40x64xbf16, #tpu.memory_space<vmem>>) attributes {dimension_semantics = [#tpu.dimension_semantics<parallel>, #tpu.dimension_semantics<parallel>], iteration_bounds = array<i64: 2, 2>, scalar_prefetch = 0 : i64, scratch_operands = 0 : i64, tpu.core_type = #tpu.core_type<tc>, window_params = [{transform_indices = @transform_0, window_bounds = array<i64: 1, 144, 64>}, {transform_indices = @transform_1, window_bounds = array<i64: 1, 72, 64>}, {transform_indices = @transform_2, window_bounds = array<i64: 1, 72, 64>}, {pipeline_mode = #tpu.pipeline_mode<synchronous>, transform_indices = @transform_3, window_bounds = array<i64: 3, 192, 64>}, {pipeline_mode = #tpu.pipeline_mode<synchronous>, transform_indices = @transform_4, window_bounds = array<i64: 1, 64>}, {transform_indices = @transform_5, window_bounds = array<i64: 1, 40, 64>}]} {
    %c0 = arith.constant 0 : index
    %c0_0 = arith.constant 0 : index
    %c0_1 = arith.constant 0 : index
    %0 = vector.load %arg2[%c0, %c0_0, %c0_1] : memref<1x144x64xbf16, #tpu.memory_space<vmem>>, vector<1x144x64xbf16>
    %1 = vector.shape_cast %0 : vector<1x144x64xbf16> to vector<144x64xbf16>
    %cst = arith.constant 0.000000e+00 : bf16
    %2 = vector.broadcast %cst : bf16 to vector<18x64xbf16>
    %c0_i32 = arith.constant 0 : i32
    %3 = arith.cmpi sgt, %arg1, %c0_i32 : i32
    %c0_2 = arith.constant 0 : index
    %c54 = arith.constant 54 : index
    %c0_3 = arith.constant 0 : index
    %4 = vector.load %arg3[%c0_2, %c54, %c0_3] : memref<1x72x64xbf16, #tpu.memory_space<vmem>>, vector<1x18x64xbf16>
    %5 = vector.shape_cast %4 : vector<1x18x64xbf16> to vector<18x64xbf16>
    %6 = arith.select %3, %5, %2 : vector<18x64xbf16>
    %c1_i32 = arith.constant 1 : i32
    %7 = arith.cmpi slt, %arg1, %c1_i32 : i32
    %c0_4 = arith.constant 0 : index
    %c0_5 = arith.constant 0 : index
    %c0_6 = arith.constant 0 : index
    %8 = vector.load %arg4[%c0_4, %c0_5, %c0_6] : memref<1x72x64xbf16, #tpu.memory_space<vmem>>, vector<1x18x64xbf16>
    %9 = vector.shape_cast %8 : vector<1x18x64xbf16> to vector<18x64xbf16>
    %10 = arith.select %7, %9, %2 : vector<18x64xbf16>
    %cst_7 = arith.constant 0.000000e+00 : bf16
    %11 = vector.broadcast %cst_7 : bf16 to vector<1x64xbf16>
    %12 = tpu.concatenate %11, %6, %1, %10, %11 in 0 : vector<1x64xbf16>, vector<18x64xbf16>, vector<144x64xbf16>, vector<18x64xbf16>, vector<1x64xbf16> -> vector<182x64xbf16>
    %cst_8 = arith.constant 0.000000e+00 : f32
    %13 = vector.broadcast %cst_8 : f32 to vector<144x64xf32>
    %14 = vector.extract_strided_slice %12 {offsets = [0, 0], sizes = [144, 64], strides = [1, 1]} : vector<182x64xbf16> to vector<144x64xbf16>
    %15 = vector.extract_strided_slice %12 {offsets = [1, 0], sizes = [144, 64], strides = [1, 1]} : vector<182x64xbf16> to vector<144x64xbf16>
    %16 = vector.extract_strided_slice %12 {offsets = [2, 0], sizes = [144, 64], strides = [1, 1]} : vector<182x64xbf16> to vector<144x64xbf16>
    %17 = tpu.concatenate %14, %15, %16 in 1 : vector<144x64xbf16>, vector<144x64xbf16>, vector<144x64xbf16> -> vector<144x192xbf16>
    %c0_9 = arith.constant 0 : index
    %c0_10 = arith.constant 0 : index
    %c0_11 = arith.constant 0 : index
    %18 = vector.load %arg5[%c0_9, %c0_10, %c0_11] : memref<3x192x64xbf16, #tpu.memory_space<vmem>>, vector<1x192x64xbf16>
    %19 = vector.shape_cast %18 : vector<1x192x64xbf16> to vector<192x64xbf16>
    %cst_12 = arith.constant dense<0.000000e+00> : vector<144x64xf32>
    %20 = tpu.matmul %17, %19, %cst_12 {dimension_numbers = #tpu.dot_dimension_numbers<[1], [0], [0], [1], [0, 0, 1, 1], [], []>} : vector<144x192xbf16>, vector<192x64xbf16>, vector<144x64xf32> -> vector<144x64xf32>
    %21 = arith.addf %13, %20 : vector<144x64xf32>
    %22 = vector.extract_strided_slice %12 {offsets = [18, 0], sizes = [144, 64], strides = [1, 1]} : vector<182x64xbf16> to vector<144x64xbf16>
    %23 = vector.extract_strided_slice %12 {offsets = [19, 0], sizes = [144, 64], strides = [1, 1]} : vector<182x64xbf16> to vector<144x64xbf16>
    %24 = vector.extract_strided_slice %12 {offsets = [20, 0], sizes = [144, 64], strides = [1, 1]} : vector<182x64xbf16> to vector<144x64xbf16>
    %25 = tpu.concatenate %22, %23, %24 in 1 : vector<144x64xbf16>, vector<144x64xbf16>, vector<144x64xbf16> -> vector<144x192xbf16>
    %c1 = arith.constant 1 : index
    %c0_13 = arith.constant 0 : index
    %c0_14 = arith.constant 0 : index
    %26 = vector.load %arg5[%c1, %c0_13, %c0_14] : memref<3x192x64xbf16, #tpu.memory_space<vmem>>, vector<1x192x64xbf16>
    %27 = vector.shape_cast %26 : vector<1x192x64xbf16> to vector<192x64xbf16>
    %cst_15 = arith.constant dense<0.000000e+00> : vector<144x64xf32>
    %28 = tpu.matmul %25, %27, %cst_15 {dimension_numbers = #tpu.dot_dimension_numbers<[1], [0], [0], [1], [0, 0, 1, 1], [], []>} : vector<144x192xbf16>, vector<192x64xbf16>, vector<144x64xf32> -> vector<144x64xf32>
    %29 = arith.addf %21, %28 : vector<144x64xf32>
    %30 = vector.extract_strided_slice %12 {offsets = [36, 0], sizes = [144, 64], strides = [1, 1]} : vector<182x64xbf16> to vector<144x64xbf16>
    %31 = vector.extract_strided_slice %12 {offsets = [37, 0], sizes = [144, 64], strides = [1, 1]} : vector<182x64xbf16> to vector<144x64xbf16>
    %32 = vector.extract_strided_slice %12 {offsets = [38, 0], sizes = [144, 64], strides = [1, 1]} : vector<182x64xbf16> to vector<144x64xbf16>
    %33 = tpu.concatenate %30, %31, %32 in 1 : vector<144x64xbf16>, vector<144x64xbf16>, vector<144x64xbf16> -> vector<144x192xbf16>
    %c2 = arith.constant 2 : index
    %c0_16 = arith.constant 0 : index
    %c0_17 = arith.constant 0 : index
    %34 = vector.load %arg5[%c2, %c0_16, %c0_17] : memref<3x192x64xbf16, #tpu.memory_space<vmem>>, vector<1x192x64xbf16>
    %35 = vector.shape_cast %34 : vector<1x192x64xbf16> to vector<192x64xbf16>
    %cst_18 = arith.constant dense<0.000000e+00> : vector<144x64xf32>
    %36 = tpu.matmul %33, %35, %cst_18 {dimension_numbers = #tpu.dot_dimension_numbers<[1], [0], [0], [1], [0, 0, 1, 1], [], []>} : vector<144x192xbf16>, vector<192x64xbf16>, vector<144x64xf32> -> vector<144x64xf32>
    %37 = arith.addf %29, %36 : vector<144x64xf32>
    %c0_19 = arith.constant 0 : index
    %c0_20 = arith.constant 0 : index
    %38 = vector.load %arg6[%c0_19, %c0_20] : memref<1x64xf32, #tpu.memory_space<vmem>>, vector<1x64xf32>
    %39 = vector.broadcast %38 : vector<1x64xf32> to vector<144x64xf32>
    %40 = arith.addf %37, %39 : vector<144x64xf32>
    %cst_21 = arith.constant 0.000000e+00 : f32
    %41 = vector.broadcast %cst_21 : f32 to vector<144x64xf32>
    %42 = arith.maximumf %40, %41 : vector<144x64xf32>
    %43 = vector.shape_cast %42 : vector<144x64xf32> to vector<8x18x64xf32>
    %44 = vector.extract_strided_slice %43 {offsets = [0, 1, 0], sizes = [8, 16, 64], strides = [1, 1, 1]} : vector<8x18x64xf32> to vector<8x16x64xf32>
    %45 = vector.shape_cast %44 : vector<8x16x64xf32> to vector<4x2x16x64xf32>
    %46 = vector.extract_strided_slice %45 {offsets = [0, 0, 0, 0], sizes = [4, 1, 16, 64], strides = [1, 1, 1, 1]} : vector<4x2x16x64xf32> to vector<4x1x16x64xf32>
    %47 = vector.shape_cast %46 : vector<4x1x16x64xf32> to vector<4x16x64xf32>
    %48 = vector.extract_strided_slice %45 {offsets = [0, 1, 0, 0], sizes = [4, 1, 16, 64], strides = [1, 1, 1, 1]} : vector<4x2x16x64xf32> to vector<4x1x16x64xf32>
    %49 = vector.shape_cast %48 : vector<4x1x16x64xf32> to vector<4x16x64xf32>
    %50 = arith.maximumf %47, %49 : vector<4x16x64xf32>
    %51 = vector.shape_cast %50 : vector<4x16x64xf32> to vector<4x8x2x64xf32>
    %52 = vector.extract_strided_slice %51 {offsets = [0, 0, 0, 0], sizes = [4, 8, 1, 64], strides = [1, 1, 1, 1]} : vector<4x8x2x64xf32> to vector<4x8x1x64xf32>
    %53 = vector.shape_cast %52 : vector<4x8x1x64xf32> to vector<4x8x64xf32>
    %54 = vector.extract_strided_slice %51 {offsets = [0, 0, 1, 0], sizes = [4, 8, 1, 64], strides = [1, 1, 1, 1]} : vector<4x8x2x64xf32> to vector<4x8x1x64xf32>
    %55 = vector.shape_cast %54 : vector<4x8x1x64xf32> to vector<4x8x64xf32>
    %56 = arith.maximumf %53, %55 : vector<4x8x64xf32>
    %cst_22 = arith.constant 0.000000e+00 : f32
    %57 = vector.broadcast %cst_22 : f32 to vector<4x1x64xf32>
    %58 = tpu.concatenate %57, %56, %57 in 1 : vector<4x1x64xf32>, vector<4x8x64xf32>, vector<4x1x64xf32> -> vector<4x10x64xf32>
    %59 = vector.shape_cast %58 : vector<4x10x64xf32> to vector<40x64xf32>
    %60 = arith.truncf %59 : vector<40x64xf32> to vector<40x64xbf16>
    %c0_23 = arith.constant 0 : index
    %c0_24 = arith.constant 0 : index
    %c0_25 = arith.constant 0 : index
    %61 = vector.load %arg7[%c0_23, %c0_24, %c0_25] : memref<1x40x64xbf16, #tpu.memory_space<vmem>>, vector<1x40x64xbf16>
    %62 = vector.shape_cast %61 : vector<1x40x64xbf16> to vector<40x64xbf16>
    %63 = vector.shape_cast %60 : vector<40x64xbf16> to vector<1x40x64xbf16>
    tpu.vector_store %arg7[%c0_23, %c0_24, %c0_25], %63 {strides = array<i32>} : memref<1x40x64xbf16, #tpu.memory_space<vmem>>, vector<1x40x64xbf16>,
    return
  }
  func.func @transform_0(%arg0: i32, %arg1: i32) -> (i32, i32, i32) {
    %c0_i32 = arith.constant 0 : i32
    %c0_i32_0 = arith.constant 0 : i32
    return %arg0, %arg1, %c0_i32 : i32, i32, i32
  }
  func.func @transform_1(%arg0: i32, %arg1: i32) -> (i32, i32, i32) {
    %c2_i32 = arith.constant 2 : i32
    %0 = arith.muli %arg1, %c2_i32 : i32
    %c1_i32 = arith.constant 1 : i32
    %1 = arith.subi %0, %c1_i32 : i32
    %c0_i32 = arith.constant 0 : i32
    %2 = arith.maxsi %1, %c0_i32 : i32
    %c0_i32_0 = arith.constant 0 : i32
    %c0_i32_1 = arith.constant 0 : i32
    return %arg0, %2, %c0_i32_0 : i32, i32, i32
  }
  func.func @transform_2(%arg0: i32, %arg1: i32) -> (i32, i32, i32) {
    %c1_i32 = arith.constant 1 : i32
    %0 = arith.addi %arg1, %c1_i32 : i32
    %c2_i32 = arith.constant 2 : i32
    %1 = arith.muli %0, %c2_i32 : i32
    %c0_i32 = arith.constant 0 : i32
    %c0_i32_0 = arith.constant 0 : i32
    return %arg0, %1, %c0_i32 : i32, i32, i32
  }
  func.func @transform_3(%arg0: i32, %arg1: i32) -> (i32, i32, i32) {
    %c0_i32 = arith.constant 0 : i32
    %c0_i32_0 = arith.constant 0 : i32
    %c0_i32_1 = arith.constant 0 : i32
    %c0_i32_2 = arith.constant 0 : i32
    return %c0_i32, %c0_i32_0, %c0_i32_1 : i32, i32, i32
  }
  func.func @transform_4(%arg0: i32, %arg1: i32) -> (i32, i32) {
    %c0_i32 = arith.constant 0 : i32
    %c0_i32_0 = arith.constant 0 : i32
    %c0_i32_1 = arith.constant 0 : i32
    return %c0_i32, %c0_i32_0 : i32, i32
  }
  func.func @transform_5(%arg0: i32, %arg1: i32) -> (i32, i32, i32) {
    %c0_i32 = arith.constant 0 : i32
    %c0_i32_0 = arith.constant 0 : i32
    return %arg0, %arg1, %c0_i32 : i32, i32, i32
  }
}

module attributes {stable_mosaic.version = 11 : i64} {
  func.func @_fused_conv_kernel(%arg0: i32, %arg1: i32, %arg2: memref<1x120x64xbf16, #tpu.memory_space<vmem>>, %arg3: memref<3x192x64xbf16, #tpu.memory_space<vmem>>, %arg4: memref<1x64xf32, #tpu.memory_space<vmem>>, %arg5: memref<80x1xf32, #tpu.memory_space<vmem>>, %arg6: memref<1x120x64xbf16, #tpu.memory_space<vmem>>) attributes {dimension_semantics = [#tpu.dimension_semantics<parallel>, #tpu.dimension_semantics<parallel>], iteration_bounds = array<i64: 2, 1>, scalar_prefetch = 0 : i64, scratch_operands = 0 : i64, tpu.core_type = #tpu.core_type<tc>, window_params = [{transform_indices = @transform_0, window_bounds = array<i64: 1, 120, 64>}, {pipeline_mode = #tpu.pipeline_mode<synchronous>, transform_indices = @transform_1, window_bounds = array<i64: 3, 192, 64>}, {pipeline_mode = #tpu.pipeline_mode<synchronous>, transform_indices = @transform_2, window_bounds = array<i64: 1, 64>}, {pipeline_mode = #tpu.pipeline_mode<synchronous>, transform_indices = @transform_3, window_bounds = array<i64: 80, 1>}, {transform_indices = @transform_4, window_bounds = array<i64: 1, 120, 64>}]} {
    %c0 = arith.constant 0 : index
    %c0_0 = arith.constant 0 : index
    %c0_1 = arith.constant 0 : index
    %0 = vector.load %arg2[%c0, %c0_0, %c0_1] : memref<1x120x64xbf16, #tpu.memory_space<vmem>>, vector<1x80x64xbf16>
    %1 = vector.shape_cast %0 : vector<1x80x64xbf16> to vector<80x64xbf16>
    %cst = arith.constant 0.000000e+00 : bf16
    %2 = vector.broadcast %cst : bf16 to vector<10x64xbf16>
    %cst_2 = arith.constant 0.000000e+00 : bf16
    %3 = vector.broadcast %cst_2 : bf16 to vector<10x64xbf16>
    %cst_3 = arith.constant 0.000000e+00 : bf16
    %4 = vector.broadcast %cst_3 : bf16 to vector<1x64xbf16>
    %5 = tpu.concatenate %4, %2, %1, %3, %4 in 0 : vector<1x64xbf16>, vector<10x64xbf16>, vector<80x64xbf16>, vector<10x64xbf16>, vector<1x64xbf16> -> vector<102x64xbf16>
    %cst_4 = arith.constant 0.000000e+00 : f32
    %6 = vector.broadcast %cst_4 : f32 to vector<80x64xf32>
    %7 = vector.extract_strided_slice %5 {offsets = [0, 0], sizes = [80, 64], strides = [1, 1]} : vector<102x64xbf16> to vector<80x64xbf16>
    %8 = vector.extract_strided_slice %5 {offsets = [1, 0], sizes = [80, 64], strides = [1, 1]} : vector<102x64xbf16> to vector<80x64xbf16>
    %9 = vector.extract_strided_slice %5 {offsets = [2, 0], sizes = [80, 64], strides = [1, 1]} : vector<102x64xbf16> to vector<80x64xbf16>
    %10 = tpu.concatenate %7, %8, %9 in 1 : vector<80x64xbf16>, vector<80x64xbf16>, vector<80x64xbf16> -> vector<80x192xbf16>
    %c0_5 = arith.constant 0 : index
    %c0_6 = arith.constant 0 : index
    %c0_7 = arith.constant 0 : index
    %11 = vector.load %arg3[%c0_5, %c0_6, %c0_7] : memref<3x192x64xbf16, #tpu.memory_space<vmem>>, vector<1x192x64xbf16>
    %12 = vector.shape_cast %11 : vector<1x192x64xbf16> to vector<192x64xbf16>
    %cst_8 = arith.constant dense<0.000000e+00> : vector<80x64xf32>
    %13 = tpu.matmul %10, %12, %cst_8 {dimension_numbers = #tpu.dot_dimension_numbers<[1], [0], [0], [1], [0, 0, 1, 1], [], []>} : vector<80x192xbf16>, vector<192x64xbf16>, vector<80x64xf32> -> vector<80x64xf32>
    %14 = arith.addf %6, %13 : vector<80x64xf32>
    %15 = vector.extract_strided_slice %5 {offsets = [10, 0], sizes = [80, 64], strides = [1, 1]} : vector<102x64xbf16> to vector<80x64xbf16>
    %16 = vector.extract_strided_slice %5 {offsets = [11, 0], sizes = [80, 64], strides = [1, 1]} : vector<102x64xbf16> to vector<80x64xbf16>
    %17 = vector.extract_strided_slice %5 {offsets = [12, 0], sizes = [80, 64], strides = [1, 1]} : vector<102x64xbf16> to vector<80x64xbf16>
    %18 = tpu.concatenate %15, %16, %17 in 1 : vector<80x64xbf16>, vector<80x64xbf16>, vector<80x64xbf16> -> vector<80x192xbf16>
    %c1 = arith.constant 1 : index
    %c0_9 = arith.constant 0 : index
    %c0_10 = arith.constant 0 : index
    %19 = vector.load %arg3[%c1, %c0_9, %c0_10] : memref<3x192x64xbf16, #tpu.memory_space<vmem>>, vector<1x192x64xbf16>
    %20 = vector.shape_cast %19 : vector<1x192x64xbf16> to vector<192x64xbf16>
    %cst_11 = arith.constant dense<0.000000e+00> : vector<80x64xf32>
    %21 = tpu.matmul %18, %20, %cst_11 {dimension_numbers = #tpu.dot_dimension_numbers<[1], [0], [0], [1], [0, 0, 1, 1], [], []>} : vector<80x192xbf16>, vector<192x64xbf16>, vector<80x64xf32> -> vector<80x64xf32>
    %22 = arith.addf %14, %21 : vector<80x64xf32>
    %23 = vector.extract_strided_slice %5 {offsets = [20, 0], sizes = [80, 64], strides = [1, 1]} : vector<102x64xbf16> to vector<80x64xbf16>
    %24 = vector.extract_strided_slice %5 {offsets = [21, 0], sizes = [80, 64], strides = [1, 1]} : vector<102x64xbf16> to vector<80x64xbf16>
    %25 = vector.extract_strided_slice %5 {offsets = [22, 0], sizes = [80, 64], strides = [1, 1]} : vector<102x64xbf16> to vector<80x64xbf16>
    %26 = tpu.concatenate %23, %24, %25 in 1 : vector<80x64xbf16>, vector<80x64xbf16>, vector<80x64xbf16> -> vector<80x192xbf16>
    %c2 = arith.constant 2 : index
    %c0_12 = arith.constant 0 : index
    %c0_13 = arith.constant 0 : index
    %27 = vector.load %arg3[%c2, %c0_12, %c0_13] : memref<3x192x64xbf16, #tpu.memory_space<vmem>>, vector<1x192x64xbf16>
    %28 = vector.shape_cast %27 : vector<1x192x64xbf16> to vector<192x64xbf16>
    %cst_14 = arith.constant dense<0.000000e+00> : vector<80x64xf32>
    %29 = tpu.matmul %26, %28, %cst_14 {dimension_numbers = #tpu.dot_dimension_numbers<[1], [0], [0], [1], [0, 0, 1, 1], [], []>} : vector<80x192xbf16>, vector<192x64xbf16>, vector<80x64xf32> -> vector<80x64xf32>
    %30 = arith.addf %22, %29 : vector<80x64xf32>
    %c0_15 = arith.constant 0 : index
    %c0_16 = arith.constant 0 : index
    %31 = vector.load %arg4[%c0_15, %c0_16] : memref<1x64xf32, #tpu.memory_space<vmem>>, vector<1x64xf32>
    %32 = vector.broadcast %31 : vector<1x64xf32> to vector<80x64xf32>
    %33 = arith.addf %30, %32 : vector<80x64xf32>
    %cst_17 = arith.constant 0.000000e+00 : f32
    %34 = vector.broadcast %cst_17 : f32 to vector<80x64xf32>
    %35 = arith.maximumf %33, %34 : vector<80x64xf32>
    %c0_18 = arith.constant 0 : index
    %c0_19 = arith.constant 0 : index
    %36 = vector.load %arg5[%c0_18, %c0_19] : memref<80x1xf32, #tpu.memory_space<vmem>>, vector<80x1xf32>
    %37 = vector.broadcast %36 : vector<80x1xf32> to vector<80x64xf32>
    %38 = arith.mulf %35, %37 : vector<80x64xf32>
    %39 = arith.truncf %38 : vector<80x64xf32> to vector<80x64xbf16>
    %c0_20 = arith.constant 0 : index
    %c0_21 = arith.constant 0 : index
    %c0_22 = arith.constant 0 : index
    %40 = vector.load %arg6[%c0_20, %c0_21, %c0_22] : memref<1x120x64xbf16, #tpu.memory_space<vmem>>, vector<1x80x64xbf16>
    %41 = vector.shape_cast %40 : vector<1x80x64xbf16> to vector<80x64xbf16>
    %42 = vector.shape_cast %39 : vector<80x64xbf16> to vector<1x80x64xbf16>
    tpu.vector_store %arg6[%c0_20, %c0_21, %c0_22], %42 {strides = array<i32>} : memref<1x120x64xbf16, #tpu.memory_space<vmem>>, vector<1x80x64xbf16>,
    return
  }
  func.func @transform_0(%arg0: i32, %arg1: i32) -> (i32, i32, i32) {
    %c0_i32 = arith.constant 0 : i32
    %c0_i32_0 = arith.constant 0 : i32
    %c0_i32_1 = arith.constant 0 : i32
    return %arg0, %c0_i32, %c0_i32_0 : i32, i32, i32
  }
  func.func @transform_1(%arg0: i32, %arg1: i32) -> (i32, i32, i32) {
    %c0_i32 = arith.constant 0 : i32
    %c0_i32_0 = arith.constant 0 : i32
    %c0_i32_1 = arith.constant 0 : i32
    %c0_i32_2 = arith.constant 0 : i32
    return %c0_i32, %c0_i32_0, %c0_i32_1 : i32, i32, i32
  }
  func.func @transform_2(%arg0: i32, %arg1: i32) -> (i32, i32) {
    %c0_i32 = arith.constant 0 : i32
    %c0_i32_0 = arith.constant 0 : i32
    %c0_i32_1 = arith.constant 0 : i32
    return %c0_i32, %c0_i32_0 : i32, i32
  }
  func.func @transform_3(%arg0: i32, %arg1: i32) -> (i32, i32) {
    %c0_i32 = arith.constant 0 : i32
    %c0_i32_0 = arith.constant 0 : i32
    %c0_i32_1 = arith.constant 0 : i32
    return %c0_i32, %c0_i32_0 : i32, i32
  }
  func.func @transform_4(%arg0: i32, %arg1: i32) -> (i32, i32, i32) {
    %c0_i32 = arith.constant 0 : i32
    %c0_i32_0 = arith.constant 0 : i32
    %c0_i32_1 = arith.constant 0 : i32
    return %arg0, %c0_i32, %c0_i32_0 : i32, i32, i32
  }
}

module attributes {stable_mosaic.version = 11 : i64} {
  func.func @_fused_conv_kernel(%arg0: i32, %arg1: i32, %arg2: memref<1x144x1xbf16, #tpu.memory_space<vmem>>, %arg3: memref<1x72x1xbf16, #tpu.memory_space<vmem>>, %arg4: memref<1x72x1xbf16, #tpu.memory_space<vmem>>, %arg5: memref<9x1x64xf32, #tpu.memory_space<vmem>>, %arg6: memref<1x64xf32, #tpu.memory_space<vmem>>, %arg7: memref<144x1xf32, #tpu.memory_space<vmem>>, %arg8: memref<1x144x64xbf16, #tpu.memory_space<vmem>>) attributes {dimension_semantics = [#tpu.dimension_semantics<parallel>, #tpu.dimension_semantics<parallel>], iteration_bounds = array<i64: 2, 2>, scalar_prefetch = 0 : i64, scratch_operands = 0 : i64, tpu.core_type = #tpu.core_type<tc>, window_params = [{transform_indices = @transform_0, window_bounds = array<i64: 1, 144, 1>}, {transform_indices = @transform_1, window_bounds = array<i64: 1, 72, 1>}, {transform_indices = @transform_2, window_bounds = array<i64: 1, 72, 1>}, {pipeline_mode = #tpu.pipeline_mode<synchronous>, transform_indices = @transform_3, window_bounds = array<i64: 9, 1, 64>}, {pipeline_mode = #tpu.pipeline_mode<synchronous>, transform_indices = @transform_4, window_bounds = array<i64: 1, 64>}, {pipeline_mode = #tpu.pipeline_mode<synchronous>, transform_indices = @transform_5, window_bounds = array<i64: 144, 1>}, {transform_indices = @transform_6, window_bounds = array<i64: 1, 144, 64>}]} {
    %c0 = arith.constant 0 : index
    %c0_0 = arith.constant 0 : index
    %c0_1 = arith.constant 0 : index
    %0 = vector.load %arg2[%c0, %c0_0, %c0_1] : memref<1x144x1xbf16, #tpu.memory_space<vmem>>, vector<1x144x1xbf16>
    %1 = vector.shape_cast %0 : vector<1x144x1xbf16> to vector<144x1xbf16>
    %cst = arith.constant 0.000000e+00 : bf16
    %2 = vector.broadcast %cst : bf16 to vector<18x1xbf16>
    %c0_i32 = arith.constant 0 : i32
    %3 = arith.cmpi sgt, %arg1, %c0_i32 : i32
    %c0_2 = arith.constant 0 : index
    %c54 = arith.constant 54 : index
    %c0_3 = arith.constant 0 : index
    %4 = vector.load %arg3[%c0_2, %c54, %c0_3] : memref<1x72x1xbf16, #tpu.memory_space<vmem>>, vector<1x18x1xbf16>
    %5 = vector.shape_cast %4 : vector<1x18x1xbf16> to vector<18x1xbf16>
    %6 = arith.select %3, %5, %2 : vector<18x1xbf16>
    %c1_i32 = arith.constant 1 : i32
    %7 = arith.cmpi slt, %arg1, %c1_i32 : i32
    %c0_4 = arith.constant 0 : index
    %c0_5 = arith.constant 0 : index
    %c0_6 = arith.constant 0 : index
    %8 = vector.load %arg4[%c0_4, %c0_5, %c0_6] : memref<1x72x1xbf16, #tpu.memory_space<vmem>>, vector<1x18x1xbf16>
    %9 = vector.shape_cast %8 : vector<1x18x1xbf16> to vector<18x1xbf16>
    %10 = arith.select %7, %9, %2 : vector<18x1xbf16>
    %cst_7 = arith.constant 0.000000e+00 : bf16
    %11 = vector.broadcast %cst_7 : bf16 to vector<1x1xbf16>
    %12 = tpu.concatenate %11, %6, %1, %10, %11 in 0 : vector<1x1xbf16>, vector<18x1xbf16>, vector<144x1xbf16>, vector<18x1xbf16>, vector<1x1xbf16> -> vector<182x1xbf16>
    %cst_8 = arith.constant 0.000000e+00 : f32
    %13 = vector.broadcast %cst_8 : f32 to vector<144x64xf32>
    %14 = arith.extf %12 : vector<182x1xbf16> to vector<182x1xf32>
    %15 = vector.extract_strided_slice %14 {offsets = [0, 0], sizes = [144, 1], strides = [1, 1]} : vector<182x1xf32> to vector<144x1xf32>
    %c0_9 = arith.constant 0 : index
    %c0_10 = arith.constant 0 : index
    %c0_11 = arith.constant 0 : index
    %16 = vector.load %arg5[%c0_9, %c0_10, %c0_11] : memref<9x1x64xf32, #tpu.memory_space<vmem>>, vector<1x1x64xf32>
    %17 = vector.shape_cast %16 : vector<1x1x64xf32> to vector<1x64xf32>
    %18 = vector.broadcast %15 : vector<144x1xf32> to vector<144x64xf32>
    %19 = vector.broadcast %17 : vector<1x64xf32> to vector<144x64xf32>
    %20 = arith.mulf %18, %19 : vector<144x64xf32>
    %21 = arith.addf %13, %20 : vector<144x64xf32>
    %22 = vector.extract_strided_slice %14 {offsets = [1, 0], sizes = [144, 1], strides = [1, 1]} : vector<182x1xf32> to vector<144x1xf32>
    %c1 = arith.constant 1 : index
    %c0_12 = arith.constant 0 : index
    %c0_13 = arith.constant 0 : index
    %23 = vector.load %arg5[%c1, %c0_12, %c0_13] : memref<9x1x64xf32, #tpu.memory_space<vmem>>, vector<1x1x64xf32>
    %24 = vector.shape_cast %23 : vector<1x1x64xf32> to vector<1x64xf32>
    %25 = vector.broadcast %22 : vector<144x1xf32> to vector<144x64xf32>
    %26 = vector.broadcast %24 : vector<1x64xf32> to vector<144x64xf32>
    %27 = arith.mulf %25, %26 : vector<144x64xf32>
    %28 = arith.addf %21, %27 : vector<144x64xf32>
    %29 = vector.extract_strided_slice %14 {offsets = [2, 0], sizes = [144, 1], strides = [1, 1]} : vector<182x1xf32> to vector<144x1xf32>
    %c2 = arith.constant 2 : index
    %c0_14 = arith.constant 0 : index
    %c0_15 = arith.constant 0 : index
    %30 = vector.load %arg5[%c2, %c0_14, %c0_15] : memref<9x1x64xf32, #tpu.memory_space<vmem>>, vector<1x1x64xf32>
    %31 = vector.shape_cast %30 : vector<1x1x64xf32> to vector<1x64xf32>
    %32 = vector.broadcast %29 : vector<144x1xf32> to vector<144x64xf32>
    %33 = vector.broadcast %31 : vector<1x64xf32> to vector<144x64xf32>
    %34 = arith.mulf %32, %33 : vector<144x64xf32>
    %35 = arith.addf %28, %34 : vector<144x64xf32>
    %36 = vector.extract_strided_slice %14 {offsets = [18, 0], sizes = [144, 1], strides = [1, 1]} : vector<182x1xf32> to vector<144x1xf32>
    %c3 = arith.constant 3 : index
    %c0_16 = arith.constant 0 : index
    %c0_17 = arith.constant 0 : index
    %37 = vector.load %arg5[%c3, %c0_16, %c0_17] : memref<9x1x64xf32, #tpu.memory_space<vmem>>, vector<1x1x64xf32>
    %38 = vector.shape_cast %37 : vector<1x1x64xf32> to vector<1x64xf32>
    %39 = vector.broadcast %36 : vector<144x1xf32> to vector<144x64xf32>
    %40 = vector.broadcast %38 : vector<1x64xf32> to vector<144x64xf32>
    %41 = arith.mulf %39, %40 : vector<144x64xf32>
    %42 = arith.addf %35, %41 : vector<144x64xf32>
    %43 = vector.extract_strided_slice %14 {offsets = [19, 0], sizes = [144, 1], strides = [1, 1]} : vector<182x1xf32> to vector<144x1xf32>
    %c4 = arith.constant 4 : index
    %c0_18 = arith.constant 0 : index
    %c0_19 = arith.constant 0 : index
    %44 = vector.load %arg5[%c4, %c0_18, %c0_19] : memref<9x1x64xf32, #tpu.memory_space<vmem>>, vector<1x1x64xf32>
    %45 = vector.shape_cast %44 : vector<1x1x64xf32> to vector<1x64xf32>
    %46 = vector.broadcast %43 : vector<144x1xf32> to vector<144x64xf32>
    %47 = vector.broadcast %45 : vector<1x64xf32> to vector<144x64xf32>
    %48 = arith.mulf %46, %47 : vector<144x64xf32>
    %49 = arith.addf %42, %48 : vector<144x64xf32>
    %50 = vector.extract_strided_slice %14 {offsets = [20, 0], sizes = [144, 1], strides = [1, 1]} : vector<182x1xf32> to vector<144x1xf32>
    %c5 = arith.constant 5 : index
    %c0_20 = arith.constant 0 : index
    %c0_21 = arith.constant 0 : index
    %51 = vector.load %arg5[%c5, %c0_20, %c0_21] : memref<9x1x64xf32, #tpu.memory_space<vmem>>, vector<1x1x64xf32>
    %52 = vector.shape_cast %51 : vector<1x1x64xf32> to vector<1x64xf32>
    %53 = vector.broadcast %50 : vector<144x1xf32> to vector<144x64xf32>
    %54 = vector.broadcast %52 : vector<1x64xf32> to vector<144x64xf32>
    %55 = arith.mulf %53, %54 : vector<144x64xf32>
    %56 = arith.addf %49, %55 : vector<144x64xf32>
    %57 = vector.extract_strided_slice %14 {offsets = [36, 0], sizes = [144, 1], strides = [1, 1]} : vector<182x1xf32> to vector<144x1xf32>
    %c6 = arith.constant 6 : index
    %c0_22 = arith.constant 0 : index
    %c0_23 = arith.constant 0 : index
    %58 = vector.load %arg5[%c6, %c0_22, %c0_23] : memref<9x1x64xf32, #tpu.memory_space<vmem>>, vector<1x1x64xf32>
    %59 = vector.shape_cast %58 : vector<1x1x64xf32> to vector<1x64xf32>
    %60 = vector.broadcast %57 : vector<144x1xf32> to vector<144x64xf32>
    %61 = vector.broadcast %59 : vector<1x64xf32> to vector<144x64xf32>
    %62 = arith.mulf %60, %61 : vector<144x64xf32>
    %63 = arith.addf %56, %62 : vector<144x64xf32>
    %64 = vector.extract_strided_slice %14 {offsets = [37, 0], sizes = [144, 1], strides = [1, 1]} : vector<182x1xf32> to vector<144x1xf32>
    %c7 = arith.constant 7 : index
    %c0_24 = arith.constant 0 : index
    %c0_25 = arith.constant 0 : index
    %65 = vector.load %arg5[%c7, %c0_24, %c0_25] : memref<9x1x64xf32, #tpu.memory_space<vmem>>, vector<1x1x64xf32>
    %66 = vector.shape_cast %65 : vector<1x1x64xf32> to vector<1x64xf32>
    %67 = vector.broadcast %64 : vector<144x1xf32> to vector<144x64xf32>
    %68 = vector.broadcast %66 : vector<1x64xf32> to vector<144x64xf32>
    %69 = arith.mulf %67, %68 : vector<144x64xf32>
    %70 = arith.addf %63, %69 : vector<144x64xf32>
    %71 = vector.extract_strided_slice %14 {offsets = [38, 0], sizes = [144, 1], strides = [1, 1]} : vector<182x1xf32> to vector<144x1xf32>
    %c8 = arith.constant 8 : index
    %c0_26 = arith.constant 0 : index
    %c0_27 = arith.constant 0 : index
    %72 = vector.load %arg5[%c8, %c0_26, %c0_27] : memref<9x1x64xf32, #tpu.memory_space<vmem>>, vector<1x1x64xf32>
    %73 = vector.shape_cast %72 : vector<1x1x64xf32> to vector<1x64xf32>
    %74 = vector.broadcast %71 : vector<144x1xf32> to vector<144x64xf32>
    %75 = vector.broadcast %73 : vector<1x64xf32> to vector<144x64xf32>
    %76 = arith.mulf %74, %75 : vector<144x64xf32>
    %77 = arith.addf %70, %76 : vector<144x64xf32>
    %c0_28 = arith.constant 0 : index
    %c0_29 = arith.constant 0 : index
    %78 = vector.load %arg6[%c0_28, %c0_29] : memref<1x64xf32, #tpu.memory_space<vmem>>, vector<1x64xf32>
    %79 = vector.broadcast %78 : vector<1x64xf32> to vector<144x64xf32>
    %80 = arith.addf %77, %79 : vector<144x64xf32>
    %cst_30 = arith.constant 0.000000e+00 : f32
    %81 = vector.broadcast %cst_30 : f32 to vector<144x64xf32>
    %82 = arith.maximumf %80, %81 : vector<144x64xf32>
    %c0_31 = arith.constant 0 : index
    %c0_32 = arith.constant 0 : index
    %83 = vector.load %arg7[%c0_31, %c0_32] : memref<144x1xf32, #tpu.memory_space<vmem>>, vector<144x1xf32>
    %84 = vector.broadcast %83 : vector<144x1xf32> to vector<144x64xf32>
    %85 = arith.mulf %82, %84 : vector<144x64xf32>
    %86 = arith.truncf %85 : vector<144x64xf32> to vector<144x64xbf16>
    %c0_33 = arith.constant 0 : index
    %c0_34 = arith.constant 0 : index
    %c0_35 = arith.constant 0 : index
    %87 = vector.load %arg8[%c0_33, %c0_34, %c0_35] : memref<1x144x64xbf16, #tpu.memory_space<vmem>>, vector<1x144x64xbf16>
    %88 = vector.shape_cast %87 : vector<1x144x64xbf16> to vector<144x64xbf16>
    %89 = vector.shape_cast %86 : vector<144x64xbf16> to vector<1x144x64xbf16>
    tpu.vector_store %arg8[%c0_33, %c0_34, %c0_35], %89 {strides = array<i32>} : memref<1x144x64xbf16, #tpu.memory_space<vmem>>, vector<1x144x64xbf16>,
    return
  }
  func.func @transform_0(%arg0: i32, %arg1: i32) -> (i32, i32, i32) {
    %c0_i32 = arith.constant 0 : i32
    %c0_i32_0 = arith.constant 0 : i32
    return %arg0, %arg1, %c0_i32 : i32, i32, i32
  }
  func.func @transform_1(%arg0: i32, %arg1: i32) -> (i32, i32, i32) {
    %c2_i32 = arith.constant 2 : i32
    %0 = arith.muli %arg1, %c2_i32 : i32
    %c1_i32 = arith.constant 1 : i32
    %1 = arith.subi %0, %c1_i32 : i32
    %c0_i32 = arith.constant 0 : i32
    %2 = arith.maxsi %1, %c0_i32 : i32
    %c0_i32_0 = arith.constant 0 : i32
    %c0_i32_1 = arith.constant 0 : i32
    return %arg0, %2, %c0_i32_0 : i32, i32, i32
  }
  func.func @transform_2(%arg0: i32, %arg1: i32) -> (i32, i32, i32) {
    %c1_i32 = arith.constant 1 : i32
    %0 = arith.addi %arg1, %c1_i32 : i32
    %c2_i32 = arith.constant 2 : i32
    %1 = arith.muli %0, %c2_i32 : i32
    %c0_i32 = arith.constant 0 : i32
    %c0_i32_0 = arith.constant 0 : i32
    return %arg0, %1, %c0_i32 : i32, i32, i32
  }
  func.func @transform_3(%arg0: i32, %arg1: i32) -> (i32, i32, i32) {
    %c0_i32 = arith.constant 0 : i32
    %c0_i32_0 = arith.constant 0 : i32
    %c0_i32_1 = arith.constant 0 : i32
    %c0_i32_2 = arith.constant 0 : i32
    return %c0_i32, %c0_i32_0, %c0_i32_1 : i32, i32, i32
  }
  func.func @transform_4(%arg0: i32, %arg1: i32) -> (i32, i32) {
    %c0_i32 = arith.constant 0 : i32
    %c0_i32_0 = arith.constant 0 : i32
    %c0_i32_1 = arith.constant 0 : i32
    return %c0_i32, %c0_i32_0 : i32, i32
  }
  func.func @transform_5(%arg0: i32, %arg1: i32) -> (i32, i32) {
    %c0_i32 = arith.constant 0 : i32
    %c0_i32_0 = arith.constant 0 : i32
    %c0_i32_1 = arith.constant 0 : i32
    return %c0_i32, %c0_i32_0 : i32, i32
  }
  func.func @transform_6(%arg0: i32, %arg1: i32) -> (i32, i32, i32) {
    %c0_i32 = arith.constant 0 : i32
    %c0_i32_0 = arith.constant 0 : i32
    return %arg0, %arg1, %c0_i32 : i32, i32, i32
  }
}

module attributes {stable_mosaic.version = 11 : i64} {
  func.func @_fused_conv_kernel(%arg0: i32, %arg1: i32, %arg2: memref<1x120x64xbf16, #tpu.memory_space<vmem>>, %arg3: memref<3x192x64xbf16, #tpu.memory_space<vmem>>, %arg4: memref<1x64xf32, #tpu.memory_space<vmem>>, %arg5: memref<1x48x64xbf16, #tpu.memory_space<vmem>>) attributes {dimension_semantics = [#tpu.dimension_semantics<parallel>, #tpu.dimension_semantics<parallel>], iteration_bounds = array<i64: 2, 1>, scalar_prefetch = 0 : i64, scratch_operands = 0 : i64, tpu.core_type = #tpu.core_type<tc>, window_params = [{transform_indices = @transform_0, window_bounds = array<i64: 1, 120, 64>}, {pipeline_mode = #tpu.pipeline_mode<synchronous>, transform_indices = @transform_1, window_bounds = array<i64: 3, 192, 64>}, {pipeline_mode = #tpu.pipeline_mode<synchronous>, transform_indices = @transform_2, window_bounds = array<i64: 1, 64>}, {transform_indices = @transform_3, window_bounds = array<i64: 1, 48, 64>}]} {
    %c0 = arith.constant 0 : index
    %c0_0 = arith.constant 0 : index
    %c0_1 = arith.constant 0 : index
    %0 = vector.load %arg2[%c0, %c0_0, %c0_1] : memref<1x120x64xbf16, #tpu.memory_space<vmem>>, vector<1x80x64xbf16>
    %1 = vector.shape_cast %0 : vector<1x80x64xbf16> to vector<80x64xbf16>
    %cst = arith.constant 0.000000e+00 : bf16
    %2 = vector.broadcast %cst : bf16 to vector<10x64xbf16>
    %cst_2 = arith.constant 0.000000e+00 : bf16
    %3 = vector.broadcast %cst_2 : bf16 to vector<10x64xbf16>
    %cst_3 = arith.constant 0.000000e+00 : bf16
    %4 = vector.broadcast %cst_3 : bf16 to vector<1x64xbf16>
    %5 = tpu.concatenate %4, %2, %1, %3, %4 in 0 : vector<1x64xbf16>, vector<10x64xbf16>, vector<80x64xbf16>, vector<10x64xbf16>, vector<1x64xbf16> -> vector<102x64xbf16>
    %cst_4 = arith.constant 0.000000e+00 : f32
    %6 = vector.broadcast %cst_4 : f32 to vector<80x64xf32>
    %7 = vector.extract_strided_slice %5 {offsets = [0, 0], sizes = [80, 64], strides = [1, 1]} : vector<102x64xbf16> to vector<80x64xbf16>
    %8 = vector.extract_strided_slice %5 {offsets = [1, 0], sizes = [80, 64], strides = [1, 1]} : vector<102x64xbf16> to vector<80x64xbf16>
    %9 = vector.extract_strided_slice %5 {offsets = [2, 0], sizes = [80, 64], strides = [1, 1]} : vector<102x64xbf16> to vector<80x64xbf16>
    %10 = tpu.concatenate %7, %8, %9 in 1 : vector<80x64xbf16>, vector<80x64xbf16>, vector<80x64xbf16> -> vector<80x192xbf16>
    %c0_5 = arith.constant 0 : index
    %c0_6 = arith.constant 0 : index
    %c0_7 = arith.constant 0 : index
    %11 = vector.load %arg3[%c0_5, %c0_6, %c0_7] : memref<3x192x64xbf16, #tpu.memory_space<vmem>>, vector<1x192x64xbf16>
    %12 = vector.shape_cast %11 : vector<1x192x64xbf16> to vector<192x64xbf16>
    %cst_8 = arith.constant dense<0.000000e+00> : vector<80x64xf32>
    %13 = tpu.matmul %10, %12, %cst_8 {dimension_numbers = #tpu.dot_dimension_numbers<[1], [0], [0], [1], [0, 0, 1, 1], [], []>} : vector<80x192xbf16>, vector<192x64xbf16>, vector<80x64xf32> -> vector<80x64xf32>
    %14 = arith.addf %6, %13 : vector<80x64xf32>
    %15 = vector.extract_strided_slice %5 {offsets = [10, 0], sizes = [80, 64], strides = [1, 1]} : vector<102x64xbf16> to vector<80x64xbf16>
    %16 = vector.extract_strided_slice %5 {offsets = [11, 0], sizes = [80, 64], strides = [1, 1]} : vector<102x64xbf16> to vector<80x64xbf16>
    %17 = vector.extract_strided_slice %5 {offsets = [12, 0], sizes = [80, 64], strides = [1, 1]} : vector<102x64xbf16> to vector<80x64xbf16>
    %18 = tpu.concatenate %15, %16, %17 in 1 : vector<80x64xbf16>, vector<80x64xbf16>, vector<80x64xbf16> -> vector<80x192xbf16>
    %c1 = arith.constant 1 : index
    %c0_9 = arith.constant 0 : index
    %c0_10 = arith.constant 0 : index
    %19 = vector.load %arg3[%c1, %c0_9, %c0_10] : memref<3x192x64xbf16, #tpu.memory_space<vmem>>, vector<1x192x64xbf16>
    %20 = vector.shape_cast %19 : vector<1x192x64xbf16> to vector<192x64xbf16>
    %cst_11 = arith.constant dense<0.000000e+00> : vector<80x64xf32>
    %21 = tpu.matmul %18, %20, %cst_11 {dimension_numbers = #tpu.dot_dimension_numbers<[1], [0], [0], [1], [0, 0, 1, 1], [], []>} : vector<80x192xbf16>, vector<192x64xbf16>, vector<80x64xf32> -> vector<80x64xf32>
    %22 = arith.addf %14, %21 : vector<80x64xf32>
    %23 = vector.extract_strided_slice %5 {offsets = [20, 0], sizes = [80, 64], strides = [1, 1]} : vector<102x64xbf16> to vector<80x64xbf16>
    %24 = vector.extract_strided_slice %5 {offsets = [21, 0], sizes = [80, 64], strides = [1, 1]} : vector<102x64xbf16> to vector<80x64xbf16>
    %25 = vector.extract_strided_slice %5 {offsets = [22, 0], sizes = [80, 64], strides = [1, 1]} : vector<102x64xbf16> to vector<80x64xbf16>
    %26 = tpu.concatenate %23, %24, %25 in 1 : vector<80x64xbf16>, vector<80x64xbf16>, vector<80x64xbf16> -> vector<80x192xbf16>
    %c2 = arith.constant 2 : index
    %c0_12 = arith.constant 0 : index
    %c0_13 = arith.constant 0 : index
    %27 = vector.load %arg3[%c2, %c0_12, %c0_13] : memref<3x192x64xbf16, #tpu.memory_space<vmem>>, vector<1x192x64xbf16>
    %28 = vector.shape_cast %27 : vector<1x192x64xbf16> to vector<192x64xbf16>
    %cst_14 = arith.constant dense<0.000000e+00> : vector<80x64xf32>
    %29 = tpu.matmul %26, %28, %cst_14 {dimension_numbers = #tpu.dot_dimension_numbers<[1], [0], [0], [1], [0, 0, 1, 1], [], []>} : vector<80x192xbf16>, vector<192x64xbf16>, vector<80x64xf32> -> vector<80x64xf32>
    %30 = arith.addf %22, %29 : vector<80x64xf32>
    %c0_15 = arith.constant 0 : index
    %c0_16 = arith.constant 0 : index
    %31 = vector.load %arg4[%c0_15, %c0_16] : memref<1x64xf32, #tpu.memory_space<vmem>>, vector<1x64xf32>
    %32 = vector.broadcast %31 : vector<1x64xf32> to vector<80x64xf32>
    %33 = arith.addf %30, %32 : vector<80x64xf32>
    %cst_17 = arith.constant 0.000000e+00 : f32
    %34 = vector.broadcast %cst_17 : f32 to vector<80x64xf32>
    %35 = arith.maximumf %33, %34 : vector<80x64xf32>
    %36 = vector.shape_cast %35 : vector<80x64xf32> to vector<8x10x64xf32>
    %37 = vector.extract_strided_slice %36 {offsets = [0, 1, 0], sizes = [8, 8, 64], strides = [1, 1, 1]} : vector<8x10x64xf32> to vector<8x8x64xf32>
    %38 = vector.shape_cast %37 : vector<8x8x64xf32> to vector<4x2x8x64xf32>
    %39 = vector.extract_strided_slice %38 {offsets = [0, 0, 0, 0], sizes = [4, 1, 8, 64], strides = [1, 1, 1, 1]} : vector<4x2x8x64xf32> to vector<4x1x8x64xf32>
    %40 = vector.shape_cast %39 : vector<4x1x8x64xf32> to vector<4x8x64xf32>
    %41 = vector.extract_strided_slice %38 {offsets = [0, 1, 0, 0], sizes = [4, 1, 8, 64], strides = [1, 1, 1, 1]} : vector<4x2x8x64xf32> to vector<4x1x8x64xf32>
    %42 = vector.shape_cast %41 : vector<4x1x8x64xf32> to vector<4x8x64xf32>
    %43 = arith.maximumf %40, %42 : vector<4x8x64xf32>
    %44 = vector.shape_cast %43 : vector<4x8x64xf32> to vector<4x4x2x64xf32>
    %45 = vector.extract_strided_slice %44 {offsets = [0, 0, 0, 0], sizes = [4, 4, 1, 64], strides = [1, 1, 1, 1]} : vector<4x4x2x64xf32> to vector<4x4x1x64xf32>
    %46 = vector.shape_cast %45 : vector<4x4x1x64xf32> to vector<4x4x64xf32>
    %47 = vector.extract_strided_slice %44 {offsets = [0, 0, 1, 0], sizes = [4, 4, 1, 64], strides = [1, 1, 1, 1]} : vector<4x4x2x64xf32> to vector<4x4x1x64xf32>
    %48 = vector.shape_cast %47 : vector<4x4x1x64xf32> to vector<4x4x64xf32>
    %49 = arith.maximumf %46, %48 : vector<4x4x64xf32>
    %cst_18 = arith.constant 0.000000e+00 : f32
    %50 = vector.broadcast %cst_18 : f32 to vector<4x1x64xf32>
    %51 = tpu.concatenate %50, %49, %50 in 1 : vector<4x1x64xf32>, vector<4x4x64xf32>, vector<4x1x64xf32> -> vector<4x6x64xf32>
    %52 = vector.shape_cast %51 : vector<4x6x64xf32> to vector<24x64xf32>
    %53 = arith.truncf %52 : vector<24x64xf32> to vector<24x64xbf16>
    %c0_19 = arith.constant 0 : index
    %c0_20 = arith.constant 0 : index
    %c0_21 = arith.constant 0 : index
    %54 = vector.load %arg5[%c0_19, %c0_20, %c0_21] : memref<1x48x64xbf16, #tpu.memory_space<vmem>>, vector<1x24x64xbf16>
    %55 = vector.shape_cast %54 : vector<1x24x64xbf16> to vector<24x64xbf16>
    %56 = vector.shape_cast %53 : vector<24x64xbf16> to vector<1x24x64xbf16>
    tpu.vector_store %arg5[%c0_19, %c0_20, %c0_21], %56 {strides = array<i32>} : memref<1x48x64xbf16, #tpu.memory_space<vmem>>, vector<1x24x64xbf16>,
    return
  }
  func.func @transform_0(%arg0: i32, %arg1: i32) -> (i32, i32, i32) {
    %c0_i32 = arith.constant 0 : i32
    %c0_i32_0 = arith.constant 0 : i32
    %c0_i32_1 = arith.constant 0 : i32
    return %arg0, %c0_i32, %c0_i32_0 : i32, i32, i32
  }
  func.func @transform_1(%arg0: i32, %arg1: i32) -> (i32, i32, i32) {
    %c0_i32 = arith.constant 0 : i32
    %c0_i32_0 = arith.constant 0 : i32
    %c0_i32_1 = arith.constant 0 : i32
    %c0_i32_2 = arith.constant 0 : i32
    return %c0_i32, %c0_i32_0, %c0_i32_1 : i32, i32, i32
  }
  func.func @transform_2(%arg0: i32, %arg1: i32) -> (i32, i32) {
    %c0_i32 = arith.constant 0 : i32
    %c0_i32_0 = arith.constant 0 : i32
    %c0_i32_1 = arith.constant 0 : i32
    return %c0_i32, %c0_i32_0 : i32, i32
  }
  func.func @transform_3(%arg0: i32, %arg1: i32) -> (i32, i32, i32) {
    %c0_i32 = arith.constant 0 : i32
    %c0_i32_0 = arith.constant 0 : i32
    %c0_i32_1 = arith.constant 0 : i32
    return %arg0, %c0_i32, %c0_i32_0 : i32, i32, i32
  }
}

module attributes {stable_mosaic.version = 11 : i64} {
  func.func @_fused_conv_kernel(%arg0: i32, %arg1: i32, %arg2: memref<1x48x64xbf16, #tpu.memory_space<vmem>>, %arg3: memref<3x192x128xbf16, #tpu.memory_space<vmem>>, %arg4: memref<1x128xf32, #tpu.memory_space<vmem>>, %arg5: memref<24x1xf32, #tpu.memory_space<vmem>>, %arg6: memref<1x48x128xbf16, #tpu.memory_space<vmem>>) attributes {dimension_semantics = [#tpu.dimension_semantics<parallel>, #tpu.dimension_semantics<parallel>], iteration_bounds = array<i64: 2, 1>, scalar_prefetch = 0 : i64, scratch_operands = 0 : i64, tpu.core_type = #tpu.core_type<tc>, window_params = [{transform_indices = @transform_0, window_bounds = array<i64: 1, 48, 64>}, {pipeline_mode = #tpu.pipeline_mode<synchronous>, transform_indices = @transform_1, window_bounds = array<i64: 3, 192, 128>}, {pipeline_mode = #tpu.pipeline_mode<synchronous>, transform_indices = @transform_2, window_bounds = array<i64: 1, 128>}, {pipeline_mode = #tpu.pipeline_mode<synchronous>, transform_indices = @transform_3, window_bounds = array<i64: 24, 1>}, {transform_indices = @transform_4, window_bounds = array<i64: 1, 48, 128>}]} {
    %c0 = arith.constant 0 : index
    %c0_0 = arith.constant 0 : index
    %c0_1 = arith.constant 0 : index
    %0 = vector.load %arg2[%c0, %c0_0, %c0_1] : memref<1x48x64xbf16, #tpu.memory_space<vmem>>, vector<1x24x64xbf16>
    %1 = vector.shape_cast %0 : vector<1x24x64xbf16> to vector<24x64xbf16>
    %cst = arith.constant 0.000000e+00 : bf16
    %2 = vector.broadcast %cst : bf16 to vector<6x64xbf16>
    %cst_2 = arith.constant 0.000000e+00 : bf16
    %3 = vector.broadcast %cst_2 : bf16 to vector<6x64xbf16>
    %cst_3 = arith.constant 0.000000e+00 : bf16
    %4 = vector.broadcast %cst_3 : bf16 to vector<1x64xbf16>
    %5 = tpu.concatenate %4, %2, %1, %3, %4 in 0 : vector<1x64xbf16>, vector<6x64xbf16>, vector<24x64xbf16>, vector<6x64xbf16>, vector<1x64xbf16> -> vector<38x64xbf16>
    %cst_4 = arith.constant 0.000000e+00 : f32
    %6 = vector.broadcast %cst_4 : f32 to vector<24x128xf32>
    %7 = vector.extract_strided_slice %5 {offsets = [0, 0], sizes = [24, 64], strides = [1, 1]} : vector<38x64xbf16> to vector<24x64xbf16>
    %8 = vector.extract_strided_slice %5 {offsets = [1, 0], sizes = [24, 64], strides = [1, 1]} : vector<38x64xbf16> to vector<24x64xbf16>
    %9 = vector.extract_strided_slice %5 {offsets = [2, 0], sizes = [24, 64], strides = [1, 1]} : vector<38x64xbf16> to vector<24x64xbf16>
    %10 = tpu.concatenate %7, %8, %9 in 1 : vector<24x64xbf16>, vector<24x64xbf16>, vector<24x64xbf16> -> vector<24x192xbf16>
    %c0_5 = arith.constant 0 : index
    %c0_6 = arith.constant 0 : index
    %c0_7 = arith.constant 0 : index
    %11 = vector.load %arg3[%c0_5, %c0_6, %c0_7] : memref<3x192x128xbf16, #tpu.memory_space<vmem>>, vector<1x192x128xbf16>
    %12 = vector.shape_cast %11 : vector<1x192x128xbf16> to vector<192x128xbf16>
    %cst_8 = arith.constant dense<0.000000e+00> : vector<24x128xf32>
    %13 = tpu.matmul %10, %12, %cst_8 {dimension_numbers = #tpu.dot_dimension_numbers<[1], [0], [0], [1], [0, 0, 1, 1], [], []>} : vector<24x192xbf16>, vector<192x128xbf16>, vector<24x128xf32> -> vector<24x128xf32>
    %14 = arith.addf %6, %13 : vector<24x128xf32>
    %15 = vector.extract_strided_slice %5 {offsets = [6, 0], sizes = [24, 64], strides = [1, 1]} : vector<38x64xbf16> to vector<24x64xbf16>
    %16 = vector.extract_strided_slice %5 {offsets = [7, 0], sizes = [24, 64], strides = [1, 1]} : vector<38x64xbf16> to vector<24x64xbf16>
    %17 = vector.extract_strided_slice %5 {offsets = [8, 0], sizes = [24, 64], strides = [1, 1]} : vector<38x64xbf16> to vector<24x64xbf16>
    %18 = tpu.concatenate %15, %16, %17 in 1 : vector<24x64xbf16>, vector<24x64xbf16>, vector<24x64xbf16> -> vector<24x192xbf16>
    %c1 = arith.constant 1 : index
    %c0_9 = arith.constant 0 : index
    %c0_10 = arith.constant 0 : index
    %19 = vector.load %arg3[%c1, %c0_9, %c0_10] : memref<3x192x128xbf16, #tpu.memory_space<vmem>>, vector<1x192x128xbf16>
    %20 = vector.shape_cast %19 : vector<1x192x128xbf16> to vector<192x128xbf16>
    %cst_11 = arith.constant dense<0.000000e+00> : vector<24x128xf32>
    %21 = tpu.matmul %18, %20, %cst_11 {dimension_numbers = #tpu.dot_dimension_numbers<[1], [0], [0], [1], [0, 0, 1, 1], [], []>} : vector<24x192xbf16>, vector<192x128xbf16>, vector<24x128xf32> -> vector<24x128xf32>
    %22 = arith.addf %14, %21 : vector<24x128xf32>
    %23 = vector.extract_strided_slice %5 {offsets = [12, 0], sizes = [24, 64], strides = [1, 1]} : vector<38x64xbf16> to vector<24x64xbf16>
    %24 = vector.extract_strided_slice %5 {offsets = [13, 0], sizes = [24, 64], strides = [1, 1]} : vector<38x64xbf16> to vector<24x64xbf16>
    %25 = vector.extract_strided_slice %5 {offsets = [14, 0], sizes = [24, 64], strides = [1, 1]} : vector<38x64xbf16> to vector<24x64xbf16>
    %26 = tpu.concatenate %23, %24, %25 in 1 : vector<24x64xbf16>, vector<24x64xbf16>, vector<24x64xbf16> -> vector<24x192xbf16>
    %c2 = arith.constant 2 : index
    %c0_12 = arith.constant 0 : index
    %c0_13 = arith.constant 0 : index
    %27 = vector.load %arg3[%c2, %c0_12, %c0_13] : memref<3x192x128xbf16, #tpu.memory_space<vmem>>, vector<1x192x128xbf16>
    %28 = vector.shape_cast %27 : vector<1x192x128xbf16> to vector<192x128xbf16>
    %cst_14 = arith.constant dense<0.000000e+00> : vector<24x128xf32>
    %29 = tpu.matmul %26, %28, %cst_14 {dimension_numbers = #tpu.dot_dimension_numbers<[1], [0], [0], [1], [0, 0, 1, 1], [], []>} : vector<24x192xbf16>, vector<192x128xbf16>, vector<24x128xf32> -> vector<24x128xf32>
    %30 = arith.addf %22, %29 : vector<24x128xf32>
    %c0_15 = arith.constant 0 : index
    %c0_16 = arith.constant 0 : index
    %31 = vector.load %arg4[%c0_15, %c0_16] : memref<1x128xf32, #tpu.memory_space<vmem>>, vector<1x128xf32>
    %32 = vector.broadcast %31 : vector<1x128xf32> to vector<24x128xf32>
    %33 = arith.addf %30, %32 : vector<24x128xf32>
    %cst_17 = arith.constant 0.000000e+00 : f32
    %34 = vector.broadcast %cst_17 : f32 to vector<24x128xf32>
    %35 = arith.maximumf %33, %34 : vector<24x128xf32>
    %c0_18 = arith.constant 0 : index
    %c0_19 = arith.constant 0 : index
    %36 = vector.load %arg5[%c0_18, %c0_19] : memref<24x1xf32, #tpu.memory_space<vmem>>, vector<24x1xf32>
    %37 = vector.broadcast %36 : vector<24x1xf32> to vector<24x128xf32>
    %38 = arith.mulf %35, %37 : vector<24x128xf32>
    %39 = arith.truncf %38 : vector<24x128xf32> to vector<24x128xbf16>
    %c0_20 = arith.constant 0 : index
    %c0_21 = arith.constant 0 : index
    %c0_22 = arith.constant 0 : index
    %40 = vector.load %arg6[%c0_20, %c0_21, %c0_22] : memref<1x48x128xbf16, #tpu.memory_space<vmem>>, vector<1x24x128xbf16>
    %41 = vector.shape_cast %40 : vector<1x24x128xbf16> to vector<24x128xbf16>
    %42 = vector.shape_cast %39 : vector<24x128xbf16> to vector<1x24x128xbf16>
    tpu.vector_store %arg6[%c0_20, %c0_21, %c0_22], %42 {strides = array<i32>} : memref<1x48x128xbf16, #tpu.memory_space<vmem>>, vector<1x24x128xbf16>,
    return
  }
  func.func @transform_0(%arg0: i32, %arg1: i32) -> (i32, i32, i32) {
    %c0_i32 = arith.constant 0 : i32
    %c0_i32_0 = arith.constant 0 : i32
    %c0_i32_1 = arith.constant 0 : i32
    return %arg0, %c0_i32, %c0_i32_0 : i32, i32, i32
  }
  func.func @transform_1(%arg0: i32, %arg1: i32) -> (i32, i32, i32) {
    %c0_i32 = arith.constant 0 : i32
    %c0_i32_0 = arith.constant 0 : i32
    %c0_i32_1 = arith.constant 0 : i32
    %c0_i32_2 = arith.constant 0 : i32
    return %c0_i32, %c0_i32_0, %c0_i32_1 : i32, i32, i32
  }
  func.func @transform_2(%arg0: i32, %arg1: i32) -> (i32, i32) {
    %c0_i32 = arith.constant 0 : i32
    %c0_i32_0 = arith.constant 0 : i32
    %c0_i32_1 = arith.constant 0 : i32
    return %c0_i32, %c0_i32_0 : i32, i32
  }
  func.func @transform_3(%arg0: i32, %arg1: i32) -> (i32, i32) {
    %c0_i32 = arith.constant 0 : i32
    %c0_i32_0 = arith.constant 0 : i32
    %c0_i32_1 = arith.constant 0 : i32
    return %c0_i32, %c0_i32_0 : i32, i32
  }
  func.func @transform_4(%arg0: i32, %arg1: i32) -> (i32, i32, i32) {
    %c0_i32 = arith.constant 0 : i32
    %c0_i32_0 = arith.constant 0 : i32
    %c0_i32_1 = arith.constant 0 : i32
    return %arg0, %c0_i32, %c0_i32_0 : i32, i32, i32
  }
}

module attributes {stable_mosaic.version = 11 : i64} {
  func.func @_fused_conv_kernel(%arg0: i32, %arg1: i32, %arg2: memref<1x48x128xbf16, #tpu.memory_space<vmem>>, %arg3: memref<3x384x128xbf16, #tpu.memory_space<vmem>>, %arg4: memref<1x128xf32, #tpu.memory_space<vmem>>, %arg5: memref<1x24x128xbf16, #tpu.memory_space<vmem>>) attributes {dimension_semantics = [#tpu.dimension_semantics<parallel>, #tpu.dimension_semantics<parallel>], iteration_bounds = array<i64: 2, 1>, scalar_prefetch = 0 : i64, scratch_operands = 0 : i64, tpu.core_type = #tpu.core_type<tc>, window_params = [{transform_indices = @transform_0, window_bounds = array<i64: 1, 48, 128>}, {pipeline_mode = #tpu.pipeline_mode<synchronous>, transform_indices = @transform_1, window_bounds = array<i64: 3, 384, 128>}, {pipeline_mode = #tpu.pipeline_mode<synchronous>, transform_indices = @transform_2, window_bounds = array<i64: 1, 128>}, {transform_indices = @transform_3, window_bounds = array<i64: 1, 24, 128>}]} {
    %c0 = arith.constant 0 : index
    %c0_0 = arith.constant 0 : index
    %c0_1 = arith.constant 0 : index
    %0 = vector.load %arg2[%c0, %c0_0, %c0_1] : memref<1x48x128xbf16, #tpu.memory_space<vmem>>, vector<1x24x128xbf16>
    %1 = vector.shape_cast %0 : vector<1x24x128xbf16> to vector<24x128xbf16>
    %cst = arith.constant 0.000000e+00 : bf16
    %2 = vector.broadcast %cst : bf16 to vector<6x128xbf16>
    %cst_2 = arith.constant 0.000000e+00 : bf16
    %3 = vector.broadcast %cst_2 : bf16 to vector<6x128xbf16>
    %cst_3 = arith.constant 0.000000e+00 : bf16
    %4 = vector.broadcast %cst_3 : bf16 to vector<1x128xbf16>
    %5 = tpu.concatenate %4, %2, %1, %3, %4 in 0 : vector<1x128xbf16>, vector<6x128xbf16>, vector<24x128xbf16>, vector<6x128xbf16>, vector<1x128xbf16> -> vector<38x128xbf16>
    %cst_4 = arith.constant 0.000000e+00 : f32
    %6 = vector.broadcast %cst_4 : f32 to vector<24x128xf32>
    %7 = vector.extract_strided_slice %5 {offsets = [0, 0], sizes = [24, 128], strides = [1, 1]} : vector<38x128xbf16> to vector<24x128xbf16>
    %8 = vector.extract_strided_slice %5 {offsets = [1, 0], sizes = [24, 128], strides = [1, 1]} : vector<38x128xbf16> to vector<24x128xbf16>
    %9 = vector.extract_strided_slice %5 {offsets = [2, 0], sizes = [24, 128], strides = [1, 1]} : vector<38x128xbf16> to vector<24x128xbf16>
    %10 = tpu.concatenate %7, %8, %9 in 1 : vector<24x128xbf16>, vector<24x128xbf16>, vector<24x128xbf16> -> vector<24x384xbf16>
    %c0_5 = arith.constant 0 : index
    %c0_6 = arith.constant 0 : index
    %c0_7 = arith.constant 0 : index
    %11 = vector.load %arg3[%c0_5, %c0_6, %c0_7] : memref<3x384x128xbf16, #tpu.memory_space<vmem>>, vector<1x384x128xbf16>
    %12 = vector.shape_cast %11 : vector<1x384x128xbf16> to vector<384x128xbf16>
    %cst_8 = arith.constant dense<0.000000e+00> : vector<24x128xf32>
    %13 = tpu.matmul %10, %12, %cst_8 {dimension_numbers = #tpu.dot_dimension_numbers<[1], [0], [0], [1], [0, 0, 1, 1], [], []>} : vector<24x384xbf16>, vector<384x128xbf16>, vector<24x128xf32> -> vector<24x128xf32>
    %14 = arith.addf %6, %13 : vector<24x128xf32>
    %15 = vector.extract_strided_slice %5 {offsets = [6, 0], sizes = [24, 128], strides = [1, 1]} : vector<38x128xbf16> to vector<24x128xbf16>
    %16 = vector.extract_strided_slice %5 {offsets = [7, 0], sizes = [24, 128], strides = [1, 1]} : vector<38x128xbf16> to vector<24x128xbf16>
    %17 = vector.extract_strided_slice %5 {offsets = [8, 0], sizes = [24, 128], strides = [1, 1]} : vector<38x128xbf16> to vector<24x128xbf16>
    %18 = tpu.concatenate %15, %16, %17 in 1 : vector<24x128xbf16>, vector<24x128xbf16>, vector<24x128xbf16> -> vector<24x384xbf16>
    %c1 = arith.constant 1 : index
    %c0_9 = arith.constant 0 : index
    %c0_10 = arith.constant 0 : index
    %19 = vector.load %arg3[%c1, %c0_9, %c0_10] : memref<3x384x128xbf16, #tpu.memory_space<vmem>>, vector<1x384x128xbf16>
    %20 = vector.shape_cast %19 : vector<1x384x128xbf16> to vector<384x128xbf16>
    %cst_11 = arith.constant dense<0.000000e+00> : vector<24x128xf32>
    %21 = tpu.matmul %18, %20, %cst_11 {dimension_numbers = #tpu.dot_dimension_numbers<[1], [0], [0], [1], [0, 0, 1, 1], [], []>} : vector<24x384xbf16>, vector<384x128xbf16>, vector<24x128xf32> -> vector<24x128xf32>
    %22 = arith.addf %14, %21 : vector<24x128xf32>
    %23 = vector.extract_strided_slice %5 {offsets = [12, 0], sizes = [24, 128], strides = [1, 1]} : vector<38x128xbf16> to vector<24x128xbf16>
    %24 = vector.extract_strided_slice %5 {offsets = [13, 0], sizes = [24, 128], strides = [1, 1]} : vector<38x128xbf16> to vector<24x128xbf16>
    %25 = vector.extract_strided_slice %5 {offsets = [14, 0], sizes = [24, 128], strides = [1, 1]} : vector<38x128xbf16> to vector<24x128xbf16>
    %26 = tpu.concatenate %23, %24, %25 in 1 : vector<24x128xbf16>, vector<24x128xbf16>, vector<24x128xbf16> -> vector<24x384xbf16>
    %c2 = arith.constant 2 : index
    %c0_12 = arith.constant 0 : index
    %c0_13 = arith.constant 0 : index
    %27 = vector.load %arg3[%c2, %c0_12, %c0_13] : memref<3x384x128xbf16, #tpu.memory_space<vmem>>, vector<1x384x128xbf16>
    %28 = vector.shape_cast %27 : vector<1x384x128xbf16> to vector<384x128xbf16>
    %cst_14 = arith.constant dense<0.000000e+00> : vector<24x128xf32>
    %29 = tpu.matmul %26, %28, %cst_14 {dimension_numbers = #tpu.dot_dimension_numbers<[1], [0], [0], [1], [0, 0, 1, 1], [], []>} : vector<24x384xbf16>, vector<384x128xbf16>, vector<24x128xf32> -> vector<24x128xf32>
    %30 = arith.addf %22, %29 : vector<24x128xf32>
    %c0_15 = arith.constant 0 : index
    %c0_16 = arith.constant 0 : index
    %31 = vector.load %arg4[%c0_15, %c0_16] : memref<1x128xf32, #tpu.memory_space<vmem>>, vector<1x128xf32>
    %32 = vector.broadcast %31 : vector<1x128xf32> to vector<24x128xf32>
    %33 = arith.addf %30, %32 : vector<24x128xf32>
    %cst_17 = arith.constant 0.000000e+00 : f32
    %34 = vector.broadcast %cst_17 : f32 to vector<24x128xf32>
    %35 = arith.maximumf %33, %34 : vector<24x128xf32>
    %36 = vector.shape_cast %35 : vector<24x128xf32> to vector<4x6x128xf32>
    %37 = vector.extract_strided_slice %36 {offsets = [0, 1, 0], sizes = [4, 4, 128], strides = [1, 1, 1]} : vector<4x6x128xf32> to vector<4x4x128xf32>
    %38 = vector.shape_cast %37 : vector<4x4x128xf32> to vector<2x2x4x128xf32>
    %39 = vector.extract_strided_slice %38 {offsets = [0, 0, 0, 0], sizes = [2, 1, 4, 128], strides = [1, 1, 1, 1]} : vector<2x2x4x128xf32> to vector<2x1x4x128xf32>
    %40 = vector.shape_cast %39 : vector<2x1x4x128xf32> to vector<2x4x128xf32>
    %41 = vector.extract_strided_slice %38 {offsets = [0, 1, 0, 0], sizes = [2, 1, 4, 128], strides = [1, 1, 1, 1]} : vector<2x2x4x128xf32> to vector<2x1x4x128xf32>
    %42 = vector.shape_cast %41 : vector<2x1x4x128xf32> to vector<2x4x128xf32>
    %43 = arith.maximumf %40, %42 : vector<2x4x128xf32>
    %44 = vector.shape_cast %43 : vector<2x4x128xf32> to vector<2x2x2x128xf32>
    %45 = vector.extract_strided_slice %44 {offsets = [0, 0, 0, 0], sizes = [2, 2, 1, 128], strides = [1, 1, 1, 1]} : vector<2x2x2x128xf32> to vector<2x2x1x128xf32>
    %46 = vector.shape_cast %45 : vector<2x2x1x128xf32> to vector<2x2x128xf32>
    %47 = vector.extract_strided_slice %44 {offsets = [0, 0, 1, 0], sizes = [2, 2, 1, 128], strides = [1, 1, 1, 1]} : vector<2x2x2x128xf32> to vector<2x2x1x128xf32>
    %48 = vector.shape_cast %47 : vector<2x2x1x128xf32> to vector<2x2x128xf32>
    %49 = arith.maximumf %46, %48 : vector<2x2x128xf32>
    %cst_18 = arith.constant 0.000000e+00 : f32
    %50 = vector.broadcast %cst_18 : f32 to vector<2x1x128xf32>
    %51 = tpu.concatenate %50, %49, %50 in 1 : vector<2x1x128xf32>, vector<2x2x128xf32>, vector<2x1x128xf32> -> vector<2x4x128xf32>
    %52 = vector.shape_cast %51 : vector<2x4x128xf32> to vector<8x128xf32>
    %53 = arith.truncf %52 : vector<8x128xf32> to vector<8x128xbf16>
    %c0_19 = arith.constant 0 : index
    %c0_20 = arith.constant 0 : index
    %c0_21 = arith.constant 0 : index
    %54 = vector.load %arg5[%c0_19, %c0_20, %c0_21] : memref<1x24x128xbf16, #tpu.memory_space<vmem>>, vector<1x8x128xbf16>
    %55 = vector.shape_cast %54 : vector<1x8x128xbf16> to vector<8x128xbf16>
    %56 = vector.shape_cast %53 : vector<8x128xbf16> to vector<1x8x128xbf16>
    tpu.vector_store %arg5[%c0_19, %c0_20, %c0_21], %56 {strides = array<i32>} : memref<1x24x128xbf16, #tpu.memory_space<vmem>>, vector<1x8x128xbf16>,
    return
  }
  func.func @transform_0(%arg0: i32, %arg1: i32) -> (i32, i32, i32) {
    %c0_i32 = arith.constant 0 : i32
    %c0_i32_0 = arith.constant 0 : i32
    %c0_i32_1 = arith.constant 0 : i32
    return %arg0, %c0_i32, %c0_i32_0 : i32, i32, i32
  }
  func.func @transform_1(%arg0: i32, %arg1: i32) -> (i32, i32, i32) {
    %c0_i32 = arith.constant 0 : i32
    %c0_i32_0 = arith.constant 0 : i32
    %c0_i32_1 = arith.constant 0 : i32
    %c0_i32_2 = arith.constant 0 : i32
    return %c0_i32, %c0_i32_0, %c0_i32_1 : i32, i32, i32
  }
  func.func @transform_2(%arg0: i32, %arg1: i32) -> (i32, i32) {
    %c0_i32 = arith.constant 0 : i32
    %c0_i32_0 = arith.constant 0 : i32
    %c0_i32_1 = arith.constant 0 : i32
    return %c0_i32, %c0_i32_0 : i32, i32
  }
  func.func @transform_3(%arg0: i32, %arg1: i32) -> (i32, i32, i32) {
    %c0_i32 = arith.constant 0 : i32
    %c0_i32_0 = arith.constant 0 : i32
    %c0_i32_1 = arith.constant 0 : i32
    return %arg0, %c0_i32, %c0_i32_0 : i32, i32, i32
  }
}

module attributes {stable_mosaic.version = 11 : i64} {
  func.func @_fused_conv_kernel(%arg0: i32, %arg1: i32, %arg2: memref<1x24x128xbf16, #tpu.memory_space<vmem>>, %arg3: memref<3x384x128xbf16, #tpu.memory_space<vmem>>, %arg4: memref<1x128xf32, #tpu.memory_space<vmem>>, %arg5: memref<8x1xf32, #tpu.memory_space<vmem>>, %arg6: memref<1x24x128xbf16, #tpu.memory_space<vmem>>) attributes {dimension_semantics = [#tpu.dimension_semantics<parallel>, #tpu.dimension_semantics<parallel>], iteration_bounds = array<i64: 2, 1>, scalar_prefetch = 0 : i64, scratch_operands = 0 : i64, tpu.core_type = #tpu.core_type<tc>, window_params = [{transform_indices = @transform_0, window_bounds = array<i64: 1, 24, 128>}, {pipeline_mode = #tpu.pipeline_mode<synchronous>, transform_indices = @transform_1, window_bounds = array<i64: 3, 384, 128>}, {pipeline_mode = #tpu.pipeline_mode<synchronous>, transform_indices = @transform_2, window_bounds = array<i64: 1, 128>}, {pipeline_mode = #tpu.pipeline_mode<synchronous>, transform_indices = @transform_3, window_bounds = array<i64: 8, 1>}, {transform_indices = @transform_4, window_bounds = array<i64: 1, 24, 128>}]} {
    %c0 = arith.constant 0 : index
    %c0_0 = arith.constant 0 : index
    %c0_1 = arith.constant 0 : index
    %0 = vector.load %arg2[%c0, %c0_0, %c0_1] : memref<1x24x128xbf16, #tpu.memory_space<vmem>>, vector<1x8x128xbf16>
    %1 = vector.shape_cast %0 : vector<1x8x128xbf16> to vector<8x128xbf16>
    %cst = arith.constant 0.000000e+00 : bf16
    %2 = vector.broadcast %cst : bf16 to vector<4x128xbf16>
    %cst_2 = arith.constant 0.000000e+00 : bf16
    %3 = vector.broadcast %cst_2 : bf16 to vector<4x128xbf16>
    %cst_3 = arith.constant 0.000000e+00 : bf16
    %4 = vector.broadcast %cst_3 : bf16 to vector<1x128xbf16>
    %5 = tpu.concatenate %4, %2, %1, %3, %4 in 0 : vector<1x128xbf16>, vector<4x128xbf16>, vector<8x128xbf16>, vector<4x128xbf16>, vector<1x128xbf16> -> vector<18x128xbf16>
    %cst_4 = arith.constant 0.000000e+00 : f32
    %6 = vector.broadcast %cst_4 : f32 to vector<8x128xf32>
    %7 = vector.extract_strided_slice %5 {offsets = [0, 0], sizes = [8, 128], strides = [1, 1]} : vector<18x128xbf16> to vector<8x128xbf16>
    %8 = vector.extract_strided_slice %5 {offsets = [1, 0], sizes = [8, 128], strides = [1, 1]} : vector<18x128xbf16> to vector<8x128xbf16>
    %9 = vector.extract_strided_slice %5 {offsets = [2, 0], sizes = [8, 128], strides = [1, 1]} : vector<18x128xbf16> to vector<8x128xbf16>
    %10 = tpu.concatenate %7, %8, %9 in 1 : vector<8x128xbf16>, vector<8x128xbf16>, vector<8x128xbf16> -> vector<8x384xbf16>
    %c0_5 = arith.constant 0 : index
    %c0_6 = arith.constant 0 : index
    %c0_7 = arith.constant 0 : index
    %11 = vector.load %arg3[%c0_5, %c0_6, %c0_7] : memref<3x384x128xbf16, #tpu.memory_space<vmem>>, vector<1x384x128xbf16>
    %12 = vector.shape_cast %11 : vector<1x384x128xbf16> to vector<384x128xbf16>
    %cst_8 = arith.constant dense<0.000000e+00> : vector<8x128xf32>
    %13 = tpu.matmul %10, %12, %cst_8 {dimension_numbers = #tpu.dot_dimension_numbers<[1], [0], [0], [1], [0, 0, 1, 1], [], []>} : vector<8x384xbf16>, vector<384x128xbf16>, vector<8x128xf32> -> vector<8x128xf32>
    %14 = arith.addf %6, %13 : vector<8x128xf32>
    %15 = vector.extract_strided_slice %5 {offsets = [4, 0], sizes = [8, 128], strides = [1, 1]} : vector<18x128xbf16> to vector<8x128xbf16>
    %16 = vector.extract_strided_slice %5 {offsets = [5, 0], sizes = [8, 128], strides = [1, 1]} : vector<18x128xbf16> to vector<8x128xbf16>
    %17 = vector.extract_strided_slice %5 {offsets = [6, 0], sizes = [8, 128], strides = [1, 1]} : vector<18x128xbf16> to vector<8x128xbf16>
    %18 = tpu.concatenate %15, %16, %17 in 1 : vector<8x128xbf16>, vector<8x128xbf16>, vector<8x128xbf16> -> vector<8x384xbf16>
    %c1 = arith.constant 1 : index
    %c0_9 = arith.constant 0 : index
    %c0_10 = arith.constant 0 : index
    %19 = vector.load %arg3[%c1, %c0_9, %c0_10] : memref<3x384x128xbf16, #tpu.memory_space<vmem>>, vector<1x384x128xbf16>
    %20 = vector.shape_cast %19 : vector<1x384x128xbf16> to vector<384x128xbf16>
    %cst_11 = arith.constant dense<0.000000e+00> : vector<8x128xf32>
    %21 = tpu.matmul %18, %20, %cst_11 {dimension_numbers = #tpu.dot_dimension_numbers<[1], [0], [0], [1], [0, 0, 1, 1], [], []>} : vector<8x384xbf16>, vector<384x128xbf16>, vector<8x128xf32> -> vector<8x128xf32>
    %22 = arith.addf %14, %21 : vector<8x128xf32>
    %23 = vector.extract_strided_slice %5 {offsets = [8, 0], sizes = [8, 128], strides = [1, 1]} : vector<18x128xbf16> to vector<8x128xbf16>
    %24 = vector.extract_strided_slice %5 {offsets = [9, 0], sizes = [8, 128], strides = [1, 1]} : vector<18x128xbf16> to vector<8x128xbf16>
    %25 = vector.extract_strided_slice %5 {offsets = [10, 0], sizes = [8, 128], strides = [1, 1]} : vector<18x128xbf16> to vector<8x128xbf16>
    %26 = tpu.concatenate %23, %24, %25 in 1 : vector<8x128xbf16>, vector<8x128xbf16>, vector<8x128xbf16> -> vector<8x384xbf16>
    %c2 = arith.constant 2 : index
    %c0_12 = arith.constant 0 : index
    %c0_13 = arith.constant 0 : index
    %27 = vector.load %arg3[%c2, %c0_12, %c0_13] : memref<3x384x128xbf16, #tpu.memory_space<vmem>>, vector<1x384x128xbf16>
    %28 = vector.shape_cast %27 : vector<1x384x128xbf16> to vector<384x128xbf16>
    %cst_14 = arith.constant dense<0.000000e+00> : vector<8x128xf32>
    %29 = tpu.matmul %26, %28, %cst_14 {dimension_numbers = #tpu.dot_dimension_numbers<[1], [0], [0], [1], [0, 0, 1, 1], [], []>} : vector<8x384xbf16>, vector<384x128xbf16>, vector<8x128xf32> -> vector<8x128xf32>
    %30 = arith.addf %22, %29 : vector<8x128xf32>
    %c0_15 = arith.constant 0 : index
    %c0_16 = arith.constant 0 : index
    %31 = vector.load %arg4[%c0_15, %c0_16] : memref<1x128xf32, #tpu.memory_space<vmem>>, vector<1x128xf32>
    %32 = vector.broadcast %31 : vector<1x128xf32> to vector<8x128xf32>
    %33 = arith.addf %30, %32 : vector<8x128xf32>
    %cst_17 = arith.constant 0.000000e+00 : f32
    %34 = vector.broadcast %cst_17 : f32 to vector<8x128xf32>
    %35 = arith.maximumf %33, %34 : vector<8x128xf32>
    %c0_18 = arith.constant 0 : index
    %c0_19 = arith.constant 0 : index
    %36 = vector.load %arg5[%c0_18, %c0_19] : memref<8x1xf32, #tpu.memory_space<vmem>>, vector<8x1xf32>
    %37 = vector.broadcast %36 : vector<8x1xf32> to vector<8x128xf32>
    %38 = arith.mulf %35, %37 : vector<8x128xf32>
    %39 = arith.truncf %38 : vector<8x128xf32> to vector<8x128xbf16>
    %c0_20 = arith.constant 0 : index
    %c0_21 = arith.constant 0 : index
    %c0_22 = arith.constant 0 : index
    %40 = vector.load %arg6[%c0_20, %c0_21, %c0_22] : memref<1x24x128xbf16, #tpu.memory_space<vmem>>, vector<1x8x128xbf16>
    %41 = vector.shape_cast %40 : vector<1x8x128xbf16> to vector<8x128xbf16>
    %42 = vector.shape_cast %39 : vector<8x128xbf16> to vector<1x8x128xbf16>
    tpu.vector_store %arg6[%c0_20, %c0_21, %c0_22], %42 {strides = array<i32>} : memref<1x24x128xbf16, #tpu.memory_space<vmem>>, vector<1x8x128xbf16>,
    return
  }
  func.func @transform_0(%arg0: i32, %arg1: i32) -> (i32, i32, i32) {
    %c0_i32 = arith.constant 0 : i32
    %c0_i32_0 = arith.constant 0 : i32
    %c0_i32_1 = arith.constant 0 : i32
    return %arg0, %c0_i32, %c0_i32_0 : i32, i32, i32
  }
  func.func @transform_1(%arg0: i32, %arg1: i32) -> (i32, i32, i32) {
    %c0_i32 = arith.constant 0 : i32
    %c0_i32_0 = arith.constant 0 : i32
    %c0_i32_1 = arith.constant 0 : i32
    %c0_i32_2 = arith.constant 0 : i32
    return %c0_i32, %c0_i32_0, %c0_i32_1 : i32, i32, i32
  }
  func.func @transform_2(%arg0: i32, %arg1: i32) -> (i32, i32) {
    %c0_i32 = arith.constant 0 : i32
    %c0_i32_0 = arith.constant 0 : i32
    %c0_i32_1 = arith.constant 0 : i32
    return %c0_i32, %c0_i32_0 : i32, i32
  }
  func.func @transform_3(%arg0: i32, %arg1: i32) -> (i32, i32) {
    %c0_i32 = arith.constant 0 : i32
    %c0_i32_0 = arith.constant 0 : i32
    %c0_i32_1 = arith.constant 0 : i32
    return %c0_i32, %c0_i32_0 : i32, i32
  }
  func.func @transform_4(%arg0: i32, %arg1: i32) -> (i32, i32, i32) {
    %c0_i32 = arith.constant 0 : i32
    %c0_i32_0 = arith.constant 0 : i32
    %c0_i32_1 = arith.constant 0 : i32
    return %arg0, %c0_i32, %c0_i32_0 : i32, i32, i32
  }
}

module attributes {stable_mosaic.version = 11 : i64} {
  func.func @_fused_conv_kernel(%arg0: i32, %arg1: i32, %arg2: memref<1x24x128xbf16, #tpu.memory_space<vmem>>, %arg3: memref<3x384x256xbf16, #tpu.memory_space<vmem>>, %arg4: memref<1x256xf32, #tpu.memory_space<vmem>>, %arg5: memref<256x128xbf16, #tpu.memory_space<vmem>>, %arg6: memref<1x128xf32, #tpu.memory_space<vmem>>, %arg7: memref<1x24x128xf32, #tpu.memory_space<vmem>>) attributes {dimension_semantics = [#tpu.dimension_semantics<parallel>, #tpu.dimension_semantics<parallel>], iteration_bounds = array<i64: 2, 1>, scalar_prefetch = 0 : i64, scratch_operands = 0 : i64, tpu.core_type = #tpu.core_type<tc>, window_params = [{transform_indices = @transform_0, window_bounds = array<i64: 1, 24, 128>}, {pipeline_mode = #tpu.pipeline_mode<synchronous>, transform_indices = @transform_1, window_bounds = array<i64: 3, 384, 256>}, {pipeline_mode = #tpu.pipeline_mode<synchronous>, transform_indices = @transform_2, window_bounds = array<i64: 1, 256>}, {pipeline_mode = #tpu.pipeline_mode<synchronous>, transform_indices = @transform_3, window_bounds = array<i64: 256, 128>}, {pipeline_mode = #tpu.pipeline_mode<synchronous>, transform_indices = @transform_4, window_bounds = array<i64: 1, 128>}, {transform_indices = @transform_5, window_bounds = array<i64: 1, 24, 128>}]} {
    %c0 = arith.constant 0 : index
    %c0_0 = arith.constant 0 : index
    %c0_1 = arith.constant 0 : index
    %0 = vector.load %arg2[%c0, %c0_0, %c0_1] : memref<1x24x128xbf16, #tpu.memory_space<vmem>>, vector<1x8x128xbf16>
    %1 = vector.shape_cast %0 : vector<1x8x128xbf16> to vector<8x128xbf16>
    %cst = arith.constant 0.000000e+00 : bf16
    %2 = vector.broadcast %cst : bf16 to vector<4x128xbf16>
    %cst_2 = arith.constant 0.000000e+00 : bf16
    %3 = vector.broadcast %cst_2 : bf16 to vector<4x128xbf16>
    %cst_3 = arith.constant 0.000000e+00 : bf16
    %4 = vector.broadcast %cst_3 : bf16 to vector<1x128xbf16>
    %5 = tpu.concatenate %4, %2, %1, %3, %4 in 0 : vector<1x128xbf16>, vector<4x128xbf16>, vector<8x128xbf16>, vector<4x128xbf16>, vector<1x128xbf16> -> vector<18x128xbf16>
    %cst_4 = arith.constant 0.000000e+00 : f32
    %6 = vector.broadcast %cst_4 : f32 to vector<8x256xf32>
    %7 = vector.extract_strided_slice %5 {offsets = [0, 0], sizes = [8, 128], strides = [1, 1]} : vector<18x128xbf16> to vector<8x128xbf16>
    %8 = vector.extract_strided_slice %5 {offsets = [1, 0], sizes = [8, 128], strides = [1, 1]} : vector<18x128xbf16> to vector<8x128xbf16>
    %9 = vector.extract_strided_slice %5 {offsets = [2, 0], sizes = [8, 128], strides = [1, 1]} : vector<18x128xbf16> to vector<8x128xbf16>
    %10 = tpu.concatenate %7, %8, %9 in 1 : vector<8x128xbf16>, vector<8x128xbf16>, vector<8x128xbf16> -> vector<8x384xbf16>
    %c0_5 = arith.constant 0 : index
    %c0_6 = arith.constant 0 : index
    %c0_7 = arith.constant 0 : index
    %11 = vector.load %arg3[%c0_5, %c0_6, %c0_7] : memref<3x384x256xbf16, #tpu.memory_space<vmem>>, vector<1x384x256xbf16>
    %12 = vector.shape_cast %11 : vector<1x384x256xbf16> to vector<384x256xbf16>
    %cst_8 = arith.constant dense<0.000000e+00> : vector<8x256xf32>
    %13 = tpu.matmul %10, %12, %cst_8 {dimension_numbers = #tpu.dot_dimension_numbers<[1], [0], [0], [1], [0, 0, 1, 1], [], []>} : vector<8x384xbf16>, vector<384x256xbf16>, vector<8x256xf32> -> vector<8x256xf32>
    %14 = arith.addf %6, %13 : vector<8x256xf32>
    %15 = vector.extract_strided_slice %5 {offsets = [4, 0], sizes = [8, 128], strides = [1, 1]} : vector<18x128xbf16> to vector<8x128xbf16>
    %16 = vector.extract_strided_slice %5 {offsets = [5, 0], sizes = [8, 128], strides = [1, 1]} : vector<18x128xbf16> to vector<8x128xbf16>
    %17 = vector.extract_strided_slice %5 {offsets = [6, 0], sizes = [8, 128], strides = [1, 1]} : vector<18x128xbf16> to vector<8x128xbf16>
    %18 = tpu.concatenate %15, %16, %17 in 1 : vector<8x128xbf16>, vector<8x128xbf16>, vector<8x128xbf16> -> vector<8x384xbf16>
    %c1 = arith.constant 1 : index
    %c0_9 = arith.constant 0 : index
    %c0_10 = arith.constant 0 : index
    %19 = vector.load %arg3[%c1, %c0_9, %c0_10] : memref<3x384x256xbf16, #tpu.memory_space<vmem>>, vector<1x384x256xbf16>
    %20 = vector.shape_cast %19 : vector<1x384x256xbf16> to vector<384x256xbf16>
    %cst_11 = arith.constant dense<0.000000e+00> : vector<8x256xf32>
    %21 = tpu.matmul %18, %20, %cst_11 {dimension_numbers = #tpu.dot_dimension_numbers<[1], [0], [0], [1], [0, 0, 1, 1], [], []>} : vector<8x384xbf16>, vector<384x256xbf16>, vector<8x256xf32> -> vector<8x256xf32>
    %22 = arith.addf %14, %21 : vector<8x256xf32>
    %23 = vector.extract_strided_slice %5 {offsets = [8, 0], sizes = [8, 128], strides = [1, 1]} : vector<18x128xbf16> to vector<8x128xbf16>
    %24 = vector.extract_strided_slice %5 {offsets = [9, 0], sizes = [8, 128], strides = [1, 1]} : vector<18x128xbf16> to vector<8x128xbf16>
    %25 = vector.extract_strided_slice %5 {offsets = [10, 0], sizes = [8, 128], strides = [1, 1]} : vector<18x128xbf16> to vector<8x128xbf16>
    %26 = tpu.concatenate %23, %24, %25 in 1 : vector<8x128xbf16>, vector<8x128xbf16>, vector<8x128xbf16> -> vector<8x384xbf16>
    %c2 = arith.constant 2 : index
    %c0_12 = arith.constant 0 : index
    %c0_13 = arith.constant 0 : index
    %27 = vector.load %arg3[%c2, %c0_12, %c0_13] : memref<3x384x256xbf16, #tpu.memory_space<vmem>>, vector<1x384x256xbf16>
    %28 = vector.shape_cast %27 : vector<1x384x256xbf16> to vector<384x256xbf16>
    %cst_14 = arith.constant dense<0.000000e+00> : vector<8x256xf32>
    %29 = tpu.matmul %26, %28, %cst_14 {dimension_numbers = #tpu.dot_dimension_numbers<[1], [0], [0], [1], [0, 0, 1, 1], [], []>} : vector<8x384xbf16>, vector<384x256xbf16>, vector<8x256xf32> -> vector<8x256xf32>
    %30 = arith.addf %22, %29 : vector<8x256xf32>
    %c0_15 = arith.constant 0 : index
    %c0_16 = arith.constant 0 : index
    %31 = vector.load %arg4[%c0_15, %c0_16] : memref<1x256xf32, #tpu.memory_space<vmem>>, vector<1x256xf32>
    %32 = vector.broadcast %31 : vector<1x256xf32> to vector<8x256xf32>
    %33 = arith.addf %30, %32 : vector<8x256xf32>
    %cst_17 = arith.constant 0.000000e+00 : f32
    %34 = vector.broadcast %cst_17 : f32 to vector<8x256xf32>
    %35 = arith.maximumf %33, %34 : vector<8x256xf32>
    %36 = arith.truncf %35 : vector<8x256xf32> to vector<8x256xbf16>
    %c0_18 = arith.constant 0 : index
    %c0_19 = arith.constant 0 : index
    %37 = vector.load %arg5[%c0_18, %c0_19] : memref<256x128xbf16, #tpu.memory_space<vmem>>, vector<256x128xbf16>
    %cst_20 = arith.constant dense<0.000000e+00> : vector<8x128xf32>
    %38 = tpu.matmul %36, %37, %cst_20 {dimension_numbers = #tpu.dot_dimension_numbers<[1], [0], [0], [1], [0, 0, 1, 1], [], []>} : vector<8x256xbf16>, vector<256x128xbf16>, vector<8x128xf32> -> vector<8x128xf32>
    %c0_21 = arith.constant 0 : index
    %c0_22 = arith.constant 0 : index
    %39 = vector.load %arg6[%c0_21, %c0_22] : memref<1x128xf32, #tpu.memory_space<vmem>>, vector<1x128xf32>
    %40 = vector.broadcast %39 : vector<1x128xf32> to vector<8x128xf32>
    %41 = arith.addf %38, %40 : vector<8x128xf32>
    %c0_23 = arith.constant 0 : index
    %c0_24 = arith.constant 0 : index
    %c0_25 = arith.constant 0 : index
    %42 = vector.load %arg7[%c0_23, %c0_24, %c0_25] : memref<1x24x128xf32, #tpu.memory_space<vmem>>, vector<1x8x128xf32>
    %43 = vector.shape_cast %42 : vector<1x8x128xf32> to vector<8x128xf32>
    %44 = vector.shape_cast %41 : vector<8x128xf32> to vector<1x8x128xf32>
    tpu.vector_store %arg7[%c0_23, %c0_24, %c0_25], %44 {strides = array<i32>} : memref<1x24x128xf32, #tpu.memory_space<vmem>>, vector<1x8x128xf32>,
    return
  }
  func.func @transform_0(%arg0: i32, %arg1: i32) -> (i32, i32, i32) {
    %c0_i32 = arith.constant 0 : i32
    %c0_i32_0 = arith.constant 0 : i32
    %c0_i32_1 = arith.constant 0 : i32
    return %arg0, %c0_i32, %c0_i32_0 : i32, i32, i32
  }
  func.func @transform_1(%arg0: i32, %arg1: i32) -> (i32, i32, i32) {
    %c0_i32 = arith.constant 0 : i32
    %c0_i32_0 = arith.constant 0 : i32
    %c0_i32_1 = arith.constant 0 : i32
    %c0_i32_2 = arith.constant 0 : i32
    return %c0_i32, %c0_i32_0, %c0_i32_1 : i32, i32, i32
  }
  func.func @transform_2(%arg0: i32, %arg1: i32) -> (i32, i32) {
    %c0_i32 = arith.constant 0 : i32
    %c0_i32_0 = arith.constant 0 : i32
    %c0_i32_1 = arith.constant 0 : i32
    return %c0_i32, %c0_i32_0 : i32, i32
  }
  func.func @transform_3(%arg0: i32, %arg1: i32) -> (i32, i32) {
    %c0_i32 = arith.constant 0 : i32
    %c0_i32_0 = arith.constant 0 : i32
    %c0_i32_1 = arith.constant 0 : i32
    return %c0_i32, %c0_i32_0 : i32, i32
  }
  func.func @transform_4(%arg0: i32, %arg1: i32) -> (i32, i32) {
    %c0_i32 = arith.constant 0 : i32
    %c0_i32_0 = arith.constant 0 : i32
    %c0_i32_1 = arith.constant 0 : i32
    return %c0_i32, %c0_i32_0 : i32, i32
  }
  func.func @transform_5(%arg0: i32, %arg1: i32) -> (i32, i32, i32) {
    %c0_i32 = arith.constant 0 : i32
    %c0_i32_0 = arith.constant 0 : i32
    %c0_i32_1 = arith.constant 0 : i32
    return %arg0, %c0_i32, %c0_i32_0 : i32, i32, i32
  }
}

module attributes {stable_mosaic.version = 11 : i64} {
  func.func @_fused_conv_kernel(%arg0: i32, %arg1: i32, %arg2: memref<1x24x128xbf16, #tpu.memory_space<vmem>>, %arg3: memref<3x384x256xbf16, #tpu.memory_space<vmem>>, %arg4: memref<1x256xf32, #tpu.memory_space<vmem>>, %arg5: memref<256x256xbf16, #tpu.memory_space<vmem>>, %arg6: memref<1x256xf32, #tpu.memory_space<vmem>>, %arg7: memref<1x24x256xf32, #tpu.memory_space<vmem>>) attributes {dimension_semantics = [#tpu.dimension_semantics<parallel>, #tpu.dimension_semantics<parallel>], iteration_bounds = array<i64: 2, 1>, scalar_prefetch = 0 : i64, scratch_operands = 0 : i64, tpu.core_type = #tpu.core_type<tc>, window_params = [{transform_indices = @transform_0, window_bounds = array<i64: 1, 24, 128>}, {pipeline_mode = #tpu.pipeline_mode<synchronous>, transform_indices = @transform_1, window_bounds = array<i64: 3, 384, 256>}, {pipeline_mode = #tpu.pipeline_mode<synchronous>, transform_indices = @transform_2, window_bounds = array<i64: 1, 256>}, {pipeline_mode = #tpu.pipeline_mode<synchronous>, transform_indices = @transform_3, window_bounds = array<i64: 256, 256>}, {pipeline_mode = #tpu.pipeline_mode<synchronous>, transform_indices = @transform_4, window_bounds = array<i64: 1, 256>}, {transform_indices = @transform_5, window_bounds = array<i64: 1, 24, 256>}]} {
    %c0 = arith.constant 0 : index
    %c0_0 = arith.constant 0 : index
    %c0_1 = arith.constant 0 : index
    %0 = vector.load %arg2[%c0, %c0_0, %c0_1] : memref<1x24x128xbf16, #tpu.memory_space<vmem>>, vector<1x8x128xbf16>
    %1 = vector.shape_cast %0 : vector<1x8x128xbf16> to vector<8x128xbf16>
    %cst = arith.constant 0.000000e+00 : bf16
    %2 = vector.broadcast %cst : bf16 to vector<4x128xbf16>
    %cst_2 = arith.constant 0.000000e+00 : bf16
    %3 = vector.broadcast %cst_2 : bf16 to vector<4x128xbf16>
    %cst_3 = arith.constant 0.000000e+00 : bf16
    %4 = vector.broadcast %cst_3 : bf16 to vector<1x128xbf16>
    %5 = tpu.concatenate %4, %2, %1, %3, %4 in 0 : vector<1x128xbf16>, vector<4x128xbf16>, vector<8x128xbf16>, vector<4x128xbf16>, vector<1x128xbf16> -> vector<18x128xbf16>
    %cst_4 = arith.constant 0.000000e+00 : f32
    %6 = vector.broadcast %cst_4 : f32 to vector<8x256xf32>
    %7 = vector.extract_strided_slice %5 {offsets = [0, 0], sizes = [8, 128], strides = [1, 1]} : vector<18x128xbf16> to vector<8x128xbf16>
    %8 = vector.extract_strided_slice %5 {offsets = [1, 0], sizes = [8, 128], strides = [1, 1]} : vector<18x128xbf16> to vector<8x128xbf16>
    %9 = vector.extract_strided_slice %5 {offsets = [2, 0], sizes = [8, 128], strides = [1, 1]} : vector<18x128xbf16> to vector<8x128xbf16>
    %10 = tpu.concatenate %7, %8, %9 in 1 : vector<8x128xbf16>, vector<8x128xbf16>, vector<8x128xbf16> -> vector<8x384xbf16>
    %c0_5 = arith.constant 0 : index
    %c0_6 = arith.constant 0 : index
    %c0_7 = arith.constant 0 : index
    %11 = vector.load %arg3[%c0_5, %c0_6, %c0_7] : memref<3x384x256xbf16, #tpu.memory_space<vmem>>, vector<1x384x256xbf16>
    %12 = vector.shape_cast %11 : vector<1x384x256xbf16> to vector<384x256xbf16>
    %cst_8 = arith.constant dense<0.000000e+00> : vector<8x256xf32>
    %13 = tpu.matmul %10, %12, %cst_8 {dimension_numbers = #tpu.dot_dimension_numbers<[1], [0], [0], [1], [0, 0, 1, 1], [], []>} : vector<8x384xbf16>, vector<384x256xbf16>, vector<8x256xf32> -> vector<8x256xf32>
    %14 = arith.addf %6, %13 : vector<8x256xf32>
    %15 = vector.extract_strided_slice %5 {offsets = [4, 0], sizes = [8, 128], strides = [1, 1]} : vector<18x128xbf16> to vector<8x128xbf16>
    %16 = vector.extract_strided_slice %5 {offsets = [5, 0], sizes = [8, 128], strides = [1, 1]} : vector<18x128xbf16> to vector<8x128xbf16>
    %17 = vector.extract_strided_slice %5 {offsets = [6, 0], sizes = [8, 128], strides = [1, 1]} : vector<18x128xbf16> to vector<8x128xbf16>
    %18 = tpu.concatenate %15, %16, %17 in 1 : vector<8x128xbf16>, vector<8x128xbf16>, vector<8x128xbf16> -> vector<8x384xbf16>
    %c1 = arith.constant 1 : index
    %c0_9 = arith.constant 0 : index
    %c0_10 = arith.constant 0 : index
    %19 = vector.load %arg3[%c1, %c0_9, %c0_10] : memref<3x384x256xbf16, #tpu.memory_space<vmem>>, vector<1x384x256xbf16>
    %20 = vector.shape_cast %19 : vector<1x384x256xbf16> to vector<384x256xbf16>
    %cst_11 = arith.constant dense<0.000000e+00> : vector<8x256xf32>
    %21 = tpu.matmul %18, %20, %cst_11 {dimension_numbers = #tpu.dot_dimension_numbers<[1], [0], [0], [1], [0, 0, 1, 1], [], []>} : vector<8x384xbf16>, vector<384x256xbf16>, vector<8x256xf32> -> vector<8x256xf32>
    %22 = arith.addf %14, %21 : vector<8x256xf32>
    %23 = vector.extract_strided_slice %5 {offsets = [8, 0], sizes = [8, 128], strides = [1, 1]} : vector<18x128xbf16> to vector<8x128xbf16>
    %24 = vector.extract_strided_slice %5 {offsets = [9, 0], sizes = [8, 128], strides = [1, 1]} : vector<18x128xbf16> to vector<8x128xbf16>
    %25 = vector.extract_strided_slice %5 {offsets = [10, 0], sizes = [8, 128], strides = [1, 1]} : vector<18x128xbf16> to vector<8x128xbf16>
    %26 = tpu.concatenate %23, %24, %25 in 1 : vector<8x128xbf16>, vector<8x128xbf16>, vector<8x128xbf16> -> vector<8x384xbf16>
    %c2 = arith.constant 2 : index
    %c0_12 = arith.constant 0 : index
    %c0_13 = arith.constant 0 : index
    %27 = vector.load %arg3[%c2, %c0_12, %c0_13] : memref<3x384x256xbf16, #tpu.memory_space<vmem>>, vector<1x384x256xbf16>
    %28 = vector.shape_cast %27 : vector<1x384x256xbf16> to vector<384x256xbf16>
    %cst_14 = arith.constant dense<0.000000e+00> : vector<8x256xf32>
    %29 = tpu.matmul %26, %28, %cst_14 {dimension_numbers = #tpu.dot_dimension_numbers<[1], [0], [0], [1], [0, 0, 1, 1], [], []>} : vector<8x384xbf16>, vector<384x256xbf16>, vector<8x256xf32> -> vector<8x256xf32>
    %30 = arith.addf %22, %29 : vector<8x256xf32>
    %c0_15 = arith.constant 0 : index
    %c0_16 = arith.constant 0 : index
    %31 = vector.load %arg4[%c0_15, %c0_16] : memref<1x256xf32, #tpu.memory_space<vmem>>, vector<1x256xf32>
    %32 = vector.broadcast %31 : vector<1x256xf32> to vector<8x256xf32>
    %33 = arith.addf %30, %32 : vector<8x256xf32>
    %cst_17 = arith.constant 0.000000e+00 : f32
    %34 = vector.broadcast %cst_17 : f32 to vector<8x256xf32>
    %35 = arith.maximumf %33, %34 : vector<8x256xf32>
    %36 = arith.truncf %35 : vector<8x256xf32> to vector<8x256xbf16>
    %c0_18 = arith.constant 0 : index
    %c0_19 = arith.constant 0 : index
    %37 = vector.load %arg5[%c0_18, %c0_19] : memref<256x256xbf16, #tpu.memory_space<vmem>>, vector<256x256xbf16>
    %cst_20 = arith.constant dense<0.000000e+00> : vector<8x256xf32>
    %38 = tpu.matmul %36, %37, %cst_20 {dimension_numbers = #tpu.dot_dimension_numbers<[1], [0], [0], [1], [0, 0, 1, 1], [], []>} : vector<8x256xbf16>, vector<256x256xbf16>, vector<8x256xf32> -> vector<8x256xf32>
    %c0_21 = arith.constant 0 : index
    %c0_22 = arith.constant 0 : index
    %39 = vector.load %arg6[%c0_21, %c0_22] : memref<1x256xf32, #tpu.memory_space<vmem>>, vector<1x256xf32>
    %40 = vector.broadcast %39 : vector<1x256xf32> to vector<8x256xf32>
    %41 = arith.addf %38, %40 : vector<8x256xf32>
    %42 = arith.mulf %41, %41 : vector<8x256xf32>
    %cst_23 = arith.constant dense<0.000000e+00> : vector<8xf32>
    %43 = vector.multi_reduction <add>, %42, %cst_23 [1] : vector<8x256xf32> to vector<8xf32>
    %44 = vector.shape_cast %43 : vector<8xf32> to vector<8x1xf32>
    %cst_24 = arith.constant 9.99999996E-13 : f32
    %45 = vector.broadcast %cst_24 : f32 to vector<8x1xf32>
    %46 = arith.addf %44, %45 : vector<8x1xf32>
    %47 = math.rsqrt %46 : vector<8x1xf32>
    %48 = vector.broadcast %47 : vector<8x1xf32> to vector<8x256xf32>
    %49 = arith.mulf %41, %48 : vector<8x256xf32>
    %c0_25 = arith.constant 0 : index
    %c0_26 = arith.constant 0 : index
    %c0_27 = arith.constant 0 : index
    %50 = vector.load %arg7[%c0_25, %c0_26, %c0_27] : memref<1x24x256xf32, #tpu.memory_space<vmem>>, vector<1x8x256xf32>
    %51 = vector.shape_cast %50 : vector<1x8x256xf32> to vector<8x256xf32>
    %52 = vector.shape_cast %49 : vector<8x256xf32> to vector<1x8x256xf32>
    tpu.vector_store %arg7[%c0_25, %c0_26, %c0_27], %52 {strides = array<i32>} : memref<1x24x256xf32, #tpu.memory_space<vmem>>, vector<1x8x256xf32>,
    return
  }
  func.func @transform_0(%arg0: i32, %arg1: i32) -> (i32, i32, i32) {
    %c0_i32 = arith.constant 0 : i32
    %c0_i32_0 = arith.constant 0 : i32
    %c0_i32_1 = arith.constant 0 : i32
    return %arg0, %c0_i32, %c0_i32_0 : i32, i32, i32
  }
  func.func @transform_1(%arg0: i32, %arg1: i32) -> (i32, i32, i32) {
    %c0_i32 = arith.constant 0 : i32
    %c0_i32_0 = arith.constant 0 : i32
    %c0_i32_1 = arith.constant 0 : i32
    %c0_i32_2 = arith.constant 0 : i32
    return %c0_i32, %c0_i32_0, %c0_i32_1 : i32, i32, i32
  }
  func.func @transform_2(%arg0: i32, %arg1: i32) -> (i32, i32) {
    %c0_i32 = arith.constant 0 : i32
    %c0_i32_0 = arith.constant 0 : i32
    %c0_i32_1 = arith.constant 0 : i32
    return %c0_i32, %c0_i32_0 : i32, i32
  }
  func.func @transform_3(%arg0: i32, %arg1: i32) -> (i32, i32) {
    %c0_i32 = arith.constant 0 : i32
    %c0_i32_0 = arith.constant 0 : i32
    %c0_i32_1 = arith.constant 0 : i32
    return %c0_i32, %c0_i32_0 : i32, i32
  }
  func.func @transform_4(%arg0: i32, %arg1: i32) -> (i32, i32) {
    %c0_i32 = arith.constant 0 : i32
    %c0_i32_0 = arith.constant 0 : i32
    %c0_i32_1 = arith.constant 0 : i32
    return %c0_i32, %c0_i32_0 : i32, i32
  }
  func.func @transform_5(%arg0: i32, %arg1: i32) -> (i32, i32, i32) {
    %c0_i32 = arith.constant 0 : i32
    %c0_i32_0 = arith.constant 0 : i32
    %c0_i32_1 = arith.constant 0 : i32
    return %arg0, %c0_i32, %c0_i32_0 : i32, i32, i32
  }
}

</mosaic_0001>

<bundles_post_ra>
// kernel: superpoint_forward.12
= control target key start
LH: loop header
LB: loop body
LE: loop exit
PB: predicated region body
PF: predicated region fallthrough
CT: control target
= control target key end

     0   :  { %s1522_s15 = smov 0   ;;  %s1524_s16 = smov 0   ;;  %s2029_s0 = inlined_call_operand.vmem [shape: bf16[2,120,64], index: 0, kind: input, shape index: {}]   ;;  %s2030_s1 = inlined_call_operand.vmem [shape: bf16[3,192,64], index: 1, kind: input, shape index: {}]   ;;  %s2031_s2 = inlined_call_operand.vmem [shape: f32[1,64], index: 2, kind: input, shape index: {}]   ;;  %s2032_s3 = inlined_call_operand.vmem [shape: f32[80,1], index: 3, kind: input, shape index: {}]   ;;  %s2033_s4 = inlined_call_operand.vmem [shape: bf16[2,120,64], index: 4, kind: output, shape index: {}]  }
   0x1   :  { %s1526_s17 = smov 0  }
   0x2 LB: > { %s26_s18 = sadd.s32 1, %s1489_s16  ;;  %p1247_p0 = scmp.ge.s32.totalorder %s1493_s17, 1  ;;  %s1493_s17 = sphi %s1526_s17, %s14_s17   ;;  %s1489_s16 = sphi %s1524_s16, %s2037_s16   ;;  %s1485_s15 = sphi %s1522_s15, %s2036_s15  }
   0x3   : > { %p28_p1 = scmp.ge.s32.totalorder %s26_s18, 2  ;;  %p174_p2 = scmp.lt.s32.totalorder %s1493_s17, 3 }
   0x5   : > { %s2039_s18 = smov (%p28_p1, %s26_s18), 0  ;;  %p175_p3 = pnand %p1247_p0, %p174_p2 }
   0x6   : > { %p200_p4 = scmp.lt.s32.totalorder (!%p175_p3), %s1485_s15, 1  ;;  %s1496_s26 = smov (!%p175_p3), 64  }
   0x7   : > { %178 = sbr.rel (%p175_p3) target bundleno = 426 (0x1aa), region = 36 }
   0xc   : > { %s2041_s15 = smov (!%p200_p4, %s1485_s15), 1  ;;  %v1495_v0 = vmov 0   ;;  %v1435_v1 = vld [vmem:[%s2030_s1 + $0x38] sm:$0xff]   ;;  %v1436_v2 = vld [vmem:[%s2030_s1 + $0x30] sm:$0xff]   ;;  %vm246_vm0 = vsmask.f32 5376 }
   0xd   : > { %719 = vmatprep.subr.bf16.mxu1 %v1495_v0  ;;  %559 = vmatprep.subr.bf16.mxu0 %v1495_v0  ;;  %s1401_s23 = smul.u32 60, %s2041_s15  ;;  %v1437_v3 = vld [vmem:[%s2030_s1 + $0x98] sm:$0xff]   ;;  %v1438_v4 = vld [vmem:[%s2030_s1 + $0x28] sm:$0xff]   ;;  %v1439_v5 = vld [vmem:[%s2030_s1 + $0x90] sm:$0xff]   ;;  %vm293_vm1 = vcmask 1045504   ;;  %v1582_v27 = vrot.slane %v1495_v0, 1 }
   0xe   : > { %1429 = vset.pattern.permute.xlu1 %v1495_v0  ;;  %1428 = vset.pattern.permute.xlu0 %v1495_v0  ;;  %vm297_vm2 = vsmask.f32 7424  ;;  %vm1573_vm3 = vmand %vm293_vm1, %vm246_vm0  ;;  %v1440_v24 = vld [vmem:[%s2030_s1 + $0x20] sm:$0xff]   ;;  %v1441_v28 = vld [vmem:[%s2030_s1 + $0x88] sm:$0xff]   ;;  %vm354_vm4 = vcmask 1046528   ;;  %vm366_vm5 = vcmask 523264  }
   0xf   : > { %720 = vmatpush1.bf16.msra.mxu1 %v1435_v1  ;;  %s204_s28 = scalar_lea.vmem %s2029_s0, %s1401_s23  ;;  %560 = vmatpush1.bf16.msra.mxu0 %v1437_v3  ;;  %v1442_v37 = vld [vmem:[%s2030_s1 + $0x18] sm:$0xff]   ;;  %v1443_v42 = vld [vmem:[%s2030_s1 + $0x80] sm:$0xff]   ;;  %v1444_v47 = vld [vmem:[%s2030_s1 + $0x10] sm:$0xff]   ;;  %vm444_vm6 = vcmask 1042432   ;;  %s1975_s10 = scalar_lea.vmem %s2033_s4, %s1401_s23  ;;  %vm1172_vm7 = vcmask 519168  }
  0x10   : > { %721 = vmatprep.subr.bf16.mxu1 %v1495_v0  ;;  %561 = vmatprep.subr.bf16.mxu0 %v1495_v0  ;;  %v1430_v6 = vld [vmem:[%s204_s28] sm:$0xff]   ;;  %v1431_v7 = vld [vmem:[%s204_s28 + $0x8] sm:$0xff]   ;;  %v1432_v12 = vld [vmem:[%s204_s28 + $0x10] sm:$0xff]  }
  0x11   : > { %v248_v8 = vshrl.u32 %v1430_v6, 16  ;;  %v251_v9 = vshll.u32 %v1430_v6, 16  ;;  %v256_v10 = vshrl.u32 %v1431_v7, 16  ;;  %v259_v11 = vshll.u32 %v1431_v7, 16  ;;  %v1433_v13 = vld [vmem:[%s204_s28 + $0x18] sm:$0xff]   ;;  %v1434_v23 = vld [vmem:[%s204_s28 + $0x20] sm:$0xff]  }
  0x12   : > { %v265_v19 = vshrl.u32 %v1432_v12, 16  ;;  %v268_v20 = vshll.u32 %v1432_v12, 16  ;;  %v274_v21 = vshrl.u32 %v1433_v13, 16  ;;  %v277_v22 = vshll.u32 %v1433_v13, 16  ;;  %v1445_v58 = vld [vmem:[%s2030_s1 + $0x78] sm:$0xff]   ;;  %v1447_v7 = vld [vmem:[%s2030_s1 + $0x70] sm:$0xff]  }
  0x13   : > { %722 = vmatpush1.bf16.msra.mxu1 %v1436_v2  ;;  %562 = vmatpush1.bf16.msra.mxu0 %v1439_v5  ;;  %v250_v14 = vrot.slane %v248_v8, 2  ;;  %v253_v15 = vrot.slane %v251_v9, 3  ;;  %v258_v16 = vrot.slane %v256_v10, 2  ;;  %v261_v17 = vrot.slane %v259_v11, 3 }
  0x14   : > { %723 = vmatprep.subr.bf16.mxu1 %v1495_v0  ;;  %563 = vmatprep.subr.bf16.mxu0 %v1495_v0  ;;  %v267_v29 = vrot.slane %v265_v19, 2  ;;  %v270_v30 = vrot.slane %v268_v20, 3  ;;  %v276_v31 = vrot.slane %v274_v21, 2  ;;  %v279_v32 = vrot.slane %v277_v22, 3  ;;  %v1449_v21 = vld [vmem:[%s2030_s1 + $0x68] sm:$0xff]  }
  0x15   : > { %v254_v25 = vor.u32 %v253_v15, %v250_v14  ;;  %v262_v26 = vor.u32 %v261_v17, %v258_v16  ;;  %v283_v35 = vshrl.u32 %v1434_v23, 16  ;;  %v286_v36 = vshll.u32 %v1434_v23, 16  ;;  %v1448_v17 = vld [vmem:[%s2030_s1] sm:$0xff]  }
  0x16   : > { %v271_v41 = vor.u32 %v270_v30, %v267_v29  ;;  %v280_v43 = vor.u32 %v279_v32, %v276_v31  ;;  %v1451_v31 = vld [vmem:[%s2030_s1 + $0x60] sm:$0xff]  }
  0x17   : > { %724 = vmatpush1.bf16.msra.mxu1 %v1438_v4  ;;  %v1588_v33 = vsel %vm246_vm0, %v254_v25, %v262_v26  ;;  %v1592_v34 = vsel %vm1573_vm3, 0, %v254_v25  ;;  %564 = vmatpush1.bf16.msra.mxu0 %v1441_v28  ;;  %v285_v45 = vrot.slane %v283_v35, 2  ;;  %v288_v46 = vrot.slane %v286_v36, 3  ;;  %v1446_v4 = vld [vmem:[%s2030_s1 + $0x8] sm:$0xff]  }
  0x18   : > { %725 = vmatprep.subr.bf16.mxu1 %v1495_v0  ;;  %v299_v38 = vshrl.u32 %v1592_v34, 16  ;;  %v301_v39 = vshll.u32 %v1592_v34, 16  ;;  %v306_v40 = vshll.u32 %v1588_v33, 16  ;;  %565 = vmatprep.subr.bf16.mxu0 %v1495_v0  ;;  %v310_v44 = vshrl.u32 %v1588_v33, 16 }
  0x19   : > { %v1610_v50 = vsel %vm246_vm0, %v262_v26, %v271_v41  ;;  %v1613_v51 = vsel %vm246_vm0, %v271_v41, %v280_v43  ;;  %v289_v54 = vor.u32 %v288_v46, %v285_v45  ;;  %v355_v18 = vrot.slane %v1592_v34, 1  ;;  %v1455_v45 = vld [vmem:[%s2030_s1 + $0xb0] sm:$0xff]   ;;  %v1456_v46 = vld [vmem:[%s2030_s1 + $0x40] sm:$0xff]  }
  0x1a   : > { %v303_v48 = vrot.slane %v301_v39, 1  ;;  %v308_v49 = vrot.slane %v306_v40, 1  ;;  %v314_v52 = vshll.u32 %v1610_v50, 16  ;;  %v318_v53 = vshrl.u32 %v1610_v50, 16  ;;  %v1453_v40 = vld [vmem:[%s2030_s1 + $0xb8] sm:$0xff]  }
  0x1b   : > { %726 = vmatpush1.bf16.msra.mxu1 %v1440_v24  ;;  %566 = vmatpush1.bf16.msra.mxu0 %v1443_v42  ;;  %v322_v56 = vshll.u32 %v1613_v51, 16  ;;  %v1624_v60 = vsel %vm246_vm0, %v280_v43, %v289_v54  ;;  %v326_v61 = vshrl.u32 %v1613_v51, 16  ;;  %v1629_v62 = vsel %vm1573_vm3, %v289_v54, 0  ;;  %v1450_v24 = vld [vmem:[%s2030_s1 + $0x58] sm:$0xff]   ;;  %v1454_v43 = vld [vmem:[%s2030_s1 + $0x48] sm:$0xff]  }
  0x1c   : > { %727 = vmatprep.subr.bf16.mxu1 %v1495_v0  ;;  %v304_v55 = vor.u32 %v303_v48, %v299_v38  ;;  %v312_v57 = vor.u32 %v310_v44, %v308_v49  ;;  %567 = vmatprep.subr.bf16.mxu0 %v1495_v0  ;;  %v316_v59 = vrot.slane %v314_v52, 1  ;;  %v330_v2 = vshll.u32 %v1624_v60, 16  ;;  %v1452_v38 = vld [vmem:[%s2030_s1 + $0x50] sm:$0xff]   ;;  %v1459_v48 = vld [vmem:[%s2030_s1 + $0xa0] sm:$0xff]  }
  0x1d   : > { %v324_v1 = vrot.slane %v322_v56, 1  ;;  %v334_v3 = vshrl.u32 %v1624_v60, 16  ;;  %v338_v6 = vshll.u32 %v1629_v62, 16  ;;  %v406_v11 = vshrl.u32 %v1629_v62, 16 }
  0x1e   : > { %v309_v63 = vsel %vm297_vm2, %v304_v55, %v308_v49  ;;  %v320_v5 = vor.u32 %v318_v53, %v316_v59  ;;  %v317_v8 = vsel %vm297_vm2, %v312_v57, %v316_v59  ;;  %v332_v10 = vrot.slane %v330_v2, 1  ;;  %v1064_v2 = vld [vmem:[%s2032_s3 + $0x10] sm:$0xff] }
  0x1f   : > { %728 = vmatpush1.bf16.msra.mxu1 %v1442_v37  ;;  %342 = vrot.lane.b32.xlu0 %v309_v63, %s1496_s26  ;;  %v328_v9 = vor.u32 %v326_v61, %v324_v1  ;;  %v360_v13 = vrot.slane %v1613_v51, 1  ;;  %v340_v14 = vrot.slane %v338_v6, 1  ;;  %v356_v22 = vrot.slane %v1588_v33, 1  ;;  %v1068_v6 = vld [vmem:[%s2032_s3 + $0x30] sm:$0xff] }
  0x20   : > { %729 = vmatprep.subr.bf16.mxu1 %v1495_v0  ;;  %568 = vmatpush1.bf16.msra.mxu0 %v1445_v58  ;;  %v325_v12 = vsel %vm297_vm2, %v320_v5, %v324_v1  ;;  %v336_v15 = vor.u32 %v334_v3, %v332_v10  ;;  %v358_v23 = vrot.slane %v1610_v50, 1  ;;  %v362_v37 = vrot.slane %v1624_v60, 1  ;;  %v1063_v1 = vld [vmem:[%s2032_s3 + $0x8] sm:$0xff]  ;;  %v1065_v3 = vld [vmem:[%s2032_s3 + $0x18] sm:$0xff] }
  0x21   : > { %569 = vmatprep.subr.bf16.mxu0 %v1495_v0  ;;  %346 = vrot.lane.b32.xlu1 %v325_v12, %s1496_s26  ;;  %v333_v16 = vsel %vm297_vm2, %v328_v9, %v332_v10  ;;  %v408_v20 = vor.u32 %v406_v11, %v340_v14  ;;  %v357_v25 = vsel %vm354_vm4, %v355_v18, %v356_v22  ;;  %v1734_v49 = vrot.slane %v1629_v62, 1  ;;  %v1067_v5 = vld [vmem:[%s2032_s3 + $0x28] sm:$0xff]  ;;  %v1458_v10 = vld [vmem:[%s2030_s1 + $0xf8] sm:$0xff]  }
  0x22   : > { %v341_v19 = vsel %vm297_vm2, %v336_v15, %v340_v14  ;;  %v448_v26 = vrot.slane %v357_v25, 5  ;;  %v1670_v28 = vsel %vm354_vm4, %v356_v22, %v358_v23  ;;  %v1673_v29 = vsel %vm354_vm4, %v358_v23, %v360_v13  ;;  %1308 = vmatprep.mubr.msk.bf16.mxu1 %vm366_vm5, %v357_v25  ;;  %v1071_v9 = vld [vmem:[%s2032_s3 + $0x48] sm:$0xff]  ;;  %v1463_v22 = vld [vmem:[%s2030_s1 + $0xd8] sm:$0xff]  }
  0x23   : > { %730 = vmatpush1.bf16.msra.mxu1 %v1444_v47  ;;  %344 = vrot.lane.b32.xlu0 %v317_v8, %s1496_s26  ;;  %v796_v30 = vsel %vm297_vm2, %v408_v20, %v1582_v27  ;;  %v449_v32 = vrot.slane %v1670_v28, 5  ;;  %v453_v35 = vrot.slane %v1673_v29, 5  ;;  %v1700_v41 = vsel %vm354_vm4, %v360_v13, %v362_v37  ;;  %v1457_v47 = vld [vmem:[%s2030_s1 + $0xa8] sm:$0xff]   ;;  %v1070_v8 = vld [vmem:[%s2032_s3 + $0x40] sm:$0xff]  ;;  %v1460_v13 = vld [vmem:[%s2030_s1 + $0xf0] sm:$0xff]  }
  0x24   : > { %731 = vmatprep.subr.bf16.mxu1 %v1495_v0  ;;  %570 = vmatpush1.bf16.msra.mxu0 %v1447_v7  ;;  %v457_v42 = vrot.slane %v1700_v41, 5  ;;  %v1739_v52 = vsel %vm354_vm4, %v362_v37, %v1734_v49  ;;  %v806_v53 = vsel %vm354_vm4, %v1734_v49, %v1582_v27  ;;  %v858_v57 = vrot.slane %v1582_v27, 2  ;;  %v1069_v7 = vld [vmem:[%s2032_s3 + $0x38] sm:$0xff]  ;;  %v1461_v18 = vld [vmem:[%s2030_s1 + $0xe8] sm:$0xff]  }
  0x25   : > { %571 = vmatprep.subr.bf16.mxu0 %v1495_v0  ;;  %348 = vrot.lane.b32.xlu1 %v333_v16, %s1496_s26  ;;  %v450_v36 = vsel %vm444_vm6, %v448_v26, %v449_v32  ;;  %v1693_v39 = vsel %vm444_vm6, %v449_v32, %v453_v35  ;;  %v850_v54 = vrot.slane %v1739_v52, 2  ;;  %v854_v55 = vrot.slane %v806_v53, 2  ;;  %v1464_v26 = vld [vmem:[%s2030_s1 + $0xd0] sm:$0xff]   ;;  %v1465_v32 = vld [vmem:[%s2030_s1 + $0xc8] sm:$0xff]  }
  0x26   : > { %1291 = vmatprep.mubr.msk.bf16.mxu0 %vm366_vm5, %v450_v36  ;;  %v1713_v44 = vsel %vm444_vm6, %v453_v35, %v457_v42  ;;  %v842_v59 = vrot.slane %v1673_v29, 2  ;;  %v846_v61 = vrot.slane %v1700_v41, 2  ;;  %v1469_v53 = vld [vmem:[%s2030_s1 + $0x108] sm:$0xff]  }
  0x27   : > { %732 = vmatpush1.bf16.msra.mxu1 %v1446_v4  ;;  %350 = vrot.lane.b32.xlu0 %v341_v19, %s1496_s26  ;;  %v1748_v56 = vsel %vm293_vm1, %v850_v54, %v854_v55  ;;  %v1752_v58 = vsel %vm293_vm1, %v854_v55, %v858_v57  ;;  %v1066_v4 = vld [vmem:[%s2032_s3 + $0x20] sm:$0xff] }
  0x28   : > { %733 = vmatprep.subr.bf16.mxu1 %v1495_v0  ;;  %572 = vmatpush1.bf16.msra.mxu0 %v1449_v21  ;;  %v1761_v63 = vsel %vm293_vm1, %v842_v59, %v846_v61 }
  0x29   : > { %573 = vmatprep.subr.bf16.mxu0 %v1495_v0  ;;  %409 = vrot.lane.b32.xlu1 %v408_v20, %s1496_s26 }
  0x2b   : > { %734 = vmatpush1.bf16.msra.mxu1 %v1448_v17  ;;  %800 = vrot.lane.b32.xlu0 %v796_v30, %s1496_s26  ;;  %v461_v30 = vrot.slane %v1739_v52, 5 }
  0x2c   : > { %743 = vmatprep.subr.bf16.mxu1 %v1495_v0  ;;  %574 = vmatpush1.bf16.msra.mxu0 %v1451_v31 }
  0x2d   : > { %583 = vmatprep.subr.bf16.mxu0 %v1495_v0  ;;  %802 = vrot.lane.b32.xlu1 %v1582_v27, %s1496_s26  ;;  %v1062_v27 = vld [vmem:[%s2032_s3] sm:$0xff]  ;;  %v462_v36 = vsel %vm444_vm6, %v457_v42, %v461_v30  ;;  %v1467_v42 = vld [vmem:[%s2030_s1 + $0x118] sm:$0xff]  }
  0x2f   : > { %744 = vmatpush2.bf16.msra.mxu1 %v1450_v24  ;;  %1074 = vperm.xlu0 %1428, %v1062_v27  }
  0x30   : > { %745 = vmatprep.subr.bf16.mxu1 %v1495_v0  ;;  %584 = vmatpush2.bf16.msra.mxu0 %v1453_v40 }
  0x31   : > { %585 = vmatprep.subr.bf16.mxu0 %v1495_v0  ;;  %1079 = vperm.xlu1 %1429, %v1063_v1  }
  0x33   : > { %746 = vmatpush2.bf16.msra.mxu1 %v1452_v38  ;;  %1089 = vperm.xlu0 %1428, %v1065_v3  }
  0x34   : > { %747 = vmatprep.subr.bf16.mxu1 %v1495_v0  ;;  %586 = vmatpush2.bf16.msra.mxu0 %v1455_v45 }
  0x35   : > { %587 = vmatprep.subr.bf16.mxu0 %v1495_v0  ;;  %1084 = vperm.xlu1 %1429, %v1064_v2  }
  0x37   : > { %748 = vmatpush2.bf16.msra.mxu1 %v1454_v43  ;;  %1099 = vperm.xlu0 %1428, %v1067_v5  }
  0x38   : > { %749 = vmatprep.subr.bf16.mxu1 %v1495_v0  ;;  %588 = vmatpush2.bf16.msra.mxu0 %v1457_v47  ;;  %v841_v47 = vrot.slane %v1670_v28, 2 }
  0x39   : > { %589 = vmatprep.subr.bf16.mxu0 %v1495_v0  ;;  %1094 = vperm.xlu1 %1429, %v1066_v4  }
  0x3b   : > { %750 = vmatpush2.bf16.msra.mxu1 %v1456_v46  ;;  %1109 = vperm.xlu0 %1428, %v1069_v7   ;;  %v1468_v46 = vld [vmem:[%s2030_s1 + $0x110] sm:$0xff]  }
  0x3c   : > { %1377 = vmatprep.subr.bf16.mxu1 %v1495_v0  ;;  %590 = vmatpush2.bf16.msra.mxu0 %v1459_v48 }
  0x3d   : > { %952 = vmatprep.subr.bf16.mxu0 %v1495_v0  ;;  %1104 = vperm.xlu1 %1429, %v1068_v6  }
  0x3f   : > { %1119 = vperm.xlu0 %1428, %v1071_v9  }
  0x41   : > { %1114 = vperm.xlu1 %1429, %v1070_v8  }
  0x91   : > { %v343_v11 = vpop.permute.xlu0 %342 }
  0x92   : > { %v368_v12 = vsel %vm366_vm5, %v1592_v34, %v343_v11 }
  0x93   : > { %752 = vmatmul.mubr.bf16.vlgmr.msra.gmra.mxu1 %v368_v12  ;;  %v445_v16 = vrot.slane %v368_v12, 5  ;;  %v347_v17 = vpop.permute.xlu1 %346 }
  0x94   : > { %1389 = vmatpush1.bf16.msra.mxu1 %v1458_v10  ;;  %1309 = vmatprep.mubr.msk.bf16.mxu1 %vm366_vm5, %v1670_v28  ;;  %v1816_v20 = vsel %vm366_vm5, %v1610_v50, %v347_v17  ;;  %v843_v28 = vsel %vm293_vm1, %v841_v47, %v842_v59 }
  0x95   : > { %v345_v14 = vpop.permute.xlu0 %344  ;;  %1378 = vmatprep.subr.bf16.mxu1 %v1495_v0  ;;  %v451_v21 = vrot.slane %v1816_v20, 5  ;;  %v839_v2 = vrot.slane %v1816_v20, 2 }
  0x96   : > { %v1806_v15 = vsel %vm366_vm5, %v1588_v33, %v345_v14  ;;  %v1462_v33 = vld [vmem:[%s2030_s1 + $0xe0] sm:$0xff]  }
  0x97   : > { %v446_v34 = vrot.slane %v1806_v15, 5  ;;  %v349_v50 = vpop.permute.xlu1 %348  ;;  %v838_v3 = vrot.slane %v1806_v15, 2 }
  0x98   : > { %1390 = vmatpush1.bf16.msra.mxu1 %v1460_v13  ;;  %v1835_v23 = vsel %vm366_vm5, %v1613_v51, %v349_v50 }
  0x99   : > { %v447_v19 = vsel %vm444_vm6, %v445_v16, %v446_v34  ;;  %1379 = vmatprep.subr.bf16.mxu1 %v1495_v0  ;;  %v452_v24 = vsel %vm444_vm6, %v446_v34, %v451_v21  ;;  %v455_v25 = vrot.slane %v1835_v23, 5  ;;  %v351_v51 = vpop.permute.xlu0 %350  ;;  %v840_v5 = vsel %vm293_vm1, %v838_v3, %v839_v2 }
  0x9a   : > { %592 = vmatmul.mubr.bf16.vlgmr.msra.gmra.mxu0 %v447_v19  ;;  %v1858_v35 = vsel %vm366_vm5, %v1624_v60, %v351_v51  ;;  %v1466_v60 = vld [vmem:[%s2030_s1 + $0xc0] sm:$0xff]   ;;  %v844_v6 = vrot.slane %v1835_v23, 2 }
  0x9b   : > { %953 = vmatpush1.bf16.msra.mxu0 %v1458_v10  ;;  %760 = vmatmul.mubr.bf16.gmra.mxu1 %v1806_v15  ;;  %v456_v31 = vsel %vm444_vm6, %v451_v21, %v455_v25  ;;  %v459_v37 = vrot.slane %v1858_v35, 5  ;;  %v410_v38 = vpop.permute.xlu1 %409  ;;  %v848_v59 = vrot.slane %v1858_v35, 2 }
  0x9c   : > { %1391 = vmatpush1.bf16.msra.mxu1 %v1461_v18  ;;  %954 = vmatprep.subr.bf16.mxu0 %v1495_v0  ;;  %v412_v43 = vsel %vm366_vm5, %v1629_v62, %v410_v38 }
  0x9d   : > { %1380 = vmatprep.subr.bf16.mxu1 %v1495_v0  ;;  %1292 = vmatprep.mubr.msk.bf16.mxu0 %vm366_vm5, %v1693_v39  ;;  %v465_v39 = vrot.slane %v1734_v49, 5  ;;  %v460_v40 = vsel %vm444_vm6, %v455_v25, %v459_v37  ;;  %v463_v45 = vrot.slane %v412_v43, 5  ;;  %v801_v49 = vpop.permute.xlu0 %800  ;;  %v849_v7 = vsel %vm293_vm1, %v844_v6, %v848_v59 }
  0x9e   : > { %1310 = vmatprep.mubr.msk.bf16.mxu1 %vm366_vm5, %v1673_v29  ;;  %v808_v55 = vsel %vm366_vm5, %v1629_v62, %v801_v49 }
  0x9f   : > { %955 = vmatpush1.bf16.msra.mxu0 %v1460_v13  ;;  %v464_v48 = vsel %vm444_vm6, %v459_v37, %v463_v45  ;;  %v852_v29 = vrot.slane %v808_v55, 2  ;;  %v803_v57 = vpop.permute.xlu1 %802 }
  0xa0   : > { %1392 = vmatpush1.bf16.msra.mxu1 %v1462_v33  ;;  %956 = vmatprep.subr.bf16.mxu0 %v1495_v0  ;;  %v810_v62 = vsel %vm366_vm5, 0, %v803_v57 }
  0xa1   : > { %1381 = vmatprep.subr.bf16.mxu1 %v1495_v0  ;;  %v853_v1 = vsel %vm293_vm1, %v848_v59, %v852_v29  ;;  %v856_v27 = vrot.slane %v810_v62, 2 }
  0xa2   : > { %600 = vmatmul.mubr.bf16.gmra.mxu0 %v452_v24 }
  0xa3   : > { %957 = vmatpush1.bf16.msra.mxu0 %v1461_v18  ;;  %768 = vmatmul.mubr.bf16.gmra.mxu1 %v1816_v20  ;;  %v857_v4 = vsel %vm293_vm1, %v852_v29, %v856_v27 }
  0xa4   : > { %1393 = vmatpush1.bf16.msra.mxu1 %v1463_v22  ;;  %958 = vmatprep.subr.bf16.mxu0 %v1495_v0 }
  0xa5   : > { %1382 = vmatprep.subr.bf16.mxu1 %v1495_v0  ;;  %1293 = vmatprep.mubr.msk.bf16.mxu0 %vm366_vm5, %v1713_v44  ;;  %v466_v44 = vsel %vm444_vm6, %v461_v30, %v465_v39 }
  0xa6   : > { %1311 = vmatprep.mubr.msk.bf16.mxu1 %vm366_vm5, %v1700_v41 }
  0xa7   : > { %959 = vmatpush1.bf16.msra.mxu0 %v1462_v33 }
  0xa8   : > { %1394 = vmatpush1.bf16.msra.mxu1 %v1464_v26  ;;  %960 = vmatprep.subr.bf16.mxu0 %v1495_v0 }
  0xa9   : > { %1383 = vmatprep.subr.bf16.mxu1 %v1495_v0 }
  0xaa   : > { %608 = vmatmul.mubr.bf16.gmra.mxu0 %v456_v31 }
  0xab   : > { %961 = vmatpush1.bf16.msra.mxu0 %v1463_v22  ;;  %776 = vmatmul.mubr.bf16.gmra.mxu1 %v1835_v23 }
  0xac   : > { %1395 = vmatpush1.bf16.msra.mxu1 %v1465_v32  ;;  %962 = vmatprep.subr.bf16.mxu0 %v1495_v0 }
  0xad   : > { %1384 = vmatprep.subr.bf16.mxu1 %v1495_v0  ;;  %1294 = vmatprep.mubr.msk.bf16.mxu0 %vm366_vm5, %v462_v36  ;;  %v1953_v36 = vpop.permute.xlu1 %1079 }
  0xae   : > { %1312 = vmatprep.mubr.msk.bf16.mxu1 %vm366_vm5, %v1739_v52 }
  0xaf   : > { %963 = vmatpush1.bf16.msra.mxu0 %v1464_v26 }
  0xb0   : > { %1396 = vmatpush1.bf16.msra.mxu1 %v1466_v60  ;;  %964 = vmatprep.subr.bf16.mxu0 %v1495_v0 }
  0xb1   : > { %1385 = vmatprep.subr.bf16.mxu1 %v1495_v0  ;;  %v1955_v43 = vpop.permute.xlu1 %1084 }
  0xb2   : > { %616 = vmatmul.mubr.bf16.gmra.mxu0 %v460_v40  ;;  %v1075_v40 = vpop.permute.xlu0 %1074 }
  0xb3   : > { %965 = vmatpush1.bf16.msra.mxu0 %v1465_v32  ;;  %784 = vmatmul.mubr.bf16.gmra.mxu1 %v1858_v35 }
  0xb4   : > { %1397 = vmatpush2.bf16.msra.mxu1 %v1467_v42  ;;  %966 = vmatprep.subr.bf16.mxu0 %v1495_v0 }
  0xb5   : > { %1386 = vmatprep.subr.bf16.mxu1 %v1495_v0  ;;  %1295 = vmatprep.mubr.msk.bf16.mxu0 %vm366_vm5, %v466_v44 }
  0xb6   : > { %1352 = vmatprep.mubr.msk.bf16.mxu1 %vm366_vm5, %v1748_v56  ;;  %v1470_v56 = vld [vmem:[%s2030_s1 + $0x100] sm:$0xff]  }
  0xb7   : > { %967 = vmatpush1.bf16.msra.mxu0 %v1466_v60 }
  0xb8   : > { %1398 = vmatpush2.bf16.msra.mxu1 %v1468_v46  ;;  %976 = vmatprep.subr.bf16.mxu0 %v1495_v0 }
  0xb9   : > { %1387 = vmatprep.subr.bf16.mxu1 %v1495_v0 }
  0xba   : > { %624 = vmatmul.mubr.bf16.gmra.mxu0 %v464_v48  ;;  %v1959_v48 = vpop.permute.xlu1 %1094 }
  0xbb   : > { %977 = vmatpush2.bf16.msra.mxu0 %v1467_v42  ;;  %1349 = vmatprep.mubr.msk.bf16.mxu0 %vm366_vm5, %v843_v28  ;;  %v1964_v28 = vld [vmem:[%s2031_s2] ss:$0 sm:$0xff] }
  0xbc   : > { %1399 = vmatpush2.bf16.msra.mxu1 %v1469_v53  ;;  %978 = vmatprep.subr.bf16.mxu0 %v1495_v0 }
  0xbd   : > { %1388 = vmatprep.subr.bf16.mxu1 %v1495_v0 }
  0xbf   : > { %979 = vmatpush2.bf16.msra.mxu0 %v1468_v46  ;;  %v1957_v46 = vpop.permute.xlu0 %1089 }
  0xc0   : > { %1400 = vmatpush2.bf16.msra.mxu1 %v1470_v56  ;;  %980 = vmatprep.subr.bf16.mxu0 %v1495_v0 }
  0xc3   : > { %981 = vmatpush2.bf16.msra.mxu0 %v1469_v53  ;;  %1009 = vmatmul.mubr.bf16.vlgmr.msra.gmra.mxu1 %v853_v1  ;;  %v1966_v29 = vpop.permute.xlu0 %1099  ;;  %v1105_v1 = vpop.permute.xlu1 %1104 }
  0xc4   : > { %982 = vmatprep.subr.bf16.mxu0 %v1495_v0  ;;  %1353 = vmatprep.mubr.msk.bf16.mxu1 %vm366_vm5, %v1752_v58  ;;  %v851_v0 = vsel %vm293_vm1, %v846_v61, %v850_v54  ;;  %v845_v58 = vsel %vm293_vm1, %v839_v2, %v844_v6 }
  0xc7   : > { %983 = vmatpush2.bf16.msra.mxu0 %v1470_v56 }
  0xca   : > { %985 = vmatmul.mubr.bf16.vlgmr.msra.gmra.mxu0 %v840_v5 }
  0xcb   : > { %1017 = vmatmul.mubr.bf16.gmra.mxu1 %v857_v4  ;;  %1350 = vmatprep.mubr.msk.bf16.mxu0 %vm366_vm5, %v1761_v63 }
  0xd2   : > { %993 = vmatmul.mubr.bf16.gmra.mxu0 %v845_v58 }
  0xd3   : > { %1351 = vmatprep.mubr.msk.bf16.mxu0 %vm366_vm5, %v851_v0 }
  0xda   : > { %1001 = vmatmul.mubr.bf16.gmra.mxu0 %v849_v7 }
 0x153   : > { %v753_v8 = vpop.f32.mrf.mxu1 }
 0x155   : > { %v755_v9 = vpop.f32.mrf.mxu1 }
 0x157   : > { %v1933_v10 = vpop.f32.mrf.mxu1 }
 0x159   : > { %v758_v63 = vpop.f32.mrf.mxu1 }
 0x15a   : > { %v593_v11 = vpop.f32.mrf.mxu0  ;;  %v1110_v63 = vpop.permute.xlu0 %1109 }
 0x15b   : > { %v1935_v12 = vpop.f32.mrf.mxu1  ;;  %v754_v3 = vadd.f32 %v753_v8, %v593_v11 }
 0x15c   : > { %v595_v52 = vpop.f32.mrf.mxu0 }
 0x15d   : > { %v763_v41 = vpop.f32.mrf.mxu1 }
 0x15e   : > { %v1937_v13 = vpop.f32.mrf.mxu0 }
 0x15f   : > { %v1939_v54 = vpop.f32.mrf.mxu1 }
 0x160   : > { %v598_v61 = vpop.f32.mrf.mxu0 }
 0x161   : > { %v766_v14 = vpop.f32.mrf.mxu1  ;;  %v757_v61 = vadd.f32 %v1933_v10, %v1937_v13 }
 0x162   : > { %v1941_v15 = vpop.f32.mrf.mxu0 }
 0x163   : > { %v1943_v16 = vpop.f32.mrf.mxu1  ;;  %v762_v10 = vadd.f32 %v1935_v12, %v1941_v15 }
 0x164   : > { %v603_v17 = vpop.f32.mrf.mxu0 }
 0x165   : > { %v771_v34 = vpop.f32.mrf.mxu1 }
 0x166   : > { %v1945_v18 = vpop.f32.mrf.mxu0 }
 0x167   : > { %v1947_v19 = vpop.f32.mrf.mxu1  ;;  %v765_v15 = vadd.f32 %v1939_v54, %v1945_v18 }
 0x168   : > { %v606_v20 = vpop.f32.mrf.mxu0 }
 0x169   : > { %v774_v33 = vpop.f32.mrf.mxu1 }
 0x16a   : > { %v1949_v21 = vpop.f32.mrf.mxu0 }
 0x16b   : > { %v777_v50 = vpop.f32.mrf.mxu1  ;;  %v770_v54 = vadd.f32 %v1943_v16, %v1949_v21 }
 0x16c   : > { %v611_v22 = vpop.f32.mrf.mxu0 }
 0x16d   : > { %v779_v23 = vpop.f32.mrf.mxu1 }
 0x16e   : > { %v1951_v24 = vpop.f32.mrf.mxu0 }
 0x16f   : > { %v780_v25 = vpop.f32.mrf.mxu1 }
 0x170   : > { %v614_v26 = vpop.f32.mrf.mxu0 }
 0x171   : > { %v782_v51 = vpop.f32.mrf.mxu1  ;;  %v1115_v26 = vpop.permute.xlu1 %1114 }
 0x172   : > { %v617_v30 = vpop.f32.mrf.mxu0 }
 0x173   : > { %v785_v31 = vpop.f32.mrf.mxu1  ;;  %v778_v49 = vadd.f32 %v777_v50, %v617_v30 }
 0x174   : > { %v619_v32 = vpop.f32.mrf.mxu0 }
 0x175   : > { %v787_v35 = vpop.f32.mrf.mxu1 }
 0x176   : > { %v620_v37 = vpop.f32.mrf.mxu0 }
 0x177   : > { %v788_v60 = vpop.f32.mrf.mxu1  ;;  %v781_v57 = vadd.f32 %v780_v25, %v620_v37 }
 0x178   : > { %v622_v38 = vpop.f32.mrf.mxu0 }
 0x179   : > { %v790_v39 = vpop.f32.mrf.mxu1 }
 0x17a   : > { %v625_v42 = vpop.f32.mrf.mxu0 }
 0x17b   : > { %v786_v5 = vadd.f32 %v785_v31, %v625_v42 }
 0x17c   : > { %v627_v44 = vpop.f32.mrf.mxu0 }
 0x17e   : > { %v628_v45 = vpop.f32.mrf.mxu0 }
 0x17f   : > { %v789_v34 = vadd.f32 %v788_v60, %v628_v45 }
 0x180   : > { %v630_v47 = vpop.f32.mrf.mxu0 }
 0x181   : > { %v1120_v47 = vpop.permute.xlu0 %1119 }
 0x183   : > { %v1010_v53 = vpop.f32.mrf.mxu1 }
 0x184   : > { %v1031_v55 = vadd.f32 %v1010_v53, %v778_v49 }
 0x185   : > { %v1012_v56 = vpop.f32.mrf.mxu1 }
 0x186   : > { %v1048_v59 = vadd.f32 %v1964_v28, %v1031_v55 }
 0x187   : > { %v1013_v62 = vpop.f32.mrf.mxu1 }
 0x188   : > { %v1032_v27 = vadd.f32 %v1013_v62, %v781_v57  ;;  %v1058_v2 = vmax.f32 %v1048_v59, 0.0 }
 0x189   : > { %v1015_v4 = vpop.f32.mrf.mxu1 }
 0x18a   : > { %v1049_v6 = vadd.f32 %v1964_v28, %v1032_v27  ;;  %v1128_v0 = vmul.f32 %v1105_v1, %v1058_v2  ;;  %v986_v58 = vpop.f32.mrf.mxu0 }
 0x18b   : > { %v1025_v7 = vadd.f32 %v986_v58, %v754_v3  ;;  %v1018_v9 = vpop.f32.mrf.mxu1  ;;  %v773_v58 = vadd.f32 %v1947_v19, %v1951_v24 }
 0x18c   : > { %v1373_v52 = vpack.c.bf16 %v1128_v0, %v1128_v0  ;;  %v1033_v41 = vadd.f32 %v1018_v9, %v786_v5  ;;  %v988_v8 = vpop.f32.mrf.mxu0  ;;  %v1059_v11 = vmax.f32 %v1049_v6, 0.0 }
 0x18d   : > { %v1042_v14 = vadd.f32 %v1964_v28, %v1025_v7  ;;  %v1020_v17 = vpop.f32.mrf.mxu1 }
 0x18e   : > { %1179 = vst.msk [vmem:[%s1975_s10 + $0x18] sm:$0xf] %vm1172_vm7, %v1373_v52  ;;  %v1050_v20 = vadd.f32 %v1964_v28, %v1033_v41  ;;  %v1129_v33 = vmul.f32 %v1110_v63, %v1059_v11  ;;  %v989_v50 = vpop.f32.mrf.mxu0 }
 0x18f   : > { %v1052_v22 = vmax.f32 %v1042_v14, 0.0  ;;  %v1026_v23 = vadd.f32 %v989_v50, %v757_v61  ;;  %v1021_v25 = vpop.f32.mrf.mxu1 }
 0x190   : > { %v1374_v51 = vpack.c.bf16 %v1129_v33, %v1129_v33  ;;  %v1034_v30 = vadd.f32 %v1021_v25, %v789_v34  ;;  %v991_v31 = vpop.f32.mrf.mxu0  ;;  %v1060_v32 = vmax.f32 %v1050_v20, 0.0 }
 0x191   : > { %v1122_v13 = vmul.f32 %v1075_v40, %v1052_v22  ;;  %v1043_v35 = vadd.f32 %v1964_v28, %v1026_v23  ;;  %v1023_v37 = vpop.f32.mrf.mxu1 }
 0x192   : > { %1180 = vst.msk [vmem:[%s1975_s10 + $0x1c] sm:$0xf] %vm1172_vm7, %v1374_v51  ;;  %v1051_v60 = vadd.f32 %v1964_v28, %v1034_v30  ;;  %v1130_v38 = vmul.f32 %v1115_v26, %v1060_v32  ;;  %v994_v39 = vpop.f32.mrf.mxu0 }
 0x193   : > { %v1367_v42 = vpack.c.bf16 %v1122_v13, %v1122_v13  ;;  %v1053_v44 = vmax.f32 %v1043_v35, 0.0  ;;  %v1027_v45 = vadd.f32 %v994_v39, %v762_v10 }
 0x194   : > { %v1375_v49 = vpack.c.bf16 %v1130_v38, %v1130_v38  ;;  %v996_v53 = vpop.f32.mrf.mxu0  ;;  %v1061_v12 = vmax.f32 %v1051_v60, 0.0 }
 0x195   : > { %1173 = vst.msk [vmem:[%s1975_s10] sm:$0xf] %vm1172_vm7, %v1367_v42  ;;  %v1123_v40 = vmul.f32 %v1953_v36, %v1053_v44  ;;  %v1044_v55 = vadd.f32 %v1964_v28, %v1027_v45 }
 0x196   : > { %1181 = vst.msk [vmem:[%s1975_s10 + $0x20] sm:$0xf] %vm1172_vm7, %v1375_v49  ;;  %v1131_v56 = vmul.f32 %v1120_v47, %v1061_v12  ;;  %v997_v57 = vpop.f32.mrf.mxu0 }
 0x197   : > { %v1368_v59 = vpack.c.bf16 %v1123_v40, %v1123_v40  ;;  %v1054_v62 = vmax.f32 %v1044_v55, 0.0  ;;  %v1028_v1 = vadd.f32 %v997_v57, %v765_v15 }
 0x198   : > { %v1376_v27 = vpack.c.bf16 %v1131_v56, %v1131_v56  ;;  %v999_v2 = vpop.f32.mrf.mxu0 }
 0x199   : > { %1174 = vst.msk [vmem:[%s1975_s10 + $0x4] sm:$0xf] %vm1172_vm7, %v1368_v59  ;;  %v1124_v18 = vmul.f32 %v1955_v43, %v1054_v62  ;;  %v1045_v36 = vadd.f32 %v1964_v28, %v1028_v1 }
 0x19a   : > { %1182 = vst.msk [vmem:[%s1975_s10 + $0x24] sm:$0xf] %vm1172_vm7, %v1376_v27  ;;  %v1002_v3 = vpop.f32.mrf.mxu0 }
 0x19b   : > { %v1369_v4 = vpack.c.bf16 %v1124_v18, %v1124_v18  ;;  %v1055_v5 = vmax.f32 %v1045_v36, 0.0  ;;  %v1029_v6 = vadd.f32 %v1002_v3, %v770_v54 }
 0x19c   : > { %v1004_v0 = vpop.f32.mrf.mxu0 }
 0x19d   : > { %1175 = vst.msk [vmem:[%s1975_s10 + $0x8] sm:$0xf] %vm1172_vm7, %v1369_v4  ;;  %v1125_v16 = vmul.f32 %v1957_v46, %v1055_v5  ;;  %v1046_v21 = vadd.f32 %v1964_v28, %v1029_v6 }
 0x19e   : > { %v1005_v43 = vpop.f32.mrf.mxu0 }
 0x19f   : > { %v1370_v7 = vpack.c.bf16 %v1125_v16, %v1125_v16  ;;  %v1056_v9 = vmax.f32 %v1046_v21, 0.0  ;;  %v1030_v63 = vadd.f32 %v1005_v43, %v773_v58 }
 0x1a0   : > { %v1007_v52 = vpop.f32.mrf.mxu0 }
 0x1a1   : > { %1176 = vst.msk [vmem:[%s1975_s10 + $0xc] sm:$0xf] %vm1172_vm7, %v1370_v7  ;;  %v1126_v41 = vmul.f32 %v1959_v48, %v1056_v9  ;;  %v1047_v8 = vadd.f32 %v1964_v28, %v1030_v63 }
 0x1a3   : > { %v1371_v11 = vpack.c.bf16 %v1126_v41, %v1126_v41  ;;  %v1057_v19 = vmax.f32 %v1047_v8, 0.0 }
 0x1a5   : > { %1177 = vst.msk [vmem:[%s1975_s10 + $0x10] sm:$0xf] %vm1172_vm7, %v1371_v11  ;;  %v1127_v24 = vmul.f32 %v1966_v29, %v1057_v19 }
 0x1a7   : > { %v1372_v46 = vpack.c.bf16 %v1127_v24, %v1127_v24 }
 0x1a9   : > { %1178 = vst.msk [vmem:[%s1975_s10 + $0x14] sm:$0xf] %vm1172_vm7, %v1372_v46 }
 0x1aa PF: > { %s14_s17 = sadd.s32 1, %s1493_s17   ;;  %s2036_s15 = smov %s1489_s16 }
 0x1ab   : > { %p11_p5 = scmp.ge.s32.totalorder %s14_s17, 4   ;;  %s2037_s16 = smov %s2039_s18 }
 0x1ad   :  { %13 = sbr.rel (!%p11_p5) target bundleno = 2 (0x2), region = 68 }

// kernel: superpoint_forward.13
= control target key start
LH: loop header
LB: loop body
LE: loop exit
PB: predicated region body
PF: predicated region fallthrough
CT: control target
= control target key end

     0   :  { %s2020_s12 = smov 0   ;;  %s2022_s13 = smov 0   ;;  %s2610_s0 = inlined_call_operand.vmem [shape: bf16[2,120,64], index: 0, kind: input, shape index: {}]   ;;  %s2611_s1 = inlined_call_operand.vmem [shape: bf16[3,192,64], index: 1, kind: input, shape index: {}]   ;;  %s2612_s2 = inlined_call_operand.vmem [shape: f32[1,64], index: 2, kind: input, shape index: {}]   ;;  %s2613_s3 = inlined_call_operand.vmem [shape: bf16[2,48,64], index: 3, kind: output, shape index: {}]  }
   0x1   :  { %s2024_s14 = smov 0  }
   0x2 LB: > { %s25_s15 = sadd.s32 1, %s1991_s13  ;;  %p1743_p0 = scmp.ge.s32.totalorder %s1995_s14, 1  ;;  %s1995_s14 = sphi %s2024_s14, %s13_s14   ;;  %s1991_s13 = sphi %s2022_s13, %s2621_s13   ;;  %s1987_s12 = sphi %s2020_s12, %s2620_s12  }
   0x3   : > { %p27_p1 = scmp.ge.s32.totalorder %s25_s15, 2  ;;  %p149_p2 = scmp.lt.s32.totalorder %s1995_s14, 3 }
   0x5   : > { %s2623_s15 = smov (%p27_p1, %s25_s15), 0  ;;  %p150_p3 = pnand %p1743_p0, %p149_p2 }
   0x6   : > { %p173_p4 = scmp.lt.s32.totalorder (!%p150_p3), %s1987_s12, 1  ;;  %s1998_s21 = smov (!%p150_p3), 64  }
   0x7   : > { %153 = sbr.rel (%p150_p3) target bundleno = 472 (0x1d8), region = 32 }
   0xc   : > { %s2625_s12 = smov (!%p173_p4, %s1987_s12), 1  ;;  %v1997_v0 = vmov 0   ;;  %v1937_v1 = vld [vmem:[%s2611_s1 + $0x38] sm:$0xff]   ;;  %v1938_v2 = vld [vmem:[%s2611_s1 + $0x30] sm:$0xff]   ;;  %vm219_vm0 = vsmask.f32 5376 }
   0xd   : > { %692 = vmatprep.subr.bf16.mxu1 %v1997_v0  ;;  %532 = vmatprep.subr.bf16.mxu0 %v1997_v0  ;;  %s1903_s20 = smul.u32 60, %s2625_s12  ;;  %v1939_v3 = vld [vmem:[%s2611_s1 + $0x98] sm:$0xff]   ;;  %v1940_v4 = vld [vmem:[%s2611_s1 + $0x28] sm:$0xff]   ;;  %v1941_v5 = vld [vmem:[%s2611_s1 + $0x90] sm:$0xff]   ;;  %vm266_vm1 = vcmask 1045504   ;;  %v2076_v27 = vrot.slane %v1997_v0, 1 }
   0xe   : > { %693 = vmatpush1.bf16.msra.mxu1 %v1937_v1  ;;  %533 = vmatpush1.bf16.msra.mxu0 %v1939_v3  ;;  %vm270_vm2 = vsmask.f32 7424  ;;  %vm2067_vm3 = vmand %vm266_vm1, %vm219_vm0  ;;  %v1942_v24 = vld [vmem:[%s2611_s1 + $0x20] sm:$0xff]   ;;  %v1943_v28 = vld [vmem:[%s2611_s1 + $0x88] sm:$0xff]   ;;  %vm327_vm4 = vcmask 1046528   ;;  %vm339_vm5 = vcmask 523264  }
   0xf   : > { %694 = vmatprep.subr.bf16.mxu1 %v1997_v0  ;;  %s177_s25 = scalar_lea.vmem %s2610_s0, %s1903_s20  ;;  %534 = vmatprep.subr.bf16.mxu0 %v1997_v0  ;;  %v1944_v37 = vld [vmem:[%s2611_s1 + $0x18] sm:$0xff]   ;;  %v1945_v42 = vld [vmem:[%s2611_s1 + $0x80] sm:$0xff]   ;;  %v1946_v47 = vld [vmem:[%s2611_s1 + $0x10] sm:$0xff]   ;;  %vm417_vm6 = vcmask 1042432   ;;  %vm1295_vm7 = vcmask 1040384   ;;  %vm1296_vm8 = vcmask 1042434  }
  0x10   : > { %v1932_v6 = vld [vmem:[%s177_s25] sm:$0xff]   ;;  %v1933_v7 = vld [vmem:[%s177_s25 + $0x8] sm:$0xff]   ;;  %v1934_v12 = vld [vmem:[%s177_s25 + $0x10] sm:$0xff]   ;;  %vm1298_vm9 = vcmask 1044484   ;;  %vm1300_vm10 = vcmask 1046534   ;;  %vm1515_vm14 = vcmask 1043459  }
  0x11   : > { %v221_v8 = vshrl.u32 %v1932_v6, 16  ;;  %v224_v9 = vshll.u32 %v1932_v6, 16  ;;  %v229_v10 = vshrl.u32 %v1933_v7, 16  ;;  %v232_v11 = vshll.u32 %v1933_v7, 16  ;;  %v1935_v13 = vld [vmem:[%s177_s25 + $0x18] sm:$0xff]   ;;  %v1936_v23 = vld [vmem:[%s177_s25 + $0x20] sm:$0xff]   ;;  %vm2441_vm11 = vmor %vm1295_vm7, %vm1296_vm8 }
  0x12   : > { %695 = vmatpush1.bf16.msra.mxu1 %v1938_v2  ;;  %535 = vmatpush1.bf16.msra.mxu0 %v1941_v5  ;;  %v238_v19 = vshrl.u32 %v1934_v12, 16  ;;  %v241_v20 = vshll.u32 %v1934_v12, 16  ;;  %v247_v21 = vshrl.u32 %v1935_v13, 16  ;;  %v250_v22 = vshll.u32 %v1935_v13, 16  ;;  %v1947_v58 = vld [vmem:[%s2611_s1 + $0x78] sm:$0xff]   ;;  %v1949_v7 = vld [vmem:[%s2611_s1 + $0x70] sm:$0xff]   ;;  %vm1299_vm12 = vmor %vm2441_vm11, %vm1298_vm9 }
  0x13   : > { %696 = vmatprep.subr.bf16.mxu1 %v1997_v0  ;;  %536 = vmatprep.subr.bf16.mxu0 %v1997_v0  ;;  %v223_v14 = vrot.slane %v221_v8, 2  ;;  %v226_v15 = vrot.slane %v224_v9, 3  ;;  %v231_v16 = vrot.slane %v229_v10, 2  ;;  %v234_v17 = vrot.slane %v232_v11, 3  ;;  %vm2463_vm13 = vmor %vm1299_vm12, %vm1300_vm10  ;;  %s1904_s26 = smul.u32 24, %s2625_s12 }
  0x14   : > { %v240_v29 = vrot.slane %v238_v19, 2  ;;  %v243_v30 = vrot.slane %v241_v20, 3  ;;  %v249_v31 = vrot.slane %v247_v21, 2  ;;  %v252_v32 = vrot.slane %v250_v22, 3  ;;  %v1951_v21 = vld [vmem:[%s2611_s1 + $0x68] sm:$0xff]  }
  0x15   : > { %v227_v25 = vor.u32 %v226_v15, %v223_v14  ;;  %v235_v26 = vor.u32 %v234_v17, %v231_v16  ;;  %v256_v35 = vshrl.u32 %v1936_v23, 16  ;;  %v259_v36 = vshll.u32 %v1936_v23, 16  ;;  %v1950_v17 = vld [vmem:[%s2611_s1] sm:$0xff]   ;;  %s182_s28 = scalar_lea.vmem %s2613_s3, %s1904_s26 }
  0x16   : > { %697 = vmatpush1.bf16.msra.mxu1 %v1940_v4  ;;  %537 = vmatpush1.bf16.msra.mxu0 %v1943_v28  ;;  %v244_v41 = vor.u32 %v243_v30, %v240_v29  ;;  %v253_v43 = vor.u32 %v252_v32, %v249_v31  ;;  %v1948_v4 = vld [vmem:[%s2611_s1 + $0x8] sm:$0xff]   ;;  %v1953_v31 = vld [vmem:[%s2611_s1 + $0x60] sm:$0xff]   ;;  %vm1535_vm15 = vcmask 1044480  }
  0x17   : > { %698 = vmatprep.subr.bf16.mxu1 %v1997_v0  ;;  %v2082_v33 = vsel %vm219_vm0, %v227_v25, %v235_v26  ;;  %v2086_v34 = vsel %vm2067_vm3, 0, %v227_v25  ;;  %538 = vmatprep.subr.bf16.mxu0 %v1997_v0  ;;  %v258_v45 = vrot.slane %v256_v35, 2  ;;  %v261_v46 = vrot.slane %v259_v36, 3 }
  0x18   : > { %v272_v38 = vshrl.u32 %v2086_v34, 16  ;;  %v274_v39 = vshll.u32 %v2086_v34, 16  ;;  %v279_v40 = vshll.u32 %v2082_v33, 16  ;;  %v283_v44 = vshrl.u32 %v2082_v33, 16 }
  0x19   : > { %v2104_v50 = vsel %vm219_vm0, %v235_v26, %v244_v41  ;;  %v2107_v51 = vsel %vm219_vm0, %v244_v41, %v253_v43  ;;  %v262_v54 = vor.u32 %v261_v46, %v258_v45  ;;  %v328_v18 = vrot.slane %v2086_v34, 1  ;;  %v1957_v45 = vld [vmem:[%s2611_s1 + $0xb0] sm:$0xff]   ;;  %v1958_v46 = vld [vmem:[%s2611_s1 + $0x40] sm:$0xff]  }
  0x1a   : > { %699 = vmatpush1.bf16.msra.mxu1 %v1942_v24  ;;  %v276_v48 = vrot.slane %v274_v39, 1  ;;  %v281_v49 = vrot.slane %v279_v40, 1  ;;  %v287_v52 = vshll.u32 %v2104_v50, 16  ;;  %v291_v53 = vshrl.u32 %v2104_v50, 16  ;;  %539 = vmatpush1.bf16.msra.mxu0 %v1945_v42  ;;  %v1952_v24 = vld [vmem:[%s2611_s1 + $0x58] sm:$0xff]  }
  0x1b   : > { %700 = vmatprep.subr.bf16.mxu1 %v1997_v0  ;;  %v295_v56 = vshll.u32 %v2107_v51, 16  ;;  %540 = vmatprep.subr.bf16.mxu0 %v1997_v0  ;;  %v2118_v60 = vsel %vm219_vm0, %v253_v43, %v262_v54  ;;  %v299_v61 = vshrl.u32 %v2107_v51, 16  ;;  %v2123_v62 = vsel %vm2067_vm3, %v262_v54, 0  ;;  %v1955_v40 = vld [vmem:[%s2611_s1 + $0xb8] sm:$0xff]   ;;  %v1956_v43 = vld [vmem:[%s2611_s1 + $0x48] sm:$0xff]  }
  0x1c   : > { %v277_v55 = vor.u32 %v276_v48, %v272_v38  ;;  %v285_v57 = vor.u32 %v283_v44, %v281_v49  ;;  %v289_v59 = vrot.slane %v287_v52, 1  ;;  %v303_v2 = vshll.u32 %v2118_v60, 16  ;;  %v1954_v38 = vld [vmem:[%s2611_s1 + $0x50] sm:$0xff]   ;;  %v1961_v48 = vld [vmem:[%s2611_s1 + $0xa0] sm:$0xff]  }
  0x1d   : > { %v297_v1 = vrot.slane %v295_v56, 1  ;;  %v307_v3 = vshrl.u32 %v2118_v60, 16  ;;  %v311_v6 = vshll.u32 %v2123_v62, 16  ;;  %v379_v11 = vshrl.u32 %v2123_v62, 16 }
  0x1e   : > { %701 = vmatpush1.bf16.msra.mxu1 %v1944_v37  ;;  %v282_v63 = vsel %vm270_vm2, %v277_v55, %v281_v49  ;;  %v293_v5 = vor.u32 %v291_v53, %v289_v59  ;;  %v290_v8 = vsel %vm270_vm2, %v285_v57, %v289_v59  ;;  %v305_v10 = vrot.slane %v303_v2, 1  ;;  %541 = vmatpush1.bf16.msra.mxu0 %v1947_v58 }
  0x1f   : > { %702 = vmatprep.subr.bf16.mxu1 %v1997_v0  ;;  %315 = vrot.lane.b32.xlu0 %v282_v63, %s1998_s21  ;;  %v301_v9 = vor.u32 %v299_v61, %v297_v1  ;;  %v333_v13 = vrot.slane %v2107_v51, 1  ;;  %v313_v14 = vrot.slane %v311_v6, 1  ;;  %v329_v22 = vrot.slane %v2082_v33, 1 }
  0x20   : > { %v298_v12 = vsel %vm270_vm2, %v293_v5, %v297_v1  ;;  %542 = vmatprep.subr.bf16.mxu0 %v1997_v0  ;;  %v309_v15 = vor.u32 %v307_v3, %v305_v10  ;;  %v331_v23 = vrot.slane %v2104_v50, 1  ;;  %v335_v37 = vrot.slane %v2118_v60, 1  ;;  %v1960_v1 = vld [vmem:[%s2611_s1 + $0xf8] sm:$0xff]   ;;  %v1962_v3 = vld [vmem:[%s2611_s1 + $0xf0] sm:$0xff]  }
  0x21   : > { %319 = vrot.lane.b32.xlu1 %v298_v12, %s1998_s21  ;;  %v306_v16 = vsel %vm270_vm2, %v301_v9, %v305_v10  ;;  %v381_v20 = vor.u32 %v379_v11, %v313_v14  ;;  %v330_v25 = vsel %vm327_vm4, %v328_v18, %v329_v22  ;;  %v2228_v49 = vrot.slane %v2123_v62, 1  ;;  %v1965_v12 = vld [vmem:[%s2611_s1 + $0xd8] sm:$0xff]  }
  0x22   : > { %703 = vmatpush1.bf16.msra.mxu1 %v1946_v47  ;;  %v314_v19 = vsel %vm270_vm2, %v309_v15, %v313_v14  ;;  %543 = vmatpush1.bf16.msra.mxu0 %v1949_v7  ;;  %v421_v26 = vrot.slane %v330_v25, 5  ;;  %v2164_v28 = vsel %vm327_vm4, %v329_v22, %v331_v23  ;;  %v2167_v29 = vsel %vm327_vm4, %v331_v23, %v333_v13  ;;  %v1959_v47 = vld [vmem:[%s2611_s1 + $0xa8] sm:$0xff]  }
  0x23   : > { %704 = vmatprep.subr.bf16.mxu1 %v1997_v0  ;;  %317 = vrot.lane.b32.xlu0 %v290_v8, %s1998_s21  ;;  %v769_v30 = vsel %vm270_vm2, %v381_v20, %v2076_v27  ;;  %v422_v32 = vrot.slane %v2164_v28, 5  ;;  %v426_v35 = vrot.slane %v2167_v29, 5  ;;  %v2194_v41 = vsel %vm327_vm4, %v333_v13, %v335_v37  ;;  %v1963_v8 = vld [vmem:[%s2611_s1 + $0xe8] sm:$0xff]  }
  0x24   : > { %544 = vmatprep.subr.bf16.mxu0 %v1997_v0  ;;  %1804 = vmatprep.mubr.msk.bf16.mxu1 %vm339_vm5, %v330_v25  ;;  %v430_v42 = vrot.slane %v2194_v41, 5  ;;  %v2233_v52 = vsel %vm327_vm4, %v335_v37, %v2228_v49  ;;  %v779_v53 = vsel %vm327_vm4, %v2228_v49, %v2076_v27  ;;  %v831_v57 = vrot.slane %v2076_v27, 2 }
  0x25   : > { %321 = vrot.lane.b32.xlu1 %v306_v16, %s1998_s21  ;;  %v423_v36 = vsel %vm417_vm6, %v421_v26, %v422_v32  ;;  %v2187_v39 = vsel %vm417_vm6, %v422_v32, %v426_v35  ;;  %v823_v54 = vrot.slane %v2233_v52, 2  ;;  %v827_v55 = vrot.slane %v779_v53, 2  ;;  %v1966_v16 = vld [vmem:[%s2611_s1 + $0xd0] sm:$0xff]   ;;  %v1969_v26 = vld [vmem:[%s2611_s1 + $0x118] sm:$0xff]  }
  0x26   : > { %705 = vmatpush1.bf16.msra.mxu1 %v1948_v4  ;;  %545 = vmatpush1.bf16.msra.mxu0 %v1951_v21  ;;  %v2207_v44 = vsel %vm417_vm6, %v426_v35, %v430_v42  ;;  %v815_v59 = vrot.slane %v2167_v29, 2  ;;  %v819_v61 = vrot.slane %v2194_v41, 2  ;;  %v1970_v35 = vld [vmem:[%s2611_s1 + $0x110] sm:$0xff]   ;;  %vm1675_vm0 = vcmask 519168  }
  0x27   : > { %706 = vmatprep.subr.bf16.mxu1 %v1997_v0  ;;  %323 = vrot.lane.b32.xlu0 %v314_v19, %s1998_s21  ;;  %v2242_v56 = vsel %vm266_vm1, %v823_v54, %v827_v55  ;;  %v2246_v58 = vsel %vm266_vm1, %v827_v55, %v831_v57  ;;  %v1967_v19 = vld [vmem:[%s2611_s1 + $0xc8] sm:$0xff]  }
  0x28   : > { %546 = vmatprep.subr.bf16.mxu0 %v1997_v0  ;;  %1787 = vmatprep.mubr.msk.bf16.mxu0 %vm339_vm5, %v423_v36  ;;  %v2255_v63 = vsel %vm266_vm1, %v815_v59, %v819_v61  ;;  %v814_v36 = vrot.slane %v2164_v28, 2 }
  0x29   : > { %382 = vrot.lane.b32.xlu1 %v381_v20, %s1998_s21 }
  0x2a   : > { %707 = vmatpush1.bf16.msra.mxu1 %v1950_v17  ;;  %547 = vmatpush1.bf16.msra.mxu0 %v1953_v31  ;;  %v434_v17 = vrot.slane %v2233_v52, 5 }
  0x2b   : > { %716 = vmatprep.subr.bf16.mxu1 %v1997_v0  ;;  %773 = vrot.lane.b32.xlu0 %v769_v30, %s1998_s21 }
  0x2c   : > { %556 = vmatprep.subr.bf16.mxu0 %v1997_v0  ;;  %v435_v21 = vsel %vm417_vm6, %v430_v42, %v434_v17  ;;  %v1972_v42 = vld [vmem:[%s2611_s1 + $0x100] sm:$0xff]  }
  0x2d   : > { %775 = vrot.lane.b32.xlu1 %v2076_v27, %s1998_s21 }
  0x2e   : > { %717 = vmatpush2.bf16.msra.mxu1 %v1952_v24  ;;  %557 = vmatpush2.bf16.msra.mxu0 %v1955_v40  ;;  %v438_v24 = vrot.slane %v2228_v49, 5 }
  0x2f   : > { %718 = vmatprep.subr.bf16.mxu1 %v1997_v0  ;;  %558 = vmatprep.subr.bf16.mxu0 %v1997_v0 }
  0x30   : > { %v439_v31 = vsel %vm417_vm6, %v434_v17, %v438_v24 }
  0x32   : > { %719 = vmatpush2.bf16.msra.mxu1 %v1954_v38  ;;  %559 = vmatpush2.bf16.msra.mxu0 %v1957_v45 }
  0x33   : > { %720 = vmatprep.subr.bf16.mxu1 %v1997_v0  ;;  %560 = vmatprep.subr.bf16.mxu0 %v1997_v0 }
  0x36   : > { %721 = vmatpush2.bf16.msra.mxu1 %v1956_v43  ;;  %561 = vmatpush2.bf16.msra.mxu0 %v1959_v47 }
  0x37   : > { %722 = vmatprep.subr.bf16.mxu1 %v1997_v0  ;;  %562 = vmatprep.subr.bf16.mxu0 %v1997_v0 }
  0x3a   : > { %723 = vmatpush2.bf16.msra.mxu1 %v1958_v46  ;;  %563 = vmatpush2.bf16.msra.mxu0 %v1961_v48 }
  0x3b   : > { %1879 = vmatprep.subr.bf16.mxu1 %v1997_v0  ;;  %925 = vmatprep.subr.bf16.mxu0 %v1997_v0 }
  0x91   : > { %v316_v2 = vpop.permute.xlu0 %315 }
  0x92   : > { %v341_v27 = vsel %vm339_vm5, %v2086_v34, %v316_v2 }
  0x93   : > { %725 = vmatmul.mubr.bf16.vlgmr.msra.gmra.mxu1 %v341_v27  ;;  %v418_v6 = vrot.slane %v341_v27, 5  ;;  %v320_v7 = vpop.permute.xlu1 %319 }
  0x94   : > { %1891 = vmatpush1.bf16.msra.mxu1 %v1960_v1  ;;  %1805 = vmatprep.mubr.msk.bf16.mxu1 %vm339_vm5, %v2164_v28  ;;  %v2280_v10 = vsel %vm339_vm5, %v2104_v50, %v320_v7  ;;  %v816_v28 = vsel %vm266_vm1, %v814_v36, %v815_v59 }
  0x95   : > { %v318_v4 = vpop.permute.xlu0 %317  ;;  %1880 = vmatprep.subr.bf16.mxu1 %v1997_v0  ;;  %v424_v11 = vrot.slane %v2280_v10, 5  ;;  %v812_v47 = vrot.slane %v2280_v10, 2 }
  0x96   : > { %v2270_v5 = vsel %vm339_vm5, %v2082_v33, %v318_v4  ;;  %v1964_v33 = vld [vmem:[%s2611_s1 + $0xe0] sm:$0xff]  }
  0x97   : > { %v419_v34 = vrot.slane %v2270_v5, 5  ;;  %v322_v50 = vpop.permute.xlu1 %321  ;;  %v811_v48 = vrot.slane %v2270_v5, 2 }
  0x98   : > { %1892 = vmatpush1.bf16.msra.mxu1 %v1962_v3  ;;  %v2299_v13 = vsel %vm339_vm5, %v2107_v51, %v322_v50 }
  0x99   : > { %v420_v9 = vsel %vm417_vm6, %v418_v6, %v419_v34  ;;  %1881 = vmatprep.subr.bf16.mxu1 %v1997_v0  ;;  %v425_v14 = vsel %vm417_vm6, %v419_v34, %v424_v11  ;;  %v428_v15 = vrot.slane %v2299_v13, 5  ;;  %v324_v51 = vpop.permute.xlu0 %323  ;;  %v813_v53 = vsel %vm266_vm1, %v811_v48, %v812_v47 }
  0x9a   : > { %565 = vmatmul.mubr.bf16.vlgmr.msra.gmra.mxu0 %v420_v9  ;;  %v2322_v20 = vsel %vm339_vm5, %v2118_v60, %v324_v51  ;;  %v1968_v60 = vld [vmem:[%s2611_s1 + $0xc0] sm:$0xff]   ;;  %v817_v55 = vrot.slane %v2299_v13, 2 }
  0x9b   : > { %926 = vmatpush1.bf16.msra.mxu0 %v1960_v1  ;;  %733 = vmatmul.mubr.bf16.gmra.mxu1 %v2270_v5  ;;  %v429_v18 = vsel %vm417_vm6, %v424_v11, %v428_v15  ;;  %v432_v22 = vrot.slane %v2322_v20, 5  ;;  %v383_v23 = vpop.permute.xlu1 %382 }
  0x9c   : > { %1893 = vmatpush1.bf16.msra.mxu1 %v1963_v8  ;;  %927 = vmatprep.subr.bf16.mxu0 %v1997_v0  ;;  %v385_v30 = vsel %vm339_vm5, %v2123_v62, %v383_v23 }
  0x9d   : > { %1882 = vmatprep.subr.bf16.mxu1 %v1997_v0  ;;  %1788 = vmatprep.mubr.msk.bf16.mxu0 %vm339_vm5, %v2187_v39  ;;  %v433_v25 = vsel %vm417_vm6, %v428_v15, %v432_v22  ;;  %v436_v32 = vrot.slane %v385_v30, 5  ;;  %v774_v38 = vpop.permute.xlu0 %773  ;;  %v1971_v39 = vld [vmem:[%s2611_s1 + $0x108] sm:$0xff]  }
  0x9e   : > { %1806 = vmatprep.mubr.msk.bf16.mxu1 %vm339_vm5, %v2167_v29  ;;  %v781_v40 = vsel %vm339_vm5, %v2123_v62, %v774_v38 }
  0x9f   : > { %928 = vmatpush1.bf16.msra.mxu0 %v1962_v3  ;;  %v437_v37 = vsel %vm417_vm6, %v432_v22, %v436_v32  ;;  %v825_v29 = vrot.slane %v781_v40, 2  ;;  %v776_v43 = vpop.permute.xlu1 %775  ;;  %v1049_v40 = vlaneseq }
  0xa0   : > { %1894 = vmatpush1.bf16.msra.mxu1 %v1964_v33  ;;  %929 = vmatprep.subr.bf16.mxu0 %v1997_v0  ;;  %v783_v62 = vsel %vm339_vm5, 0, %v776_v43  ;;  %v2416_v43 = vld [vmem:[%s2612_s2] ss:$0 sm:$0xff] }
  0xa1   : > { %1883 = vmatprep.subr.bf16.mxu1 %v1997_v0  ;;  %v829_v46 = vrot.slane %v783_v62, 2 }
  0xa2   : > { %573 = vmatmul.mubr.bf16.gmra.mxu0 %v425_v14 }
  0xa3   : > { %930 = vmatpush1.bf16.msra.mxu0 %v1963_v8  ;;  %741 = vmatmul.mubr.bf16.gmra.mxu1 %v2280_v10  ;;  %v830_v49 = vsel %vm266_vm1, %v825_v29, %v829_v46 }
  0xa4   : > { %1895 = vmatpush1.bf16.msra.mxu1 %v1965_v12  ;;  %931 = vmatprep.subr.bf16.mxu0 %v1997_v0 }
  0xa5   : > { %1884 = vmatprep.subr.bf16.mxu1 %v1997_v0  ;;  %1789 = vmatprep.mubr.msk.bf16.mxu0 %vm339_vm5, %v2207_v44  ;;  %v821_v44 = vrot.slane %v2322_v20, 2 }
  0xa6   : > { %1807 = vmatprep.mubr.msk.bf16.mxu1 %vm339_vm5, %v2194_v41 }
  0xa7   : > { %932 = vmatpush1.bf16.msra.mxu0 %v1964_v33  ;;  %v826_v45 = vsel %vm266_vm1, %v821_v44, %v825_v29  ;;  %v822_v57 = vsel %vm266_vm1, %v817_v55, %v821_v44 }
  0xa8   : > { %1896 = vmatpush1.bf16.msra.mxu1 %v1966_v16  ;;  %933 = vmatprep.subr.bf16.mxu0 %v1997_v0 }
  0xa9   : > { %1885 = vmatprep.subr.bf16.mxu1 %v1997_v0 }
  0xaa   : > { %581 = vmatmul.mubr.bf16.gmra.mxu0 %v429_v18 }
  0xab   : > { %934 = vmatpush1.bf16.msra.mxu0 %v1965_v12  ;;  %749 = vmatmul.mubr.bf16.gmra.mxu1 %v2299_v13 }
  0xac   : > { %1897 = vmatpush1.bf16.msra.mxu1 %v1967_v19  ;;  %935 = vmatprep.subr.bf16.mxu0 %v1997_v0 }
  0xad   : > { %1886 = vmatprep.subr.bf16.mxu1 %v1997_v0  ;;  %1790 = vmatprep.mubr.msk.bf16.mxu0 %vm339_vm5, %v435_v21 }
  0xae   : > { %1808 = vmatprep.mubr.msk.bf16.mxu1 %vm339_vm5, %v2233_v52 }
  0xaf   : > { %936 = vmatpush1.bf16.msra.mxu0 %v1966_v16 }
  0xb0   : > { %1898 = vmatpush1.bf16.msra.mxu1 %v1968_v60  ;;  %937 = vmatprep.subr.bf16.mxu0 %v1997_v0 }
  0xb1   : > { %1887 = vmatprep.subr.bf16.mxu1 %v1997_v0 }
  0xb2   : > { %589 = vmatmul.mubr.bf16.gmra.mxu0 %v433_v25 }
  0xb3   : > { %938 = vmatpush1.bf16.msra.mxu0 %v1967_v19  ;;  %757 = vmatmul.mubr.bf16.gmra.mxu1 %v2322_v20 }
  0xb4   : > { %1899 = vmatpush2.bf16.msra.mxu1 %v1969_v26  ;;  %939 = vmatprep.subr.bf16.mxu0 %v1997_v0 }
  0xb5   : > { %1888 = vmatprep.subr.bf16.mxu1 %v1997_v0  ;;  %1791 = vmatprep.mubr.msk.bf16.mxu0 %vm339_vm5, %v439_v31 }
  0xb6   : > { %1848 = vmatprep.mubr.msk.bf16.mxu1 %vm339_vm5, %v2242_v56  ;;  %v818_v56 = vsel %vm266_vm1, %v812_v47, %v817_v55 }
  0xb7   : > { %940 = vmatpush1.bf16.msra.mxu0 %v1968_v60 }
  0xb8   : > { %1900 = vmatpush2.bf16.msra.mxu1 %v1970_v35  ;;  %949 = vmatprep.subr.bf16.mxu0 %v1997_v0 }
  0xb9   : > { %1889 = vmatprep.subr.bf16.mxu1 %v1997_v0 }
  0xba   : > { %597 = vmatmul.mubr.bf16.gmra.mxu0 %v437_v37 }
  0xbb   : > { %950 = vmatpush2.bf16.msra.mxu0 %v1969_v26  ;;  %1845 = vmatprep.mubr.msk.bf16.mxu0 %vm339_vm5, %v816_v28 }
  0xbc   : > { %1901 = vmatpush2.bf16.msra.mxu1 %v1971_v39  ;;  %951 = vmatprep.subr.bf16.mxu0 %v1997_v0 }
  0xbd   : > { %1890 = vmatprep.subr.bf16.mxu1 %v1997_v0 }
  0xbf   : > { %952 = vmatpush2.bf16.msra.mxu0 %v1970_v35 }
  0xc0   : > { %1902 = vmatpush2.bf16.msra.mxu1 %v1972_v42  ;;  %953 = vmatprep.subr.bf16.mxu0 %v1997_v0 }
  0xc3   : > { %954 = vmatpush2.bf16.msra.mxu0 %v1971_v39  ;;  %982 = vmatmul.mubr.bf16.vlgmr.msra.gmra.mxu1 %v826_v45  ;;  %v1999_v39 = vmov 1983009808  }
  0xc4   : > { %955 = vmatprep.subr.bf16.mxu0 %v1997_v0  ;;  %1849 = vmatprep.mubr.msk.bf16.mxu1 %vm339_vm5, %v2246_v58  ;;  %v824_v0 = vsel %vm266_vm1, %v819_v61, %v823_v54  ;;  %v1047_v28 = vunpack.c.l.s4 %v1999_v39 }
  0xc6   : > { %v1048_v48 = vunpack.c.0.s8 %v1047_v28 }
  0xc7   : > { %956 = vmatpush2.bf16.msra.mxu0 %v1972_v42 }
  0xca   : > { %958 = vmatmul.mubr.bf16.vlgmr.msra.gmra.mxu0 %v813_v53 }
  0xcb   : > { %990 = vmatmul.mubr.bf16.gmra.mxu1 %v830_v49  ;;  %1846 = vmatprep.mubr.msk.bf16.mxu0 %vm339_vm5, %v2255_v63  ;;  %v1050_v49 = vshrl.u32 %v1049_v40, 7 }
  0xd2   : > { %966 = vmatmul.mubr.bf16.gmra.mxu0 %v818_v56 }
  0xd3   : > { %1847 = vmatprep.mubr.msk.bf16.mxu0 %vm339_vm5, %v824_v0 }
  0xda   : > { %974 = vmatmul.mubr.bf16.gmra.mxu0 %v822_v57 }
 0x153   : > { %v726_v58 = vpop.f32.mrf.mxu1 }
 0x155   : > { %v728_v59 = vpop.f32.mrf.mxu1 }
 0x157   : > { %v729_v1 = vpop.f32.mrf.mxu1 }
 0x159   : > { %v731_v63 = vpop.f32.mrf.mxu1 }
 0x15a   : > { %v566_v2 = vpop.f32.mrf.mxu0 }
 0x15b   : > { %v727_v27 = vadd.f32 %v726_v58, %v566_v2  ;;  %v2397_v3 = vpop.f32.mrf.mxu1 }
 0x15c   : > { %v568_v52 = vpop.f32.mrf.mxu0 }
 0x15d   : > { %v736_v41 = vpop.f32.mrf.mxu1 }
 0x15e   : > { %v569_v4 = vpop.f32.mrf.mxu0 }
 0x15f   : > { %v2399_v54 = vadd.f32 %v729_v1, %v569_v4  ;;  %v2401_v61 = vpop.f32.mrf.mxu1  ;;  %v2425_v4 = vsub.s32 %v1048_v48, %v1050_v49 }
 0x160   : > { %v571_v5 = vpop.f32.mrf.mxu0 }
 0x161   : > { %v739_v6 = vpop.f32.mrf.mxu1 }
 0x162   : > { %v2403_v7 = vpop.f32.mrf.mxu0 }
 0x163   : > { %v2405_v34 = vpop.f32.mrf.mxu1 }
 0x164   : > { %v576_v8 = vpop.f32.mrf.mxu0 }
 0x165   : > { %v744_v9 = vpop.f32.mrf.mxu1 }
 0x166   : > { %v2407_v10 = vpop.f32.mrf.mxu0 }
 0x167   : > { %v745_v33 = vpop.f32.mrf.mxu1 }
 0x168   : > { %v579_v11 = vpop.f32.mrf.mxu0 }
 0x169   : > { %v747_v50 = vpop.f32.mrf.mxu1 }
 0x16a   : > { %v2409_v12 = vpop.f32.mrf.mxu0 }
 0x16b   : > { %v750_v13 = vpop.f32.mrf.mxu1 }
 0x16c   : > { %v584_v14 = vpop.f32.mrf.mxu0 }
 0x16d   : > { %v752_v15 = vpop.f32.mrf.mxu1 }
 0x16e   : > { %v585_v16 = vpop.f32.mrf.mxu0 }
 0x16f   : > { %v2411_v51 = vadd.f32 %v745_v33, %v585_v16  ;;  %v753_v17 = vpop.f32.mrf.mxu1 }
 0x170   : > { %v587_v18 = vpop.f32.mrf.mxu0 }
 0x171   : > { %v755_v19 = vpop.f32.mrf.mxu1  ;;  %v735_v18 = vadd.f32 %v2397_v3, %v2403_v7 }
 0x172   : > { %v590_v20 = vpop.f32.mrf.mxu0 }
 0x173   : > { %v758_v21 = vpop.f32.mrf.mxu1  ;;  %v751_v62 = vadd.f32 %v750_v13, %v590_v20 }
 0x174   : > { %v592_v22 = vpop.f32.mrf.mxu0 }
 0x175   : > { %v760_v60 = vpop.f32.mrf.mxu1 }
 0x176   : > { %v593_v23 = vpop.f32.mrf.mxu0 }
 0x177   : > { %v761_v24 = vpop.f32.mrf.mxu1  ;;  %v754_v38 = vadd.f32 %v753_v17, %v593_v23 }
 0x178   : > { %v595_v25 = vpop.f32.mrf.mxu0 }
 0x179   : > { %v763_v26 = vpop.f32.mrf.mxu1 }
 0x17a   : > { %v598_v30 = vpop.f32.mrf.mxu0 }
 0x17b   : > { %v759_v45 = vadd.f32 %v758_v21, %v598_v30 }
 0x17c   : > { %v600_v31 = vpop.f32.mrf.mxu0 }
 0x17e   : > { %v601_v32 = vpop.f32.mrf.mxu0 }
 0x17f   : > { %v762_v63 = vadd.f32 %v761_v24, %v601_v32  ;;  %v2445_v24 = vsub.s32 0, %v1050_v49 }
 0x180   : > { %v603_v35 = vpop.f32.mrf.mxu0 }
 0x183   : > { %v983_v36 = vpop.f32.mrf.mxu1 }
 0x184   : > { %v1004_v0 = vadd.f32 %v983_v36, %v751_v62 }
 0x185   : > { %v985_v37 = vpop.f32.mrf.mxu1 }
 0x186   : > { %v1021_v8 = vadd.f32 %v2416_v43, %v1004_v0 }
 0x187   : > { %v986_v42 = vpop.f32.mrf.mxu1 }
 0x188   : > { %v1005_v29 = vadd.f32 %v986_v42, %v754_v38  ;;  %v2436_v22 = vmax.f32 %v1021_v8, 0.0 }
 0x189   : > { %v988_v44 = vpop.f32.mrf.mxu1 }
 0x18a   : > { %v1022_v46 = vadd.f32 %v2416_v43, %v1005_v29  ;;  %v959_v47 = vpop.f32.mrf.mxu0 }
 0x18b   : > { %v998_v53 = vadd.f32 %v959_v47, %v727_v27  ;;  %v991_v55 = vpop.f32.mrf.mxu1 }
 0x18c   : > { %v2419_v56 = vmax.f32 %v1022_v46, 0.0  ;;  %v1006_v57 = vadd.f32 %v991_v55, %v759_v45  ;;  %v961_v58 = vpop.f32.mrf.mxu0 }
 0x18d   : > { %v1015_v59 = vadd.f32 %v2416_v43, %v998_v53  ;;  %v993_v1 = vpop.f32.mrf.mxu1 }
 0x18e   : > { %v1164_v2 = vcombine.high %v2419_v56, %v2419_v56  ;;  %v1023_v52 = vadd.f32 %v2416_v43, %v1006_v57  ;;  %v962_v41 = vpop.f32.mrf.mxu0 }
 0x18f   : > { %v1025_v5 = vmax.f32 %v1015_v59, 0.0  ;;  %v999_v27 = vadd.f32 %v962_v41, %v2399_v54  ;;  %v994_v6 = vpop.f32.mrf.mxu1 }
 0x190   : > { %v1033_v9 = vmax.f32 %v1023_v52, 0.0  ;;  %v1007_v33 = vadd.f32 %v994_v6, %v762_v63  ;;  %v964_v11 = vpop.f32.mrf.mxu0  ;;  %v1178_v15 = vrot.slane %v1164_v2, %v2425_v4 }
 0x191   : > { %v1045_v50 = vcombine.high %v1025_v5, %v1025_v5  ;;  %v1016_v13 = vadd.f32 %v2416_v43, %v999_v27  ;;  %v996_v14 = vpop.f32.mrf.mxu1  ;;  %v1052_v19 = vrot.slane %v1025_v5, %v2425_v4  ;;  %v738_v5 = vadd.f32 %v2401_v61, %v2407_v10 }
 0x192   : > { %v1181_v16 = vcombine.high %v1033_v9, %v1033_v9  ;;  %v1024_v17 = vadd.f32 %v2416_v43, %v1007_v33  ;;  %v967_v54 = vpop.f32.mrf.mxu0  ;;  %v1188_v20 = vrot.slane %v1033_v9, %v2425_v4  ;;  %v1180_v35 = vcombine.high %v1178_v15, %v1178_v15 }
 0x193   : > { %v1026_v21 = vmax.f32 %v1016_v13, 0.0  ;;  %v2448_v3 = vrot.slane %v1045_v50, %v2425_v4  ;;  %v1000_v31 = vadd.f32 %v967_v54, %v735_v18  ;;  %v1060_v39 = vcombine.high %v1052_v19, %v1052_v19 }
 0x194   : > { %v1195_v60 = vrot.slane %v1181_v16, %v2425_v4  ;;  %v1034_v25 = vmax.f32 %v1024_v17, 0.0  ;;  %v969_v26 = vpop.f32.mrf.mxu0  ;;  %v1196_v28 = vcombine.high %v1188_v20, %v1188_v20  ;;  %v1147_v33 = vcombine.high %v2436_v22, %v2436_v22 }
 0x195   : > { %v1062_v7 = vcombine.high %v1026_v21, %v1026_v21  ;;  %v2451_v30 = vrot.slane %v1026_v21, %v2425_v4  ;;  %v1017_v53 = vadd.f32 %v2416_v43, %v1000_v31  ;;  %v743_v26 = vadd.f32 %v2405_v34, %v2409_v12 }
 0x196   : > { %v1197_v32 = vcombine.high %v1195_v60, %v1195_v60  ;;  %v1198_v36 = vcombine.high %v1034_v25, %v1034_v25  ;;  %v1205_v37 = vrot.slane %v1034_v25, %v2425_v4  ;;  %v970_v38 = vpop.f32.mrf.mxu0  ;;  %v2489_v31 = vrot.slane %v1147_v33, %v2425_v4 }
 0x197   : > { %v1076_v40 = vrot.slane %v1062_v7, %v2425_v4  ;;  %v1077_v42 = vcombine.high %v2451_v30, %v2451_v30  ;;  %v1027_v17 = vmax.f32 %v1017_v53, 0.0  ;;  %v2486_v7 = vrot.slane %v2436_v22, %v2425_v4 }
 0x198   : > { %v1270_v29 = vmax.f32 %v1178_v15, %v1197_v32  ;;  %v1212_v44 = vrot.slane %v1198_v36, %v2425_v4  ;;  %v1213_v62 = vcombine.high %v1205_v37, %v1205_v37  ;;  %v1271_v45 = vmax.f32 %v1180_v35, %v1205_v37  ;;  %v972_v46 = vpop.f32.mrf.mxu0 }
 0x199   : > { %v1078_v47 = vcombine.high %v1076_v40, %v1076_v40  ;;  %v1255_v48 = vmax.f32 %v1052_v19, %v1077_v42  ;;  %v1256_v49 = vmax.f32 %v1060_v39, %v1076_v40  ;;  %v1001_v32 = vadd.f32 %v970_v38, %v738_v5 }
 0x19a   : > { %v1854_v55 = vrot.slane %v1270_v29, 9  ;;  %v1214_v57 = vcombine.high %v1212_v44, %v1212_v44  ;;  %v1272_v58 = vmax.f32 %v1188_v20, %v1213_v62  ;;  %v1273_v59 = vmax.f32 %v1196_v28, %v1212_v44  ;;  %v975_v1 = vpop.f32.mrf.mxu0 }
 0x19b   : > { %v1257_v63 = vmax.f32 %v2448_v3, %v1078_v47  ;;  %v1851_v2 = vrot.slane %v1255_v48, 9  ;;  %v1304_v52 = vrot.slane %v1256_v49, 7  ;;  %v1343_v41 = vrot.slane %v1271_v45, 7 }
 0x19c   : > { %v1274_v27 = vmax.f32 %v1195_v60, %v1214_v57  ;;  %v1346_v6 = vrot.slane %v1272_v58, 7  ;;  %v1349_v8 = vrot.slane %v1273_v59, 7  ;;  %v977_v9 = vpop.f32.mrf.mxu0  ;;  %v1061_v37 = vcombine.high %v2448_v3, %v2448_v3 }
 0x19d   : > { %v1305_v11 = vsel %vm2463_vm13, %v1851_v2, %v1304_v52  ;;  %v1306_v50 = vrot.slane %v1304_v52, 2  ;;  %v1307_v13 = vrot.slane %v1257_v63, 7  ;;  %v1345_v15 = vrot.slane %v1343_v41, 2 }
 0x19e   : > { %v1855_v14 = vrot.slane %v1305_v11, 9  ;;  %v1348_v16 = vrot.slane %v1346_v6, 2  ;;  %v978_v54 = vpop.f32.mrf.mxu0  ;;  %v1344_v10 = vsel %vm2463_vm13, %v1854_v55, %v1343_v41  ;;  %v1351_v18 = vrot.slane %v1349_v8, 2 }
 0x19f   : > { %v1308_v61 = vsel %vm2463_vm13, %v1306_v50, %v1307_v13  ;;  %v1352_v19 = vrot.slane %v1274_v27, 7  ;;  %v1347_v60 = vsel %vm2463_vm13, %v1345_v15, %v1346_v6  ;;  %v1867_v36 = vrot.slane %v1344_v10, 9 }
 0x1a0   : > { %v1856_v20 = vrot.slane %v1308_v61, 9  ;;  %v1418_v21 = vmax.f32 %v1305_v11, %v1855_v14  ;;  %v1350_v23 = vsel %vm2463_vm13, %v1348_v16, %v1349_v8  ;;  %v980_v25 = vpop.f32.mrf.mxu0  ;;  %v1086_v39 = vrot.slane %v1027_v17, %v2425_v4 }
 0x1a1   : > { %v1309_v28 = vrot.slane %v1307_v13, 2  ;;  %v1353_v40 = vsel %vm2463_vm13, %v1351_v18, %v1352_v19  ;;  %v1868_v34 = vrot.slane %v1347_v60, 9  ;;  %v1869_v12 = vrot.slane %v1350_v23, 9 }
 0x1a2   : > { %v1419_v35 = vmax.f32 %v1308_v61, %v1856_v20  ;;  %v1453_v22 = vrot.slane %v1418_v21, %v2445_v24  ;;  %v1094_v29 = vcombine.high %v1086_v39, %v1086_v39  ;;  %v1258_v38 = vmax.f32 %v1061_v37, %v1086_v39 }
 0x1a3   : > { %v1162_v44 = vcombine.high %v2486_v7, %v2486_v7  ;;  %v1079_v62 = vcombine.high %v1027_v17, %v1027_v17  ;;  %v1018_v3 = vadd.f32 %v2416_v43, %v1001_v32  ;;  %v1002_v45 = vadd.f32 %v975_v1, %v743_v26 }
 0x1a4   : > { %v1457_v42 = vrot.slane %v1419_v35, %v2445_v24  ;;  %v1430_v47 = vmax.f32 %v1344_v10, %v1867_v36  ;;  %v1259_v48 = vmax.f32 %v2451_v30, %v1094_v29  ;;  %v1310_v49 = vrot.slane %v1258_v38, 7 }
 0x1a5   : > { %v1870_v53 = vrot.slane %v1353_v40, 9  ;;  %v1431_v55 = vmax.f32 %v1347_v60, %v1868_v34  ;;  %v1028_v57 = vmax.f32 %v1018_v3, 0.0  ;;  %v1019_v58 = vadd.f32 %v2416_v43, %v1002_v45 }
 0x1a6   : > { %v1514_v46 = vsel %vm1296_vm8, %v1457_v42, %v1453_v22  ;;  %v1432_v59 = vmax.f32 %v1350_v23, %v1869_v12  ;;  %v1311_v63 = vsel %vm2463_vm13, %v1309_v28, %v1310_v49  ;;  %v1312_v2 = vrot.slane %v1310_v49, 2 }
 0x1a7   : > { %v1313_v52 = vrot.slane %v1259_v48, 7  ;;  %v2508_v1 = vrot.slane %v2419_v56, %v2425_v4  ;;  %v1093_v41 = vrot.slane %v1079_v62, %v2425_v4  ;;  %v1857_v5 = vrot.slane %v1311_v63, 9 }
 0x1a8   : > { %v1096_v30 = vcombine.high %v1028_v57, %v1028_v57  ;;  %v1103_v6 = vrot.slane %v1028_v57, %v2425_v4  ;;  %v1029_v8 = vmax.f32 %v1019_v58, 0.0  ;;  %v1003_v9 = vadd.f32 %v978_v54, %v2411_v51 }
 0x1a9   : > { %v1314_v27 = vsel %vm2463_vm13, %v1312_v2, %v1313_v52  ;;  %v1501_v33 = vrot.slane %v1430_v47, %v2445_v24  ;;  %v1420_v50 = vmax.f32 %v1311_v63, %v1857_v5  ;;  %v1433_v13 = vmax.f32 %v1353_v40, %v1870_v53 }
 0x1aa   : > { %v1858_v11 = vrot.slane %v1314_v27, 9  ;;  %v1110_v56 = vrot.slane %v1096_v30, %v2425_v4  ;;  %v1505_v14 = vrot.slane %v1431_v55, %v2445_v24  ;;  %v1509_v15 = vrot.slane %v1432_v59, %v2445_v24 }
 0x1ab   : > { %v1113_v16 = vcombine.high %v1029_v8, %v1029_v8  ;;  %v1461_v61 = vrot.slane %v1420_v50, %v2445_v24  ;;  %v1120_v18 = vrot.slane %v1029_v8, %v2425_v4  ;;  %v1111_v51 = vcombine.high %v1103_v6, %v1103_v6 }
 0x1ac   : > { %v1421_v17 = vmax.f32 %v1314_v27, %v1858_v11  ;;  %v1112_v10 = vcombine.high %v1110_v56, %v1110_v56  ;;  %v1095_v54 = vcombine.high %v1093_v41, %v1093_v41  ;;  %v1020_v20 = vadd.f32 %v2416_v43, %v1003_v9 }
 0x1ad   : > { %v1127_v19 = vrot.slane %v1113_v16, %v2425_v4  ;;  %v1516_v60 = vsel %vm1515_vm14, %v1461_v61, %v1514_v46  ;;  %v1128_v25 = vcombine.high %v1120_v18, %v1120_v18  ;;  %v1524_v26 = vsel %vm1296_vm8, %v1505_v14, %v1501_v33 }
 0x1ae   : > { %v1465_v21 = vrot.slane %v1421_v17, %v2445_v24  ;;  %v1260_v23 = vmax.f32 %v1093_v41, %v1112_v10  ;;  %v1261_v35 = vmax.f32 %v1095_v54, %v1120_v18  ;;  %v1030_v40 = vmax.f32 %v1020_v20, 0.0 }
 0x1af   : > { %v1129_v32 = vcombine.high %v1127_v19, %v1127_v19  ;;  %v1263_v36 = vmax.f32 %v1111_v51, %v1127_v19  ;;  %v1262_v28 = vmax.f32 %v1103_v6, %v1128_v25  ;;  %v1163_v34 = vcombine.high %v2489_v31, %v2489_v31 }
 0x1b0   : > { %v1517_v37 = vsel %vm1298_vm9, %v1465_v21, %v1516_v60  ;;  %v1852_v39 = vrot.slane %v1260_v23, 9  ;;  %v1513_v43 = vrot.slane %v1433_v13, %v2445_v24  ;;  %v1317_v22 = vrot.slane %v1261_v35, 7 }
 0x1b1   : > { %v1264_v12 = vmax.f32 %v1110_v56, %v1129_v32  ;;  %v1525_v42 = vsel %vm1515_vm14, %v1509_v15, %v1524_v26  ;;  %v1531_v29 = vsel %vm1295_vm7, 0.0, %v1517_v37  ;;  %v1320_v38 = vrot.slane %v1262_v28, 7 }
 0x1b2   : > { %v1323_v62 = vrot.slane %v1263_v36, 7  ;;  %v1179_v3 = vcombine.high %v2508_v1, %v2508_v1  ;;  %v1318_v45 = vsel %vm2463_vm13, %v1852_v39, %v1317_v22  ;;  %v1319_v46 = vrot.slane %v1317_v22, 2 }
 0x1b3   : > { %v1130_v47 = vcombine.high %v1030_v40, %v1030_v40  ;;  %v1322_v48 = vrot.slane %v1320_v38, 2  ;;  %v1326_v53 = vrot.slane %v1264_v12, 7  ;;  %v1859_v55 = vrot.slane %v1318_v45, 9 }
 0x1b4   : > { %v1325_v49 = vrot.slane %v1323_v62, 2  ;;  %v1526_v57 = vsel %vm1298_vm9, %v1513_v43, %v1525_v42  ;;  %v1536_v58 = vsel %vm1535_vm15, %v1531_v29, 0.0  ;;  %v1321_v59 = vsel %vm2463_vm13, %v1319_v46, %v1320_v38 }
 0x1b5   : > { %v1137_v63 = vrot.slane %v1030_v40, %v2425_v4  ;;  %v1324_v2 = vsel %vm2463_vm13, %v1322_v48, %v1323_v62  ;;  %v1860_v41 = vrot.slane %v1321_v59, 9  ;;  %v1422_v5 = vmax.f32 %v1318_v45, %v1859_v55 }
 0x1b6   : > { %v1327_v52 = vsel %vm2463_vm13, %v1325_v49, %v1326_v53  ;;  %v1269_v30 = vmax.f32 %v2486_v7, %v1179_v3  ;;  %v1861_v27 = vrot.slane %v1324_v2, 9  ;;  %v1144_v8 = vrot.slane %v1130_v47, %v2425_v4 }
 0x1b7   : > { %v1862_v6 = vrot.slane %v1327_v52, 9  ;;  %v1534_v9 = vsel %vm1295_vm7, 0.0, %v1526_v57  ;;  %v1423_v33 = vmax.f32 %v1321_v59, %v1860_v41  ;;  %v1145_v11 = vcombine.high %v1137_v63, %v1137_v63 }
 0x1b8   : > { %v1265_v50 = vmax.f32 %v1137_v63, %v1162_v44  ;;  %v1551_v56 = vrot.slane %v1536_v58, %v2425_v4  ;;  %v1424_v13 = vmax.f32 %v1324_v2, %v1861_v27  ;;  %v1146_v15 = vcombine.high %v1144_v8, %v1144_v8 }
 0x1b9   : > { %v1425_v14 = vmax.f32 %v1327_v52, %v1862_v6  ;;  %v1469_v16 = vrot.slane %v1422_v5, %v2445_v24  ;;  %v1473_v17 = vrot.slane %v1423_v33, %v2445_v24  ;;  %v1266_v61 = vmax.f32 %v1145_v11, %v2489_v31 }
 0x1ba   : > { %v1267_v10 = vmax.f32 %v1144_v8, %v1163_v34  ;;  %v1544_v18 = vcombine.high %v1536_v58, %v1536_v58  ;;  %v1477_v51 = vrot.slane %v1424_v13, %v2445_v24  ;;  %v1268_v7 = vmax.f32 %v1146_v15, %v2508_v1 }
 0x1bb   : > { %v1481_v54 = vrot.slane %v1425_v14, %v2445_v24  ;;  %v1518_v44 = vsel %vm1296_vm8, %v1473_v17, %v1469_v16  ;;  %v1853_v19 = vrot.slane %v1265_v50, 9  ;;  %v1330_v20 = vrot.slane %v1266_v61, 7 }
 0x1bc   : > { %v1333_v21 = vrot.slane %v1267_v10, 7  ;;  %v1339_v60 = vrot.slane %v1269_v30, 7  ;;  %v1559_v23 = vcombine.high %v1551_v56, %v1551_v56  ;;  %v1519_v25 = vsel %vm1515_vm14, %v1477_v51, %v1518_v44 }
 0x1bd   : > { %v1336_v26 = vrot.slane %v1268_v7, 7  ;;  %v1520_v31 = vsel %vm1298_vm9, %v1481_v54, %v1519_v25  ;;  %v1331_v32 = vsel %vm2463_vm13, %v1853_v19, %v1330_v20  ;;  %v1332_v35 = vrot.slane %v1330_v20, 2 }
 0x1be   : > { %v1335_v36 = vrot.slane %v1333_v21, 2  ;;  %v1539_v37 = vsel %vm1535_vm15, %v1534_v9, 0.0  ;;  %v1532_v1 = vsel %vm1295_vm7, 0.0, %v1520_v31  ;;  %v1863_v28 = vrot.slane %v1331_v32, 9 }
 0x1bf   : > { %v1338_v39 = vrot.slane %v1336_v26, 2  ;;  %v1558_v40 = vrot.slane %v1544_v18, %v2425_v4  ;;  %v1537_v34 = vsel %vm1535_vm15, %v1532_v1, 0.0  ;;  %v1334_v43 = vsel %vm2463_vm13, %v1332_v35, %v1333_v21 }
 0x1c0   : > { %v1337_v12 = vsel %vm2463_vm13, %v1335_v36, %v1336_v26  ;;  %v1608_v22 = vcombine.low %v1551_v56, %v1559_v23  ;;  %v1567_v42 = vrot.slane %v1537_v34, %v2425_v4  ;;  %v1864_v38 = vrot.slane %v1334_v43, 9 }
 0x1c1   : > { %v1340_v29 = vsel %vm2463_vm13, %v1338_v39, %v1339_v60  ;;  %v1865_v62 = vrot.slane %v1337_v12, 9  ;;  %v1426_v45 = vmax.f32 %v1331_v32, %v1863_v28  ;;  %v1592_v48 = vcombine.high %v1539_v37, %v1539_v37 }
 0x1c2   : > { %v1866_v3 = vrot.slane %v1340_v29, 9  ;;  %v1609_v46 = vcombine.low %v1558_v40, %v1567_v42  ;;  %v1427_v47 = vmax.f32 %v1334_v43, %v1864_v38  ;;  %v1616_v55 = vrot.slane %v1608_v22, %v2425_v4 }
 0x1c3   : > { %v1428_v49 = vmax.f32 %v1337_v12, %v1865_v62  ;;  %v1485_v58 = vrot.slane %v1426_v45, %v2445_v24  ;;  %v1599_v0 = vrot.slane %v1539_v37, %v2425_v4  ;;  %v1560_v63 = vcombine.high %v1537_v34, %v1537_v34 }
 0x1c4   : > { %v1429_v53 = vmax.f32 %v1340_v29, %v1866_v3  ;;  %v1623_v57 = vrot.slane %v1609_v46, %v2425_v4  ;;  %v1489_v59 = vrot.slane %v1427_v47, %v2445_v24  ;;  %v1606_v27 = vrot.slane %v1592_v48, %v2425_v4 }
 0x1c5   : > { %v1493_v2 = vrot.slane %v1428_v49, %v2445_v24  ;;  %v1607_v9 = vcombine.high %v1599_v0, %v1599_v0  ;;  %v1574_v33 = vrot.slane %v1560_v63, %v2425_v4  ;;  %v1575_v11 = vcombine.high %v1567_v42, %v1567_v42 }
 0x1c6   : > { %v1497_v52 = vrot.slane %v1429_v53, %v2445_v24  ;;  %v1624_v41 = vcombine.low %v1616_v55, %v1623_v57  ;;  %v1521_v5 = vsel %vm1296_vm8, %v1489_v59, %v1485_v58 }
 0x1c7   : > { %v1522_v30 = vsel %vm1515_vm14, %v1493_v2, %v1521_v5  ;;  %v1643_v14 = vcombine.low %v1607_v9, %v1606_v27  ;;  %v1625_v15 = vcombine.low %v1575_v11, %v1574_v33 }
 0x1c8   : > { %v1876_v6 = vpack.c.bf16 %v1624_v41, %v1624_v41  ;;  %v1523_v8 = vsel %vm1298_vm9, %v1497_v52, %v1522_v30 }
 0x1c9   : > { %v1533_v24 = vsel %vm1295_vm7, 0.0, %v1523_v8  ;;  %v1657_v18 = vrot.slane %v1643_v14, %v2425_v4  ;;  %v1633_v51 = vrot.slane %v1625_v15, %v2425_v4 }
 0x1ca   : > { %1676 = vst.msk [vmem:[%s182_s28] sm:$0xf] %vm1675_vm0, %v1876_v6  ;;  %v1538_v50 = vsel %vm1535_vm15, %v1533_v24, 0.0 }
 0x1cb   : > { %v1576_v56 = vcombine.high %v1538_v50, %v1538_v50  ;;  %v1583_v13 = vrot.slane %v1538_v50, %v2425_v4 }
 0x1cd   : > { %v1590_v16 = vrot.slane %v1576_v56, %v2425_v4  ;;  %v1591_v17 = vcombine.high %v1583_v13, %v1583_v13 }
 0x1cf   : > { %v1626_v61 = vcombine.low %v1583_v13, %v1591_v17  ;;  %v1642_v10 = vcombine.low %v1590_v16, %v1599_v0 }
 0x1d1   : > { %v1640_v54 = vrot.slane %v1626_v61, %v2425_v4  ;;  %v1650_v7 = vrot.slane %v1642_v10, %v2425_v4 }
 0x1d3   : > { %v1641_v44 = vcombine.low %v1633_v51, %v1640_v54  ;;  %v1658_v19 = vcombine.low %v1650_v7, %v1657_v18 }
 0x1d5   : > { %v1877_v20 = vpack.c.bf16 %v1641_v44, %v1641_v44  ;;  %v1878_v21 = vpack.c.bf16 %v1658_v19, %v1658_v19 }
 0x1d7   : > { %1677 = vst.msk [vmem:[%s182_s28 + $0x4] sm:$0xf] %vm1675_vm0, %v1877_v20  ;;  %1678 = vst.msk [vmem:[%s182_s28 + $0x8] sm:$0xf] %vm1675_vm0, %v1878_v21 }
 0x1d8 PF: > { %s13_s14 = sadd.s32 1, %s1995_s14   ;;  %s2620_s12 = smov %s1991_s13 }
 0x1d9   : > { %p10_p5 = scmp.ge.s32.totalorder %s13_s14, 4   ;;  %s2621_s13 = smov %s2623_s15 }
 0x1db   :  { %12 = sbr.rel (!%p10_p5) target bundleno = 2 (0x2), region = 64 }

// kernel: superpoint_forward.10
= control target key start
LH: loop header
LB: loop body
LE: loop exit
PB: predicated region body
PF: predicated region fallthrough
CT: control target
= control target key end

     0   :  { %s2864_s21 = smov 0   ;;  %s2866_s22 = smov 0   ;;  %s4413_s0 = inlined_call_operand.vmem [shape: bf16[2,360,1], index: 0, kind: input, shape index: {}, may-alias: {0,1,2}]   ;;  %s4414_s1 = inlined_call_operand.vmem [shape: bf16[2,360,1], index: 1, kind: input, shape index: {}, may-alias: {0,1,2}]   ;;  %s4415_s2 = inlined_call_operand.vmem [shape: bf16[2,360,1], index: 2, kind: input, shape index: {}, may-alias: {0,1,2}]   ;;  %s4416_s3 = inlined_call_operand.vmem [shape: f32[9,1,64], index: 3, kind: input, shape index: {}]   ;;  %s4417_s4 = inlined_call_operand.vmem [shape: f32[1,64], index: 4, kind: input, shape index: {}]   ;;  %s4418_s5 = inlined_call_operand.vmem [shape: f32[144,1], index: 5, kind: input, shape index: {}]   ;;  %s4419_s6 = inlined_call_operand.vmem [shape: bf16[2,360,64], index: 6, kind: output, shape index: {}]  }
   0x1   :  { %s2868_s23 = smov 0   ;;  %s2870_s24 = smov 0  }
   0x2   :  { %s2872_s25 = smov 0   ;;  %s2874_s26 = smov 0  }
   0x3   :  { %s2876_s27 = smov 0  }
   0x4 LB: > { %s25_s28 = sadd.s32 1, %s2786_s25  ;;  %s28_s29 = sadd.s32 1, %s2790_s26  ;;  %s2794_s27 = sphi %s2876_s27, %s16_s27   ;;  %s2790_s26 = sphi %s2874_s26, %s4598_s26   ;;  %s2786_s25 = sphi %s2872_s25, %s4597_s25   ;;  %s2782_s24 = sphi %s2870_s24, %s4596_s24   ;;  %s2778_s23 = sphi %s2868_s23, %s4595_s23   ;;  %s2774_s22 = sphi %s2866_s22, %s4594_s22   ;;  %s2770_s21 = sphi %s2864_s21, %s4593_s21  }
   0x5   : > { %p26_p0 = scmp.ge.s32.totalorder %s25_s28, 2  ;;  %s2400_s30 = sadd.s32 4294967295, %s2794_s27  }
   0x6   : > { %p206_p1 = scmp.ne.s32.totalorder %s2774_s22, %s2770_s21  ;;  %p207_p2 = scmp.eq.s32.totalorder %s2400_s30, 3 }
   0x7   : > { %s4600_s28 = smov (%p26_p0, %s25_s28), 0  ;;  %s4602_s29 = smov (!%p26_p0, %s28_s29), %s2790_s26 }
   0x8   : > { %s192_s7 = ssub.s32 %s2786_s25, %s4600_s28  ;;  %p30_p3 = scmp.ge.s32.totalorder %s4602_s29, 2 }
   0x9   : > { %p2410_p4 = scmp.ge.s32.totalorder %s2794_s27, 1  ;;  %p2910_p5 = por %p207_p2, %p206_p1 }
   0xa   : > { %p299_p6 = scmp.lt.s32.totalorder %s2794_s27, 5  ;;  %s4604_s29 = smov (%p30_p3, %s4602_s29), 0 }
   0xb   : > { %s191_s9 = ssub.s32 %s2790_s26, %s4604_s29  ;;  %s196_s11 = sadd.s32 1, %s2774_s22 }
   0xc   : > { %p300_p7 = pnand %p2410_p4, %p299_p6  ;;  %s193_s10 = sor.u32 %s192_s7, %s191_s9 }
   0xd   : > { %p194_p8 = scmp.eq.s32.totalorder %s193_s10, 0 }
   0xe   : > { %303 = sbr.rel (%p300_p7) target bundleno = 433 (0x1b1), region = 44 }
   0xf   : > { %s2921_s12 = scalar_select %p194_p8, %s2774_s22, %s196_s11  }
  0x13   : > { %v1840_v0 = vld [vmem:[%s4418_s5 + $0x8] sm:$0xff]  ;;  %v1839_v1 = vld [vmem:[%s4418_s5] sm:$0xff]  ;;  %s2930_s17 = smul.u32 18, %s2778_s23  ;;  %p365_p9 = scmp.lt.s32.totalorder %s2782_s24, 1  ;;  %v2828_v2 = vmov 0   ;;  %vm649_vm1 = vcmask 1041408  }
  0x14   : > { %2629 = vset.pattern.permute.xlu1 %v2828_v2  ;;  %2628 = vset.pattern.permute.xlu0 %v2828_v2  ;;  %s396_s18 = sadd.s32 1, %s2778_s23  ;;  %s2412_s9 = sshll.u32 %s2778_s23, 1  ;;  %vm527_vm0 = vsmask.f32 1280  ;;  %vm653_vm3 = vcmask 1042432   ;;  %vm645_vm7 = vcmask 1040384  }
  0x15   : > { %1864 = vperm.xlu1 %2629, %v1840_v0   ;;  %1859 = vperm.xlu0 %2628, %v1839_v1   ;;  %s366_s19 = scalar_select %p365_p9, %s2782_s24, 1  ;;  %vm3021_vm5 = vmand %vm649_vm1, %vm527_vm0  ;;  %vm654_vm6 = vsmask.f32 2304  ;;  %vm646_vm8 = vsmask.f32 256  ;;  %vm1353_vm12 = vcmask 1043456  }
  0x16   : > { %p367_p10 = scmp.lt.s32.totalorder %s2930_s17, 44  ;;  %s2416_s20 = smul.u32 18, %s396_s18  ;;  %vm655_vm9 = vmand %vm653_vm3, %vm654_vm6  ;;  %vm462_vm10 = vsmask.f32 5376  ;;  %vm984_vm13 = vcmask 1045504   ;;  %vm1233_vm14 = vcmask 1044480  }
  0x17   : > { %s2936_s30 = smul.u32 45, %s366_s19  ;;  %s2946_s16 = sadd.s32 4294967295, %s2412_s9  ;;  %vm647_vm11 = vmand %vm645_vm7, %vm646_vm8  ;;  %vm864_vm15 = vcmask 1046528  }
  0x18   : > { %s368_s7 = scalar_select %p367_p10, %s2930_s17, 44 }
  0x19   : > { %p401_p11 = scmp.lt.s32.totalorder %s2416_s20, 44  ;;  %p380_p12 = scmp.gt.s32.totalorder %s2946_s16, 0 }
  0x1a   : > { %s370_s10 = sadd.s32 %s2936_s30, %s368_s7  ;;  %p444_p13 = scmp.lt.s32.totalorder %s2778_s23, 1 }
  0x1b   : > { %s2411_s11 = sshll.u32 %s370_s10, 2  ;;  %s4606_s20 = smov (!%p401_p11, %s2416_s20), 44 }
  0x1c   : > { %s2944_s15 = scalar_lea.vmem %s4413_s0, %s2411_s11  ;;  %s404_s18 = sadd.s32 %s2936_s30, %s4606_s20 }
  0x1d   : > { %v2685_v3 = vld [vmem:[%s2944_s15 + $0x10] sm:$0xff]   ;;  %v2686_v4 = vld [vmem:[%s2944_s15 + $0x18] sm:$0xff]   ;;  %v2687_v9 = vld [vmem:[%s2944_s15] sm:$0xff]   ;;  %s2956_s19 = sshll.u32 %s404_s18, 2  ;;  %s4608_s16 = smov (!%p380_p12, %s2946_s16), 0 }
  0x1e   : > { %v546_v5 = vshrl.u32 %v2685_v3, 16  ;;  %v549_v6 = vshll.u32 %v2685_v3, 16  ;;  %v555_v7 = vshrl.u32 %v2686_v4, 16  ;;  %v558_v8 = vshll.u32 %v2686_v4, 16  ;;  %v2688_v10 = vld [vmem:[%s2944_s15 + $0x8] sm:$0xff]   ;;  %v2689_v21 = vld [vmem:[%s2944_s15 + $0x20] sm:$0xff]   ;;  %s2980_s10 = scalar_lea.vmem %s4415_s2, %s2956_s19 }
  0x1f   : > { %v529_v15 = vshrl.u32 %v2687_v9, 16  ;;  %v532_v16 = vshll.u32 %v2687_v9, 16  ;;  %v537_v17 = vshrl.u32 %v2688_v10, 16  ;;  %v540_v18 = vshll.u32 %v2688_v10, 16  ;;  %v2690_v22 = vld [vmem:[%s2944_s15 + $0x28] sm:$0xff]   ;;  %v2691_v31 = vld [vmem:[%s2944_s15 + $0x30] sm:$0xff]  }
  0x20   : > { %v548_v11 = vrot.slane %v546_v5, 6  ;;  %v551_v12 = vrot.slane %v549_v6, 7  ;;  %v557_v13 = vrot.slane %v555_v7, 6  ;;  %v560_v14 = vrot.slane %v558_v8, 7  ;;  %v2692_v36 = vld [vmem:[%s2944_s15 + $0x38] sm:$0xff]   ;;  %s382_s11 = smul.u32 9, %s4608_s16 }
  0x21   : > { %v531_v23 = vrot.slane %v529_v15, 6  ;;  %v534_v24 = vrot.slane %v532_v16, 7  ;;  %v539_v25 = vrot.slane %v537_v17, 6  ;;  %v542_v26 = vrot.slane %v540_v18, 7  ;;  %s2974_s20 = scalar_select %p444_p13, 1, 0 }
  0x22   : > { %v552_v19 = vor.u32 %v551_v12, %v548_v11  ;;  %v561_v20 = vor.u32 %v560_v14, %v557_v13  ;;  %v564_v28 = vshrl.u32 %v2689_v21, 16  ;;  %v567_v29 = vshll.u32 %v2689_v21, 16  ;;  %p434_p0 = scmp.gt.s32.totalorder %s2778_s23, 0  ;;  %v2693_v57 = vld [vmem:[%s2944_s15 + $0x40] sm:$0xff]   ;;  %p385_p1 = scmp.lt.s32.totalorder %s382_s11, 44 }
  0x23   : > { %v573_v30 = vshrl.u32 %v2690_v22, 16  ;;  %v2961_v34 = vor.u32 %v534_v24, %v531_v23  ;;  %v543_v35 = vor.u32 %v542_v26, %v539_v25  ;;  %v576_v40 = vshll.u32 %v2690_v22, 16  ;;  %v445_v61 = vld [vmem:[%s2980_s10] sm:$0xf]  ;;  %v446_v3 = vld [vmem:[%s2980_s10 + $0x4] sm:$0xf] }
  0x24   : > { %v562_v27 = vsel %vm527_vm0, %v552_v19, %v561_v20  ;;  %v566_v37 = vrot.slane %v564_v28, 6  ;;  %v569_v38 = vrot.slane %v567_v29, 7  ;;  %v582_v44 = vshrl.u32 %v2691_v31, 16  ;;  %s4610_s11 = smov (!%p385_p1, %s382_s11), 44  ;;  %s357_s18 = sand.u32 1, %s2770_s21  }
  0x25   : > { %v665_v32 = vunpack.c.l.bf16 %v562_v27  ;;  %v666_v33 = vunpack.c.h.bf16 %v562_v27  ;;  %v575_v39 = vrot.slane %v573_v30, 6  ;;  %v544_v42 = vsel %vm527_vm0, %v2961_v34, %v543_v35  ;;  %s2992_s13 = scalar_select %p434_p0, 1, 0 }
  0x26   : > { %v553_v43 = vsel %vm527_vm0, %v543_v35, %v552_v19  ;;  %v661_v45 = vunpack.c.l.bf16 %v544_v42  ;;  %v662_v46 = vunpack.c.h.bf16 %v544_v42  ;;  %v570_v47 = vor.u32 %v569_v38, %v566_v37  ;;  %s388_s14 = sadd.s32 %s2936_s30, %s4610_s11  ;;  %s2503_s21 = smul.u32 72, %s357_s18 }
  0x27   : > { %v2640_v41 = vpack.i.bf16 %v666_v33, %v665_v32  ;;  %v578_v48 = vrot.slane %v576_v40, 7  ;;  %v663_v49 = vunpack.c.l.bf16 %v553_v43  ;;  %v664_v50 = vunpack.c.h.bf16 %v553_v43  ;;  %s2414_s23 = sshll.u32 %s388_s14, 2  ;;  %v1856_v32 = vld [vmem:[%s4418_s5 + $0x88] sm:$0xff]  ;;  %s2505_s15 = smul.u32 (%p2910_p5), 45, %s2782_s24 }
  0x28   : > { %v584_v51 = vrot.slane %v582_v44, 6  ;;  %v585_v52 = vshll.u32 %v2691_v31, 16  ;;  %v2630_v53 = vpack.i.bf16 %v662_v46, %v661_v45  ;;  %v591_v55 = vshrl.u32 %v2692_v36, 16  ;;  %s390_s30 = scalar_lea.vmem %s4414_s1, %s2414_s23  ;;  %s3578_s19 = scalar_lea.vmem [#allocation2], %s2503_s21  }
  0x29   : > { %2641 = vperm.xlu0 %2628, %v2640_v41   ;;  %v579_v54 = vor.u32 %v578_v48, %v575_v39  ;;  %v594_v56 = vshll.u32 %v2692_v36, 16  ;;  %v2635_v58 = vpack.i.bf16 %v664_v50, %v663_v49  ;;  %v571_v60 = vsel %vm527_vm0, %v561_v20, %v570_v47  ;;  %v447_v20 = vld [vmem:[%s2980_s10 + $0x8] sm:$0x1]  ;;  %v437_v24 = vld [vmem:[%s390_s30 + $0x20] sm:$0xf]  ;;  %s2064_s23 = ssub.s32 (%p2910_p5), 45, %s2930_s17  ;;  %s2070_s16 = sadd.s32 (%p2910_p5), %s2505_s15, %s2930_s17 }
  0x2a   : > { %v587_v59 = vrot.slane %v585_v52, 7  ;;  %v449_v62 = vstv %s2974_s20  ;;  %2631 = vperm.xlu1 %2629, %v2630_v53   ;;  %v593_v0 = vrot.slane %v591_v55, 6  ;;  %v667_v2 = vunpack.c.l.bf16 %v571_v60  ;;  %v435_v35 = vld [vmem:[%s390_s30 + $0x18] sm:$0x8]  ;;  %v436_v36 = vld [vmem:[%s390_s30 + $0x1c] sm:$0xf] }
  0x2b   : > { %v580_v63 = vsel %vm527_vm0, %v570_v47, %v579_v54  ;;  %v596_v1 = vrot.slane %v594_v56, 7  ;;  %v668_v7 = vunpack.c.h.bf16 %v571_v60  ;;  %vm2994_vm2 = vcmp.eq.s32.totalorder %v449_v62, 1  ;;  %p2065_p2 = scmp.lt.s32.totalorder (%p2910_p5), %s2064_s23, 18  ;;  %s2469_s30 = sshll.u32 (%p2910_p5), %s2070_s16, 2 }
  0x2c   : > { %v669_v4 = vunpack.c.l.bf16 %v580_v63  ;;  %v670_v5 = vunpack.c.h.bf16 %v580_v63  ;;  %v588_v6 = vor.u32 %v587_v59, %v584_v51  ;;  %v600_v10 = vshrl.u32 %v2693_v57, 16  ;;  %s4310_s7 = scalar_lea.vmem (%p2910_p5), %s4419_s6, %s2469_s30  }
  0x2d   : > { %v597_v8 = vor.u32 %v596_v1, %v593_v0  ;;  %v603_v11 = vshll.u32 %v2693_v57, 16  ;;  %v2645_v13 = vpack.i.bf16 %v668_v7, %v667_v2  ;;  %v451_v14 = vsel %vm2994_vm2, %v445_v61, 0  ;;  %v1841_v7 = vld [vmem:[%s4418_s5 + $0x10] sm:$0xff] }
  0x2e   : > { %v2650_v12 = vpack.i.bf16 %v670_v5, %v669_v4  ;;  %v452_v15 = vsel %vm2994_vm2, %v446_v3, 0  ;;  %2636 = vperm.xlu1 %2629, %v2635_v58   ;;  %v602_v17 = vrot.slane %v600_v10, 6  ;;  %v589_v23 = vsel %vm527_vm0, %v579_v54, %v588_v6 }
  0x2f   : > { %v598_v16 = vsel %vm527_vm0, %v588_v6, %v597_v8  ;;  %v605_v18 = vrot.slane %v603_v11, 7  ;;  %v2429_v19 = vcombine.low %v451_v14, %v452_v15  ;;  %v439_v25 = vstv %s2992_s13 }
  0x30   : > { %2651 = vperm.xlu0 %2628, %v2650_v12   ;;  %v673_v21 = vunpack.c.l.bf16 %v598_v16  ;;  %v674_v22 = vunpack.c.h.bf16 %v598_v16  ;;  %v671_v29 = vunpack.c.l.bf16 %v589_v23  ;;  %v672_v31 = vunpack.c.h.bf16 %v589_v23  ;;  %v1845_v23 = vld [vmem:[%s4418_s5 + $0x30] sm:$0xff] }
  0x31   : > { %v606_v26 = vor.u32 %v605_v18, %v602_v17  ;;  %v627_v27 = vshrl.u32 %v2429_v19, 16  ;;  %v630_v28 = vshll.u32 %v2429_v19, 16  ;;  %vm3010_vm4 = vcmp.eq.s32.totalorder %v439_v25, 1  ;;  %v1842_v18 = vld [vmem:[%s4418_s5 + $0x18] sm:$0xff]  ;;  %v1847_v25 = vld [vmem:[%s4418_s5 + $0x40] sm:$0xff] }
  0x32   : > { %v2660_v30 = vpack.i.bf16 %v674_v22, %v673_v21  ;;  %v453_v33 = vsel %vm2994_vm2, %v447_v20, 0  ;;  %2646 = vperm.xlu1 %2629, %v2645_v13   ;;  %v443_v40 = vsel %vm3010_vm4, %v437_v24, 0  ;;  %v2655_v42 = vpack.i.bf16 %v672_v31, %v671_v29  ;;  %v1844_v20 = vld [vmem:[%s4418_s5 + $0x28] sm:$0xff]  ;;  %v1843_v21 = vld [vmem:[%s4418_s5 + $0x20] sm:$0xff]  ;;  %v1846_v22 = vld [vmem:[%s4418_s5 + $0x38] sm:$0xff] }
  0x33   : > { %v629_v37 = vrot.slane %v627_v27, 6  ;;  %v632_v38 = vrot.slane %v630_v28, 7  ;;  %v607_v39 = vsel %vm527_vm0, %v597_v8, %v606_v26  ;;  %v2419_v45 = vcombine.low %v443_v40, %v443_v40  ;;  %v1848_v24 = vld [vmem:[%s4418_s5 + $0x48] sm:$0xff]  ;;  %v1849_v27 = vld [vmem:[%s4418_s5 + $0x50] sm:$0xff]  ;;  %v1851_v29 = vld [vmem:[%s4418_s5 + $0x60] sm:$0xff] }
  0x34   : > { %2661 = vperm.xlu0 %2628, %v2660_v30   ;;  %v675_v43 = vunpack.c.l.bf16 %v607_v39  ;;  %v676_v44 = vunpack.c.h.bf16 %v607_v39  ;;  %v2430_v47 = vcombine.low %v453_v33, %v453_v33  ;;  %v441_v48 = vsel %vm3010_vm4, %v435_v35, 0  ;;  %v1852_v28 = vld [vmem:[%s4418_s5 + $0x68] sm:$0xff]  ;;  %v1854_v30 = vld [vmem:[%s4418_s5 + $0x78] sm:$0xff]  ;;  %v1853_v31 = vld [vmem:[%s4418_s5 + $0x70] sm:$0xff] }
  0x35   : > { %v633_v46 = vor.u32 %v632_v38, %v629_v37  ;;  %v442_v49 = vsel %vm3010_vm4, %v436_v36, 0  ;;  %v472_v50 = vshrl.u32 %v2419_v45, 16  ;;  %v475_v51 = vshll.u32 %v2419_v45, 16  ;;  %v1855_v33 = vld [vmem:[%s4418_s5 + $0x80] sm:$0xff]  ;;  %v3103_v40 = vld [vmem:[%s4416_s3 + $0x8] ss:$0 sm:$0xff] }
  0x36   : > { %v2418_v52 = vcombine.low %v441_v48, %v442_v49  ;;  %2656 = vperm.xlu1 %2629, %v2655_v42   ;;  %v2665_v54 = vpack.i.bf16 %v676_v44, %v675_v43  ;;  %v635_v55 = vshrl.u32 %v2430_v47, 16  ;;  %v638_v56 = vshll.u32 %v2430_v47, 16  ;;  %v3093_v38 = vld [vmem:[%s4416_s3 + $0x6] ss:$0 sm:$0xff]  ;;  %v3098_v39 = vld [vmem:[%s4416_s3 + $0x7] ss:$0 sm:$0xff] }
  0x37   : > { %v652_v53 = vsel %vm3021_vm5, %v606_v26, %v633_v46  ;;  %v474_v59 = vrot.slane %v472_v50, 2  ;;  %v477_v60 = vrot.slane %v475_v51, 3  ;;  %v1850_v26 = vld [vmem:[%s4418_s5 + $0x58] sm:$0xff]  ;;  %4470 = vst [vmem:[#allocation5_spill] sm:$0xff] %v3093_v38  ;;  %4471 = vst [vmem:[#allocation6_spill] sm:$0xff] %v3098_v39 }
  0x38   : > { %v677_v57 = vunpack.c.l.bf16 %v652_v53  ;;  %v678_v58 = vunpack.c.h.bf16 %v652_v53  ;;  %v637_v61 = vrot.slane %v635_v55, 6  ;;  %v640_v62 = vrot.slane %v638_v56, 7  ;;  %4472 = vst [vmem:[#allocation7_spill] sm:$0xff] %v3103_v40  ;;  %v3112_v44 = vld [vmem:[%s4416_s3 + $0x3] ss:$0 sm:$0xff] }
  0x39   : > { %v464_v63 = vshrl.u32 %v2418_v52, 16  ;;  %v467_v0 = vshll.u32 %v2418_v52, 16  ;;  %v478_v2 = vor.u32 %v477_v60, %v474_v59  ;;  %v3133_v50 = vld [vmem:[%s4416_s3 + $0x4] ss:$0 sm:$0xff]  ;;  %v3146_v53 = vld [vmem:[%s4416_s3 + $0x5] ss:$0 sm:$0xff] }
  0x3a   : > { %v2670_v1 = vpack.i.bf16 %v678_v58, %v677_v57  ;;  %2666 = vperm.xlu1 %2629, %v2665_v54   ;;  %v641_v3 = vor.u32 %v640_v62, %v637_v61 }
  0x3b   : > { %v466_v4 = vrot.slane %v464_v63, 2  ;;  %v469_v5 = vrot.slane %v467_v0, 3  ;;  %v651_v6 = vsel %vm3021_vm5, %v478_v2, %v2961_v34 }
  0x3c   : > { %2671 = vperm.xlu0 %2628, %v2670_v1   ;;  %v659_v8 = vunpack.c.l.bf16 %v651_v6  ;;  %v660_v9 = vunpack.c.h.bf16 %v651_v6  ;;  %v642_v10 = vsel %vm527_vm0, %v633_v46, %v641_v3  ;;  %vm2037_vm0 = vcmask 519168  }
  0x3d   : > { %v470_v11 = vor.u32 %v469_v5, %v466_v4  ;;  %v656_v12 = vsel %vm655_vm9, %v642_v10, 0  ;;  %v3179_v5 = vld [vmem:[%s4416_s3 + $0x1] ss:$0 sm:$0xff] }
  0x3e   : > { %v679_v13 = vunpack.c.l.bf16 %v656_v12  ;;  %v2675_v15 = vpack.i.bf16 %v660_v9, %v659_v8 }
  0x3f   : > { %v479_v14 = vsel %vm462_vm10, %v470_v11, %v478_v2 }
  0x40   : > { %1869 = vperm.xlu0 %2628, %v1841_v7   ;;  %v648_v16 = vsel %vm647_vm11, 0, %v479_v14  ;;  %1436 = vperm.xlu1 %2629, %v679_v13  }
  0x41   : > { %v657_v34 = vunpack.c.l.bf16 %v648_v16  ;;  %v658_v17 = vunpack.c.h.bf16 %v648_v16 }
  0x43   : > { %v2680_v19 = vpack.i.bf16 %v658_v17, %v657_v34 }
  0x44   : > { %2676 = vperm.xlu0 %2628, %v2675_v15   ;;  %1874 = vperm.xlu1 %2629, %v1842_v18  }
  0x48   : > { %2681 = vperm.xlu0 %2628, %v2680_v19   ;;  %1884 = vperm.xlu1 %2629, %v1844_v20  }
  0x4c   : > { %1879 = vperm.xlu0 %2628, %v1843_v21   ;;  %1894 = vperm.xlu1 %2629, %v1846_v22  }
  0x50   : > { %1889 = vperm.xlu0 %2628, %v1845_v23   ;;  %1904 = vperm.xlu1 %2629, %v1848_v24   ;;  %v3215_v23 = vld [vmem:[%s4416_s3 + $0x2] ss:$0 sm:$0xff] }
  0x54   : > { %1899 = vperm.xlu0 %2628, %v1847_v25   ;;  %1914 = vperm.xlu1 %2629, %v1850_v26  }
  0x58   : > { %1909 = vperm.xlu0 %2628, %v1849_v27   ;;  %1924 = vperm.xlu1 %2629, %v1852_v28  }
  0x5c   : > { %1919 = vperm.xlu0 %2628, %v1851_v29   ;;  %1934 = vperm.xlu1 %2629, %v1854_v30  }
  0x60   : > { %1929 = vperm.xlu0 %2628, %v1853_v31   ;;  %1944 = vperm.xlu1 %2629, %v1856_v32  }
  0x64   : > { %1939 = vperm.xlu0 %2628, %v1855_v33  }
  0x90   : > { %v3086_v35 = vpop.permute.xlu0 %1859  ;;  %v3088_v36 = vpop.permute.xlu1 %1864 }
  0x91   : > { %4468 = vst [vmem:[#allocation3_spill] sm:$0xff] %v3086_v35  ;;  %4469 = vst [vmem:[#allocation4_spill] sm:$0xff] %v3088_v36 }
  0xa4   : > { %v2642_v37 = vpop.permute.xlu0 %2641 }
  0xa5   : > { %v3105_v41 = vunpack.i.h.bf16 %v2642_v37  ;;  %v3107_v42 = vunpack.i.l.bf16 %v2642_v37  ;;  %v2632_v43 = vpop.permute.xlu1 %2631 }
  0xa6   : > { %v3126_v48 = vunpack.i.h.bf16 %v2632_v43  ;;  %v3128_v49 = vunpack.i.l.bf16 %v2632_v43 }
  0xa7   : > { %4473 = vst [vmem:[#allocation8_spill] sm:$0xff] %v3105_v41  ;;  %4474 = vst [vmem:[#allocation9_spill] sm:$0xff] %v3107_v42  ;;  %v3116_v45 = vmul.f32 %v3107_v42, %v3093_v38  ;;  %v3120_v46 = vmul.f32 %v3107_v42, %v3098_v39  ;;  %v3124_v47 = vmul.f32 %v3107_v42, %v3103_v40 }
  0xa8   : > { %v3137_v51 = vmul.f32 %v3105_v41, %v3093_v38  ;;  %v3141_v52 = vmul.f32 %v3105_v41, %v3098_v39  ;;  %v3150_v54 = vmul.f32 %v3128_v49, %v3112_v44  ;;  %v1445_v55 = vmul.f32 %v3128_v49, %v3093_v38 }
  0xa9   : > { %4475 = vst [vmem:[#allocation10_spill] sm:$0xff] %v3124_v47  ;;  %v3157_v57 = vmul.f32 %v3105_v41, %v3103_v40  ;;  %v2637_v58 = vpop.permute.xlu1 %2636  ;;  %v3161_v59 = vmul.f32 %v3128_v49, %v3133_v50  ;;  %v1446_v60 = vmul.f32 %v3126_v48, %v3093_v38  ;;  %v1564_v1 = vmul.f32 %v3128_v49, %v3098_v39 }
  0xaa   : > { %4476 = vst [vmem:[#allocation11_spill] sm:$0xff] %v3137_v51  ;;  %4477 = vst [vmem:[#allocation12_spill] sm:$0xff] %v3141_v52  ;;  %v3167_v0 = vunpack.i.l.bf16 %v2637_v58  ;;  %v1565_v2 = vmul.f32 %v3126_v48, %v3098_v39  ;;  %v3174_v4 = vunpack.i.h.bf16 %v2637_v58  ;;  %v3184_v7 = vmul.f32 %v3128_v49, %v3146_v53 }
  0xab   : > { %4478 = vst [vmem:[#allocation13_spill] sm:$0xff] %v3157_v57  ;;  %v2652_v63 = vpop.permute.xlu0 %2651  ;;  %v1684_v8 = vmul.f32 %v3128_v49, %v3103_v40  ;;  %v1483_v10 = vrot.slane %v1445_v55, 4  ;;  %v1484_v11 = vrot.slane %v1446_v60, 4  ;;  %v3203_v34 = vmul.f32 %v3126_v48, %v3103_v40 }
  0xac   : > { %4479 = vst [vmem:[#allocation14_spill] sm:$0xff] %v3167_v0  ;;  %v3190_v9 = vmul.f32 %v3167_v0, %v3093_v38  ;;  %v3194_v12 = vmul.f32 %v3167_v0, %v3098_v39  ;;  %v3196_v13 = vunpack.i.h.bf16 %v2652_v63  ;;  %v3198_v14 = vunpack.i.l.bf16 %v2652_v63 }
  0xad   : > { %v2647_v15 = vpop.permute.xlu1 %2646  ;;  %v1603_v19 = vrot.slane %v1564_v1, 5  ;;  %v1604_v20 = vrot.slane %v1565_v2, 5  ;;  %v3208_v21 = vmul.f32 %v3128_v49, %v3179_v5  ;;  %v1723_v26 = vrot.slane %v1684_v8, 6 }
  0xae   : > { %4480 = vst [vmem:[#allocation15_spill] sm:$0xff] %v3196_v13  ;;  %4481 = vst [vmem:[#allocation16_spill] sm:$0xff] %v3198_v14  ;;  %v1486_v18 = vrot.slane %v3190_v9, 4  ;;  %v3210_v22 = vunpack.i.h.bf16 %v2647_v15  ;;  %v1606_v25 = vrot.slane %v3194_v12, 5  ;;  %v3223_v29 = vunpack.i.l.bf16 %v2647_v15 }
  0xaf   : > { %v2662_v17 = vpop.permute.xlu0 %2661  ;;  %v3226_v30 = vsel %vm1353_vm12, %v1483_v10, %v1484_v11  ;;  %v4421_v32 = vrot.slane %v3203_v34, 6  ;;  %v1079_v33 = vmul.f32 %v3126_v48, %v3112_v44  ;;  %v3233_v37 = vmul.f32 %v3167_v0, %v3112_v44 }
  0xb0   : > { %4482 = vst [vmem:[#allocation17_spill] sm:$0xff] %v3210_v22  ;;  %v3219_v27 = vunpack.i.h.bf16 %v2662_v17  ;;  %v3221_v28 = vunpack.i.l.bf16 %v2662_v17  ;;  %4485 = vst [vmem:[#allocation20_spill] sm:$0xff] %v3223_v29  ;;  %v1198_v43 = vmul.f32 %v3126_v48, %v3133_v50  ;;  %v3238_v55 = vsel %vm1353_vm12, %v1484_v11, %v1486_v18 }
  0xb1   : > { %v2657_v31 = vpop.permute.xlu1 %2656  ;;  %v3241_v58 = vsel %vm653_vm3, %v1603_v19, %v1604_v20  ;;  %v3246_v63 = vmul.f32 %v3128_v49, %v3215_v23  ;;  %v3249_v1 = vsel %vm653_vm3, %v1604_v20, %v1606_v25  ;;  %v1119_v2 = vrot.slane %v1079_v33, 2 }
  0xb2   : > { %4483 = vst [vmem:[#allocation18_spill] sm:$0xff] %v3219_v27  ;;  %4484 = vst [vmem:[#allocation19_spill] sm:$0xff] %v3221_v28  ;;  %v3254_v9 = vmul.f32 %v3167_v0, %v3133_v50  ;;  %v1318_v10 = vmul.f32 %v3126_v48, %v3146_v53  ;;  %v3260_v11 = vmul.f32 %v3167_v0, %v3146_v53  ;;  %v3266_v17 = vunpack.i.h.bf16 %v2657_v31 }
  0xb3   : > { %v1448_v12 = vmul.f32 %v3174_v4, %v3093_v38  ;;  %v1567_v15 = vmul.f32 %v3174_v4, %v3098_v39  ;;  %v3268_v19 = vunpack.i.l.bf16 %v2657_v31  ;;  %v3273_v33 = vsel %vm649_vm1, %v1723_v26, %v4421_v32 }
  0xb4   : > { %4486 = vst [vmem:[#allocation21_spill] sm:$0xff] %v3254_v9  ;;  %4487 = vst [vmem:[#allocation22_spill] sm:$0xff] %v3260_v11  ;;  %v1239_v60 = vrot.slane %v1198_v43, 3  ;;  %v1359_v24 = vrot.slane %v1318_v10, 4  ;;  %v4494_v26 = vrot.slane %v3150_v54, 2  ;;  %v4495_v32 = vrot.slane %v3233_v37, 2 }
  0xb5   : > { %4488 = vst [vmem:[#allocation23_spill] sm:$0xff] %v3266_v17  ;;  %4489 = vst [vmem:[#allocation24_spill] sm:$0xff] %v3268_v19  ;;  %v2667_v20 = vpop.permute.xlu1 %2666  ;;  %v1488_v6 = vrot.slane %v1448_v12, 4  ;;  %v1608_v10 = vrot.slane %v1567_v15, 5  ;;  %v4499_v56 = vrot.slane %v3161_v59, 3  ;;  %v4503_v15 = vrot.slane %v3254_v9, 3 }
  0xb6   : > { %4490 = vst [vmem:[#allocation25_spill] sm:$0xff] %v3273_v33  ;;  %v3275_v3 = vunpack.i.h.bf16 %v2667_v20  ;;  %v3289_v43 = vsel %vm984_vm13, %v4494_v26, %v1119_v2  ;;  %v3294_v61 = vsel %vm984_vm13, %v1119_v2, %v4495_v32  ;;  %v3316_v2 = vunpack.i.l.bf16 %v2667_v20 }
  0xb7   : > { %v2672_v62 = vpop.permute.xlu0 %2671  ;;  %v3308_v26 = vsel %vm1233_vm14, %v4499_v56, %v1239_v60  ;;  %v3321_v28 = vsel %vm1233_vm14, %v1239_v60, %v4503_v15  ;;  %v3337_v20 = vsel %vm1353_vm12, %v1486_v18, %v1488_v6  ;;  %v4507_v60 = vrot.slane %v3116_v45, 4 }
  0xb8   : > { %4491 = vst [vmem:[#allocation26_spill] sm:$0xff] %v3275_v3  ;;  %v2674_v16 = vunpack.i.h.bf16 %v2672_v62  ;;  %v3279_v8 = vunpack.i.l.bf16 %v2672_v62  ;;  %v3284_v27 = vmul.f32 %v3275_v3, %v3112_v44  ;;  %4502 = vst [vmem:[#allocation34_spill] sm:$0xff] %v3316_v2  ;;  %v3354_v18 = vmul.f32 %v3167_v0, %v3103_v40  ;;  %v3365_v2 = vld [vmem:[%s4416_s3] ss:$0 sm:$0xff] }
  0xb9   : > { %v3342_v15 = vsel %vm1353_vm12, %v1488_v6, %v4507_v60  ;;  %v3358_v6 = vmul.f32 %v3174_v4, %v3103_v40  ;;  %v4513_v22 = vrot.slane %v3116_v45, 4  ;;  %v4517_v41 = vrot.slane %v3141_v52, 5 }
  0xba   : > { %4492 = vst [vmem:[#allocation27_spill] sm:$0xff] %v3279_v8  ;;  %4493 = vst [vmem:[#allocation28_spill] sm:$0xff] %v3284_v27  ;;  %v3297_v62 = vmul.f32 %v2674_v16, %v3093_v38  ;;  %v3300_v12 = vmul.f32 %v2674_v16, %v3098_v39  ;;  %v3303_v31 = vmul.f32 %v2674_v16, %v3103_v40  ;;  %v4504_v16 = vrot.slane %v3184_v7, 4 }
  0xbb   : > { %v3312_v3 = vmul.f32 %v3279_v8, %v3112_v44  ;;  %v3314_v32 = vpop.permute.xlu0 %1869  ;;  %v3329_v19 = vpop.permute.xlu1 %1436  ;;  %v4506_v8 = vrot.slane %v3260_v11, 4  ;;  %4508 = vst [vmem:[#allocation36_spill] sm:$0xff] %v3342_v15  ;;  %v3349_v27 = vsel %vm653_vm3, %v1606_v25, %v1608_v10 }
  0xbc   : > { %4496 = vst [vmem:[#allocation29_spill] sm:$0xff] %v3297_v62  ;;  %4497 = vst [vmem:[#allocation30_spill] sm:$0xff] %v3300_v12  ;;  %v3326_v17 = vsel %vm1353_vm12, %v4504_v16, %v1359_v24  ;;  %v1463_v56 = vmul.f32 %v3093_v38, %v3329_v19 }
  0xbd   : > { %4498 = vst [vmem:[#allocation31_spill] sm:$0xff] %v3303_v31  ;;  %4500 = vst [vmem:[#allocation32_spill] sm:$0xff] %v3312_v3  ;;  %v3334_v13 = vsel %vm1353_vm12, %v1359_v24, %v4506_v8  ;;  %v3369_v24 = vmul.f32 %v3098_v39, %v3329_v19  ;;  %v4510_v8 = vrot.slane %v3120_v46, 5  ;;  %v4512_v3 = vrot.slane %v3137_v51, 4 }
  0xbe   : > { %4501 = vst [vmem:[#allocation33_spill] sm:$0xff] %v3314_v32  ;;  %4505 = vst [vmem:[#allocation35_spill] sm:$0xff] %v3329_v19  ;;  %v1518_v16 = vrot.slane %v1463_v56, 4  ;;  %v4515_v19 = vrot.slane %v3297_v62, 4  ;;  %v3409_v31 = vmul.f32 %v3128_v49, %v3365_v2 }
  0xbf   : > { %v2677_v25 = vpop.permute.xlu0 %2676  ;;  %4509 = vst [vmem:[#allocation37_spill] sm:$0xff] %v3369_v24  ;;  %v3375_v60 = vsel %vm653_vm3, %v1608_v10, %v4510_v8  ;;  %v3382_v56 = vsel %vm1353_vm12, %v4513_v22, %v4512_v3  ;;  %v4518_v10 = vmov %v4510_v8  ;;  %v4520_v22 = vrot.slane %v3157_v57, 6 }
  0xc0   : > { %v2679_v12 = vunpack.i.h.bf16 %v2677_v25  ;;  %v2678_v14 = vunpack.i.l.bf16 %v2677_v25  ;;  %4511 = vst [vmem:[#allocation38_spill] sm:$0xff] %v3375_v60  ;;  %4514 = vst [vmem:[#allocation39_spill] sm:$0xff] %v3382_v56  ;;  %v3387_v24 = vsel %vm1353_vm12, %v4515_v19, %v1518_v16  ;;  %v3396_v8 = vsel %vm653_vm3, %v4518_v10, %v4517_v41 }
  0xc1   : > { %4516 = vst [vmem:[#allocation40_spill] sm:$0xff] %v3387_v24  ;;  %4519 = vst [vmem:[#allocation41_spill] sm:$0xff] %v3396_v8  ;;  %v4521_v19 = vrot.slane %v3124_v47, 6 }
  0xc2   : > { %v829_v45 = vmul.f32 %v2679_v12, %v3179_v5  ;;  %v949_v3 = vmul.f32 %v2679_v12, %v3215_v23  ;;  %v1196_v46 = vmul.f32 %v2679_v12, %v3133_v50  ;;  %v1316_v41 = vmul.f32 %v2679_v12, %v3146_v53 }
  0xc3   : > { %v3405_v16 = vsel %vm649_vm1, %v4521_v19, %v4520_v22  ;;  %v779_v10 = vmul.f32 %v2678_v14, %v3365_v2  ;;  %v1315_v25 = vmul.f32 %v2678_v14, %v3146_v53  ;;  %v2682_v24 = vpop.permute.xlu0 %2681  ;;  %v1195_v57 = vmul.f32 %v2678_v14, %v3133_v50 }
  0xc4   : > { %4522 = vst [vmem:[#allocation42_spill] sm:$0xff] %v3405_v16  ;;  %v870_v62 = vrot.slane %v829_v45, 1  ;;  %v2684_v52 = vunpack.i.h.bf16 %v2682_v24  ;;  %v2683_v51 = vunpack.i.l.bf16 %v2682_v24  ;;  %v990_v22 = vrot.slane %v949_v3, 2 }
  0xc5   : > { %v1355_v19 = vrot.slane %v1316_v41, 4  ;;  %v828_v40 = vmul.f32 %v2678_v14, %v3179_v5  ;;  %v948_v49 = vmul.f32 %v2678_v14, %v3215_v23  ;;  %v1354_v39 = vrot.slane %v1315_v25, 4 }
  0xc6   : > { %v778_v29 = vmul.f32 %v2684_v52, %v3365_v2  ;;  %v827_v38 = vmul.f32 %v2684_v52, %v3179_v5  ;;  %v947_v16 = vmul.f32 %v2684_v52, %v3215_v23  ;;  %v826_v8 = vmul.f32 %v2683_v51, %v3179_v5 }
  0xc7   : > { %v868_v45 = vrot.slane %v828_v40, 1  ;;  %v946_v56 = vmul.f32 %v2683_v51, %v3215_v23  ;;  %v988_v35 = vrot.slane %v948_v49, 2  ;;  %v1076_v41 = vmul.f32 %v2678_v14, %v3112_v44 }
  0xc8   : > { %v866_v24 = vrot.slane %v827_v38, 1  ;;  %v986_v3 = vrot.slane %v947_v16, 2  ;;  %v1077_v32 = vmul.f32 %v2679_v12, %v3112_v44  ;;  %v777_v25 = vmul.f32 %v2683_v51, %v3365_v2 }
  0xc9   : > { %v865_v36 = vrot.slane %v826_v8, 1  ;;  %v871_v0 = vsel %vm864_vm15, %v868_v45, %v870_v62  ;;  %v985_v11 = vrot.slane %v946_v56, 2  ;;  %v991_v40 = vsel %vm984_vm13, %v988_v35, %v990_v22 }
  0xca   : > { %v869_v52 = vsel %vm864_vm15, %v866_v24, %v868_v45  ;;  %v922_v60 = vadd.f32 %v871_v0, %v779_v10  ;;  %v1114_v9 = vrot.slane %v1076_v41, 2  ;;  %v989_v16 = vsel %vm984_vm13, %v986_v3, %v988_v35 }
  0xcb   : > { %v867_v49 = vsel %vm864_vm15, %v865_v36, %v866_v24  ;;  %v921_v38 = vadd.f32 %v869_v52, %v778_v29  ;;  %v1115_v14 = vrot.slane %v1077_v32, 2  ;;  %v1234_v33 = vrot.slane %v1195_v57, 3 }
  0xcc   : > { %v920_v47 = vadd.f32 %v867_v49, %v777_v25  ;;  %v1042_v15 = vadd.f32 %v991_v40, %v922_v60  ;;  %v1235_v51 = vrot.slane %v1196_v46, 3  ;;  %v780_v8 = vmul.f32 %v2679_v12, %v3365_v2 }
  0xcd   : > { %v987_v56 = vsel %vm984_vm13, %v985_v11, %v986_v3  ;;  %v1041_v42 = vadd.f32 %v989_v16, %v921_v38  ;;  %v1116_v0 = vsel %vm984_vm13, %v1114_v9, %v1115_v14  ;;  %v4523_v45 = vrot.slane %v3150_v54, 2 }
  0xce   : > { %v1040_v10 = vadd.f32 %v987_v56, %v920_v47  ;;  %v1236_v29 = vsel %vm1233_vm14, %v1234_v33, %v1235_v51  ;;  %v1356_v35 = vsel %vm1353_vm12, %v1354_v39, %v1355_v19  ;;  %v4524_v57 = vrot.slane %v3161_v59, 3 }
  0xcf   : > { %v1118_v36 = vsel %vm984_vm13, %v1115_v14, %v4523_v45  ;;  %v4525_v12 = vrot.slane %v3208_v21, 1  ;;  %v1171_v9 = vadd.f32 %v3289_v43, %v1042_v15  ;;  %v4526_v54 = vrot.slane %v3184_v7, 4 }
  0xd0   : > { %v1170_v32 = vadd.f32 %v1118_v36, %v1041_v42  ;;  %v1238_v60 = vsel %vm1233_vm14, %v1235_v51, %v4524_v57  ;;  %v1169_v47 = vadd.f32 %v1116_v0, %v1040_v10  ;;  %v4527_v33 = vrot.slane %v3246_v63, 2  ;;  %v4535_v57 = vld [vmem:[#allocation9_spill] sm:$0xff] }
  0xd1   : > { %v873_v11 = vsel %vm864_vm15, %v870_v62, %v4525_v12  ;;  %v1358_v46 = vsel %vm1353_vm12, %v1355_v19, %v4526_v54  ;;  %v1291_v59 = vadd.f32 %v3308_v26, %v1171_v9  ;;  %v4528_v3 = vrot.slane %v3354_v18, 6 }
  0xd2   : > { %v923_v24 = vadd.f32 %v873_v11, %v780_v8  ;;  %v993_v39 = vsel %vm984_vm13, %v990_v22, %v4527_v33  ;;  %v1290_v42 = vadd.f32 %v1238_v60, %v1170_v32  ;;  %v4529_v41 = vrot.slane %v3203_v34, 6  ;;  %v4537_v11 = vld [vmem:[#allocation36_spill] sm:$0xff] }
  0xd3   : > { %v3460_v43 = vmul.f32 %v3126_v48, %v3179_v5  ;;  %v1289_v7 = vadd.f32 %v1236_v29, %v1169_v47  ;;  %v3464_v19 = vmul.f32 %v3126_v48, %v3215_v23  ;;  %v3468_v22 = vmul.f32 %v3174_v4, %v3112_v44 }
  0xd4   : > { %v1727_v62 = vsel %vm649_vm1, %v4529_v41, %v4528_v3  ;;  %v1043_v15 = vadd.f32 %v993_v39, %v923_v24  ;;  %v1410_v26 = vadd.f32 %v1358_v46, %v1290_v42  ;;  %v1411_v25 = vadd.f32 %v3326_v17, %v1291_v59  ;;  %v4538_v46 = vld [vmem:[#allocation10_spill] sm:$0xff] }
  0xd5   : > { %v874_v34 = vrot.slane %v3460_v43, 1  ;;  %v3474_v52 = vmul.f32 %v3174_v4, %v3133_v50  ;;  %v1409_v40 = vadd.f32 %v1356_v35, %v1289_v7  ;;  %v994_v38 = vrot.slane %v3464_v19, 2 }
  0xd6   : > { %v1172_v49 = vadd.f32 %v3294_v61, %v1043_v15  ;;  %v1123_v16 = vrot.slane %v3468_v22, 2  ;;  %v1539_v14 = vadd.f32 %v3238_v55, %v1410_v26  ;;  %v1540_v51 = vadd.f32 %v3337_v20, %v1411_v25  ;;  %v4543_v15 = vld [vmem:[#allocation38_spill] sm:$0xff]  ;;  %v4557_v22 = vld [vmem:[#allocation8_spill] sm:$0xff] }
  0xd7   : > { %v4530_v8 = vrot.slane %v3358_v6, 6  ;;  %v4531_v17 = vmov %v4528_v3  ;;  %v4532_v0 = vmov %v4525_v12  ;;  %v1538_v10 = vadd.f32 %v3226_v30, %v1409_v40  ;;  %v4541_v3 = vld [vmem:[#allocation21_spill] sm:$0xff] }
  0xd8   : > { %v875_v61 = vsel %vm864_vm15, %v4532_v0, %v874_v34  ;;  %v1292_v45 = vadd.f32 %v3321_v28, %v1172_v49  ;;  %v1243_v20 = vrot.slane %v3474_v52, 3  ;;  %v1659_v36 = vadd.f32 %v3249_v1, %v1539_v14  ;;  %v4544_v14 = vld [vmem:[#allocation22_spill] sm:$0xff] }
  0xd9   : > { %v1729_v56 = vsel %vm649_vm1, %v4531_v17, %v4530_v8  ;;  %v924_v55 = vadd.f32 %v875_v61, %v3409_v31  ;;  %v1660_v18 = vadd.f32 %v3349_v27, %v1540_v51  ;;  %v4533_v29 = vmov %v4527_v33 }
  0xda   : > { %v995_v21 = vsel %vm984_vm13, %v4533_v29, %v994_v38  ;;  %v4534_v30 = vrot.slane %v3233_v37, 2  ;;  %v1658_v31 = vadd.f32 %v3241_v58, %v1538_v10  ;;  %v1412_v35 = vadd.f32 %v3334_v13, %v1292_v45  ;;  %v3524_v58 = vld [vmem:[%s4417_s4] ss:$0 sm:$0xff]  ;;  %v4546_v10 = vld [vmem:[#allocation14_spill] sm:$0xff] }
  0xdb   : > { %v1044_v1 = vadd.f32 %v995_v21, %v924_v55  ;;  %v3511_v27 = vmul.f32 %v3174_v4, %v3146_v53  ;;  %v1779_v32 = vadd.f32 %v1727_v62, %v1659_v36  ;;  %v1780_v63 = vadd.f32 %v1729_v56, %v1660_v18  ;;  %v4536_v13 = vld [vmem:[#allocation25_spill] sm:$0xff]  ;;  %v4547_v55 = vld [vmem:[#allocation4_spill] sm:$0xff] }
  0xdc   : > { %v1124_v28 = vsel %vm984_vm13, %v4534_v30, %v1123_v16  ;;  %v3515_v60 = vmul.f32 %v4535_v57, %v3112_v44  ;;  %v3519_v37 = vmul.f32 %v4535_v57, %v3133_v50  ;;  %v1778_v12 = vadd.f32 %v4536_v13, %v1658_v31  ;;  %v4548_v18 = vld [vmem:[#allocation33_spill] sm:$0xff] }
  0xdd   : > { %v1541_v9 = vadd.f32 %v4537_v11, %v1412_v35  ;;  %v1173_v47 = vadd.f32 %v1124_v28, %v1044_v1  ;;  %v1363_v54 = vrot.slane %v3511_v27, 4  ;;  %v4539_v24 = vrot.slane %v4538_v46, 6  ;;  %v4549_v28 = vld [vmem:[#allocation3_spill] sm:$0xff] }
  0xde   : > { %v4540_v33 = vmov %v4530_v8  ;;  %v1804_v42 = vadd.f32 %v3524_v58, %v1779_v32  ;;  %v1805_v59 = vadd.f32 %v3524_v58, %v1780_v63  ;;  %v4542_v41 = vrot.slane %v4541_v3, 3  ;;  %v4550_v1 = vld [vmem:[#allocation39_spill] sm:$0xff] }
  0xdf   : > { %v1731_v39 = vsel %vm649_vm1, %v4540_v33, %v4539_v24  ;;  %v1803_v7 = vadd.f32 %v3524_v58, %v1778_v12  ;;  %v1661_v26 = vadd.f32 %v4543_v15, %v1541_v9  ;;  %v1125_v40 = vrot.slane %v3515_v60, 2  ;;  %v4551_v24 = vld [vmem:[#allocation41_spill] sm:$0xff]  ;;  %v4554_v15 = vld [vmem:[#allocation20_spill] sm:$0xff] }
  0xe0   : > { %v1244_v62 = vsel %vm1233_vm14, %v4542_v41, %v1243_v20  ;;  %v1822_v6 = vmax.f32 %v1804_v42, 0.0  ;;  %v1823_v49 = vmax.f32 %v1805_v59, 0.0  ;;  %v4545_v51 = vrot.slane %v4544_v14, 4  ;;  %v1875_v42 = vpop.permute.xlu1 %1874  ;;  %v4552_v41 = vld [vmem:[#allocation42_spill] sm:$0xff] }
  0xe1   : > { %v1293_v25 = vadd.f32 %v1244_v62, %v1173_v47  ;;  %v1245_v17 = vrot.slane %v3519_v37, 3  ;;  %v1821_v56 = vmax.f32 %v1803_v7, 0.0  ;;  %v1781_v0 = vadd.f32 %v1731_v39, %v1661_v26  ;;  %v4553_v7 = vld [vmem:[#allocation5_spill] sm:$0xff] }
  0xe2   : > { %v1364_v8 = vsel %vm1353_vm12, %v4545_v51, %v1363_v54  ;;  %v3553_v45 = vmul.f32 %v4546_v10, %v3179_v5  ;;  %v1948_v36 = vmul.f32 %v4547_v55, %v1822_v6  ;;  %v1949_v29 = vmul.f32 %v4548_v18, %v1823_v49 }
  0xe3   : > { %v1413_v61 = vadd.f32 %v1364_v8, %v1293_v25  ;;  %v3559_v21 = vmul.f32 %v4535_v57, %v3146_v53  ;;  %v3563_v30 = vmul.f32 %v4546_v10, %v3215_v23  ;;  %v1947_v31 = vmul.f32 %v4549_v28, %v1821_v56  ;;  %v4555_v25 = vld [vmem:[#allocation6_spill] sm:$0xff] }
  0xe4   : > { %v1806_v35 = vadd.f32 %v3524_v58, %v1781_v0  ;;  %v876_v63 = vrot.slane %v3553_v45, 1  ;;  %v2486_v13 = vpack.c.bf16 %v1948_v36, %v1948_v36  ;;  %v2487_v12 = vpack.c.bf16 %v1949_v29, %v1949_v29  ;;  %v1880_v36 = vpop.permute.xlu0 %1879 }
  0xe5   : > { %v1542_v32 = vadd.f32 %v4550_v1, %v1413_v61  ;;  %v782_v11 = vmul.f32 %v3126_v48, %v3365_v2  ;;  %v996_v9 = vrot.slane %v3563_v30, 2  ;;  %v2485_v47 = vpack.c.bf16 %v1947_v31, %v1947_v31  ;;  %v4558_v61 = vld [vmem:[#allocation35_spill] sm:$0xff] }
  0xe6   : > { %v1824_v46 = vmax.f32 %v1806_v35, 0.0  ;;  %v877_v39 = vsel %vm864_vm15, %v874_v34, %v876_v63  ;;  %2039 = vst.msk [vmem:[%s3578_s19 + $0x4] sm:$0xf] %vm2037_vm0, %v2486_v13  ;;  %2040 = vst.msk [vmem:[%s3578_s19 + $0x8] sm:$0xf] %vm2037_vm0, %v2487_v12  ;;  %v1365_v48 = vrot.slane %v3559_v21, 4  ;;  %v1126_v34 = vsel %vm984_vm13, %v1123_v16, %v1125_v40 }
  0xe7   : > { %v1662_v33 = vadd.f32 %v4551_v24, %v1542_v32  ;;  %v925_v59 = vadd.f32 %v877_v39, %v782_v11  ;;  %v997_v43 = vsel %vm984_vm13, %v994_v38, %v996_v9  ;;  %2038 = vst.msk [vmem:[%s3578_s19] sm:$0xf] %vm2037_vm0, %v2485_v47  ;;  %v1451_v26 = vmul.f32 %v4554_v15, %v4553_v7  ;;  %v4556_v38 = vld [vmem:[#allocation7_spill] sm:$0xff]  ;;  %v4563_v24 = vld [vmem:[#allocation13_spill] sm:$0xff] }
  0xe8   : > { %v1950_v3 = vmul.f32 %v1875_v42, %v1824_v46  ;;  %v1570_v19 = vmul.f32 %v4554_v15, %v4555_v25  ;;  %v1690_v49 = vmul.f32 %v4554_v15, %v4556_v38  ;;  %v3606_v14 = vmul.f32 %v4557_v22, %v3112_v44  ;;  %v4559_v13 = vld [vmem:[#allocation11_spill] sm:$0xff] }
  0xe9   : > { %v1782_v62 = vadd.f32 %v4552_v41, %v1662_v33  ;;  %v1045_v6 = vadd.f32 %v997_v43, %v925_v59  ;;  %v3610_v16 = vmul.f32 %v4557_v22, %v3133_v50  ;;  %v1494_v56 = vrot.slane %v1451_v26, 4 }
  0xea   : > { %v2488_v51 = vpack.c.bf16 %v1950_v3, %v1950_v3  ;;  %v1614_v0 = vrot.slane %v1570_v19, 5  ;;  %v3615_v55 = vmul.f32 %v4556_v38, %v4558_v61  ;;  %v1246_v29 = vsel %vm1233_vm14, %v1243_v20, %v1245_v17  ;;  %v4561_v20 = vld [vmem:[#allocation12_spill] sm:$0xff] }
  0xeb   : > { %v1807_v8 = vadd.f32 %v3524_v58, %v1782_v62  ;;  %v1174_v18 = vadd.f32 %v1126_v34, %v1045_v6  ;;  %v1734_v21 = vrot.slane %v1690_v49, 6  ;;  %v1366_v31 = vsel %vm1353_vm12, %v1363_v54, %v1365_v48  ;;  %v4565_v34 = vld [vmem:[#allocation17_spill] sm:$0xff] }
  0xec   : > { %2041 = vst.msk [vmem:[%s3578_s19 + $0xc] sm:$0xf] %vm2037_vm0, %v2488_v51  ;;  %v1127_v35 = vrot.slane %v3606_v14, 2  ;;  %v3630_v1 = vmul.f32 %v4557_v22, %v3146_v53  ;;  %v4560_v12 = vrot.slane %v4559_v13, 4  ;;  %v4562_v11 = vrot.slane %v4561_v20, 5 }
  0xed   : > { %v1825_v28 = vmax.f32 %v1807_v8, 0.0  ;;  %v1294_v32 = vadd.f32 %v1246_v29, %v1174_v18  ;;  %v1247_v46 = vrot.slane %v3610_v16, 3  ;;  %v4564_v54 = vrot.slane %v4563_v24, 6 }
  0xee   : > { %v1495_v52 = vsel %vm1353_vm12, %v4560_v12, %v1494_v56  ;;  %v1615_v47 = vsel %vm653_vm3, %v4562_v11, %v1614_v0  ;;  %v1367_v39 = vrot.slane %v3630_v1, 4  ;;  %v833_v42 = vmul.f32 %v3174_v4, %v3179_v5 }
  0xef   : > { %v1951_v27 = vmul.f32 %v1880_v36, %v1825_v28  ;;  %v1735_v33 = vsel %vm649_vm1, %v4564_v54, %v1734_v21  ;;  %v1414_v59 = vadd.f32 %v1366_v31, %v1294_v32  ;;  %v953_v43 = vmul.f32 %v3174_v4, %v3215_v23 }
  0xf0   : > { %v1452_v3 = vmul.f32 %v4565_v34, %v4553_v7  ;;  %v3651_v41 = vmul.f32 %v4565_v34, %v4555_v25  ;;  %v783_v26 = vmul.f32 %v4546_v10, %v3365_v2  ;;  %v878_v19 = vrot.slane %v833_v42, 1 }
  0xf1   : > { %v2489_v62 = vpack.c.bf16 %v1951_v27, %v1951_v27  ;;  %v3657_v6 = vmul.f32 %v4565_v34, %v4556_v38  ;;  %v1543_v49 = vadd.f32 %v1495_v52, %v1414_v59  ;;  %v998_v16 = vrot.slane %v953_v43, 2  ;;  %v1885_v43 = vpop.permute.xlu1 %1884 }
  0xf2   : > { %v1496_v51 = vrot.slane %v1452_v3, 4  ;;  %v1616_v8 = vrot.slane %v3651_v41, 5  ;;  %v1128_v61 = vsel %vm984_vm13, %v1125_v40, %v1127_v35  ;;  %v879_v10 = vsel %vm864_vm15, %v876_v63, %v878_v19 }
  0xf3   : > { %2042 = vst.msk [vmem:[%s3578_s19 + $0x10] sm:$0xf] %vm2037_vm0, %v2489_v62  ;;  %v834_v36 = vmul.f32 %v4535_v57, %v3179_v5  ;;  %v3674_v18 = vmul.f32 %v4535_v57, %v3215_v23  ;;  %v1663_v29 = vadd.f32 %v1615_v47, %v1543_v49  ;;  %v1248_v28 = vsel %vm1233_vm14, %v1245_v17, %v1247_v46  ;;  %v4566_v17 = vld [vmem:[#allocation16_spill] sm:$0xff] }
  0xf4   : > { %v926_v31 = vadd.f32 %v879_v10, %v783_v26  ;;  %v1736_v60 = vrot.slane %v3657_v6, 6  ;;  %v1368_v40 = vsel %vm1353_vm12, %v1365_v48, %v1367_v39  ;;  %v999_v45 = vsel %vm984_vm13, %v996_v9, %v998_v16 }
  0xf5   : > { %v1497_v63 = vsel %vm1353_vm12, %v1494_v56, %v1496_v51  ;;  %v880_v32 = vrot.slane %v834_v36, 1  ;;  %v1783_v13 = vadd.f32 %v1735_v33, %v1663_v29  ;;  %v1617_v37 = vsel %vm653_vm3, %v1614_v0, %v1616_v8 }
  0xf6   : > { %v1046_v12 = vadd.f32 %v999_v45, %v926_v31  ;;  %v1453_v52 = vmul.f32 %v4566_v17, %v4553_v7  ;;  %v1000_v20 = vrot.slane %v3674_v18, 2  ;;  %v3695_v48 = vmul.f32 %v4566_v17, %v4555_v25 }
  0xf7   : > { %v784_v30 = vmul.f32 %v3174_v4, %v3365_v2  ;;  %v881_v9 = vsel %vm864_vm15, %v878_v19, %v880_v32  ;;  %v1808_v56 = vadd.f32 %v3524_v58, %v1783_v13  ;;  %v1737_v47 = vsel %vm649_vm1, %v1734_v21, %v1736_v60 }
  0xf8   : > { %v1175_v11 = vadd.f32 %v1128_v61, %v1046_v12  ;;  %v3704_v0 = vmul.f32 %v4566_v17, %v4556_v38  ;;  %v1001_v24 = vsel %vm984_vm13, %v998_v16, %v1000_v20  ;;  %v1084_v54 = vmul.f32 %v4554_v15, %v3112_v44 }
  0xf9   : > { %v927_v27 = vadd.f32 %v881_v9, %v784_v30  ;;  %v3711_v4 = vmul.f32 %v4554_v15, %v3133_v50  ;;  %v1826_v33 = vmax.f32 %v1808_v56, 0.0  ;;  %v1498_v59 = vrot.slane %v1453_v52, 4 }
  0xfa   : > { %v1295_v42 = vadd.f32 %v1248_v28, %v1175_v11  ;;  %v3715_v21 = vmul.f32 %v4554_v15, %v3146_v53  ;;  %v1618_v3 = vrot.slane %v3695_v48, 5  ;;  %v1129_v26 = vrot.slane %v1084_v54, 2 }
  0xfb   : > { %v1047_v62 = vadd.f32 %v1001_v24, %v927_v27  ;;  %v1249_v19 = vrot.slane %v3711_v4, 3  ;;  %v1952_v6 = vmul.f32 %v1885_v43, %v1826_v33  ;;  %v1738_v16 = vrot.slane %v3704_v0, 6 }
  0xfc   : > { %v1415_v49 = vadd.f32 %v1368_v40, %v1295_v42  ;;  %v1499_v61 = vsel %vm1353_vm12, %v1496_v51, %v1498_v59  ;;  %v1130_v10 = vsel %vm984_vm13, %v1127_v35, %v1129_v26  ;;  %v1369_v18 = vrot.slane %v3715_v21, 4  ;;  %v4567_v35 = vld [vmem:[#allocation15_spill] sm:$0xff]  ;;  %v1890_v42 = vpop.permute.xlu0 %1889 }
  0xfd   : > { %v1250_v36 = vsel %vm1233_vm14, %v1247_v46, %v1249_v19  ;;  %v3728_v29 = vmul.f32 %v4557_v22, %v3179_v5  ;;  %v2490_v28 = vpack.c.bf16 %v1952_v6, %v1952_v6  ;;  %v1176_v45 = vadd.f32 %v1130_v10, %v1047_v62 }
  0xfe   : > { %v1544_v31 = vadd.f32 %v1497_v63, %v1415_v49  ;;  %v785_v40 = vmul.f32 %v4535_v57, %v3365_v2  ;;  %v3735_v14 = vmul.f32 %v4557_v22, %v3215_v23  ;;  %v3739_v46 = vmul.f32 %v4567_v35, %v4553_v7 }
  0xff   : > { %v882_v51 = vrot.slane %v3728_v29, 1  ;;  %v3743_v13 = vmul.f32 %v4567_v35, %v4555_v25  ;;  %2043 = vst.msk [vmem:[%s3578_s19 + $0x14] sm:$0xf] %vm2037_vm0, %v2490_v28  ;;  %v1296_v12 = vadd.f32 %v1250_v36, %v1176_v45  ;;  %v3749_v57 = vmul.f32 %v4567_v35, %v4556_v38 }
 0x100   : > { %v1664_v63 = vadd.f32 %v1617_v37, %v1544_v31  ;;  %v3753_v52 = vmul.f32 %v4565_v34, %v3112_v44  ;;  %v1370_v48 = vsel %vm1353_vm12, %v1367_v39, %v1369_v18  ;;  %v1002_v9 = vrot.slane %v3735_v14, 2 }
 0x101   : > { %v883_v30 = vsel %vm864_vm15, %v880_v32, %v882_v51  ;;  %v1500_v56 = vrot.slane %v3739_v46, 4  ;;  %v1416_v11 = vadd.f32 %v1370_v48, %v1296_v12  ;;  %v1619_v0 = vsel %vm653_vm3, %v1616_v8, %v1618_v3 }
 0x102   : > { %v1784_v37 = vadd.f32 %v1737_v47, %v1664_v63  ;;  %v928_v27 = vadd.f32 %v883_v30, %v785_v40  ;;  %v1739_v24 = vsel %vm649_vm1, %v1736_v60, %v1738_v16  ;;  %v1003_v54 = vsel %vm984_vm13, %v1000_v20, %v1002_v9 }
 0x103   : > { %v1620_v1 = vrot.slane %v3743_v13, 5  ;;  %v1131_v39 = vrot.slane %v3753_v52, 2  ;;  %v1545_v4 = vadd.f32 %v1499_v61, %v1416_v11  ;;  %v1740_v47 = vrot.slane %v3749_v57, 6  ;;  %v4568_v11 = vld [vmem:[#allocation24_spill] sm:$0xff] }
 0x104   : > { %v1809_v32 = vadd.f32 %v3524_v58, %v1784_v37  ;;  %v1048_v33 = vadd.f32 %v1003_v54, %v928_v27  ;;  %v1501_v41 = vsel %vm1353_vm12, %v1498_v59, %v1500_v56  ;;  %v1204_v60 = vmul.f32 %v4565_v34, %v3133_v50 }
 0x105   : > { %v1132_v8 = vsel %vm984_vm13, %v1129_v26, %v1131_v39  ;;  %v1324_v20 = vmul.f32 %v4565_v34, %v3146_v53  ;;  %v1665_v43 = vadd.f32 %v1619_v0, %v1545_v4  ;;  %v3780_v6 = vmul.f32 %v4566_v17, %v3112_v44 }
 0x106   : > { %v1827_v21 = vmax.f32 %v1809_v32, 0.0  ;;  %v1177_v62 = vadd.f32 %v1132_v8, %v1048_v33  ;;  %v1251_v49 = vrot.slane %v1204_v60, 3  ;;  %v3784_v59 = vmul.f32 %v4566_v17, %v3133_v50 }
 0x107   : > { %v1371_v61 = vrot.slane %v1324_v20, 4  ;;  %v3788_v26 = vmul.f32 %v4566_v17, %v3146_v53  ;;  %v1785_v36 = vadd.f32 %v1739_v24, %v1665_v43  ;;  %v1621_v29 = vsel %vm653_vm3, %v1618_v3, %v1620_v1  ;;  %v1895_v3 = vpop.permute.xlu1 %1894 }
 0x108   : > { %v1953_v10 = vmul.f32 %v1890_v42, %v1827_v21  ;;  %v3793_v28 = vmul.f32 %v4554_v15, %v3179_v5  ;;  %v1741_v31 = vsel %vm649_vm1, %v1738_v16, %v1740_v47  ;;  %v1252_v45 = vsel %vm1233_vm14, %v1249_v19, %v1251_v49 }
 0x109   : > { %v786_v40 = vmul.f32 %v4557_v22, %v3365_v2  ;;  %v1133_v14 = vrot.slane %v3780_v6, 2  ;;  %v1810_v63 = vadd.f32 %v3524_v58, %v1785_v36  ;;  %v1297_v12 = vadd.f32 %v1252_v45, %v1177_v62  ;;  %v4569_v45 = vld [vmem:[#allocation23_spill] sm:$0xff] }
 0x10a   : > { %v2491_v13 = vpack.c.bf16 %v1953_v10, %v1953_v10  ;;  %v884_v57 = vrot.slane %v3793_v28, 1  ;;  %v1372_v52 = vsel %vm1353_vm12, %v1369_v18, %v1371_v61  ;;  %v1253_v48 = vrot.slane %v3784_v59, 3 }
 0x10b   : > { %v1373_v16 = vrot.slane %v3788_v26, 4  ;;  %v956_v19 = vmul.f32 %v4554_v15, %v3215_v23  ;;  %v1828_v22 = vmax.f32 %v1810_v63, 0.0  ;;  %v1417_v30 = vadd.f32 %v1372_v52, %v1297_v12 }
 0x10c   : > { %2044 = vst.msk [vmem:[%s3578_s19 + $0x18] sm:$0xf] %vm2037_vm0, %v2491_v13  ;;  %v885_v37 = vsel %vm864_vm15, %v882_v51, %v884_v57  ;;  %v1455_v0 = vmul.f32 %v4568_v11, %v4553_v7  ;;  %v1574_v18 = vmul.f32 %v4568_v11, %v4555_v25  ;;  %v3816_v54 = vmul.f32 %v4568_v11, %v4556_v38  ;;  %v1900_v13 = vpop.permute.xlu0 %1899 }
 0x10d   : > { %v929_v27 = vadd.f32 %v885_v37, %v786_v40  ;;  %v1004_v24 = vrot.slane %v956_v19, 2  ;;  %v1954_v32 = vmul.f32 %v1895_v3, %v1828_v22  ;;  %v1546_v4 = vadd.f32 %v1501_v41, %v1417_v30 }
 0x10e   : > { %v1502_v33 = vrot.slane %v1455_v0, 4  ;;  %v3820_v42 = vmul.f32 %v4567_v35, %v3112_v44  ;;  %v1622_v8 = vrot.slane %v1574_v18, 5  ;;  %v1742_v60 = vrot.slane %v3816_v54, 6 }
 0x10f   : > { %v1005_v51 = vsel %vm984_vm13, %v1002_v9, %v1004_v24  ;;  %v3826_v20 = vmul.f32 %v4567_v35, %v3133_v50  ;;  %v2492_v21 = vpack.c.bf16 %v1954_v32, %v1954_v32  ;;  %v1666_v43 = vadd.f32 %v1621_v29, %v1546_v4 }
 0x110   : > { %v1049_v62 = vadd.f32 %v1005_v51, %v929_v27  ;;  %v1134_v6 = vsel %vm984_vm13, %v1131_v39, %v1133_v14  ;;  %v1254_v41 = vsel %vm1233_vm14, %v1251_v49, %v1253_v48  ;;  %v1374_v59 = vsel %vm1353_vm12, %v1371_v61, %v1373_v16 }
 0x111   : > { %v1503_v9 = vsel %vm1353_vm12, %v1500_v56, %v1502_v33  ;;  %v1623_v26 = vsel %vm653_vm3, %v1620_v1, %v1622_v8  ;;  %2045 = vst.msk [vmem:[%s3578_s19 + $0x1c] sm:$0xf] %vm2037_vm0, %v2492_v21  ;;  %v1786_v10 = vadd.f32 %v1741_v31, %v1666_v43  ;;  %v1135_v28 = vrot.slane %v3820_v42, 2 }
 0x112   : > { %v1178_v36 = vadd.f32 %v1134_v6, %v1049_v62  ;;  %v3840_v29 = vmul.f32 %v4567_v35, %v3146_v53  ;;  %v1743_v39 = vsel %vm649_vm1, %v1740_v47, %v1742_v60  ;;  %v1255_v49 = vrot.slane %v3826_v20, 3  ;;  %v4570_v6 = vld [vmem:[#allocation19_spill] sm:$0xff] }
 0x113   : > { %v837_v46 = vmul.f32 %v4565_v34, %v3179_v5  ;;  %v957_v56 = vmul.f32 %v4565_v34, %v3215_v23  ;;  %v1811_v1 = vadd.f32 %v3524_v58, %v1786_v10  ;;  %v1456_v40 = vmul.f32 %v4569_v45, %v4553_v7 }
 0x114   : > { %v1298_v61 = vadd.f32 %v1254_v41, %v1178_v36  ;;  %v1375_v31 = vrot.slane %v3840_v29, 4  ;;  %v3854_v47 = vmul.f32 %v4569_v45, %v4555_v25  ;;  %v3858_v3 = vmul.f32 %v4569_v45, %v4556_v38 }
 0x115   : > { %v886_v63 = vrot.slane %v837_v46, 1  ;;  %v1006_v12 = vrot.slane %v957_v56, 2  ;;  %v1829_v52 = vmax.f32 %v1811_v1, 0.0  ;;  %v1136_v22 = vsel %vm984_vm13, %v1133_v14, %v1135_v28 }
 0x116   : > { %v1418_v19 = vadd.f32 %v1374_v59, %v1298_v61  ;;  %v787_v30 = vmul.f32 %v4554_v15, %v3365_v2  ;;  %v1256_v37 = vsel %vm1233_vm14, %v1253_v48, %v1255_v49  ;;  %v1504_v27 = vrot.slane %v1456_v40, 4  ;;  %v1905_v61 = vpop.permute.xlu1 %1904 }
 0x117   : > { %v887_v0 = vsel %vm864_vm15, %v884_v57, %v886_v63  ;;  %v1624_v18 = vrot.slane %v3854_v47, 5  ;;  %v1955_v54 = vmul.f32 %v1900_v13, %v1829_v52  ;;  %v1744_v51 = vrot.slane %v3858_v3, 6  ;;  %v1910_v47 = vpop.permute.xlu0 %1909 }
 0x118   : > { %v1547_v32 = vadd.f32 %v1503_v9, %v1418_v19  ;;  %v930_v4 = vadd.f32 %v887_v0, %v787_v30  ;;  %v1376_v14 = vsel %vm1353_vm12, %v1373_v16, %v1375_v31  ;;  %v1007_v15 = vsel %vm984_vm13, %v1004_v24, %v1006_v12 }
 0x119   : > { %v838_v48 = vmul.f32 %v4566_v17, %v3179_v5  ;;  %v3879_v57 = vmul.f32 %v4566_v17, %v3215_v23  ;;  %v2493_v21 = vpack.c.bf16 %v1955_v54, %v1955_v54  ;;  %v3883_v41 = vmul.f32 %v4570_v6, %v4553_v7 }
 0x11a   : > { %v1667_v43 = vadd.f32 %v1623_v26, %v1547_v32  ;;  %v1050_v62 = vadd.f32 %v1007_v15, %v930_v4  ;;  %v1505_v59 = vsel %vm1353_vm12, %v1502_v33, %v1504_v27  ;;  %v1625_v16 = vsel %vm653_vm3, %v1622_v8, %v1624_v18 }
 0x11b   : > { %v888_v24 = vrot.slane %v838_v48, 1  ;;  %v3891_v9 = vmul.f32 %v4570_v6, %v4555_v25  ;;  %2046 = vst.msk [vmem:[%s3578_s19 + $0x20] sm:$0xf] %vm2037_vm0, %v2493_v21  ;;  %v1745_v7 = vsel %vm649_vm1, %v1742_v60, %v1744_v51  ;;  %v788_v33 = vmul.f32 %v4565_v34, %v3365_v2  ;;  %v4571_v48 = vld [vmem:[#allocation18_spill] sm:$0xff] }
 0x11c   : > { %v1787_v10 = vadd.f32 %v1743_v39, %v1667_v43  ;;  %v1179_v26 = vadd.f32 %v1136_v22, %v1050_v62  ;;  %v1008_v36 = vrot.slane %v3879_v57, 2  ;;  %v1506_v8 = vrot.slane %v3883_v41, 4  ;;  %v3961_v57 = vld [vmem:[%s4416_s3 + $0x7] ss:$0 sm:$0xff] }
 0x11d   : > { %v3904_v46 = vmul.f32 %v4570_v6, %v4556_v38  ;;  %v889_v25 = vsel %vm864_vm15, %v886_v63, %v888_v24  ;;  %v1088_v60 = vmul.f32 %v4568_v11, %v3112_v44  ;;  %v1626_v34 = vrot.slane %v3891_v9, 5  ;;  %v1915_v9 = vpop.permute.xlu1 %1914 }
 0x11e   : > { %v1812_v39 = vadd.f32 %v3524_v58, %v1787_v10  ;;  %v1299_v56 = vadd.f32 %v1256_v37, %v1179_v26  ;;  %v931_v1 = vadd.f32 %v889_v25, %v788_v33  ;;  %v1009_v40 = vsel %vm984_vm13, %v1006_v12, %v1008_v36 }
 0x11f   : > { %v3914_v13 = vmul.f32 %v4568_v11, %v3133_v50  ;;  %v3918_v38 = vmul.f32 %v4568_v11, %v3146_v53  ;;  %v1137_v22 = vrot.slane %v1088_v60, 2  ;;  %v1746_v30 = vrot.slane %v3904_v46, 6 }
 0x120   : > { %v1830_v63 = vmax.f32 %v1812_v39, 0.0  ;;  %v1419_v52 = vadd.f32 %v1376_v14, %v1299_v56  ;;  %v1051_v19 = vadd.f32 %v1009_v40, %v931_v1  ;;  %v1507_v12 = vsel %vm1353_vm12, %v1504_v27, %v1506_v8 }
 0x121   : > { %v1257_v44 = vrot.slane %v3914_v13, 3  ;;  %v1377_v37 = vrot.slane %v3918_v38, 4  ;;  %v1138_v53 = vsel %vm984_vm13, %v1135_v28, %v1137_v22  ;;  %v3931_v54 = vmul.f32 %v4567_v35, %v3179_v5  ;;  %v3946_v5 = vld [vmem:[%s4416_s3 + $0x6] ss:$0 sm:$0xff]  ;;  %v4019_v13 = vld [vmem:[%s4416_s3 + $0x5] ss:$0 sm:$0xff] }
 0x122   : > { %v1956_v50 = vmul.f32 %v1905_v61, %v1830_v63  ;;  %v1548_v0 = vadd.f32 %v1505_v59, %v1419_v52  ;;  %v1180_v32 = vadd.f32 %v1138_v53, %v1051_v19  ;;  %v789_v14 = vmul.f32 %v4566_v17, %v3365_v2  ;;  %v3984_v59 = vld [vmem:[%s4416_s3 + $0x3] ss:$0 sm:$0xff]  ;;  %v4010_v61 = vld [vmem:[%s4416_s3 + $0x4] ss:$0 sm:$0xff] }
 0x123   : > { %v1258_v4 = vsel %vm1233_vm14, %v1255_v49, %v1257_v44  ;;  %v3940_v27 = vmul.f32 %v4567_v35, %v3215_v23  ;;  %v890_v28 = vrot.slane %v3931_v54, 1  ;;  %v3950_v20 = vmul.f32 %v3946_v5, %v4571_v48 }
 0x124   : > { %v2494_v42 = vpack.c.bf16 %v1956_v50, %v1956_v50  ;;  %v1668_v15 = vadd.f32 %v1625_v16, %v1548_v0  ;;  %v1300_v49 = vadd.f32 %v1258_v4, %v1180_v32  ;;  %v1378_v23 = vsel %vm1353_vm12, %v1375_v31, %v1377_v37  ;;  %v3975_v31 = vld [vmem:[%s4416_s3 + $0x8] ss:$0 sm:$0xff] }
 0x125   : > { %v1010_v17 = vrot.slane %v3940_v27, 2  ;;  %v3965_v21 = vmul.f32 %v3961_v57, %v4571_v48  ;;  %v891_v29 = vsel %vm864_vm15, %v888_v24, %v890_v28  ;;  %v3979_v62 = vmul.f32 %v3975_v31, %v4571_v48 }
 0x126   : > { %2047 = vst.msk [vmem:[%s3578_s19 + $0x24] sm:$0xf] %vm2037_vm0, %v2494_v42  ;;  %v1788_v43 = vadd.f32 %v1745_v7, %v1668_v15  ;;  %v3988_v16 = vmul.f32 %v3984_v59, %v4569_v45  ;;  %v1420_v10 = vadd.f32 %v1378_v23, %v1300_v49  ;;  %v1627_v24 = vsel %vm653_vm3, %v1624_v18, %v1626_v34 }
 0x127   : > { %v932_v26 = vadd.f32 %v891_v29, %v789_v14  ;;  %v1508_v7 = vrot.slane %v3950_v20, 4  ;;  %v1747_v25 = vsel %vm649_vm1, %v1744_v51, %v1746_v30  ;;  %v1011_v39 = vsel %vm984_vm13, %v1008_v36, %v1010_v17 }
 0x128   : > { %v1813_v33 = vadd.f32 %v3524_v58, %v1788_v43  ;;  %v1139_v56 = vrot.slane %v3988_v16, 2  ;;  %v1549_v1 = vadd.f32 %v1507_v12, %v1420_v10  ;;  %v1628_v60 = vrot.slane %v3965_v21, 5 }
 0x129   : > { %v1052_v18 = vadd.f32 %v1011_v39, %v932_v26  ;;  %v1208_v3 = vmul.f32 %v4010_v61, %v4569_v45  ;;  %v1748_v40 = vrot.slane %v3979_v62, 6  ;;  %v1328_v63 = vmul.f32 %v4019_v13, %v4569_v45 }
 0x12a   : > { %v1831_v51 = vmax.f32 %v1813_v33, 0.0  ;;  %v1140_v36 = vsel %vm984_vm13, %v1137_v22, %v1139_v56  ;;  %v1669_v52 = vadd.f32 %v1627_v24, %v1549_v1  ;;  %v1509_v19 = vsel %vm1353_vm12, %v1506_v8, %v1508_v7  ;;  %v4042_v8 = vld [vmem:[%s4416_s3 + $0x1] ss:$0 sm:$0xff] }
 0x12b   : > { %v1181_v12 = vadd.f32 %v1140_v36, %v1052_v18  ;;  %v1259_v50 = vrot.slane %v1208_v3, 3  ;;  %v1379_v53 = vrot.slane %v1328_v63, 4  ;;  %v4028_v22 = vmul.f32 %v3984_v59, %v4570_v6 }
 0x12c   : > { %v1957_v0 = vmul.f32 %v1910_v47, %v1831_v51  ;;  %v4032_v32 = vmul.f32 %v4010_v61, %v4570_v6  ;;  %v1789_v4 = vadd.f32 %v1747_v25, %v1669_v52  ;;  %v4037_v41 = vmul.f32 %v4019_v13, %v4570_v6 }
 0x12d   : > { %v1260_v14 = vsel %vm1233_vm14, %v1257_v44, %v1259_v50  ;;  %v4046_v42 = vmul.f32 %v4042_v8, %v4568_v11  ;;  %v1629_v44 = vsel %vm653_vm3, %v1626_v34, %v1628_v60  ;;  %v1749_v20 = vsel %vm649_vm1, %v1746_v30, %v1748_v40  ;;  %v4069_v30 = vld [vmem:[%s4416_s3 + $0x2] ss:$0 sm:$0xff] }
 0x12e   : > { %v2495_v15 = vpack.c.bf16 %v1957_v0, %v1957_v0  ;;  %v1301_v49 = vadd.f32 %v1260_v14, %v1181_v12  ;;  %v1814_v23 = vadd.f32 %v3524_v58, %v1789_v4  ;;  %v1380_v43 = vsel %vm1353_vm12, %v1377_v37, %v1379_v53  ;;  %v4572_v37 = vld [vmem:[#allocation34_spill] sm:$0xff] }
 0x12f   : > { %v790_v29 = vmul.f32 %v4567_v35, %v3365_v2  ;;  %v892_v62 = vrot.slane %v4046_v42, 1  ;;  %v1141_v46 = vrot.slane %v4028_v22, 2  ;;  %v960_v38 = vmul.f32 %v4069_v30, %v4568_v11 }
 0x130   : > { %2048 = vst.msk [vmem:[%s3578_s19 + $0x28] sm:$0xf] %vm2037_vm0, %v2495_v15  ;;  %v1421_v34 = vadd.f32 %v1380_v43, %v1301_v49  ;;  %v4075_v16 = vmul.f32 %v3946_v5, %v4572_v37  ;;  %v1832_v35 = vmax.f32 %v1814_v23, 0.0  ;;  %v1261_v10 = vrot.slane %v4032_v32, 3  ;;  %v4573_v49 = vld [vmem:[#allocation26_spill] sm:$0xff] }
 0x131   : > { %v1381_v24 = vrot.slane %v4037_v41, 4  ;;  %v893_v26 = vsel %vm864_vm15, %v890_v28, %v892_v62  ;;  %v1012_v39 = vrot.slane %v960_v38, 2  ;;  %v4085_v18 = vmul.f32 %v3961_v57, %v4572_v37 }
 0x132   : > { %v1550_v33 = vadd.f32 %v1509_v19, %v1421_v34  ;;  %v933_v25 = vadd.f32 %v893_v26, %v790_v29  ;;  %v1510_v47 = vrot.slane %v4075_v16, 4  ;;  %v1958_v1 = vmul.f32 %v1915_v9, %v1832_v35 }
 0x133   : > { %v4089_v3 = vmul.f32 %v3975_v31, %v4572_v37  ;;  %v4093_v54 = vmul.f32 %v3984_v59, %v4571_v48  ;;  %v1013_v51 = vsel %vm984_vm13, %v1010_v17, %v1012_v39  ;;  %v4103_v63 = vmul.f32 %v4010_v61, %v4571_v48 }
 0x134   : > { %v1670_v28 = vadd.f32 %v1629_v44, %v1550_v33  ;;  %v1511_v36 = vsel %vm1353_vm12, %v1508_v7, %v1510_v47  ;;  %v2496_v52 = vpack.c.bf16 %v1958_v1, %v1958_v1  ;;  %v1053_v19 = vadd.f32 %v1013_v51, %v933_v25  ;;  %v1920_v44 = vpop.permute.xlu0 %1919 }
 0x135   : > { %v1630_v12 = vrot.slane %v4085_v18, 5  ;;  %v1750_v0 = vrot.slane %v4089_v3, 6  ;;  %v1142_v32 = vsel %vm984_vm13, %v1139_v56, %v1141_v46  ;;  %v1262_v27 = vsel %vm1233_vm14, %v1259_v50, %v1261_v10 }
 0x136   : > { %v1790_v22 = vadd.f32 %v1749_v20, %v1670_v28  ;;  %v4111_v17 = vmul.f32 %v4019_v13, %v4571_v48  ;;  %2049 = vst.msk [vmem:[%s3578_s19 + $0x2c] sm:$0xf] %vm2037_vm0, %v2496_v52  ;;  %v1182_v7 = vadd.f32 %v1142_v32, %v1053_v19  ;;  %v1143_v56 = vrot.slane %v4093_v54, 2  ;;  %v4575_v54 = vld [vmem:[#allocation37_spill] sm:$0xff] }
 0x137   : > { %v1631_v4 = vsel %vm653_vm3, %v1628_v60, %v1630_v12  ;;  %v1751_v14 = vsel %vm649_vm1, %v1748_v40, %v1750_v0  ;;  %v1382_v41 = vsel %vm1353_vm12, %v1379_v53, %v1381_v24  ;;  %v1263_v42 = vrot.slane %v4103_v63, 3 }
 0x138   : > { %v1815_v50 = vadd.f32 %v3524_v58, %v1790_v22  ;;  %v1383_v15 = vrot.slane %v4111_v17, 4  ;;  %v1302_v20 = vadd.f32 %v1262_v27, %v1182_v7  ;;  %v841_v21 = vmul.f32 %v4042_v8, %v4569_v45  ;;  %v4574_v27 = vld [vmem:[#allocation27_spill] sm:$0xff] }
 0x139   : > { %v961_v60 = vmul.f32 %v4069_v30, %v4569_v45  ;;  %v1460_v40 = vmul.f32 %v3946_v5, %v4573_v49  ;;  %v791_v43 = vmul.f32 %v4568_v11, %v3365_v2  ;;  %v4138_v53 = vmul.f32 %v3961_v57, %v4573_v49 }
 0x13a   : > { %v1833_v23 = vmax.f32 %v1815_v50, 0.0  ;;  %v4142_v29 = vmul.f32 %v3975_v31, %v4573_v49  ;;  %v1422_v9 = vadd.f32 %v1382_v41, %v1302_v20  ;;  %v1144_v34 = vsel %vm984_vm13, %v1141_v46, %v1143_v56 }
 0x13b   : > { %v894_v38 = vrot.slane %v841_v21, 1  ;;  %v1014_v35 = vrot.slane %v961_v60, 2  ;;  %v1264_v2 = vsel %vm1233_vm14, %v1261_v10, %v1263_v42  ;;  %v1384_v11 = vsel %vm1353_vm12, %v1381_v24, %v1383_v15 }
 0x13c   : > { %v1959_v26 = vmul.f32 %v1920_v44, %v1833_v23  ;;  %v4155_v33 = vmul.f32 %v4042_v8, %v4570_v6  ;;  %v1551_v25 = vadd.f32 %v1511_v36, %v1422_v9  ;;  %v1512_v46 = vrot.slane %v1460_v40, 4 }
 0x13d   : > { %v895_v1 = vsel %vm864_vm15, %v892_v62, %v894_v38  ;;  %v1632_v28 = vrot.slane %v4138_v53, 5  ;;  %v1015_v19 = vsel %vm984_vm13, %v1012_v39, %v1014_v35  ;;  %v1752_v10 = vrot.slane %v4142_v29, 6 }
 0x13e   : > { %v2497_v51 = vpack.c.bf16 %v1959_v26, %v1959_v26  ;;  %v934_v52 = vadd.f32 %v895_v1, %v791_v43  ;;  %v1671_v22 = vadd.f32 %v1631_v4, %v1551_v25  ;;  %v896_v32 = vrot.slane %v4155_v33, 1  ;;  %v4181_v4 = vld [vmem:[%s4416_s3] ss:$0 sm:$0xff] }
 0x13f   : > { %v962_v24 = vmul.f32 %v4069_v30, %v4570_v6  ;;  %v4166_v36 = vmul.f32 %v3946_v5, %v4574_v27  ;;  %v4172_v7 = vmul.f32 %v3961_v57, %v4574_v27  ;;  %v4176_v39 = vmul.f32 %v3975_v31, %v4574_v27 }
 0x140   : > { %2050 = vst.msk [vmem:[%s3578_s19 + $0x30] sm:$0xf] %vm2037_vm0, %v2497_v51  ;;  %v1054_v62 = vadd.f32 %v1015_v19, %v934_v52  ;;  %v792_v5 = vmul.f32 %v4181_v4, %v4569_v45  ;;  %v1791_v50 = vadd.f32 %v1751_v14, %v1671_v22  ;;  %v897_v20 = vsel %vm864_vm15, %v894_v38, %v896_v32  ;;  %v1925_v14 = vpop.permute.xlu1 %1924 }
 0x141   : > { %v1016_v41 = vrot.slane %v962_v24, 2  ;;  %v1514_v44 = vrot.slane %v4166_v36, 4  ;;  %v1634_v21 = vrot.slane %v4172_v7, 5  ;;  %v1754_v31 = vrot.slane %v4176_v39, 6  ;;  %v2703_v7 = vld [vmem:[%s4417_s4] ss:$0 sm:$0xff] }
 0x142   : > { %v1183_v57 = vadd.f32 %v1144_v34, %v1054_v62  ;;  %v935_v60 = vadd.f32 %v897_v20, %v792_v5  ;;  %v1816_v40 = vadd.f32 %v3524_v58, %v1791_v50  ;;  %v1092_v43 = vmul.f32 %v3984_v59, %v4572_v37  ;;  %v4589_v39 = vld [vmem:[#allocation40_spill] sm:$0xff] }
 0x143   : > { %v1017_v23 = vsel %vm984_vm13, %v1014_v35, %v1016_v41  ;;  %v1211_v45 = vmul.f32 %v4010_v61, %v4572_v37  ;;  %v1331_v9 = vmul.f32 %v4019_v13, %v4572_v37  ;;  %v1515_v34 = vsel %vm1353_vm12, %v1512_v46, %v1514_v44 }
 0x144   : > { %v1303_v53 = vadd.f32 %v1264_v2, %v1183_v57  ;;  %v1055_v29 = vadd.f32 %v1017_v23, %v935_v60  ;;  %v1834_v38 = vmax.f32 %v1816_v40, 0.0  ;;  %v1145_v26 = vrot.slane %v1092_v43, 2  ;;  %v4576_v23 = vld [vmem:[#allocation28_spill] sm:$0xff] }
 0x145   : > { %v1265_v33 = vrot.slane %v1211_v45, 3  ;;  %v1635_v59 = vsel %vm653_vm3, %v1632_v28, %v1634_v21  ;;  %v1513_v2 = vsel %vm1353_vm12, %v1510_v47, %v1512_v46  ;;  %v1385_v25 = vrot.slane %v1331_v9, 4  ;;  %v4578_v9 = vld [vmem:[#allocation30_spill] sm:$0xff] }
 0x146   : > { %v1423_v35 = vadd.f32 %v1384_v11, %v1303_v53  ;;  %v1755_v1 = vsel %vm649_vm1, %v1752_v10, %v1754_v31  ;;  %v1960_v51 = vmul.f32 %v1925_v14, %v1834_v38  ;;  %v1146_v52 = vsel %vm984_vm13, %v1143_v56, %v1145_v26 }
 0x147   : > { %v1266_v19 = vsel %vm1233_vm14, %v1263_v42, %v1265_v33  ;;  %v843_v16 = vmul.f32 %v4042_v8, %v4571_v48  ;;  %v1184_v47 = vadd.f32 %v1146_v52, %v1055_v29  ;;  %v1386_v46 = vsel %vm1353_vm12, %v1383_v15, %v1385_v25  ;;  %v4580_v52 = vld [vmem:[#allocation31_spill] sm:$0xff] }
 0x148   : > { %v1552_v11 = vadd.f32 %v1513_v2, %v1423_v35  ;;  %v963_v22 = vmul.f32 %v4069_v30, %v4571_v48  ;;  %v1638_v24 = vrot.slane %v4575_v54, 5  ;;  %v2498_v62 = vpack.c.bf16 %v1960_v51, %v1960_v51 }
 0x149   : > { %v1633_v63 = vsel %vm653_vm3, %v1630_v12, %v1632_v28  ;;  %v898_v56 = vrot.slane %v843_v16, 1  ;;  %v1304_v5 = vadd.f32 %v1266_v19, %v1184_v47  ;;  %v793_v50 = vmul.f32 %v4181_v4, %v4570_v6 }
 0x14a   : > { %v1672_v42 = vadd.f32 %v1633_v63, %v1552_v11  ;;  %v1018_v20 = vrot.slane %v963_v22, 2  ;;  %2051 = vst.msk [vmem:[%s3578_s19 + $0x34] sm:$0xf] %vm2037_vm0, %v2498_v62  ;;  %v1753_v17 = vsel %vm649_vm1, %v1750_v0, %v1752_v10  ;;  %v1212_v18 = vmul.f32 %v4010_v61, %v4573_v49 }
 0x14b   : > { %v899_v15 = vsel %vm864_vm15, %v896_v32, %v898_v56  ;;  %v1332_v12 = vmul.f32 %v4019_v13, %v4573_v49  ;;  %v1758_v28 = vrot.slane %v3615_v55, 6  ;;  %v1424_v60 = vadd.f32 %v1386_v46, %v1304_v5  ;;  %v1930_v49 = vpop.permute.xlu0 %1929 }
 0x14c   : > { %v1792_v57 = vadd.f32 %v1753_v17, %v1672_v42  ;;  %v936_v6 = vadd.f32 %v899_v15, %v793_v50  ;;  %v1019_v40 = vsel %vm984_vm13, %v1016_v41, %v1018_v20  ;;  %v4577_v43 = vrot.slane %v4576_v23, 2  ;;  %v1935_v50 = vpop.permute.xlu1 %1934  ;;  %v4585_v17 = vld [vmem:[#allocation29_spill] sm:$0xff] }
 0x14d   : > { %v1267_v0 = vrot.slane %v1212_v18, 3  ;;  %v1213_v10 = vmul.f32 %v4010_v61, %v4574_v27  ;;  %v1553_v45 = vadd.f32 %v1515_v34, %v1424_v60  ;;  %v1333_v55 = vmul.f32 %v4019_v13, %v4574_v27 }
 0x14e   : > { %v1148_v3 = vsel %vm984_vm13, %v1145_v26, %v4577_v43  ;;  %v1817_v32 = vadd.f32 %v3524_v58, %v1792_v57  ;;  %v1056_v14 = vadd.f32 %v1019_v40, %v936_v6  ;;  %v1387_v29 = vrot.slane %v1332_v12, 4 }
 0x14f   : > { %v1268_v53 = vsel %vm1233_vm14, %v1265_v33, %v1267_v0  ;;  %v1269_v41 = vrot.slane %v1213_v10, 3  ;;  %v4579_v38 = vrot.slane %v4578_v9, 5  ;;  %v1673_v2 = vadd.f32 %v1635_v59, %v1553_v45  ;;  %v4582_v33 = vld [vmem:[#allocation32_spill] sm:$0xff] }
 0x150   : > { %v1835_v35 = vmax.f32 %v1817_v32, 0.0  ;;  %v1185_v51 = vadd.f32 %v1148_v3, %v1056_v14  ;;  %v1389_v61 = vrot.slane %v1333_v55, 4  ;;  %v4581_v19 = vrot.slane %v4580_v52, 6 }
 0x151   : > { %v1639_v26 = vsel %vm653_vm3, %v4579_v38, %v1638_v24  ;;  %v844_v13 = vmul.f32 %v4042_v8, %v4572_v37  ;;  %v964_v27 = vmul.f32 %v4069_v30, %v4572_v37  ;;  %v4583_v16 = vrot.slane %v4582_v33, 2 }
 0x152   : > { %v1759_v34 = vsel %vm649_vm1, %v4581_v19, %v1758_v28  ;;  %v4584_v11 = vmov %v4577_v43  ;;  %v1961_v46 = vmul.f32 %v1930_v49, %v1835_v35  ;;  %v1793_v59 = vadd.f32 %v1755_v1, %v1673_v2  ;;  %v1940_v43 = vpop.permute.xlu0 %1939  ;;  %v1945_v49 = vpop.permute.xlu1 %1944 }
 0x153   : > { %v1150_v47 = vsel %vm984_vm13, %v4584_v11, %v4583_v16  ;;  %v1305_v22 = vadd.f32 %v1268_v53, %v1185_v51  ;;  %v1270_v54 = vsel %vm1233_vm14, %v1267_v0, %v1269_v41  ;;  %v1388_v24 = vsel %vm1353_vm12, %v1385_v25, %v1387_v29 }
 0x154   : > { %v900_v62 = vrot.slane %v844_v13, 1  ;;  %v1020_v63 = vrot.slane %v964_v27, 2  ;;  %v1390_v8 = vsel %vm1353_vm12, %v1387_v29, %v1389_v61  ;;  %v2499_v42 = vpack.c.bf16 %v1961_v46, %v1961_v46 }
 0x155   : > { %v1818_v30 = vadd.f32 %v3524_v58, %v1793_v59  ;;  %v1425_v37 = vadd.f32 %v1388_v24, %v1305_v22  ;;  %v794_v5 = vmul.f32 %v4181_v4, %v4571_v48  ;;  %v4586_v15 = vrot.slane %v4585_v17, 4 }
 0x156   : > { %v901_v25 = vsel %vm864_vm15, %v898_v56, %v900_v62  ;;  %v1021_v18 = vsel %vm984_vm13, %v1018_v20, %v1020_v63  ;;  %2052 = vst.msk [vmem:[%s3578_s19 + $0x38] sm:$0xf] %vm2037_vm0, %v2499_v42  ;;  %v4587_v57 = vmov %v4579_v38 }
 0x157   : > { %v1517_v1 = vsel %vm1353_vm12, %v1514_v44, %v4586_v15  ;;  %v1836_v12 = vmax.f32 %v1818_v30, 0.0  ;;  %v937_v28 = vadd.f32 %v901_v25, %v794_v5  ;;  %v1637_v48 = vsel %vm653_vm3, %v1634_v21, %v4587_v57 }
 0x158   : > { %v1554_v58 = vadd.f32 %v1517_v1, %v1425_v37  ;;  %v4588_v44 = vmov %v4581_v19 }
 0x159   : > { %v1962_v4 = vmul.f32 %v1935_v50, %v1836_v12  ;;  %v1057_v60 = vadd.f32 %v1021_v18, %v937_v28  ;;  %v1757_v56 = vsel %vm649_vm1, %v1754_v31, %v4588_v44 }
 0x15a   : > { %v1674_v36 = vadd.f32 %v1637_v48, %v1554_v58 }
 0x15b   : > { %v2500_v20 = vpack.c.bf16 %v1962_v4, %v1962_v4  ;;  %v1186_v40 = vadd.f32 %v1150_v47, %v1057_v60 }
 0x15c   : > { %v1794_v6 = vadd.f32 %v1757_v56, %v1674_v36 }
 0x15d   : > { %2053 = vst.msk [vmem:[%s3578_s19 + $0x3c] sm:$0xf] %vm2037_vm0, %v2500_v20  ;;  %v1306_v23 = vadd.f32 %v1270_v54, %v1186_v40 }
 0x15e   : > { %v1819_v21 = vadd.f32 %v2703_v7, %v1794_v6 }
 0x15f   : > { %v1426_v0 = vadd.f32 %v1390_v8, %v1306_v23 }
 0x160   : > { %v1837_v3 = vmax.f32 %v1819_v21, 0.0 }
 0x161   : > { %v1555_v32 = vadd.f32 %v4589_v39, %v1426_v0 }
 0x162   : > { %v1963_v10 = vmul.f32 %v1940_v43, %v1837_v3 }
 0x163   : > { %v1675_v31 = vadd.f32 %v1639_v26, %v1555_v32 }
 0x164   : > { %v2501_v45 = vpack.c.bf16 %v1963_v10, %v1963_v10 }
 0x165   : > { %v1795_v14 = vadd.f32 %v1759_v34, %v1675_v31 }
 0x166   : > { %2054 = vst.msk [vmem:[%s3578_s19 + $0x40] sm:$0xf] %vm2037_vm0, %v2501_v45 }
 0x167   : > { %v1820_v55 = vadd.f32 %v2703_v7, %v1795_v14 }
 0x169   : > { %v1838_v53 = vmax.f32 %v1820_v55, 0.0 }
 0x16b   : > { %v1964_v29 = vmul.f32 %v1945_v49, %v1838_v53  ;;  %2062 = sbr.rel (!%p2910_p5) target bundleno = 433 (0x1b1), region = 48 }
 0x16d   : > { %v2502_v41 = vpack.c.bf16 %v1964_v29, %v1964_v29 }
 0x16f   : > { %2055 = vst.msk [vmem:[%s3578_s19 + $0x44] sm:$0xf] %vm2037_vm0, %v2502_v41 }
 0x170   : > { %s4612_s23 = smov (!%p2065_p2, %s2064_s23), 18 }
 0x171   : > { %s2467_s18 = sshll.u32 %s4612_s23, 6 }
 0x172   : > { %p2470_p3 = scmp.eq.s32.totalorder %s2467_s18, 0 }
 0x173   : > { %2704 = sdivrem.u32 (!%p2470_p3), %s4612_s23, 18 }
 0x174   : > { %2075 = sbr.rel (%p2470_p3) target bundleno = 433 (0x1b1), region = 52 }
 0x17c   : > { %s4313_s8 = spop.drf %2704 }
 0x17d   : > { %p2471_p4 = scmp.le.s32.totalorder %s4313_s8, 0 }
 0x17e   : > { %s4590_s24 = smov (!%p2471_p4), %s4310_s7  ;;  %s4591_s17 = smov (!%p2471_p4), %s3578_s19 }
 0x17f   : > { %2333 = sbr.rel (%p2471_p4) target bundleno = 408 (0x198), region = 138  ;;  %s4322_s9 = smov (!%p2471_p4), 0  }
 0x180   : > { %s4324_s10 = smov (!%p2471_p4), 0  }
 0x184 LB: >> { %v2093_v9 = vld [vmem:[%s2802_s17] sm:$0xf]  ;;  %v2095_v38 = vld [vmem:[%s2802_s17 + $0x4] sm:$0xf]  ;;  %v2097_v26 = vld [vmem:[%s2802_s17 + $0x8] sm:$0xf]  ;;  %s2810_s10 = sphi %s4324_s10, %s2087_s10   ;;  %s2806_s9 = sphi %s4322_s9, %s4592_s9   ;;  %s2802_s17 = sphi %s4591_s17, %s2134_s17   ;;  %s2798_s24 = sphi %s4590_s24, %s2135_s24  }
 0x185   : >> { %2094 = vst [vmem:[%s2798_s24] sm:$0xf] %v2093_v9  ;;  %2096 = vst [vmem:[%s2798_s24 + $0x4] sm:$0xf] %v2095_v38  ;;  %v2099_v35 = vld [vmem:[%s2802_s17 + $0xc] sm:$0xf]  ;;  %s2129_s11 = sadd.s32 1, %s2806_s9 }
 0x186   : >> { %2098 = vst [vmem:[%s2798_s24 + $0x8] sm:$0xf] %v2097_v26  ;;  %v2101_v2 = vld [vmem:[%s2802_s17 + $0x10] sm:$0xf]  ;;  %v2103_v51 = vld [vmem:[%s2802_s17 + $0x14] sm:$0xf]  ;;  %p2130_p5 = scmp.ge.s32.totalorder %s2129_s11, %s4313_s8 }
 0x187   : >> { %2100 = vst [vmem:[%s2798_s24 + $0xc] sm:$0xf] %v2099_v35  ;;  %2102 = vst [vmem:[%s2798_s24 + $0x10] sm:$0xf] %v2101_v2  ;;  %v2105_v61 = vld [vmem:[%s2802_s17 + $0x18] sm:$0xf] }
 0x188   : >> { %2104 = vst [vmem:[%s2798_s24 + $0x14] sm:$0xf] %v2103_v51  ;;  %v2107_v52 = vld [vmem:[%s2802_s17 + $0x1c] sm:$0xf]  ;;  %v2109_v19 = vld [vmem:[%s2802_s17 + $0x20] sm:$0xf] }
 0x189   : >> { %2106 = vst [vmem:[%s2798_s24 + $0x18] sm:$0xf] %v2105_v61  ;;  %2108 = vst [vmem:[%s2798_s24 + $0x1c] sm:$0xf] %v2107_v52  ;;  %v2111_v34 = vld [vmem:[%s2802_s17 + $0x24] sm:$0xf] }
 0x18a   : >> { %2110 = vst [vmem:[%s2798_s24 + $0x20] sm:$0xf] %v2109_v19  ;;  %v2113_v13 = vld [vmem:[%s2802_s17 + $0x28] sm:$0xf]  ;;  %v2115_v27 = vld [vmem:[%s2802_s17 + $0x2c] sm:$0xf] }
 0x18b   : >> { %2112 = vst [vmem:[%s2798_s24 + $0x24] sm:$0xf] %v2111_v34  ;;  %2114 = vst [vmem:[%s2798_s24 + $0x28] sm:$0xf] %v2113_v13  ;;  %v2117_v33 = vld [vmem:[%s2802_s17 + $0x30] sm:$0xf] }
 0x18c   : >> { %2116 = vst [vmem:[%s2798_s24 + $0x2c] sm:$0xf] %v2115_v27  ;;  %v2119_v16 = vld [vmem:[%s2802_s17 + $0x34] sm:$0xf]  ;;  %v2121_v11 = vld [vmem:[%s2802_s17 + $0x38] sm:$0xf] }
 0x18d   : >> { %2118 = vst [vmem:[%s2798_s24 + $0x30] sm:$0xf] %v2117_v33  ;;  %2120 = vst [vmem:[%s2798_s24 + $0x34] sm:$0xf] %v2119_v16  ;;  %v2123_v47 = vld [vmem:[%s2802_s17 + $0x3c] sm:$0xf] }
 0x18e   : >> { %2122 = vst [vmem:[%s2798_s24 + $0x38] sm:$0xf] %v2121_v11  ;;  %v2125_v46 = vld [vmem:[%s2802_s17 + $0x40] sm:$0xf]  ;;  %v2127_v59 = vld [vmem:[%s2802_s17 + $0x44] sm:$0xf] }
 0x18f   : >> { %2124 = vst [vmem:[%s2798_s24 + $0x3c] sm:$0xf] %v2123_v47  ;;  %2126 = vst [vmem:[%s2798_s24 + $0x40] sm:$0xf] %v2125_v46  ;;  %s4614_s11 = smov (%p2130_p5, %s2129_s11), 0  ;;  %s2087_s10 = sadd.s32 1, %s2810_s10  }
 0x190   : >> { %2128 = vst [vmem:[%s2798_s24 + $0x44] sm:$0xf] %v2127_v59  ;;  %s2132_s13 = smul.u32 72, %s4614_s11  ;;  %p2086_p6 = scmp.ge.s32.totalorder %s2087_s10, %s4313_s8 }
 0x191   : >> { %s4592_s9 = smov %s4614_s11 }
 0x192   : >> { %s2134_s17 = scalar_lea.vmem %s3578_s19, %s2132_s13 [#allocation2]   ;;  %s2135_s24 = scalar_lea.vmem %s4310_s7, %s2132_s13  }
 0x193   : > { %2089 = sbr.rel (!%p2086_p6) target bundleno = 388 (0x184), region = 144 }
 0x198 PF: > { %2706 = sdivrem.u32 %s4612_s23, 18 }
 0x199   : > { %s2472_s14 = smul.u32 72, %s4313_s8 }
 0x19b   : > { %s2140_s15 = scalar_lea.vmem %s3578_s19, %s2472_s14 [#allocation2]   ;;  %s2142_s16 = scalar_lea.vmem %s4310_s7, %s2472_s14  }
 0x1a1   : > { %s2707_s30 = spop.drf %2706 }
 0x1a2   : > { %p2474_p7 = scmp.le.s32.totalorder %s2707_s30, 0 }
 0x1a3   : > { %s2812_s18 = smov (!%p2474_p7), %s2142_s16   ;;  %s2816_s21 = smov (!%p2474_p7), %s2140_s15  }
 0x1a4   : > { %2347 = sbr.rel (%p2474_p7) target bundleno = 433 (0x1b1), region = 149  ;;  %s2820_s20 = smov (!%p2474_p7), 0  }
 0x1a5   : > { %s2824_s13 = smov (!%p2474_p7), 0  }
 0x1a9 LB: >> { %v2152_v22 = vld [vmem:[%s2818_s21] sm:$0xf]  ;;  %s2154_s24 = sadd.s32 1, %s2822_s20  ;;  %s2146_s13 = sadd.s32 1, %s2826_s13   ;;  %s2826_s13 = sphi %s2824_s13, %s2146_s13   ;;  %s2822_s20 = sphi %s2820_s20, %s2821_s20   ;;  %s2818_s21 = sphi %s2816_s21, %s2159_s21   ;;  %s2814_s18 = sphi %s2812_s18, %s2160_s18  }
 0x1aa   : >> { %2153 = vst [vmem:[%s2814_s18] sm:$0xf] %v2152_v22  ;;  %p2155_p8 = scmp.ge.s32.totalorder %s2154_s24, %s2707_s30  ;;  %p2145_p9 = scmp.ge.s32.totalorder %s2146_s13, %s2707_s30 }
 0x1ac   : >> { %s4616_s24 = smov (%p2155_p8, %s2154_s24), 0  ;;  %2148 = sbr.rel (!%p2145_p9) target bundleno = 425 (0x1a9), region = 155 }
 0x1ad   : >> { %s2475_s19 = sshll.u32 %s4616_s24, 2  ;;  %s2821_s20 = smov %s4616_s24  }
 0x1ae   : >> { %s2159_s21 = scalar_lea.vmem %s2140_s15, %s2475_s19 [#allocation2]   ;;  %s2160_s18 = scalar_lea.vmem %s2142_s16, %s2475_s19  }
 0x1b1 PF: > { %s16_s27 = sadd.s32 1, %s2794_s27   ;;  %s4593_s21 = smov %s2774_s22 }
 0x1b2   : > { %p13_p10 = scmp.ge.s32.totalorder %s16_s27, 6   ;;  %s4594_s22 = smov %s2921_s12 }
 0x1b3   : > { %s4595_s23 = smov %s2786_s25  ;;  %s4596_s24 = smov %s2790_s26 }
 0x1b4   : > { %s4597_s25 = smov %s4600_s28  ;;  %s4598_s26 = smov %s4604_s29 }
 0x1b5   :  { %15 = sbr.rel (!%p13_p10) target bundleno = 4 (0x4), region = 166 }

// kernel: superpoint_forward.11
= control target key start
LH: loop header
LB: loop body
LE: loop exit
PB: predicated region body
PF: predicated region fallthrough
CT: control target
= control target key end

     0   :  { %s3342_s18 = smov 0   ;;  %s3344_s19 = smov 0   ;;  %s4449_s0 = inlined_call_operand.vmem [shape: bf16[2,360,64], index: 0, kind: input, shape index: {}, may-alias: {0,1,2}]   ;;  %s4450_s1 = inlined_call_operand.vmem [shape: bf16[2,360,64], index: 1, kind: input, shape index: {}, may-alias: {0,1,2}]   ;;  %s4451_s2 = inlined_call_operand.vmem [shape: bf16[2,360,64], index: 2, kind: input, shape index: {}, may-alias: {0,1,2}]   ;;  %s4452_s3 = inlined_call_operand.vmem [shape: bf16[3,192,64], index: 3, kind: input, shape index: {}]   ;;  %s4453_s4 = inlined_call_operand.vmem [shape: f32[1,64], index: 4, kind: input, shape index: {}]   ;;  %s4454_s5 = inlined_call_operand.vmem [shape: bf16[2,120,64], index: 5, kind: output, shape index: {}]  }
   0x1   :  { %s3346_s20 = smov 0   ;;  %s3348_s21 = smov 0  }
   0x2   :  { %s3350_s22 = smov 0  }
   0x3 LB: > { %s24_s23 = sadd.s32 1, %s3299_s20  ;;  %s27_s24 = sadd.s32 1, %s3303_s21  ;;  %s3307_s22 = sphi %s3350_s22, %s15_s22   ;;  %s3303_s21 = sphi %s3348_s21, %s4475_s21   ;;  %s3299_s20 = sphi %s3346_s20, %s4474_s20   ;;  %s3295_s19 = sphi %s3344_s19, %s4473_s19   ;;  %s3291_s18 = sphi %s3342_s18, %s4472_s18  }
   0x4   : > { %p25_p0 = scmp.ge.s32.totalorder %s24_s23, 2  ;;  %p2967_p1 = scmp.ge.s32.totalorder %s3307_s22, 1 }
   0x5   : > { %p274_p2 = scmp.lt.s32.totalorder %s3307_s22, 5 }
   0x6   : > { %s4477_s23 = smov (%p25_p0, %s24_s23), 0  ;;  %s4479_s24 = smov (!%p25_p0, %s27_s24), %s3303_s21 }
   0x7   : > { %p275_p3 = pnand %p2967_p1, %p274_p2  ;;  %p29_p4 = scmp.ge.s32.totalorder %s4479_s24, 2 }
   0x8   : > { %s338_s25 = smul.u32 (!%p275_p3), 18, %s3291_s18  ;;  %p343_p5 = scmp.lt.s32.totalorder (!%p275_p3), %s3295_s19, 1 }
   0x9   : > { %s4481_s24 = smov (%p29_p4, %s4479_s24), 0  ;;  %278 = sbr.rel (%p275_p3) target bundleno = 567 (0x237), region = 40 }
   0xa   : > { %s2969_s26 = sshll.u32 (!%p275_p3), %s3291_s18, 1  ;;  %p345_p6 = scmp.lt.s32.totalorder (!%p275_p3), %s338_s25, 44 }
   0xb   : > { %s2970_s27 = sadd.s32 (!%p275_p3), 4294967295, %s2969_s26  ;;  %p417_p8 = scmp.gt.s32.totalorder (!%p275_p3), %s3291_s18, 0 }
   0xc   : > { %p358_p7 = scmp.gt.s32.totalorder (!%p275_p3), %s2970_s27, 0  ;;  %p427_p11 = scmp.lt.s32.totalorder (!%p275_p3), %s3291_s18, 1 }
   0xd   : > { %s3310_s13 = smov (!%p275_p3), 64  }
   0xe   : > { %s4483_s19 = smov (!%p343_p5, %s3295_s19), 1  ;;  %v3309_v0 = vmov 0   ;;  %s4485_s25 = smov (!%p345_p6, %s338_s25), 44  ;;  %v3233_v1 = vld [vmem:[%s4452_s3 + $0x38] sm:$0xff]   ;;  %v3234_v2 = vld [vmem:[%s4452_s3 + $0x30] sm:$0xff]   ;;  %v3236_v4 = vld [vmem:[%s4452_s3 + $0x28] sm:$0xff]  }
   0xf   : > { %s3379_s28 = smul.u32 45, %s4483_s19  ;;  %1208 = vmatprep.subr.bf16.mxu1 %v3309_v0  ;;  %1004 = vmatprep.subr.bf16.mxu0 %v3309_v0  ;;  %s4487_s27 = smov (!%p358_p7, %s2970_s27), 0  ;;  %v3235_v3 = vld [vmem:[%s4452_s3 + $0x98] sm:$0xff]   ;;  %vm510_vm0 = vsmask.f32 1280  ;;  %v3237_v5 = vld [vmem:[%s4452_s3 + $0x90] sm:$0xff]  }
  0x10   : > { %1209 = vmatpush1.bf16.msra.mxu1 %v3233_v1  ;;  %s360_s10 = smul.u32 9, %s4487_s27  ;;  %1005 = vmatpush1.bf16.msra.mxu0 %v3235_v3  ;;  %s374_s27 = sadd.s32 1, %s3291_s18  ;;  %vm624_vm1 = vcmask 1041408   ;;  %vm632_vm2 = vsmask.f32 7424  ;;  %vm620_vm4 = vcmask 1040384  }
  0x11   : > { %s348_s6 = sadd.s32 %s3379_s28, %s4485_s25  ;;  %1210 = vmatprep.subr.bf16.mxu1 %v3309_v0  ;;  %1006 = vmatprep.subr.bf16.mxu0 %v3309_v0  ;;  %s3421_s7 = smul.u32 18, %s374_s27  ;;  %vm445_vm5 = vsmask.f32 5376  ;;  %vm621_vm6 = vsmask.f32 256  ;;  %vm3455_vm7 = vmand %vm624_vm1, %vm510_vm0  ;;  %vm628_vm10 = vcmask 1042432  }
  0x12   : > { %s2968_s9 = sshll.u32 %s348_s6, 2  ;;  %p363_p9 = scmp.lt.s32.totalorder %s360_s10, 44  ;;  %vm3489_vm8 = vmand %vm620_vm4, %vm621_vm6  ;;  %vm629_vm11 = vsmask.f32 2304  ;;  %vm729_vm12 = vcmask 1046528   ;;  %vm749_vm14 = vcmask 523264  }
  0x13   : > { %s3397_s15 = scalar_lea.vmem %s4449_s0, %s2968_s9  ;;  %p379_p10 = scmp.lt.s32.totalorder %s3421_s7, 44  ;;  %vm3622_vm13 = vmand %vm628_vm10, %vm629_vm11  ;;  %vm1359_vm15 = vcmask 1045504   ;;  %vm2143_vm1 = vcmask 1044484   ;;  %vm2825_vm10 = vcmask 519168  }
  0x14   : > { %1211 = vmatpush1.bf16.msra.mxu1 %v3234_v2  ;;  %v3224_v6 = vld [vmem:[%s3397_s15 + $0x8] sm:$0xff]   ;;  %v3225_v7 = vld [vmem:[%s3397_s15 + $0x10] sm:$0xff]   ;;  %v3226_v8 = vld [vmem:[%s3397_s15 + $0x18] sm:$0xff]   ;;  %s421_s29 = scalar_select %p417_p8, 1, 0  ;;  %1007 = vmatpush1.bf16.msra.mxu0 %v3237_v5 }
  0x15   : > { %1212 = vmatprep.subr.bf16.mxu1 %v3309_v0  ;;  %v520_v9 = vshrl.u32 %v3224_v6, 16  ;;  %v523_v10 = vshll.u32 %v3224_v6, 16  ;;  %v529_v11 = vshrl.u32 %v3225_v7, 16  ;;  %v532_v12 = vshll.u32 %v3225_v7, 16  ;;  %s4489_s10 = smov (!%p363_p9, %s360_s10), 44  ;;  %v3227_v13 = vld [vmem:[%s3397_s15] sm:$0xff]   ;;  %1008 = vmatprep.subr.bf16.mxu0 %v3309_v0 }
  0x16   : > { %v538_v14 = vshrl.u32 %v3226_v8, 16  ;;  %v541_v15 = vshll.u32 %v3226_v8, 16  ;;  %v422_v16 = vstv %s421_s29  ;;  %s366_s30 = sadd.s32 %s3379_s28, %s4489_s10  ;;  %v3228_v21 = vld [vmem:[%s3397_s15 + $0x20] sm:$0xff]   ;;  %v512_v25 = vshrl.u32 %v3227_v13, 16  ;;  %v3229_v55 = vld [vmem:[%s3397_s15 + $0x28] sm:$0xff]   ;;  %s4491_s7 = smov (!%p379_p10, %s3421_s7), 44 }
  0x17   : > { %v522_v17 = vrot.slane %v520_v9, 6  ;;  %v525_v18 = vrot.slane %v523_v10, 7  ;;  %v531_v19 = vrot.slane %v529_v11, 6  ;;  %v534_v20 = vrot.slane %v532_v12, 7  ;;  %s2971_s6 = sshll.u32 %s366_s30, 2  ;;  %v3238_v2 = vld [vmem:[%s4452_s3 + $0x20] sm:$0xff]   ;;  %s382_s14 = sadd.s32 %s3379_s28, %s4491_s7 }
  0x18   : > { %1213 = vmatpush1.bf16.msra.mxu1 %v3236_v4  ;;  %v540_v22 = vrot.slane %v538_v14, 6  ;;  %v543_v23 = vrot.slane %v541_v15, 7  ;;  %vm3417_vm3 = vcmp.eq.s32.totalorder %v422_v16, 1  ;;  %s368_s11 = scalar_lea.vmem %s4450_s1, %s2971_s6  ;;  %v515_v28 = vshll.u32 %v3227_v13, 16  ;;  %v3230_v11 = vld [vmem:[%s3397_s15 + $0x30] sm:$0xff]   ;;  %v3239_v15 = vld [vmem:[%s4452_s3 + $0x88] sm:$0xff]  }
  0x19   : > { %1214 = vmatprep.subr.bf16.mxu1 %v3309_v0  ;;  %v526_v26 = vor.u32 %v525_v18, %v522_v17  ;;  %v535_v27 = vor.u32 %v534_v20, %v531_v19  ;;  %v547_v29 = vshrl.u32 %v3228_v21, 16  ;;  %v420_v31 = vld [vmem:[%s368_s11 + $0x20] sm:$0xf]  ;;  %v514_v32 = vrot.slane %v512_v25, 6  ;;  %v418_v33 = vld [vmem:[%s368_s11 + $0x18] sm:$0x8]  ;;  %1009 = vmatpush1.bf16.msra.mxu0 %v3239_v15 }
  0x1a   : > { %v544_v30 = vor.u32 %v543_v23, %v540_v22  ;;  %v550_v34 = vshll.u32 %v3228_v21, 16  ;;  %v426_v36 = vsel %vm3417_vm3, %v420_v31, 0  ;;  %v517_v37 = vrot.slane %v515_v28, 7  ;;  %v419_v38 = vld [vmem:[%s368_s11 + $0x1c] sm:$0xf]  ;;  %s2974_s30 = sshll.u32 %s382_s14, 2  ;;  %1010 = vmatprep.subr.bf16.mxu0 %v3309_v0 }
  0x1b   : > { %v3427_v35 = vsel %vm510_vm0, %v526_v26, %v535_v27  ;;  %v424_v39 = vsel %vm3417_vm3, %v418_v33, 0  ;;  %v2977_v43 = vcombine.low %v426_v36, %v426_v36  ;;  %v425_v46 = vsel %vm3417_vm3, %v419_v38, 0  ;;  %s3497_s28 = scalar_select %p427_p11, 1, 0  ;;  %v3240_v21 = vld [vmem:[%s4452_s3 + $0x18] sm:$0xff]   ;;  %v3242_v33 = vld [vmem:[%s4452_s3 + $0x10] sm:$0xff]  }
  0x1c   : > { %v3434_v40 = vsel %vm510_vm0, %v535_v27, %v544_v30  ;;  %v657_v41 = vshll.u32 %v3427_v35, 16  ;;  %v661_v42 = vshrl.u32 %v3427_v35, 16  ;;  %v518_v45 = vor.u32 %v517_v37, %v514_v32  ;;  %1215 = vmatpush1.bf16.msra.mxu1 %v3238_v2  ;;  %v3241_v27 = vld [vmem:[%s4452_s3 + $0x80] sm:$0xff]   ;;  %s3528_s9 = scalar_lea.vmem %s4451_s2, %s2974_s30  ;;  %s388_s10 = smul.u32 5, %s3291_s18 }
  0x1d   : > { %v665_v44 = vshll.u32 %v3434_v40, 16  ;;  %v455_v48 = vshrl.u32 %v2977_v43, 16  ;;  %v458_v49 = vshll.u32 %v2977_v43, 16  ;;  %v2976_v50 = vcombine.low %v424_v39, %v425_v46  ;;  %1216 = vmatprep.subr.bf16.mxu1 %v3309_v0  ;;  %v3232_v32 = vld [vmem:[%s3397_s15 + $0x40] sm:$0xff]   ;;  %1011 = vmatpush1.bf16.msra.mxu0 %v3241_v27  ;;  %s3180_s14 = smul.u32 15, %s4483_s19 }
  0x1e   : > { %v3441_v47 = vrot.slane %v657_v41, 1  ;;  %v3445_v52 = vsel %vm510_vm0, %v518_v45, %v526_v26  ;;  %v549_v53 = vrot.slane %v547_v29, 6  ;;  %v552_v54 = vrot.slane %v550_v34, 7  ;;  %v3231_v26 = vld [vmem:[%s3397_s15 + $0x38] sm:$0xff]   ;;  %1012 = vmatprep.subr.bf16.mxu0 %v3309_v0  ;;  %v428_v2 = vld [vmem:[%s3528_s9] sm:$0xf] }
  0x1f   : > { %v667_v51 = vrot.slane %v665_v44, 1  ;;  %v457_v57 = vrot.slane %v455_v48, 2  ;;  %v460_v58 = vrot.slane %v458_v49, 3  ;;  %v649_v59 = vshll.u32 %v3445_v52, 16  ;;  %v3246_v15 = vld [vmem:[%s4452_s3] sm:$0xff]   ;;  %p4207_p12 = scmp.lt.s32.totalorder %s388_s10, 14 }
  0x20   : > { %v663_v56 = vor.u32 %v661_v42, %v3441_v47  ;;  %v447_v61 = vshrl.u32 %v2976_v50, 16  ;;  %v450_v62 = vshll.u32 %v2976_v50, 16  ;;  %v653_v63 = vshrl.u32 %v3445_v52, 16  ;;  %1217 = vmatpush1.bf16.msra.mxu1 %v3240_v21  ;;  %v3247_v21 = vld [vmem:[%s4452_s3 + $0x68] sm:$0xff]  }
  0x21   : > { %v3460_v1 = vor.u32 %v552_v54, %v549_v53  ;;  %v461_v4 = vor.u32 %v460_v58, %v457_v57  ;;  %v651_v5 = vrot.slane %v649_v59, 1  ;;  %v669_v6 = vshrl.u32 %v3434_v40, 16  ;;  %1218 = vmatprep.subr.bf16.mxu1 %v3309_v0  ;;  %v3244_v54 = vld [vmem:[%s4452_s3 + $0x8] sm:$0xff]   ;;  %s4493_s10 = smov (!%p4207_p12, %s388_s10), 14 }
  0x22   : > { %v668_v3 = vsel %vm632_vm2, %v663_v56, %v667_v51  ;;  %v449_v7 = vrot.slane %v447_v61, 2  ;;  %v452_v8 = vrot.slane %v450_v62, 3  ;;  %v556_v10 = vshrl.u32 %v3229_v55, 16  ;;  %s394_s18 = sadd.s32 %s3180_s14, %s4493_s10 }
  0x23   : > { %715 = vrot.lane.b32.xlu1 %v668_v3, %s3310_s13  ;;  %v3471_v9 = vsel %vm510_vm0, %v544_v30, %v3460_v1  ;;  %v3476_v12 = vsel %vm3455_vm7, %v461_v4, %v518_v45  ;;  %v655_v13 = vor.u32 %v653_v63, %v651_v5  ;;  %v3493_v20 = vor.u32 %v669_v6, %v667_v51  ;;  %v429_v3 = vld [vmem:[%s3528_s9 + $0x4] sm:$0xf]  ;;  %s2975_s19 = sshll.u32 %s394_s18, 2 }
  0x24   : > { %v673_v14 = vshll.u32 %v3471_v9, 16  ;;  %v641_v16 = vshll.u32 %v3476_v12, 16  ;;  %v645_v17 = vshrl.u32 %v3476_v12, 16  ;;  %v453_v18 = vor.u32 %v452_v8, %v449_v7  ;;  %1219 = vmatpush1.bf16.msra.mxu1 %v3242_v33  ;;  %v3245_v7 = vld [vmem:[%s4452_s3 + $0x70] sm:$0xff]   ;;  %s4261_s25 = scalar_lea.vmem %s4454_s5, %s2975_s19 }
  0x25   : > { %v558_v23 = vrot.slane %v556_v10, 6  ;;  %v559_v24 = vshll.u32 %v3229_v55, 16  ;;  %v677_v25 = vshrl.u32 %v3471_v9, 16  ;;  %v565_v30 = vshrl.u32 %v3230_v11, 16  ;;  %1220 = vmatprep.subr.bf16.mxu1 %v3309_v0 }
  0x26   : > { %v3502_v22 = vrot.slane %v673_v14, 1  ;;  %v643_v28 = vrot.slane %v641_v16, 1  ;;  %v462_v29 = vsel %vm445_vm5, %v453_v18, %v461_v4  ;;  %v568_v31 = vshll.u32 %v3230_v11, 16  ;;  %v430_v14 = vld [vmem:[%s3528_s9 + $0x8] sm:$0x1] }
  0x27   : > { %v3517_v34 = vsel %vm3489_vm8, 0, %v462_v29  ;;  %v660_v36 = vsel %vm632_vm2, %v655_v13, %v3441_v47  ;;  %v561_v37 = vrot.slane %v559_v24, 7  ;;  %v567_v43 = vrot.slane %v565_v30, 6  ;;  %v3243_v47 = vld [vmem:[%s4452_s3 + $0x78] sm:$0xff]  }
  0x28   : > { %v679_v38 = vor.u32 %v677_v25, %v3502_v22  ;;  %v647_v39 = vor.u32 %v645_v17, %v643_v28  ;;  %v634_v41 = vshrl.u32 %v3517_v34, 16  ;;  %v636_v42 = vshll.u32 %v3517_v34, 16  ;;  %1013 = vmatpush1.bf16.msra.mxu0 %v3243_v47  ;;  %1221 = vmatpush1.bf16.msra.mxu1 %v3244_v54  ;;  %v3248_v29 = vld [vmem:[%s4452_s3 + $0x58] sm:$0xff]  }
  0x29   : > { %v562_v44 = vor.u32 %v561_v37, %v558_v23  ;;  %v570_v45 = vrot.slane %v568_v31, 7  ;;  %v574_v46 = vshrl.u32 %v3231_v26, 16  ;;  %v577_v48 = vshll.u32 %v3231_v26, 16  ;;  %1014 = vmatprep.subr.bf16.mxu0 %v3309_v0  ;;  %1222 = vmatprep.subr.bf16.mxu1 %v3309_v0 }
  0x2a   : > { %v652_v49 = vsel %vm632_vm2, %v647_v39, %v651_v5  ;;  %v638_v50 = vrot.slane %v636_v42, 1  ;;  %v583_v51 = vshrl.u32 %v3232_v32, 16  ;;  %v586_v53 = vshll.u32 %v3232_v32, 16 }
  0x2b   : > { %711 = vrot.lane.b32.xlu0 %v652_v49, %s3310_s13  ;;  %v3541_v55 = vsel %vm510_vm0, %v3460_v1, %v562_v44  ;;  %v571_v56 = vor.u32 %v570_v45, %v567_v43  ;;  %v576_v57 = vrot.slane %v574_v46, 6  ;;  %v579_v58 = vrot.slane %v577_v48, 7 }
  0x2c   : > { %v639_v59 = vor.u32 %v638_v50, %v634_v41  ;;  %v681_v61 = vshll.u32 %v3541_v55, 16  ;;  %v685_v62 = vshrl.u32 %v3541_v55, 16  ;;  %v585_v63 = vrot.slane %v583_v51, 6  ;;  %1015 = vmatpush1.bf16.msra.mxu0 %v3245_v7  ;;  %1223 = vmatpush1.bf16.msra.mxu1 %v3246_v15  ;;  %v3250_v50 = vld [vmem:[%s4452_s3 + $0x50] sm:$0xff]  }
  0x2d   : > { %v3549_v4 = vsel %vm510_vm0, %v562_v44, %v571_v56  ;;  %v580_v5 = vor.u32 %v579_v58, %v576_v57  ;;  %v588_v1 = vrot.slane %v586_v53, 7  ;;  %v432_v6 = vstv %s3497_s28  ;;  %1016 = vmatprep.subr.bf16.mxu0 %v3309_v0  ;;  %1232 = vmatprep.subr.bf16.mxu1 %v3309_v0  ;;  %v3249_v44 = vld [vmem:[%s4452_s3 + $0x60] sm:$0xff]   ;;  %v3251_v58 = vld [vmem:[%s4452_s3 + $0xb8] sm:$0xff]  }
  0x2e   : > { %v644_v8 = vsel %vm632_vm2, %v639_v59, %v643_v28  ;;  %v683_v10 = vrot.slane %v681_v61, 1  ;;  %v689_v11 = vshll.u32 %v3549_v4, 16  ;;  %v693_v13 = vshrl.u32 %v3549_v4, 16 }
  0x2f   : > { %709 = vrot.lane.b32.xlu1 %v644_v8, %s3310_s13  ;;  %713 = vrot.lane.b32.xlu0 %v660_v36, %s3310_s13  ;;  %v676_v16 = vsel %vm632_vm2, %v3493_v20, %v3502_v22  ;;  %v3569_v17 = vsel %vm510_vm0, %v571_v56, %v580_v5  ;;  %v3571_v18 = vor.u32 %v588_v1, %v585_v63  ;;  %vm3573_vm9 = vcmp.eq.s32.totalorder %v432_v6, 1  ;;  %v3252_v63 = vld [vmem:[%s4452_s3 + $0x48] sm:$0xff]  }
  0x30   : > { %v684_v23 = vsel %vm632_vm2, %v679_v38, %v683_v10  ;;  %v687_v24 = vor.u32 %v685_v62, %v683_v10  ;;  %v691_v25 = vrot.slane %v689_v11, 1  ;;  %v697_v20 = vshll.u32 %v3569_v17, 16  ;;  %1017 = vmatpush1.bf16.msra.mxu0 %v3247_v21  ;;  %1233 = vmatpush2.bf16.msra.mxu1 %v3248_v29 }
  0x31   : > { %v3585_v22 = vsel %vm510_vm0, %v580_v5, %v3571_v18  ;;  %v701_v26 = vshrl.u32 %v3569_v17, 16  ;;  %v434_v27 = vsel %vm3573_vm9, %v428_v2, 0  ;;  %v435_v28 = vsel %vm3573_vm9, %v429_v3, 0  ;;  %1018 = vmatprep.subr.bf16.mxu0 %v3309_v0  ;;  %1234 = vmatprep.subr.bf16.mxu1 %v3309_v0 }
  0x32   : > { %v695_v30 = vor.u32 %v693_v13, %v691_v25  ;;  %v699_v31 = vrot.slane %v697_v20, 1  ;;  %v705_v32 = vshll.u32 %v3585_v22, 16  ;;  %v737_v33 = vrot.slane %v3434_v40, 1 }
  0x33   : > { %717 = vrot.lane.b32.xlu0 %v676_v16, %s3310_s13  ;;  %719 = vrot.lane.b32.xlu1 %v684_v23, %s3310_s13  ;;  %v692_v36 = vsel %vm632_vm2, %v687_v24, %v691_v25  ;;  %v2987_v37 = vcombine.low %v434_v27, %v435_v28  ;;  %v436_v38 = vsel %vm3573_vm9, %v430_v14, 0  ;;  %v801_v48 = vshrl.u32 %v3585_v22, 16  ;;  %v3253_v14 = vld [vmem:[%s4452_s3 + $0xb0] sm:$0xff]   ;;  %v3254_v24 = vld [vmem:[%s4452_s3 + $0x40] sm:$0xff]  }
  0x34   : > { %v700_v39 = vsel %vm632_vm2, %v695_v30, %v699_v31  ;;  %v703_v41 = vor.u32 %v701_v26, %v699_v31  ;;  %v707_v42 = vrot.slane %v705_v32, 1  ;;  %v2988_v43 = vcombine.low %v436_v38, %v436_v38  ;;  %1019 = vmatpush1.bf16.msra.mxu0 %v3249_v44  ;;  %1235 = vmatpush2.bf16.msra.mxu1 %v3250_v50  ;;  %v3255_v30 = vld [vmem:[%s4452_s3 + $0xa8] sm:$0xff]   ;;  %v3256_v38 = vld [vmem:[%s4452_s3 + $0xa0] sm:$0xff]  }
  0x35   : > { %v602_v45 = vshrl.u32 %v2987_v37, 16  ;;  %v605_v46 = vshll.u32 %v2987_v37, 16  ;;  %1028 = vmatprep.subr.bf16.mxu0 %v3309_v0  ;;  %v730_v2 = vrot.slane %v3517_v34, 1  ;;  %v731_v3 = vrot.slane %v3476_v12, 1  ;;  %1236 = vmatprep.subr.bf16.mxu1 %v3309_v0 }
  0x36   : > { %v610_v47 = vshrl.u32 %v2988_v43, 16  ;;  %v613_v49 = vshll.u32 %v2988_v43, 16  ;;  %v708_v54 = vsel %vm632_vm2, %v703_v41, %v707_v42  ;;  %v803_v1 = vor.u32 %v801_v48, %v707_v42 }
  0x37   : > { %721 = vrot.lane.b32.xlu0 %v692_v36, %s3310_s13  ;;  %723 = vrot.lane.b32.xlu1 %v700_v39, %s3310_s13  ;;  %v604_v51 = vrot.slane %v602_v45, 6  ;;  %v607_v53 = vrot.slane %v605_v46, 7  ;;  %v733_v6 = vrot.slane %v3445_v52, 1  ;;  %v735_v7 = vrot.slane %v3427_v35, 1 }
  0x38   : > { %v612_v56 = vrot.slane %v610_v47, 6  ;;  %v615_v57 = vrot.slane %v613_v49, 7  ;;  %v732_v13 = vsel %vm729_vm12, %v730_v2, %v731_v3  ;;  %1029 = vmatpush2.bf16.msra.mxu0 %v3251_v58  ;;  %1237 = vmatpush2.bf16.msra.mxu1 %v3252_v63  ;;  %v739_v39 = vrot.slane %v3471_v9, 1  ;;  %v3257_v58 = vld [vmem:[%s4452_s3 + $0xf8] sm:$0xff]  }
  0x39   : > { %v608_v59 = vor.u32 %v607_v53, %v604_v51  ;;  %3046 = vmatprep.mubr.msk.bf16.mxu1 %vm749_vm14, %v732_v13  ;;  %v3654_v15 = vsel %vm729_vm12, %v731_v3, %v733_v6  ;;  %v3657_v16 = vsel %vm729_vm12, %v733_v6, %v735_v7  ;;  %1030 = vmatprep.subr.bf16.mxu0 %v3309_v0  ;;  %v741_v45 = vrot.slane %v3541_v55, 1 }
  0x3a   : > { %v616_v61 = vor.u32 %v615_v57, %v612_v56  ;;  %v861_v25 = vrot.slane %v3654_v15, 1  ;;  %1238 = vmatprep.subr.bf16.mxu1 %v3309_v0  ;;  %v862_v20 = vrot.slane %v3657_v16, 1  ;;  %v3699_v41 = vsel %vm729_vm12, %v737_v33, %v739_v39 }
  0x3b   : > { %725 = vrot.lane.b32.xlu0 %v708_v54, %s3310_s13  ;;  %v3636_v5 = vsel %vm3455_vm7, %v3571_v18, %v608_v59  ;;  %v3662_v18 = vsel %vm729_vm12, %v735_v7, %v737_v33  ;;  %v1368_v43 = vrot.slane %v3699_v41, 2  ;;  %v3710_v46 = vsel %vm729_vm12, %v739_v39, %v741_v45 }
  0x3c   : > { %v805_v8 = vshll.u32 %v3636_v5, 16  ;;  %v617_v10 = vsel %vm510_vm0, %v608_v59, %v616_v61  ;;  %v809_v11 = vshrl.u32 %v3636_v5, 16  ;;  %v866_v26 = vrot.slane %v3662_v18, 1  ;;  %1031 = vmatpush2.bf16.msra.mxu0 %v3253_v14  ;;  %1239 = vmatpush2.bf16.msra.mxu1 %v3254_v24 }
  0x3d   : > { %v3647_v60 = vsel %vm3622_vm13, %v617_v10, 0  ;;  %v863_v31 = vsel %vm729_vm12, %v861_v25, %v862_v20  ;;  %1032 = vmatprep.subr.bf16.mxu0 %v3309_v0  ;;  %3155 = vmatprep.subr.bf16.mxu1 %v3309_v0  ;;  %v1364_v42 = vrot.slane %v3662_v18, 2  ;;  %v1372_v48 = vrot.slane %v3710_v46, 2 }
  0x3e   : > { %v807_v19 = vrot.slane %v805_v8, 1  ;;  %v1314_v21 = vshll.u32 %v3647_v60, 16  ;;  %v1318_v23 = vshrl.u32 %v3647_v60, 16  ;;  %v867_v32 = vsel %vm729_vm12, %v862_v20, %v866_v26  ;;  %3025 = vmatprep.mubr.msk.bf16.mxu0 %vm749_vm14, %v863_v31 }
  0x3f   : > { %v3706_v44 = vsel %vm1359_vm15, %v1364_v42, %v1368_v43  ;;  %v3714_v33 = vsel %vm1359_vm15, %v1368_v43, %v1372_v48  ;;  %v743_v47 = vrot.slane %v3549_v4, 1  ;;  %v870_v14 = vrot.slane %v3699_v41, 1 }
  0x40   : > { %v808_v27 = vsel %vm632_vm2, %v803_v1, %v807_v19  ;;  %v811_v28 = vor.u32 %v809_v11, %v807_v19  ;;  %v1316_v29 = vrot.slane %v1314_v21, 1  ;;  %1033 = vmatpush2.bf16.msra.mxu0 %v3255_v30  ;;  %v745_v39 = vrot.slane %v3569_v17, 1 }
  0x41   : > { %812 = vrot.lane.b32.xlu1 %v808_v27, %s3310_s13  ;;  %1034 = vmatprep.subr.bf16.mxu0 %v3309_v0  ;;  %v3720_v49 = vsel %vm729_vm12, %v741_v45, %v743_v47  ;;  %v871_v25 = vsel %vm729_vm12, %v866_v26, %v870_v14  ;;  %v874_v26 = vrot.slane %v3710_v46, 1  ;;  %vm2141_vm0 = vcmask 1042434  }
  0x42   : > { %v1317_v36 = vsel %vm632_vm2, %v811_v28, %v1316_v29  ;;  %814 = vrot.lane.b32.xlu0 %v811_v28, %s3310_s13  ;;  %v1320_v37 = vor.u32 %v1318_v23, %v1316_v29  ;;  %v1376_v50 = vrot.slane %v3720_v49, 2  ;;  %v3261_v29 = vld [vmem:[%s4452_s3 + $0xd8] sm:$0xff]   ;;  %vm4012_vm2 = vmor %vm620_vm4, %vm2141_vm0  ;;  %vm2145_vm3 = vcmask 1046534  }
  0x43   : > { %v875_v30 = vsel %vm729_vm12, %v870_v14, %v874_v26  ;;  %vm4034_vm5 = vmor %vm4012_vm2, %vm2143_vm1  ;;  %vm2568_vm7 = vcmask 1043459   ;;  %vm2571_vm8 = vcmask 1045509   ;;  %vm2574_vm9 = vcmask 1047559  }
  0x44   : > { %1035 = vmatpush2.bf16.msra.mxu0 %v3256_v38  ;;  %v3726_v51 = vsel %vm1359_vm15, %v1372_v48, %v1376_v50  ;;  %v3263_v38 = vld [vmem:[%s4452_s3 + $0xc8] sm:$0xff]   ;;  %v3832_v48 = vsel %vm729_vm12, %v743_v47, %v745_v39  ;;  %v747_v47 = vrot.slane %v3585_v22, 1  ;;  %vm4053_vm6 = vmor %vm4034_vm5, %vm2145_vm3 }
  0x45   : > { %1321 = vrot.lane.b32.xlu1 %v1317_v36, %s3310_s13  ;;  %1506 = vmatprep.subr.bf16.mxu0 %v3309_v0  ;;  %v878_v36 = vrot.slane %v3720_v49, 1 }
  0x46   : > { %1323 = vrot.lane.b32.xlu0 %v1320_v37, %s3310_s13 }
  0x47   : > { %v879_v43 = vsel %vm729_vm12, %v874_v26, %v878_v36  ;;  %v1363_v26 = vrot.slane %v3657_v16, 2 }
  0x95   : > { %v716_v53 = vpop.permute.xlu1 %715 }
  0x96   : > { %v3730_v56 = vsel %vm749_vm14, %v3427_v35, %v716_v53  ;;  %v3264_v53 = vld [vmem:[%s4452_s3 + $0xc0] sm:$0xff]  }
  0x97   : > { %v1361_v59 = vrot.slane %v3730_v56, 2 }
  0x9d   : > { %v712_v54 = vpop.permute.xlu0 %711 }
  0x9e   : > { %v754_v57 = vsel %vm749_vm14, %v3476_v12, %v712_v54  ;;  %v3258_v12 = vld [vmem:[%s4452_s3 + $0xf0] sm:$0xff]  }
  0x9f   : > { %v858_v3 = vrot.slane %v754_v57, 1 }
  0xa1   : > { %v710_v61 = vpop.permute.xlu1 %709  ;;  %v714_v62 = vpop.permute.xlu0 %713 }
  0xa2   : > { %v751_v63 = vsel %vm749_vm14, %v3517_v34, %v710_v61  ;;  %v757_v2 = vsel %vm749_vm14, %v3445_v52, %v714_v62  ;;  %v3854_v61 = vsel %vm729_vm12, %v745_v39, %v747_v47  ;;  %v3266_v62 = vld [vmem:[%s4452_s3 + $0x110] sm:$0xff]  }
  0xa3   : > { %1241 = vmatmul.mubr.bf16.vlgmr.msra.gmra.mxu1 %v751_v63  ;;  %v859_v35 = vrot.slane %v757_v2, 1  ;;  %v1360_v1 = vrot.slane %v757_v2, 2 }
  0xa4   : > { %3047 = vmatprep.mubr.msk.bf16.mxu1 %vm749_vm14, %v3654_v15  ;;  %3167 = vmatpush1.bf16.msra.mxu1 %v3257_v58  ;;  %v864_v15 = vrot.slane %v3730_v56, 1 }
  0xa5   : > { %v860_v6 = vsel %vm729_vm12, %v858_v3, %v859_v35  ;;  %v718_v7 = vpop.permute.xlu0 %717  ;;  %v720_v8 = vpop.permute.xlu1 %719  ;;  %3156 = vmatprep.subr.bf16.mxu1 %v3309_v0  ;;  %v3750_v52 = vsel %vm1359_vm15, %v1360_v1, %v1361_v59  ;;  %v817_v3 = vrot.slane %v3636_v5, 1 }
  0xa6   : > { %1037 = vmatmul.mubr.bf16.vlgmr.msra.gmra.mxu0 %v860_v6  ;;  %v3754_v34 = vsel %vm749_vm14, %v3434_v40, %v718_v7  ;;  %v3758_v10 = vsel %vm749_vm14, %v3471_v9, %v720_v8  ;;  %v3259_v40 = vld [vmem:[%s4452_s3 + $0xe8] sm:$0xff]   ;;  %v865_v20 = vsel %vm729_vm12, %v859_v35, %v864_v15  ;;  %v3268_v7 = vld [vmem:[%s4452_s3 + $0x100] sm:$0xff]  }
  0xa7   : > { %1507 = vmatpush1.bf16.msra.mxu0 %v3257_v58  ;;  %v1366_v11 = vrot.slane %v3754_v34, 2  ;;  %3026 = vmatprep.mubr.msk.bf16.mxu0 %vm749_vm14, %v867_v32  ;;  %v1370_v13 = vrot.slane %v3758_v10, 2  ;;  %v868_v28 = vrot.slane %v3754_v34, 1  ;;  %v3262_v32 = vld [vmem:[%s4452_s3 + $0xd0] sm:$0xff]   ;;  %v872_v37 = vrot.slane %v3758_v10, 1 }
  0xa8   : > { %1508 = vmatprep.subr.bf16.mxu0 %v3309_v0  ;;  %3168 = vmatpush1.bf16.msra.mxu1 %v3258_v12  ;;  %v818_v6 = vsel %vm729_vm12, %v747_v47, %v817_v3 }
  0xa9   : > { %v722_v9 = vpop.permute.xlu0 %721  ;;  %3157 = vmatprep.subr.bf16.mxu1 %v3309_v0  ;;  %v3771_v19 = vsel %vm1359_vm15, %v1361_v59, %v1366_v11  ;;  %v3774_v21 = vsel %vm1359_vm15, %v1366_v11, %v1370_v13  ;;  %v869_v31 = vsel %vm729_vm12, %v864_v15, %v868_v28  ;;  %v873_v45 = vsel %vm729_vm12, %v868_v28, %v872_v37 }
  0xaa   : > { %v3778_v23 = vsel %vm749_vm14, %v3541_v55, %v722_v9  ;;  %v3260_v55 = vld [vmem:[%s4452_s3 + $0xe0] sm:$0xff]  }
  0xab   : > { %1249 = vmatmul.mubr.bf16.gmra.mxu1 %v754_v57  ;;  %1509 = vmatpush1.bf16.msra.mxu0 %v3258_v12  ;;  %v1374_v24 = vrot.slane %v3778_v23, 2  ;;  %v876_v54 = vrot.slane %v3778_v23, 1  ;;  %v724_v57 = vpop.permute.xlu1 %723 }
  0xac   : > { %3048 = vmatprep.mubr.msk.bf16.mxu1 %vm749_vm14, %v3657_v16  ;;  %1510 = vmatprep.subr.bf16.mxu0 %v3309_v0  ;;  %v3861_v63 = vsel %vm749_vm14, %v3549_v4, %v724_v57  ;;  %v3267_v4 = vld [vmem:[%s4452_s3 + $0x108] sm:$0xff]  }
  0xad   : > { %3169 = vmatpush1.bf16.msra.mxu1 %v3259_v40  ;;  %v3794_v27 = vsel %vm1359_vm15, %v1370_v13, %v1374_v24  ;;  %v877_v59 = vsel %vm729_vm12, %v872_v37, %v876_v54  ;;  %v726_v35 = vpop.permute.xlu0 %725  ;;  %v1326_v37 = vrot.slane %v3647_v60, 1  ;;  %v1378_v16 = vrot.slane %v3861_v63, 2 }
  0xae   : > { %1045 = vmatmul.mubr.bf16.gmra.mxu0 %v865_v20  ;;  %3158 = vmatprep.subr.bf16.mxu1 %v3309_v0  ;;  %v775_v8 = vsel %vm749_vm14, %v3569_v17, %v726_v35  ;;  %v1380_v20 = vrot.slane %v3832_v48, 2 }
  0xaf   : > { %1511 = vmatpush1.bf16.msra.mxu0 %v3259_v40  ;;  %3027 = vmatprep.mubr.msk.bf16.mxu0 %vm749_vm14, %v871_v25 }
  0xb0   : > { %1512 = vmatprep.subr.bf16.mxu0 %v3309_v0 }
  0xb1   : > { %3170 = vmatpush1.bf16.msra.mxu1 %v3260_v55 }
  0xb2   : > { %3159 = vmatprep.subr.bf16.mxu1 %v3309_v0 }
  0xb3   : > { %1257 = vmatmul.mubr.bf16.gmra.mxu1 %v757_v2  ;;  %1513 = vmatpush1.bf16.msra.mxu0 %v3260_v55  ;;  %v880_v2 = vrot.slane %v3861_v63, 1  ;;  %v813_v11 = vpop.permute.xlu1 %812  ;;  %v1384_v55 = vrot.slane %v3854_v61, 2 }
  0xb4   : > { %3049 = vmatprep.mubr.msk.bf16.mxu1 %vm749_vm14, %v3662_v18  ;;  %1514 = vmatprep.subr.bf16.mxu0 %v3309_v0  ;;  %v820_v14 = vsel %vm749_vm14, %v3585_v22, %v813_v11  ;;  %v815_v40 = vpop.permute.xlu0 %814 }
  0xb5   : > { %3171 = vmatpush1.bf16.msra.mxu1 %v3261_v29  ;;  %v881_v12 = vsel %vm729_vm12, %v876_v54, %v880_v2  ;;  %v888_v15 = vrot.slane %v820_v14, 1  ;;  %v822_v22 = vsel %vm749_vm14, %v3636_v5, %v815_v40  ;;  %v1396_v54 = vrot.slane %v1326_v37, 2 }
  0xb6   : > { %1053 = vmatmul.mubr.bf16.gmra.mxu0 %v869_v31  ;;  %3160 = vmatprep.subr.bf16.mxu1 %v3309_v0  ;;  %v892_v28 = vrot.slane %v822_v22, 1 }
  0xb7   : > { %3028 = vmatprep.mubr.msk.bf16.mxu0 %vm749_vm14, %v875_v30  ;;  %1515 = vmatpush1.bf16.msra.mxu0 %v3261_v29  ;;  %v1385_v29 = vsel %vm1359_vm15, %v1380_v20, %v1384_v55  ;;  %v1365_v30 = vsel %vm1359_vm15, %v1363_v26, %v1364_v42  ;;  %v1386_v42 = vrot.slane %v820_v14, 2 }
  0xb8   : > { %1516 = vmatprep.subr.bf16.mxu0 %v3309_v0  ;;  %v893_v31 = vsel %vm729_vm12, %v888_v15, %v892_v28 }
  0xb9   : > { %3172 = vmatpush1.bf16.msra.mxu1 %v3262_v32 }
  0xba   : > { %3161 = vmatprep.subr.bf16.mxu1 %v3309_v0 }
  0xbb   : > { %1265 = vmatmul.mubr.bf16.gmra.mxu1 %v3730_v56  ;;  %1517 = vmatpush1.bf16.msra.mxu0 %v3262_v32  ;;  %v3265_v56 = vld [vmem:[%s4452_s3 + $0x118] sm:$0xff]   ;;  %v1388_v32 = vrot.slane %v818_v6, 2 }
  0xbc   : > { %3050 = vmatprep.mubr.msk.bf16.mxu1 %vm749_vm14, %v3699_v41  ;;  %1518 = vmatprep.subr.bf16.mxu0 %v3309_v0  ;;  %v882_v41 = vrot.slane %v3832_v48, 1 }
  0xbd   : > { %3173 = vmatpush1.bf16.msra.mxu1 %v3263_v38 }
  0xbe   : > { %1061 = vmatmul.mubr.bf16.gmra.mxu0 %v873_v45  ;;  %3162 = vmatprep.subr.bf16.mxu1 %v3309_v0  ;;  %v883_v58 = vsel %vm729_vm12, %v878_v36, %v882_v41  ;;  %v1382_v36 = vrot.slane %v775_v8, 2  ;;  %v1322_v45 = vpop.permute.xlu1 %1321 }
  0xbf   : > { %3029 = vmatprep.mubr.msk.bf16.mxu0 %vm749_vm14, %v879_v43  ;;  %1519 = vmatpush1.bf16.msra.mxu0 %v3263_v38  ;;  %v1389_v38 = vsel %vm1359_vm15, %v1384_v55, %v1388_v32  ;;  %v1327_v43 = vsel %vm729_vm12, %v817_v3, %v1326_v37 }
  0xc0   : > { %1520 = vmatprep.subr.bf16.mxu0 %v3309_v0  ;;  %v1383_v39 = vsel %vm1359_vm15, %v1378_v16, %v1382_v36  ;;  %v1392_v18 = vrot.slane %v1327_v43, 2 }
  0xc1   : > { %3174 = vmatpush1.bf16.msra.mxu1 %v3264_v53 }
  0xc2   : > { %3163 = vmatprep.subr.bf16.mxu1 %v3309_v0 }
  0xc3   : > { %1273 = vmatmul.mubr.bf16.gmra.mxu1 %v3754_v34  ;;  %1521 = vmatpush1.bf16.msra.mxu0 %v3264_v53  ;;  %v890_v34 = vrot.slane %v818_v6, 1  ;;  %v1387_v53 = vsel %vm1359_vm15, %v1382_v36, %v1386_v42 }
  0xc4   : > { %3051 = vmatprep.mubr.msk.bf16.mxu1 %vm749_vm14, %v3710_v46  ;;  %1530 = vmatprep.subr.bf16.mxu0 %v3309_v0  ;;  %v886_v46 = vrot.slane %v3854_v61, 1 }
  0xc5   : > { %3175 = vmatpush2.bf16.msra.mxu1 %v3265_v56 }
  0xc6   : > { %1069 = vmatmul.mubr.bf16.gmra.mxu0 %v877_v59  ;;  %3164 = vmatprep.subr.bf16.mxu1 %v3309_v0  ;;  %v887_v1 = vsel %vm729_vm12, %v882_v41, %v886_v46  ;;  %v891_v17 = vsel %vm729_vm12, %v886_v46, %v890_v34  ;;  %v1329_v41 = vsel %vm749_vm14, %v3636_v5, %v1322_v45 }
  0xc7   : > { %3030 = vmatprep.mubr.msk.bf16.mxu0 %vm749_vm14, %v883_v58  ;;  %1531 = vmatpush2.bf16.msra.mxu0 %v3265_v56  ;;  %v1390_v47 = vrot.slane %v1329_v41, 2  ;;  %v1324_v56 = vpop.permute.xlu0 %1323 }
  0xc8   : > { %1532 = vmatprep.subr.bf16.mxu0 %v3309_v0 }
  0xc9   : > { %3176 = vmatpush2.bf16.msra.mxu1 %v3266_v62  ;;  %v1391_v57 = vsel %vm1359_vm15, %v1386_v42, %v1390_v47 }
  0xca   : > { %3165 = vmatprep.subr.bf16.mxu1 %v3309_v0 }
  0xcb   : > { %1281 = vmatmul.mubr.bf16.gmra.mxu1 %v3758_v10  ;;  %1533 = vmatpush2.bf16.msra.mxu0 %v3266_v62  ;;  %v884_v10 = vrot.slane %v775_v8, 1 }
  0xcc   : > { %3052 = vmatprep.mubr.msk.bf16.mxu1 %vm749_vm14, %v3720_v49  ;;  %1534 = vmatprep.subr.bf16.mxu0 %v3309_v0 }
  0xcd   : > { %3177 = vmatpush2.bf16.msra.mxu1 %v3267_v4  ;;  %v885_v13 = vsel %vm729_vm12, %v880_v2, %v884_v10  ;;  %v889_v25 = vsel %vm729_vm12, %v884_v10, %v888_v15 }
  0xce   : > { %1077 = vmatmul.mubr.bf16.gmra.mxu0 %v881_v12  ;;  %3166 = vmatprep.subr.bf16.mxu1 %v3309_v0 }
  0xcf   : > { %3031 = vmatprep.mubr.msk.bf16.mxu0 %vm749_vm14, %v887_v1  ;;  %1535 = vmatpush2.bf16.msra.mxu0 %v3267_v4 }
  0xd0   : > { %1536 = vmatprep.subr.bf16.mxu0 %v3309_v0  ;;  %v894_v0 = vrot.slane %v817_v3, 1 }
  0xd1   : > { %3178 = vmatpush2.bf16.msra.mxu1 %v3268_v7 }
  0xd2   : > { %v895_v9 = vsel %vm729_vm12, %v890_v34, %v894_v0 }
  0xd3   : > { %1289 = vmatmul.mubr.bf16.gmra.mxu1 %v3778_v23  ;;  %1537 = vmatpush2.bf16.msra.mxu0 %v3268_v7 }
  0xd4   : > { %3053 = vmatprep.mubr.msk.bf16.mxu1 %vm749_vm14, %v3832_v48  ;;  %v1393_v48 = vsel %vm1359_vm15, %v1388_v32, %v1392_v18 }
  0xd6   : > { %1085 = vmatmul.mubr.bf16.gmra.mxu0 %v885_v13 }
  0xd7   : > { %3032 = vmatprep.mubr.msk.bf16.mxu0 %vm749_vm14, %v891_v17 }
  0xdb   : > { %1297 = vmatmul.mubr.bf16.gmra.mxu1 %v3861_v63 }
  0xdc   : > { %3054 = vmatprep.mubr.msk.bf16.mxu1 %vm749_vm14, %v3854_v61 }
  0xde   : > { %1093 = vmatmul.mubr.bf16.gmra.mxu0 %v889_v25 }
  0xdf   : > { %3033 = vmatprep.mubr.msk.bf16.mxu0 %vm749_vm14, %v895_v9 }
  0xe3   : > { %1305 = vmatmul.mubr.bf16.gmra.mxu1 %v775_v8 }
  0xe4   : > { %3096 = vmatprep.mubr.msk.bf16.mxu1 %vm749_vm14, %v1385_v29 }
  0xe6   : > { %1101 = vmatmul.mubr.bf16.gmra.mxu0 %v893_v31 }
  0xe7   : > { %3091 = vmatprep.mubr.msk.bf16.mxu0 %vm749_vm14, %v1365_v30 }
  0xeb   : > { %1579 = vmatmul.mubr.bf16.vlgmr.msra.gmra.mxu1 %v1383_v39 }
  0xec   : > { %3097 = vmatprep.mubr.msk.bf16.mxu1 %vm749_vm14, %v1389_v38 }
  0xee   : > { %1539 = vmatmul.mubr.bf16.vlgmr.msra.gmra.mxu0 %v3750_v52  ;;  %v1397_v52 = vsel %vm1359_vm15, %v1392_v18, %v1396_v54 }
  0xef   : > { %3092 = vmatprep.mubr.msk.bf16.mxu0 %vm749_vm14, %v3706_v44  ;;  %v1331_v44 = vsel %vm749_vm14, %v3647_v60, %v1324_v56  ;;  %v1381_v60 = vsel %vm1359_vm15, %v1376_v50, %v1380_v20 }
  0xf0   : > { %v1394_v5 = vrot.slane %v1331_v44, 2 }
  0xf3   : > { %1587 = vmatmul.mubr.bf16.gmra.mxu1 %v1387_v53 }
  0xf4   : > { %3098 = vmatprep.mubr.msk.bf16.mxu1 %vm749_vm14, %v1393_v48 }
  0xf6   : > { %1547 = vmatmul.mubr.bf16.gmra.mxu0 %v3771_v19  ;;  %v1395_v19 = vsel %vm1359_vm15, %v1390_v47, %v1394_v5 }
  0xf7   : > { %3093 = vmatprep.mubr.msk.bf16.mxu0 %vm749_vm14, %v3714_v33  ;;  %v1379_v33 = vsel %vm1359_vm15, %v1374_v24, %v1378_v16 }
  0xfb   : > { %1595 = vmatmul.mubr.bf16.gmra.mxu1 %v1391_v57 }
  0xfc   : > { %3099 = vmatprep.mubr.msk.bf16.mxu1 %vm749_vm14, %v1397_v52 }
  0xfe   : > { %1555 = vmatmul.mubr.bf16.gmra.mxu0 %v3774_v21 }
  0xff   : > { %3094 = vmatprep.mubr.msk.bf16.mxu0 %vm749_vm14, %v3726_v51 }
 0x103   : > { %1603 = vmatmul.mubr.bf16.gmra.mxu1 %v1395_v19 }
 0x106   : > { %1563 = vmatmul.mubr.bf16.gmra.mxu0 %v3794_v27 }
 0x107   : > { %3095 = vmatprep.mubr.msk.bf16.mxu0 %vm749_vm14, %v1381_v60 }
 0x10e   : > { %1571 = vmatmul.mubr.bf16.gmra.mxu0 %v1379_v33 }
 0x163   : > { %v1242_v21 = vpop.f32.mrf.mxu1 }
 0x165   : > { %v1244_v58 = vpop.f32.mrf.mxu1 }
 0x166   : > { %v1038_v59 = vpop.f32.mrf.mxu0 }
 0x167   : > { %v1245_v51 = vpop.f32.mrf.mxu1  ;;  %v3948_v61 = vadd.f32 %v1242_v21, %v1038_v59 }
 0x168   : > { %v1040_v62 = vpop.f32.mrf.mxu0 }
 0x169   : > { %v1247_v63 = vpop.f32.mrf.mxu1 }
 0x16a   : > { %v1041_v49 = vpop.f32.mrf.mxu0 }
 0x16b   : > { %v1250_v46 = vpop.f32.mrf.mxu1  ;;  %v3950_v50 = vadd.f32 %v1245_v51, %v1041_v49 }
 0x16c   : > { %v1043_v27 = vpop.f32.mrf.mxu0 }
 0x16d   : > { %v1252_v2 = vpop.f32.mrf.mxu1 }
 0x16e   : > { %v1046_v3 = vpop.f32.mrf.mxu0 }
 0x16f   : > { %v1253_v4 = vpop.f32.mrf.mxu1  ;;  %v3952_v23 = vadd.f32 %v1250_v46, %v1046_v3 }
 0x170   : > { %v1048_v24 = vpop.f32.mrf.mxu0 }
 0x171   : > { %v1255_v35 = vpop.f32.mrf.mxu1 }
 0x172   : > { %v1049_v1 = vpop.f32.mrf.mxu0 }
 0x173   : > { %v1258_v12 = vpop.f32.mrf.mxu1  ;;  %v3954_v6 = vadd.f32 %v1253_v4, %v1049_v1 }
 0x174   : > { %v1051_v7 = vpop.f32.mrf.mxu0 }
 0x175   : > { %v1260_v8 = vpop.f32.mrf.mxu1 }
 0x176   : > { %v1054_v34 = vpop.f32.mrf.mxu0 }
 0x177   : > { %v1261_v10 = vpop.f32.mrf.mxu1  ;;  %v3956_v11 = vadd.f32 %v1258_v12, %v1054_v34 }
 0x178   : > { %v1056_v17 = vpop.f32.mrf.mxu0 }
 0x179   : > { %v1263_v13 = vpop.f32.mrf.mxu1 }
 0x17a   : > { %v1057_v14 = vpop.f32.mrf.mxu0 }
 0x17b   : > { %v1266_v0 = vpop.f32.mrf.mxu1  ;;  %v3958_v15 = vadd.f32 %v1261_v10, %v1057_v14 }
 0x17c   : > { %v1059_v40 = vpop.f32.mrf.mxu0 }
 0x17d   : > { %v1268_v9 = vpop.f32.mrf.mxu1  ;;  %v3311_v40 = vmov 1983009808  }
 0x17e   : > { %v1062_v25 = vpop.f32.mrf.mxu0  ;;  %v1692_v9 = vunpack.c.l.s4 %v3311_v40 }
 0x17f   : > { %v1269_v20 = vpop.f32.mrf.mxu1  ;;  %v3960_v55 = vadd.f32 %v1266_v0, %v1062_v25  ;;  %v3985_v0 = vld [vmem:[%s4453_s4] ss:$0 sm:$0xff]  ;;  %v1694_v25 = vlaneseq }
 0x180   : > { %v1064_v22 = vpop.f32.mrf.mxu0 }
 0x181   : > { %v1271_v26 = vpop.f32.mrf.mxu1 }
 0x182   : > { %v1065_v28 = vpop.f32.mrf.mxu0 }
 0x183   : > { %v1274_v29 = vpop.f32.mrf.mxu1  ;;  %v3962_v30 = vadd.f32 %v1269_v20, %v1065_v28 }
 0x184   : > { %v1067_v31 = vpop.f32.mrf.mxu0 }
 0x185   : > { %v1276_v32 = vpop.f32.mrf.mxu1  ;;  %v1693_v31 = vunpack.c.0.s8 %v1692_v9 }
 0x186   : > { %v1070_v36 = vpop.f32.mrf.mxu0  ;;  %v3988_v32 = vshrl.u32 %v1694_v25, 7 }
 0x187   : > { %v1277_v37 = vpop.f32.mrf.mxu1  ;;  %v3964_v16 = vadd.f32 %v1274_v29, %v1070_v36 }
 0x188   : > { %v1072_v38 = vpop.f32.mrf.mxu0 }
 0x189   : > { %v1279_v39 = vpop.f32.mrf.mxu1 }
 0x18a   : > { %v1073_v43 = vpop.f32.mrf.mxu0 }
 0x18b   : > { %v1282_v18 = vpop.f32.mrf.mxu1  ;;  %v3966_v42 = vadd.f32 %v1277_v37, %v1073_v43 }
 0x18c   : > { %v1075_v45 = vpop.f32.mrf.mxu0 }
 0x18d   : > { %v1284_v48 = vpop.f32.mrf.mxu1 }
 0x18e   : > { %v1078_v53 = vpop.f32.mrf.mxu0 }
 0x18f   : > { %v1285_v41 = vpop.f32.mrf.mxu1  ;;  %v1283_v54 = vadd.f32 %v1282_v18, %v1078_v53  ;;  %v3993_v53 = vsub.s32 %v1693_v31, %v3988_v32 }
 0x190   : > { %v1080_v47 = vpop.f32.mrf.mxu0 }
 0x191   : > { %v1287_v56 = vpop.f32.mrf.mxu1 }
 0x192   : > { %v1081_v44 = vpop.f32.mrf.mxu0 }
 0x193   : > { %v1290_v52 = vpop.f32.mrf.mxu1  ;;  %v1286_v57 = vadd.f32 %v1285_v41, %v1081_v44 }
 0x194   : > { %v1083_v5 = vpop.f32.mrf.mxu0 }
 0x195   : > { %v1292_v19 = vpop.f32.mrf.mxu1 }
 0x196   : > { %v1086_v60 = vpop.f32.mrf.mxu0 }
 0x197   : > { %v1293_v33 = vpop.f32.mrf.mxu1  ;;  %v1291_v21 = vadd.f32 %v1290_v52, %v1086_v60 }
 0x198   : > { %v1088_v58 = vpop.f32.mrf.mxu0 }
 0x199   : > { %v1295_v59 = vpop.f32.mrf.mxu1 }
 0x19a   : > { %v1089_v51 = vpop.f32.mrf.mxu0 }
 0x19b   : > { %v1298_v62 = vpop.f32.mrf.mxu1  ;;  %v1294_v63 = vadd.f32 %v1293_v33, %v1089_v51 }
 0x19c   : > { %v1091_v49 = vpop.f32.mrf.mxu0 }
 0x19d   : > { %v1300_v46 = vpop.f32.mrf.mxu1 }
 0x19e   : > { %v1094_v27 = vpop.f32.mrf.mxu0 }
 0x19f   : > { %v3968_v2 = vpop.f32.mrf.mxu1  ;;  %v3970_v3 = vadd.f32 %v1298_v62, %v1094_v27 }
 0x1a0   : > { %v1096_v4 = vpop.f32.mrf.mxu0 }
 0x1a1   : > { %v1303_v24 = vpop.f32.mrf.mxu1 }
 0x1a2   : > { %v3972_v35 = vpop.f32.mrf.mxu0 }
 0x1a3   : > { %v3974_v1 = vpop.f32.mrf.mxu1 }
 0x1a4   : > { %v1099_v12 = vpop.f32.mrf.mxu0 }
 0x1a5   : > { %v1308_v7 = vpop.f32.mrf.mxu1 }
 0x1a6   : > { %v3976_v8 = vpop.f32.mrf.mxu0 }
 0x1a7   : > { %v3978_v34 = vpop.f32.mrf.mxu1 }
 0x1a8   : > { %v1104_v10 = vpop.f32.mrf.mxu0 }
 0x1a9   : > { %v1311_v17 = vpop.f32.mrf.mxu1 }
 0x1aa   : > { %v3980_v13 = vpop.f32.mrf.mxu0 }
 0x1ab   : > { %v1580_v14 = vpop.f32.mrf.mxu1 }
 0x1ac   : > { %v1621_v20 = vadd.f32 %v1580_v14, %v1283_v54  ;;  %v1107_v22 = vpop.f32.mrf.mxu0 }
 0x1ad   : > { %v1582_v26 = vpop.f32.mrf.mxu1 }
 0x1ae   : > { %v1646_v28 = vadd.f32 %v3985_v0, %v1621_v20  ;;  %v1540_v29 = vpop.f32.mrf.mxu0 }
 0x1af   : > { %v1583_v36 = vpop.f32.mrf.mxu1  ;;  %v1611_v37 = vadd.f32 %v1540_v29, %v3948_v61 }
 0x1b0   : > { %v1664_v38 = vmax.f32 %v1646_v28, 0.0  ;;  %v1622_v39 = vadd.f32 %v1583_v36, %v1286_v57  ;;  %v1542_v43 = vpop.f32.mrf.mxu0 }
 0x1b1   : > { %v1636_v18 = vadd.f32 %v3985_v0, %v1611_v37  ;;  %v1585_v45 = vpop.f32.mrf.mxu1 }
 0x1b2   : > { %v1543_v48 = vpop.f32.mrf.mxu0  ;;  %v1647_v41 = vadd.f32 %v3985_v0, %v1622_v39  ;;  %v1860_v47 = vcombine.high %v1664_v38, %v1664_v38  ;;  %v1867_v60 = vrot.slane %v1664_v38, %v3993_v53 }
 0x1b3   : > { %v1588_v54 = vpop.f32.mrf.mxu1  ;;  %v1654_v52 = vmax.f32 %v1636_v18, 0.0  ;;  %v1612_v57 = vadd.f32 %v1543_v48, %v3950_v50 }
 0x1b4   : > { %v1623_v56 = vadd.f32 %v1588_v54, %v1291_v21  ;;  %v1545_v44 = vpop.f32.mrf.mxu0  ;;  %v3999_v33 = vmax.f32 %v1647_v41, 0.0  ;;  %v1874_v51 = vrot.slane %v1860_v47, %v3993_v53  ;;  %v1875_v17 = vcombine.high %v1867_v60, %v1867_v60 }
 0x1b5   : > { %v1590_v5 = vpop.f32.mrf.mxu1  ;;  %v1690_v46 = vcombine.high %v1654_v52, %v1654_v52  ;;  %v1697_v27 = vrot.slane %v1654_v52, %v3993_v53  ;;  %v1637_v7 = vadd.f32 %v3985_v0, %v1612_v57 }
 0x1b6   : > { %v1648_v61 = vadd.f32 %v3985_v0, %v1623_v56  ;;  %v1548_v19 = vpop.f32.mrf.mxu0  ;;  %v4018_v14 = vrot.slane %v3999_v33, %v3993_v53  ;;  %v1876_v26 = vcombine.high %v1874_v51, %v1874_v51 }
 0x1b7   : > { %v1591_v58 = vpop.f32.mrf.mxu1  ;;  %v1613_v59 = vadd.f32 %v1548_v19, %v3952_v23  ;;  %v4026_v29 = vrot.slane %v1690_v46, %v3993_v53  ;;  %v1705_v31 = vcombine.high %v1697_v27, %v1697_v27  ;;  %v1655_v48 = vmax.f32 %v1637_v7, 0.0 }
 0x1b8   : > { %v1666_v62 = vmax.f32 %v1648_v61, 0.0  ;;  %v1624_v21 = vadd.f32 %v1591_v58, %v1294_v63  ;;  %v1550_v49 = vpop.f32.mrf.mxu0 }
 0x1b9   : > { %v1638_v50 = vadd.f32 %v3985_v0, %v1613_v59  ;;  %v1593_v4 = vpop.f32.mrf.mxu1 }
 0x1ba   : > { %v1894_v24 = vcombine.high %v1666_v62, %v1666_v62  ;;  %v4006_v12 = vrot.slane %v1666_v62, %v3993_v53  ;;  %v1649_v23 = vadd.f32 %v3985_v0, %v1624_v21  ;;  %v1551_v10 = vpop.f32.mrf.mxu0 }
 0x1bb   : > { %v1656_v40 = vmax.f32 %v1638_v50, 0.0  ;;  %v1596_v9 = vpop.f32.mrf.mxu1  ;;  %v1614_v44 = vadd.f32 %v1551_v10, %v3954_v6 }
 0x1bc   : > { %v1908_v25 = vrot.slane %v1894_v24, %v3993_v53  ;;  %v1909_v20 = vcombine.high %v4006_v12, %v4006_v12  ;;  %v4023_v22 = vmax.f32 %v1649_v23, 0.0  ;;  %v1553_v28 = vpop.f32.mrf.mxu0  ;;  %v1625_v19 = vadd.f32 %v1596_v9, %v3970_v3 }
 0x1bd   : > { %v1724_v36 = vcombine.high %v1656_v40, %v1656_v40  ;;  %v4029_v37 = vrot.slane %v1656_v40, %v3993_v53  ;;  %v1598_v38 = vpop.f32.mrf.mxu1 }
 0x1be   : > { %v1910_v43 = vcombine.high %v1908_v25, %v1908_v25  ;;  %v4038_v18 = vmax.f32 %v1867_v60, %v1909_v20  ;;  %v2091_v45 = vmax.f32 %v1875_v17, %v1908_v25  ;;  %v4040_v41 = vpop.f32.mrf.mxu0  ;;  %v1918_v54 = vrot.slane %v4023_v22, %v3993_v53 }
 0x1bf   : > { %v1738_v47 = vrot.slane %v1724_v36, %v3993_v53  ;;  %v1739_v56 = vcombine.high %v4029_v37, %v4029_v37  ;;  %v1599_v52 = vpop.f32.mrf.mxu1  ;;  %v1707_v20 = vcombine.high %v1655_v48, %v1655_v48 }
 0x1c0   : > { %v2092_v5 = vmax.f32 %v1874_v51, %v1910_v43  ;;  %v2208_v61 = vrot.slane %v4038_v18, 7  ;;  %v2211_v57 = vrot.slane %v2091_v45, 7  ;;  %v1558_v60 = vpop.f32.mrf.mxu0  ;;  %v1926_v59 = vcombine.high %v1918_v54, %v1918_v54 }
 0x1c1   : > { %v2093_v62 = vmax.f32 %v1876_v26, %v1918_v54  ;;  %v1740_v21 = vcombine.high %v1738_v47, %v1738_v47  ;;  %v2068_v49 = vmax.f32 %v1697_v27, %v1739_v56  ;;  %v1601_v6 = vpop.f32.mrf.mxu1  ;;  %v2069_v4 = vmax.f32 %v1705_v31, %v1738_v47 }
 0x1c2   : > { %v2210_v51 = vrot.slane %v2208_v61, 2  ;;  %v2213_v46 = vrot.slane %v2211_v57, 2  ;;  %v2214_v50 = vrot.slane %v2092_v5, 7  ;;  %v4059_v3 = vpop.f32.mrf.mxu0  ;;  %v2094_v24 = vmax.f32 %v4018_v14, %v1926_v59 }
 0x1c3   : > { %v2217_v7 = vrot.slane %v2093_v62, 7  ;;  %v2070_v23 = vmax.f32 %v4026_v29, %v1740_v21  ;;  %v3101_v10 = vrot.slane %v2068_v49, 9  ;;  %v4063_v63 = vpop.f32.mrf.mxu1  ;;  %v2149_v9 = vrot.slane %v2069_v4, 7 }
 0x1c4   : > { %v4067_v27 = vsel %vm4053_vm6, %v2210_v51, %v2211_v57  ;;  %v4071_v17 = vsel %vm4053_vm6, %v2213_v46, %v2214_v50  ;;  %v2216_v40 = vrot.slane %v2214_v50, 2  ;;  %v1561_v25 = vpop.f32.mrf.mxu0  ;;  %v2220_v28 = vrot.slane %v2094_v24, 7 }
 0x1c5   : > { %v2219_v26 = vrot.slane %v2217_v7, 2  ;;  %v1639_v31 = vadd.f32 %v3985_v0, %v1614_v44  ;;  %v1606_v36 = vpop.f32.mrf.mxu1  ;;  %v2150_v39 = vsel %vm4053_vm6, %v3101_v10, %v2149_v9  ;;  %v2151_v43 = vrot.slane %v2149_v9, 2 }
 0x1c6   : > { %v4076_v38 = vsel %vm4053_vm6, %v2216_v40, %v2217_v7  ;;  %v2152_v45 = vrot.slane %v2070_v23, 7  ;;  %v4080_v54 = vpop.f32.mrf.mxu0  ;;  %v1302_v47 = vadd.f32 %v3968_v2, %v3972_v35  ;;  %v4085_v56 = vsub.s32 0, %v3988_v32 }
 0x1c7   : > { %v2221_v44 = vsel %vm4053_vm6, %v2219_v26, %v2220_v28  ;;  %v4089_v5 = vpop.f32.mrf.mxu1  ;;  %v3105_v59 = vrot.slane %v2150_v39, 9  ;;  %v1650_v62 = vadd.f32 %v3985_v0, %v1625_v19  ;;  %v1307_v49 = vadd.f32 %v3974_v1, %v3976_v8 }
 0x1c8   : > { %v3128_v57 = vrot.slane %v2221_v44, 9  ;;  %v2153_v60 = vsel %vm4053_vm6, %v2151_v43, %v2152_v45  ;;  %v1566_v21 = vpop.f32.mrf.mxu0  ;;  %v4098_v2 = vadd.f32 %v3978_v34, %v3980_v13  ;;  %v1714_v35 = vrot.slane %v1655_v48, %v3993_v53 }
 0x1c9   : > { %v3106_v32 = vrot.slane %v2153_v60, 9  ;;  %v1609_v6 = vpop.f32.mrf.mxu1  ;;  %v4102_v51 = vrot.slane %v1707_v20, %v3993_v53  ;;  %v2375_v50 = vmax.f32 %v2150_v39, %v3105_v59  ;;  %v1657_v4 = vmax.f32 %v1639_v31, 0.0 }
 0x1ca   : > { %v2398_v46 = vmax.f32 %v2221_v44, %v3128_v57  ;;  %v4104_v24 = vpop.f32.mrf.mxu0  ;;  %v1911_v19 = vcombine.high %v4023_v22, %v4023_v22  ;;  %v1626_v8 = vadd.f32 %v1599_v52, %v1302_v47  ;;  %v1615_v34 = vadd.f32 %v4040_v41, %v3956_v11 }
 0x1cb   : > { %v2376_v1 = vmax.f32 %v2153_v60, %v3106_v32  ;;  %v1877_v13 = vcombine.high %v3999_v33, %v3999_v33  ;;  %v2442_v48 = vrot.slane %v2375_v50, %v4085_v56  ;;  %v4113_v7 = vmax.f32 %v1650_v62, 0.0 }
 0x1cc   : > { %v1706_v23 = vcombine.high %v4026_v29, %v4026_v29  ;;  %v1569_v10 = vpop.f32.mrf.mxu0  ;;  %v1741_v9 = vcombine.high %v1657_v4, %v1657_v4  ;;  %v1748_v22 = vrot.slane %v1657_v4, %v3993_v53  ;;  %v1651_v52 = vadd.f32 %v3985_v0, %v1626_v8 }
 0x1cd   : > { %v2446_v40 = vrot.slane %v2376_v1, %v4085_v56  ;;  %v1722_v25 = vcombine.high %v1714_v35, %v1714_v35  ;;  %v2534_v11 = vrot.slane %v2398_v46, %v4085_v56  ;;  %v1640_v41 = vadd.f32 %v3985_v0, %v1615_v34 }
 0x1ce   : > { %v1723_v20 = vcombine.high %v4102_v51, %v4102_v51  ;;  %v4124_v26 = vpop.f32.mrf.mxu0  ;;  %v4127_v29 = vrot.slane %v1911_v19, %v3993_v53  ;;  %v1755_v31 = vrot.slane %v1741_v9, %v3993_v53  ;;  %v1756_v36 = vcombine.high %v1748_v22, %v1748_v22 }
 0x1cf   : > { %v2567_v28 = vsel %vm2141_vm0, %v2446_v40, %v2442_v48  ;;  %v2154_v39 = vrot.slane %v2152_v45, 2  ;;  %v2071_v43 = vmax.f32 %v1706_v23, %v1748_v22  ;;  %v1669_v47 = vmax.f32 %v1651_v52, 0.0 }
 0x1d0   : > { %v4131_v44 = vmax.f32 %v1640_v41, 0.0  ;;  %v1574_v57 = vpop.f32.mrf.mxu0  ;;  %v1928_v60 = vcombine.high %v4113_v7, %v4113_v7  ;;  %v1757_v59 = vcombine.high %v1755_v31, %v1755_v31  ;;  %v2072_v62 = vmax.f32 %v1714_v35, %v1756_v36 }
 0x1d1   : > { %v2073_v21 = vmax.f32 %v1722_v25, %v1755_v31  ;;  %v4136_v32 = vsel %vm620_vm4, %v2534_v11, 0.0  ;;  %v4140_v6 = vrot.slane %v4113_v7, %v3993_v53  ;;  %v2155_v45 = vrot.slane %v2071_v43, 7 }
 0x1d2   : > { %v1945_v46 = vcombine.high %v1669_v47, %v1669_v47  ;;  %v4142_v50 = vpop.f32.mrf.mxu0  ;;  %v2074_v4 = vmax.f32 %v4102_v51, %v1757_v59  ;;  %v2158_v19 = vrot.slane %v2072_v62, 7  ;;  %v1765_v35 = vrot.slane %v4131_v44, %v3993_v53 }
 0x1d3   : > { %v2161_v1 = vrot.slane %v2073_v21, 7  ;;  %v2156_v8 = vsel %vm4053_vm6, %v2154_v39, %v2155_v45  ;;  %v2157_v34 = vrot.slane %v2155_v45, 2  ;;  %v1627_v23 = vadd.f32 %v4063_v63, %v1307_v49 }
 0x1d4   : > { %v4150_v48 = vrot.slane %v1945_v46, %v3993_v53  ;;  %v1577_v10 = vpop.f32.mrf.mxu0  ;;  %v2160_v40 = vrot.slane %v2158_v19, 2  ;;  %v2164_v22 = vrot.slane %v2074_v4, 7  ;;  %v3107_v51 = vrot.slane %v2156_v8, 9 }
 0x1d5   : > { %v2163_v9 = vrot.slane %v2161_v1, 2  ;;  %v1943_v52 = vcombine.high %v4140_v6, %v4140_v6  ;;  %v2159_v25 = vsel %vm4053_vm6, %v2157_v34, %v2158_v19  ;;  %v1773_v41 = vcombine.high %v1765_v35, %v1765_v35 }
 0x1d6   : > { %v1961_v11 = vcombine.high %v4150_v48, %v4150_v48  ;;  %v2162_v31 = vsel %vm4053_vm6, %v2160_v40, %v2161_v1  ;;  %v2166_v49 = vrot.slane %v2164_v22, 2  ;;  %v3108_v36 = vrot.slane %v2159_v25, 9 }
 0x1d7   : > { %v2165_v63 = vsel %vm4053_vm6, %v2163_v9, %v2164_v22  ;;  %v3109_v39 = vrot.slane %v2162_v31, 9  ;;  %v2377_v57 = vmax.f32 %v2156_v8, %v3107_v51  ;;  %v2075_v21 = vmax.f32 %v1723_v20, %v1765_v35 }
 0x1d8   : > { %v3110_v43 = vrot.slane %v2165_v63, 9  ;;  %v2095_v59 = vmax.f32 %v4127_v29, %v1961_v11  ;;  %v2378_v62 = vmax.f32 %v2159_v25, %v3108_v36  ;;  %v2076_v45 = vmax.f32 %v4029_v37, %v1773_v41 }
 0x1d9   : > { %v1652_v46 = vadd.f32 %v3985_v0, %v1627_v23  ;;  %v2379_v4 = vmax.f32 %v2162_v31, %v3109_v39  ;;  %v2450_v1 = vrot.slane %v2377_v57, %v4085_v56  ;;  %v1927_v34 = vcombine.high %v4127_v29, %v4127_v29 }
 0x1da   : > { %v2380_v19 = vmax.f32 %v2165_v63, %v3110_v43  ;;  %v2454_v10 = vrot.slane %v2378_v62, %v4085_v56  ;;  %v2167_v40 = vrot.slane %v2075_v21, 7  ;;  %v2170_v8 = vrot.slane %v2076_v45, 7 }
 0x1db   : > { %v1670_v9 = vmax.f32 %v1652_v46, 0.0  ;;  %v2458_v20 = vrot.slane %v2379_v4, %v4085_v56  ;;  %v2569_v35 = vsel %vm2568_vm7, %v2450_v1, %v2567_v28  ;;  %v1616_v23 = vadd.f32 %v4059_v3, %v3958_v15 }
 0x1dc   : > { %v2462_v37 = vrot.slane %v2380_v19, %v4085_v56  ;;  %v2570_v22 = vsel %vm2143_vm1, %v2454_v10, %v2569_v35  ;;  %v2168_v29 = vsel %vm4053_vm6, %v2166_v49, %v2167_v40  ;;  %v2169_v51 = vrot.slane %v2167_v40, 2 }
 0x1dd   : > { %v1962_v25 = vcombine.high %v1670_v9, %v1670_v9  ;;  %v2572_v11 = vsel %vm2571_vm8, %v2458_v20, %v2570_v22  ;;  %v4180_v41 = vrot.slane %v1669_v47, %v3993_v53  ;;  %v3111_v31 = vrot.slane %v2168_v29, 9 }
 0x1de   : > { %v1969_v63 = vrot.slane %v1670_v9, %v3993_v53  ;;  %v3104_v36 = vrot.slane %v2095_v59, 9  ;;  %v4186_v15 = vsel %vm4053_vm6, %v2169_v51, %v2170_v8  ;;  %v2573_v3 = vsel %vm2145_vm3, %v2462_v37, %v2572_v11 }
 0x1df   : > { %v1976_v28 = vrot.slane %v1962_v25, %v3993_v53  ;;  %v2381_v49 = vmax.f32 %v2168_v29, %v3111_v31  ;;  %v1641_v47 = vadd.f32 %v3985_v0, %v1616_v23  ;;  %v2689_v57 = vrot.slane %v4136_v32, %v3993_v53 }
 0x1e0   : > { %v1977_v39 = vcombine.high %v1969_v63, %v1969_v63  ;;  %v2096_v43 = vmax.f32 %v1927_v34, %v1969_v63  ;;  %v4197_v59 = vrot.slane %v1928_v60, %v3993_v53  ;;  %v1758_v45 = vcombine.high %v4131_v44, %v4131_v44 }
 0x1e1   : > { %v1978_v62 = vcombine.high %v1976_v28, %v1976_v28  ;;  %v2098_v21 = vmax.f32 %v1943_v52, %v1976_v28  ;;  %v2466_v46 = vrot.slane %v2381_v49, %v4085_v56  ;;  %v1960_v1 = vcombine.high %v4180_v41, %v4180_v41 }
 0x1e2   : > { %v2097_v4 = vmax.f32 %v4140_v6, %v1977_v39  ;;  %v2224_v19 = vrot.slane %v2096_v43, 7  ;;  %v1628_v44 = vadd.f32 %v4089_v5, %v4098_v2  ;;  %v1659_v10 = vmax.f32 %v1641_v47, 0.0 }
 0x1e3   : > { %v2099_v7 = vmax.f32 %v4197_v59, %v1978_v62  ;;  %v2230_v60 = vrot.slane %v2098_v21, 7  ;;  %v2575_v52 = vsel %vm2574_vm9, %v2466_v46, %v2573_v3  ;;  %v4220_v37 = vrot.slane %v1758_v45, %v3993_v53 }
 0x1e4   : > { %v2225_v6 = vsel %vm4053_vm6, %v3104_v36, %v2224_v19  ;;  %v2226_v34 = vrot.slane %v2224_v19, 2  ;;  %v2602_v40 = vsel %vm620_vm4, 0.0, %v2575_v52  ;;  %v2227_v8 = vrot.slane %v2097_v4, 7 }
 0x1e5   : > { %v2232_v9 = vrot.slane %v2230_v60, 2  ;;  %v2233_v20 = vrot.slane %v2099_v7, 7  ;;  %v2618_v35 = vcombine.high %v2602_v40, %v2602_v40  ;;  %v2625_v23 = vrot.slane %v2602_v40, %v3993_v53 }
 0x1e6   : > { %v3129_v5 = vrot.slane %v2225_v6, 9  ;;  %v2228_v2 = vsel %vm4053_vm6, %v2226_v34, %v2227_v8  ;;  %v2229_v22 = vrot.slane %v2227_v8, 2  ;;  %v1653_v51 = vadd.f32 %v3985_v0, %v1628_v44 }
 0x1e7   : > { %v2234_v29 = vsel %vm4053_vm6, %v2232_v9, %v2233_v20  ;;  %v2632_v25 = vrot.slane %v2618_v35, %v3993_v53  ;;  %v2633_v11 = vcombine.high %v2625_v23, %v2625_v23  ;;  %v3130_v31 = vrot.slane %v2228_v2, 9 }
 0x1e8   : > { %v1775_v63 = vcombine.high %v1659_v10, %v1659_v10  ;;  %v2231_v36 = vsel %vm4053_vm6, %v2229_v22, %v2230_v60  ;;  %v3132_v3 = vrot.slane %v2234_v29, 9  ;;  %v2399_v28 = vmax.f32 %v2225_v6, %v3129_v5 }
 0x1e9   : > { %v4236_v49 = vrot.slane %v1659_v10, %v3993_v53  ;;  %v2634_v39 = vcombine.high %v2632_v25, %v2632_v25  ;;  %v2714_v43 = vcombine.low %v2625_v23, %v2633_v11  ;;  %v3131_v47 = vrot.slane %v2231_v36, 9 }
 0x1ea   : > { %v2400_v62 = vmax.f32 %v2228_v2, %v3130_v31  ;;  %v2235_v21 = vrot.slane %v2233_v20, 2  ;;  %v2402_v45 = vmax.f32 %v2234_v29, %v3132_v3  ;;  %v2538_v46 = vrot.slane %v2399_v28, %v4085_v56 }
 0x1eb   : > { %v1671_v4 = vmax.f32 %v1653_v51, 0.0  ;;  %v2715_v19 = vcombine.low %v2632_v25, %v2634_v39  ;;  %v2722_v7 = vrot.slane %v2714_v43, %v3993_v53  ;;  %v2401_v44 = vmax.f32 %v2231_v36, %v3131_v47 }
 0x1ec   : > { %v2542_v60 = vrot.slane %v2400_v62, %v4085_v56  ;;  %v2550_v52 = vrot.slane %v2402_v45, %v4085_v56  ;;  %v1944_v6 = vcombine.high %v4197_v59, %v4197_v59  ;;  %v1617_v20 = vadd.f32 %v4080_v54, %v3960_v55 }
 0x1ed   : > { %v1979_v34 = vcombine.high %v1671_v4, %v1671_v4  ;;  %v1986_v10 = vrot.slane %v1671_v4, %v3993_v53  ;;  %v2729_v40 = vrot.slane %v2715_v19, %v3993_v53  ;;  %v2546_v8 = vrot.slane %v2401_v44, %v4085_v56 }
 0x1ee   : > { %v2588_v9 = vsel %vm2141_vm0, %v2542_v60, %v2538_v46  ;;  %v1618_v59 = vadd.f32 %v4104_v24, %v3962_v30  ;;  %v4255_v29 = vrot.slane %v1775_v63, %v3993_v53  ;;  %v1642_v51 = vadd.f32 %v3985_v0, %v1617_v20 }
 0x1ef   : > { %v1993_v35 = vrot.slane %v1979_v34, %v3993_v53  ;;  %v1994_v23 = vcombine.high %v1986_v10, %v1986_v10  ;;  %v2100_v5 = vmax.f32 %v1944_v6, %v1986_v10  ;;  %v2730_v2 = vcombine.low %v2722_v7, %v2729_v40 }
 0x1f0   : > { %v2589_v22 = vsel %vm2568_vm7, %v2546_v8, %v2588_v9  ;;  %v4268_v31 = vmax.f32 %v1642_v51, 0.0  ;;  %v1643_v63 = vadd.f32 %v3985_v0, %v1618_v59  ;;  %v1774_v60 = vcombine.high %v4220_v37, %v4220_v37 }
 0x1f1   : > { %v1995_v55 = vcombine.high %v1993_v35, %v1993_v35  ;;  %v2101_v54 = vmax.f32 %v4180_v41, %v1994_v23  ;;  %v2102_v30 = vmax.f32 %v1960_v1, %v1993_v35  ;;  %v2236_v24 = vrot.slane %v2100_v5, 7 }
 0x1f2   : > { %v3150_v25 = vpack.c.bf16 %v2730_v2, %v2730_v2  ;;  %v2590_v11 = vsel %vm2143_vm1, %v2550_v52, %v2589_v22  ;;  %v1790_v41 = vcombine.high %v4236_v49, %v4236_v49  ;;  %v1792_v47 = vcombine.high %v4268_v31, %v4268_v31 }
 0x1f3   : > { %v2103_v36 = vmax.f32 %v4150_v48, %v1995_v55  ;;  %v2237_v3 = vsel %vm4053_vm6, %v2235_v21, %v2236_v24  ;;  %v2238_v28 = vrot.slane %v2236_v24, 2  ;;  %v2239_v39 = vrot.slane %v2101_v54, 7 }
 0x1f4   : > { %2826 = vst.msk [vmem:[%s4261_s25] sm:$0xf] %vm2825_vm10, %v3150_v25  ;;  %v2242_v1 = vrot.slane %v2102_v30, 7  ;;  %v3133_v43 = vrot.slane %v2237_v3, 9  ;;  %v1661_v46 = vmax.f32 %v1643_v63, 0.0  ;;  %v4283_v7 = vrot.slane %v1792_v47, %v3993_v53 }
 0x1f5   : > { %v2240_v62 = vsel %vm4053_vm6, %v2238_v28, %v2239_v39  ;;  %v2241_v45 = vrot.slane %v2239_v39, 2  ;;  %v2245_v48 = vrot.slane %v2103_v36, 7 }
 0x1f6   : > { %v2244_v4 = vrot.slane %v2242_v1, 2  ;;  %v3134_v21 = vrot.slane %v2240_v62, 9  ;;  %v2403_v19 = vmax.f32 %v2237_v3, %v3133_v43  ;;  %v1809_v52 = vcombine.high %v1661_v46, %v1661_v46 }
 0x1f7   : > { %v2243_v44 = vsel %vm4053_vm6, %v2241_v45, %v2242_v1  ;;  %v1816_v6 = vrot.slane %v1661_v46, %v3993_v53  ;;  %v1808_v20 = vcombine.high %v4283_v7, %v4283_v7 }
 0x1f8   : > { %v2246_v34 = vsel %vm4053_vm6, %v2244_v4, %v2245_v48  ;;  %v3135_v10 = vrot.slane %v2243_v44, 9  ;;  %v2404_v40 = vmax.f32 %v2240_v62, %v3134_v21  ;;  %v2554_v8 = vrot.slane %v2403_v19, %v4085_v56 }
 0x1f9   : > { %v3136_v9 = vrot.slane %v2246_v34, 9  ;;  %v1823_v35 = vrot.slane %v1809_v52, %v3993_v53  ;;  %v1824_v23 = vcombine.high %v1816_v6, %v1816_v6  ;;  %v2078_v22 = vmax.f32 %v1774_v60, %v1816_v6 }
 0x1fa   : > { %v2405_v5 = vmax.f32 %v2243_v44, %v3135_v10  ;;  %v2558_v59 = vrot.slane %v2404_v40, %v4085_v56  ;;  %v2591_v2 = vsel %vm2571_vm8, %v2554_v8, %v2590_v11  ;;  %v2077_v55 = vmax.f32 %v4220_v37, %v1808_v20 }
 0x1fb   : > { %v2406_v51 = vmax.f32 %v2246_v34, %v3136_v9  ;;  %v1825_v54 = vcombine.high %v1823_v35, %v1823_v35  ;;  %v2079_v30 = vmax.f32 %v4236_v49, %v1824_v23  ;;  %v2080_v63 = vmax.f32 %v1790_v41, %v1823_v35 }
 0x1fc   : > { %v2562_v24 = vrot.slane %v2405_v5, %v4085_v56  ;;  %v2592_v25 = vsel %vm2145_vm3, %v2558_v59, %v2591_v2  ;;  %v2174_v36 = vrot.slane %v2078_v22, 7  ;;  %v3102_v28 = vrot.slane %v2077_v55, 9 }
 0x1fd   : > { %v2566_v3 = vrot.slane %v2406_v51, %v4085_v56  ;;  %v2081_v39 = vmax.f32 %v4255_v29, %v1825_v54  ;;  %v2177_v1 = vrot.slane %v2079_v30, 7  ;;  %v3112_v11 = vrot.slane %v4186_v15, 9 }
 0x1fe   : > { %v2593_v43 = vsel %vm2574_vm9, %v2562_v24, %v2592_v25  ;;  %v2176_v37 = vrot.slane %v2174_v36, 2  ;;  %v2180_v47 = vrot.slane %v2080_v63, 7  ;;  %v2175_v62 = vsel %vm4053_vm6, %v3102_v28, %v2174_v36 }
 0x1ff   : > { %v2605_v49 = vsel %vm620_vm4, 0.0, %v2593_v43  ;;  %v2179_v45 = vrot.slane %v2177_v1, 2  ;;  %v1619_v41 = vadd.f32 %v4124_v26, %v3964_v16  ;;  %v2609_v48 = vsel %vm620_vm4, %v2566_v3, 0.0 }
 0x200   : > { %v2690_v46 = vcombine.high %v2605_v49, %v2605_v49  ;;  %v2697_v4 = vrot.slane %v2605_v49, %v3993_v53  ;;  %v2178_v21 = vsel %vm4053_vm6, %v2176_v37, %v2177_v1  ;;  %v2182_v44 = vrot.slane %v2180_v47, 2 }
 0x201   : > { %v2181_v19 = vsel %vm4053_vm6, %v2179_v45, %v2180_v47  ;;  %v2183_v60 = vrot.slane %v2081_v39, 7  ;;  %v3113_v52 = vrot.slane %v2175_v62, 9  ;;  %v3114_v26 = vrot.slane %v2178_v21, 9 }
 0x202   : > { %v2704_v6 = vrot.slane %v2690_v46, %v3993_v53  ;;  %v2705_v34 = vcombine.high %v2697_v4, %v2697_v4  ;;  %v4321_v16 = vcombine.low %v2689_v57, %v2697_v4  ;;  %v4327_v10 = vrot.slane %v1877_v13, %v3993_v53 }
 0x203   : > { %v2184_v40 = vsel %vm4053_vm6, %v2182_v44, %v2183_v60  ;;  %v3115_v8 = vrot.slane %v2181_v19, 9  ;;  %v2383_v9 = vmax.f32 %v2175_v62, %v3113_v52  ;;  %v2713_v35 = vrot.slane %v2609_v48, %v3993_v53 }
 0x204   : > { %v2706_v20 = vcombine.high %v2704_v6, %v2704_v6  ;;  %v2782_v23 = vcombine.low %v2705_v34, %v2704_v6  ;;  %v3116_v5 = vrot.slane %v2184_v40, 9  ;;  %v4333_v32 = vmax.f32 %v4186_v15, %v3112_v11 }
 0x205   : > { %v2384_v57 = vmax.f32 %v2178_v21, %v3114_v26  ;;  %v2385_v59 = vmax.f32 %v2181_v19, %v3115_v8  ;;  %v1644_v2 = vadd.f32 %v3985_v0, %v1619_v41  ;;  %v1799_v13 = vrot.slane %v4268_v31, %v3993_v53 }
 0x206   : > { %v2783_v33 = vcombine.low %v2706_v20, %v2713_v35  ;;  %v2386_v22 = vmax.f32 %v2184_v40, %v3116_v5  ;;  %v2474_v51 = vrot.slane %v2383_v9, %v4085_v56  ;;  %v1620_v15 = vadd.f32 %v4142_v50, %v3966_v42 }
 0x207   : > { %v2478_v55 = vrot.slane %v2384_v57, %v4085_v56  ;;  %v2482_v54 = vrot.slane %v2385_v59, %v4085_v56  ;;  %v1662_v30 = vmax.f32 %v1644_v2, 0.0  ;;  %v2790_v24 = vrot.slane %v2782_v23, %v3993_v53 }
 0x208   : > { %v2797_v25 = vrot.slane %v2783_v33, %v3993_v53  ;;  %v2486_v63 = vrot.slane %v2386_v22, %v4085_v56  ;;  %v1791_v31 = vcombine.high %v4255_v29, %v4255_v29  ;;  %v1645_v39 = vadd.f32 %v3985_v0, %v1620_v15 }
 0x209   : > { %v2576_v36 = vsel %vm2141_vm0, %v2478_v55, %v2474_v51  ;;  %v1826_v3 = vcombine.high %v1662_v30, %v1662_v30  ;;  %v1833_v28 = vrot.slane %v1662_v30, %v3993_v53  ;;  %v1807_v11 = vcombine.high %v1799_v13, %v1799_v13 }
 0x20a   : > { %v2798_v1 = vcombine.low %v2790_v24, %v2797_v25  ;;  %v2185_v43 = vrot.slane %v2183_v60, 2  ;;  %v2577_v42 = vsel %vm2568_vm7, %v2482_v54, %v2576_v36  ;;  %v1892_v29 = vcombine.high %v4018_v14, %v4018_v14 }
 0x20b   : > { %v1840_v50 = vrot.slane %v1826_v3, %v3993_v53  ;;  %v1841_v37 = vcombine.high %v1833_v28, %v1833_v28  ;;  %v2082_v47 = vmax.f32 %v1791_v31, %v1833_v28  ;;  %v2578_v49 = vsel %vm2143_vm1, %v2486_v63, %v2577_v42 }
 0x20c   : > { %v1893_v62 = vcombine.high %v4327_v10, %v4327_v10  ;;  %v3154_v45 = vpack.c.bf16 %v2798_v1, %v2798_v1  ;;  %v1663_v0 = vmax.f32 %v1645_v39, 0.0  ;;  %v3125_v21 = vrot.slane %v4067_v27, 9 }
 0x20d   : > { %v1842_v41 = vcombine.high %v1840_v50, %v1840_v50  ;;  %v2083_v48 = vmax.f32 %v1799_v13, %v1841_v37  ;;  %v2084_v46 = vmax.f32 %v1807_v11, %v1840_v50  ;;  %v2186_v4 = vrot.slane %v2082_v47, 7 }
 0x20e   : > { %v2470_v19 = vrot.slane %v4333_v32, %v4085_v56  ;;  %2830 = vst.msk [vmem:[%s4261_s25 + $0x10] sm:$0xf] %vm2825_vm10, %v3154_v45  ;;  %v1843_v44 = vcombine.high %v1663_v0, %v1663_v0  ;;  %v1850_v60 = vrot.slane %v1663_v0, %v3993_v53  ;;  %v3126_v31 = vrot.slane %v4071_v17, 9 }
 0x20f   : > { %v2085_v14 = vmax.f32 %v4283_v7, %v1842_v41  ;;  %v2187_v52 = vsel %vm4053_vm6, %v2185_v43, %v2186_v4  ;;  %v2188_v6 = vrot.slane %v2186_v4, 2  ;;  %v2189_v34 = vrot.slane %v2083_v48, 7 }
 0x210   : > { %v2192_v26 = vrot.slane %v2084_v46, 7  ;;  %v3117_v40 = vrot.slane %v2187_v52, 9  ;;  %v1857_v8 = vrot.slane %v1843_v44, %v3993_v53  ;;  %v1858_v9 = vcombine.high %v1850_v60, %v1850_v60 }
 0x211   : > { %v2190_v20 = vsel %vm4053_vm6, %v2188_v6, %v2189_v34  ;;  %v2191_v35 = vrot.slane %v2189_v34, 2  ;;  %v2195_v23 = vrot.slane %v2085_v14, 7  ;;  %v2086_v5 = vmax.f32 %v1850_v60, %v1892_v29 }
 0x212   : > { %v2194_v32 = vrot.slane %v2192_v26, 2  ;;  %v3118_v57 = vrot.slane %v2190_v20, 9  ;;  %v2387_v59 = vmax.f32 %v2187_v52, %v3117_v40  ;;  %v1859_v7 = vcombine.high %v1857_v8, %v1857_v8 }
 0x213   : > { %v2193_v2 = vsel %vm4053_vm6, %v2191_v35, %v2192_v26  ;;  %v2087_v33 = vmax.f32 %v1858_v9, %v4327_v10  ;;  %v2088_v13 = vmax.f32 %v1857_v8, %v1893_v62  ;;  %v3103_v22 = vrot.slane %v2086_v5, 9 }
 0x214   : > { %v2196_v51 = vsel %vm4053_vm6, %v2194_v32, %v2195_v23  ;;  %v3119_v55 = vrot.slane %v2193_v2, 9  ;;  %v2388_v54 = vmax.f32 %v2190_v20, %v3118_v57  ;;  %v2490_v30 = vrot.slane %v2387_v59, %v4085_v56 }
 0x215   : > { %v3120_v15 = vrot.slane %v2196_v51, 9  ;;  %v2089_v24 = vmax.f32 %v1859_v7, %v4006_v12  ;;  %v2199_v25 = vrot.slane %v2087_v33, 7  ;;  %v2202_v63 = vrot.slane %v2088_v13, 7 }
 0x216   : > { %v2389_v36 = vmax.f32 %v2193_v2, %v3119_v55  ;;  %v2494_v3 = vrot.slane %v2388_v54, %v4085_v56  ;;  %v2579_v10 = vsel %vm2571_vm8, %v2490_v30, %v2578_v49  ;;  %v2395_v37 = vmax.f32 %v4067_v27, %v3125_v21 }
 0x217   : > { %v2390_v28 = vmax.f32 %v2196_v51, %v3120_v15  ;;  %v2200_v39 = vsel %vm4053_vm6, %v3103_v22, %v2199_v25  ;;  %v2201_v1 = vrot.slane %v2199_v25, 2  ;;  %v2204_v11 = vrot.slane %v2202_v63, 2 }
 0x218   : > { %v2498_v43 = vrot.slane %v2389_v36, %v4085_v56  ;;  %v2580_v42 = vsel %vm2145_vm3, %v2494_v3, %v2579_v10  ;;  %v2205_v12 = vrot.slane %v2089_v24, 7  ;;  %v3121_v50 = vrot.slane %v2200_v39, 9 }
 0x219   : > { %v2606_v47 = vsel %vm620_vm4, %v2470_v19, 0.0  ;;  %v2502_v29 = vrot.slane %v2390_v28, %v4085_v56  ;;  %v2203_v49 = vsel %vm4053_vm6, %v2201_v1, %v2202_v63  ;;  %v3127_v48 = vrot.slane %v4076_v38, 9 }
 0x21a   : > { %v2581_v62 = vsel %vm2574_vm9, %v2498_v43, %v2580_v42  ;;  %v2206_v45 = vsel %vm4053_vm6, %v2204_v11, %v2205_v12  ;;  %v2207_v0 = vrot.slane %v2205_v12, 2  ;;  %v3122_v41 = vrot.slane %v2203_v49, 9 }
 0x21b   : > { %v2603_v46 = vsel %vm620_vm4, 0.0, %v2581_v62  ;;  %v3123_v4 = vrot.slane %v2206_v45, 9  ;;  %v2391_v27 = vmax.f32 %v2200_v39, %v3121_v50  ;;  %v2641_v21 = vrot.slane %v2606_v47, %v3993_v53 }
 0x21c   : > { %v2642_v19 = vcombine.high %v2603_v46, %v2603_v46  ;;  %v2649_v44 = vrot.slane %v2603_v46, %v3993_v53  ;;  %v2209_v60 = vsel %vm4053_vm6, %v2207_v0, %v2208_v61  ;;  %v2607_v14 = vsel %vm620_vm4, %v2502_v29, 0.0 }
 0x21d   : > { %v3124_v52 = vrot.slane %v2209_v60, 9  ;;  %v2392_v6 = vmax.f32 %v2203_v49, %v3122_v41  ;;  %v2393_v34 = vmax.f32 %v2206_v45, %v3123_v4  ;;  %v2396_v26 = vmax.f32 %v4071_v17, %v3126_v31 }
 0x21e   : > { %v2656_v40 = vrot.slane %v2642_v19, %v3993_v53  ;;  %v2657_v8 = vcombine.high %v2649_v44, %v2649_v44  ;;  %v2731_v9 = vcombine.low %v2641_v21, %v2649_v44  ;;  %v2506_v35 = vrot.slane %v2391_v27, %v4085_v56 }
 0x21f   : > { %v2394_v20 = vmax.f32 %v2209_v60, %v3124_v52  ;;  %v2510_v23 = vrot.slane %v2392_v6, %v4085_v56  ;;  %v2514_v18 = vrot.slane %v2393_v34, %v4085_v56  ;;  %v2397_v61 = vmax.f32 %v4076_v38, %v3127_v48 }
 0x220   : > { %v2658_v58 = vcombine.high %v2656_v40, %v2656_v40  ;;  %v2665_v5 = vrot.slane %v2607_v14, %v3993_v53  ;;  %v2732_v32 = vcombine.low %v2657_v8, %v2656_v40  ;;  %v2522_v57 = vrot.slane %v2395_v37, %v4085_v56 }
 0x221   : > { %v2518_v17 = vrot.slane %v2394_v20, %v4085_v56  ;;  %v2582_v59 = vsel %vm2141_vm0, %v2510_v23, %v2506_v35  ;;  %v2739_v7 = vrot.slane %v2731_v9, %v3993_v53  ;;  %v2526_v38 = vrot.slane %v2396_v26, %v4085_v56 }
 0x222   : > { %v2746_v2 = vrot.slane %v2732_v32, %v3993_v53  ;;  %v2748_v33 = vcombine.low %v2658_v58, %v2665_v5  ;;  %v2583_v13 = vsel %vm2568_vm7, %v2514_v18, %v2582_v59  ;;  %v2530_v51 = vrot.slane %v2397_v61, %v4085_v56 }
 0x223   : > { %v2584_v22 = vsel %vm2143_vm1, %v2518_v17, %v2583_v13  ;;  %v2780_v11 = vrot.slane %v4321_v16, %v3993_v53 }
 0x224   : > { %v2747_v55 = vcombine.low %v2739_v7, %v2746_v2  ;;  %v2585_v54 = vsel %vm2571_vm8, %v2522_v57, %v2584_v22  ;;  %v2756_v28 = vrot.slane %v2748_v33, %v3993_v53 }
 0x225   : > { %v2586_v30 = vsel %vm2145_vm3, %v2526_v38, %v2585_v54 }
 0x226   : > { %v3151_v15 = vpack.c.bf16 %v2747_v55, %v2747_v55  ;;  %v2587_v24 = vsel %vm2574_vm9, %v2530_v51, %v2586_v30 }
 0x227   : > { %v2604_v25 = vsel %vm620_vm4, 0.0, %v2587_v24 }
 0x228   : > { %2827 = vst.msk [vmem:[%s4261_s25 + $0x4] sm:$0xf] %vm2825_vm10, %v3151_v15  ;;  %v2666_v63 = vcombine.high %v2604_v25, %v2604_v25  ;;  %v2673_v31 = vrot.slane %v2604_v25, %v3993_v53 }
 0x22a   : > { %v2680_v36 = vrot.slane %v2666_v63, %v3993_v53  ;;  %v2681_v56 = vcombine.high %v2673_v31, %v2673_v31 }
 0x22c   : > { %v2682_v3 = vcombine.high %v2680_v36, %v2680_v36  ;;  %v2749_v10 = vcombine.low %v2673_v31, %v2681_v56 }
 0x22e   : > { %v2763_v39 = vrot.slane %v2749_v10, %v3993_v53  ;;  %v2765_v1 = vcombine.low %v2680_v36, %v2682_v3 }
 0x230   : > { %v2764_v43 = vcombine.low %v2756_v28, %v2763_v39  ;;  %v2773_v42 = vrot.slane %v2765_v1, %v3993_v53 }
 0x232   : > { %v2781_v12 = vcombine.low %v2773_v42, %v2780_v11  ;;  %v3152_v50 = vpack.c.bf16 %v2764_v43, %v2764_v43 }
 0x234   : > { %v3153_v37 = vpack.c.bf16 %v2781_v12, %v2781_v12  ;;  %2828 = vst.msk [vmem:[%s4261_s25 + $0x8] sm:$0xf] %vm2825_vm10, %v3152_v50 }
 0x236   : > { %2829 = vst.msk [vmem:[%s4261_s25 + $0xc] sm:$0xf] %vm2825_vm10, %v3153_v37 }
 0x237 PF: > { %s15_s22 = sadd.s32 1, %s3307_s22   ;;  %s4472_s18 = smov %s3299_s20 }
 0x238   : > { %p12_p13 = scmp.ge.s32.totalorder %s15_s22, 6   ;;  %s4473_s19 = smov %s3303_s21 }
 0x239   : > { %s4474_s20 = smov %s4477_s23  ;;  %s4475_s21 = smov %s4481_s24 }
 0x23a   :  { %14 = sbr.rel (!%p12_p13) target bundleno = 3 (0x3), region = 78 }

// kernel: superpoint_forward.14
= control target key start
LH: loop header
LB: loop body
LE: loop exit
PB: predicated region body
PF: predicated region fallthrough
CT: control target
= control target key end

     0   :  { %s1146_s15 = smov 0   ;;  %s1148_s16 = smov 0   ;;  %s1416_s0 = inlined_call_operand.vmem [shape: bf16[2,48,64], index: 0, kind: input, shape index: {}]   ;;  %s1417_s1 = inlined_call_operand.vmem [shape: bf16[3,192,128], index: 1, kind: input, shape index: {}]   ;;  %s1418_s2 = inlined_call_operand.vmem [shape: f32[1,128], index: 2, kind: input, shape index: {}]   ;;  %s1419_s3 = inlined_call_operand.vmem [shape: f32[24,1], index: 3, kind: input, shape index: {}]   ;;  %s1420_s4 = inlined_call_operand.vmem [shape: bf16[2,48,128], index: 4, kind: output, shape index: {}]  }
   0x1   :  { %s1150_s17 = smov 0  }
   0x2 LB: > { %s26_s18 = sadd.s32 1, %s1113_s16  ;;  %p895_p0 = scmp.ge.s32.totalorder %s1117_s17, 1  ;;  %s1117_s17 = sphi %s1150_s17, %s14_s17   ;;  %s1113_s16 = sphi %s1148_s16, %s1422_s16   ;;  %s1109_s15 = sphi %s1146_s15, %s1421_s15  }
   0x3   : > { %p28_p1 = scmp.ge.s32.totalorder %s26_s18, 2  ;;  %p174_p2 = scmp.lt.s32.totalorder %s1117_s17, 3 }
   0x5   : > { %s1424_s18 = smov (%p28_p1, %s26_s18), 0  ;;  %p175_p3 = pnand %p895_p0, %p174_p2 }
   0x6   : > { %p200_p4 = scmp.lt.s32.totalorder (!%p175_p3), %s1109_s15, 1  ;;  %s1120_s28 = smov (!%p175_p3), 64  }
   0x7   : > { %178 = sbr.rel (%p175_p3) target bundleno = 410 (0x19a), region = 36 }
   0xc   : > { %vm222_vm0 = vsmask.f32 3328  ;;  %v1059_v0 = vld [vmem:[%s1417_s1 + $0x38] sm:$0xff]   ;;  %s1426_s15 = smov (!%p200_p4, %s1109_s15), 1  ;;  %v1119_v1 = vmov 0   ;;  %v1060_v2 = vld [vmem:[%s1417_s1 + $0x30] sm:$0xff]  }
   0xd   : > { %545 = vmatprep.subr.bf16.mxu1 %v1119_v1  ;;  %419 = vmatprep.subr.bf16.mxu0 %v1119_v1  ;;  %s1028_s23 = smul.u32 24, %s1426_s15  ;;  %v1061_v3 = vld [vmem:[%s1417_s1 + $0x98] sm:$0xff]   ;;  %v1062_v4 = vld [vmem:[%s1417_s1 + $0x28] sm:$0xff]   ;;  %vm242_vm1 = vcmask 1043456   ;;  %v1063_v5 = vld [vmem:[%s1417_s1 + $0x90] sm:$0xff]   ;;  %vm245_vm2 = vcmask 1047552  }
   0xe   : > { %546 = vmatpush1.bf16.msra.mxu1 %v1059_v0  ;;  %1056 = vset.pattern.permute.xlu1 %v1119_v1  ;;  %vm246_vm3 = vsmask.f32 7424  ;;  %v1064_v12 = vld [vmem:[%s1417_s1 + $0x20] sm:$0xff]   ;;  %v1065_v13 = vld [vmem:[%s1417_s1 + $0x88] sm:$0xff]   ;;  %vm243_vm4 = vmand %vm242_vm1, %vm222_vm0  ;;  %v1222_v27 = vrot.slane %v1119_v1, 1  ;;  %vm270_vm6 = vcmask 1046528  }
   0xf   : > { %547 = vmatprep.subr.bf16.mxu1 %v1119_v1  ;;  %1055 = vset.pattern.permute.xlu0 %v1119_v1  ;;  %s204_s30 = scalar_lea.vmem %s1416_s0, %s1028_s23  ;;  %vm247_vm5 = vmand %vm245_vm2, %vm246_vm3  ;;  %v1067_v20 = vld [vmem:[%s1417_s1 + $0x80] sm:$0xff]   ;;  %v1066_v21 = vld [vmem:[%s1417_s1 + $0x18] sm:$0xff]   ;;  %vm274_vm7 = vcmask 523264   ;;  %vm332_vm8 = vcmask 1044480   ;;  %vm639_vm9 = vcmask 1041408   ;;  %s209_s21 = scalar_lea.vmem %s1420_s4, %s1028_s23 }
  0x10   : > { %420 = vmatpush1.bf16.msra.mxu0 %v1061_v3  ;;  %v1057_v6 = vld [vmem:[%s204_s30] sm:$0xff]   ;;  %v1058_v7 = vld [vmem:[%s204_s30 + $0x8] ss:$0 sps:$4 sm:$0xff]   ;;  %v1069_v30 = vld [vmem:[%s1417_s1 + $0x78] sm:$0xff]   ;;  %v648_v59 = vrot.slane %v1222_v27, 6 }
  0x11   : > { %421 = vmatprep.subr.bf16.mxu0 %v1119_v1  ;;  %v224_v8 = vshrl.u32 %v1057_v6, 16  ;;  %v227_v9 = vshll.u32 %v1057_v6, 16  ;;  %v232_v10 = vshrl.u32 %v1058_v7, 16  ;;  %v235_v11 = vshll.u32 %v1058_v7, 16  ;;  %v1068_v32 = vld [vmem:[%s1417_s1 + $0x10] sm:$0xff]   ;;  %v1070_v39 = vld [vmem:[%s1417_s1 + $0x8] sm:$0xff]  }
  0x12   : > { %548 = vmatpush1.bf16.msra.mxu1 %v1060_v2  ;;  %v1071_v36 = vld [vmem:[%s1417_s1 + $0x70] sm:$0xff]   ;;  %v1073_v45 = vld [vmem:[%s1417_s1 + $0x68] sm:$0xff]   ;;  %v1072_v47 = vld [vmem:[%s1417_s1] sm:$0xff]  }
  0x13   : > { %549 = vmatprep.subr.bf16.mxu1 %v1119_v1  ;;  %v226_v14 = vrot.slane %v224_v8, 4  ;;  %v229_v15 = vrot.slane %v227_v9, 5  ;;  %v234_v16 = vrot.slane %v232_v10, 4  ;;  %v237_v17 = vrot.slane %v235_v11, 5  ;;  %v1075_v49 = vld [vmem:[%s1417_s1 + $0x60] sm:$0xff]   ;;  %v1074_v50 = vld [vmem:[%s1417_s1 + $0x58] sm:$0xff]  }
  0x14   : > { %422 = vmatpush1.bf16.msra.mxu0 %v1063_v5  ;;  %v1077_v51 = vld [vmem:[%s1417_s1 + $0xb8] sm:$0xff]   ;;  %v1076_v52 = vld [vmem:[%s1417_s1 + $0x50] sm:$0xff]   ;;  %v1078_v54 = vld [vmem:[%s1417_s1 + $0x48] sm:$0xff]  }
  0x15   : > { %423 = vmatprep.subr.bf16.mxu0 %v1119_v1  ;;  %v230_v18 = vor.u32 %v229_v15, %v226_v14  ;;  %v238_v19 = vor.u32 %v237_v17, %v234_v16  ;;  %v1079_v53 = vld [vmem:[%s1417_s1 + $0xb0] sm:$0xff]   ;;  %v1081_v55 = vld [vmem:[%s1417_s1 + $0xa8] sm:$0xff]   ;;  %v1080_v56 = vld [vmem:[%s1417_s1 + $0x40] sm:$0xff]  }
  0x16   : > { %550 = vmatpush1.bf16.msra.mxu1 %v1062_v4  ;;  %v1083_v57 = vld [vmem:[%s1417_s1 + $0xa0] sm:$0xff]   ;;  %v795_v63 = vld [vmem:[%s1419_s3 + $0x8] sm:$0xff]  ;;  %v796_v2 = vld [vmem:[%s1419_s3 + $0x10] sm:$0xff] }
  0x17   : > { %551 = vmatprep.subr.bf16.mxu1 %v1119_v1  ;;  %v239_v22 = vsel %vm222_vm0, %v230_v18, %v238_v19  ;;  %v1214_v23 = vsel %vm243_vm4, 0, %v230_v18  ;;  %v794_v0 = vld [vmem:[%s1419_s3] sm:$0xff]  ;;  %v1082_v3 = vld [vmem:[%s1417_s1 + $0xf8] sm:$0xff]   ;;  %v1084_v6 = vld [vmem:[%s1417_s1 + $0xf0] sm:$0xff]  }
  0x18   : > { %424 = vmatpush1.bf16.msra.mxu0 %v1065_v13  ;;  %v1217_v24 = vsel %vm247_vm5, %v239_v22, 0  ;;  %v250_v25 = vshrl.u32 %v1214_v23, 16  ;;  %v252_v26 = vshll.u32 %v1214_v23, 16  ;;  %v271_v37 = vrot.slane %v1214_v23, 1  ;;  %v1085_v11 = vld [vmem:[%s1417_s1 + $0xe8] sm:$0xff]   ;;  %v1086_v13 = vld [vmem:[%s1417_s1 + $0xe0] sm:$0xff]  }
  0x19   : > { %425 = vmatprep.subr.bf16.mxu0 %v1119_v1  ;;  %v257_v28 = vshll.u32 %v1217_v24, 16  ;;  %v261_v29 = vshrl.u32 %v1217_v24, 16  ;;  %v1244_v40 = vrot.slane %v1217_v24, 1  ;;  %v1087_v14 = vld [vmem:[%s1417_s1 + $0xd8] sm:$0xff]   ;;  %v1088_v15 = vld [vmem:[%s1417_s1 + $0xd0] sm:$0xff]   ;;  %v1089_v16 = vld [vmem:[%s1417_s1 + $0xc8] sm:$0xff]  }
  0x1a   : > { %552 = vmatpush1.bf16.msra.mxu1 %v1064_v12  ;;  %v254_v31 = vrot.slane %v252_v26, 1  ;;  %v1090_v17 = vld [vmem:[%s1417_s1 + $0xc0] sm:$0xff]   ;;  %v1091_v18 = vld [vmem:[%s1417_s1 + $0x118] sm:$0xff]   ;;  %v1093_v22 = vld [vmem:[%s1417_s1 + $0x108] sm:$0xff]  }
  0x1b   : > { %553 = vmatprep.subr.bf16.mxu1 %v1119_v1  ;;  %v259_v33 = vrot.slane %v257_v28, 1  ;;  %v273_v42 = vsel %vm270_vm6, %v271_v37, %v1244_v40  ;;  %v607_v43 = vsel %vm270_vm6, %v1244_v40, %v1222_v27  ;;  %v337_v44 = vrot.slane %v1244_v40, 3 }
  0x1c   : > { %426 = vmatpush1.bf16.msra.mxu0 %v1067_v20  ;;  %v255_v34 = vor.u32 %v254_v31, %v250_v25  ;;  %v336_v46 = vrot.slane %v273_v42, 3  ;;  %950 = vmatprep.mubr.msk.bf16.mxu1 %vm274_vm7, %v273_v42  ;;  %v644_v58 = vrot.slane %v607_v43, 6  ;;  %v643_v61 = vrot.slane %v273_v42, 6  ;;  %v1092_v20 = vld [vmem:[%s1417_s1 + $0x110] sm:$0xff]  }
  0x1d   : > { %427 = vmatprep.subr.bf16.mxu0 %v1119_v1  ;;  %v263_v35 = vor.u32 %v261_v29, %v259_v33 }
  0x1e   : > { %554 = vmatpush1.bf16.msra.mxu1 %v1066_v21  ;;  %v260_v38 = vsel %vm246_vm3, %v255_v34, %v259_v33  ;;  %v338_v48 = vsel %vm332_vm8, %v336_v46, %v337_v44  ;;  %v649_v60 = vsel %vm639_vm9, %v644_v58, %v648_v59  ;;  %v645_v62 = vsel %vm639_vm9, %v643_v61, %v644_v58 }
  0x1f   : > { %555 = vmatprep.subr.bf16.mxu1 %v1119_v1  ;;  %264 = vrot.lane.b32.xlu0 %v260_v38, %s1120_s28  ;;  %v597_v41 = vsel %vm246_vm3, %v263_v35, %v1222_v27 }
  0x20   : > { %428 = vmatpush1.bf16.msra.mxu0 %v1069_v30  ;;  %601 = vrot.lane.b32.xlu1 %v597_v41, %s1120_s28 }
  0x21   : > { %429 = vmatprep.subr.bf16.mxu0 %v1119_v1  ;;  %936 = vmatprep.mubr.msk.bf16.mxu0 %vm274_vm7, %v338_v48 }
  0x22   : > { %556 = vmatpush1.bf16.msra.mxu1 %v1068_v32 }
  0x23   : > { %557 = vmatprep.subr.bf16.mxu1 %v1119_v1  ;;  %266 = vrot.lane.b32.xlu0 %v263_v35, %s1120_s28 }
  0x24   : > { %430 = vmatpush1.bf16.msra.mxu0 %v1071_v36  ;;  %603 = vrot.lane.b32.xlu1 %v1222_v27, %s1120_s28  ;;  %v1094_v27 = vld [vmem:[%s1417_s1 + $0x100] sm:$0xff]  }
  0x25   : > { %431 = vmatprep.subr.bf16.mxu0 %v1119_v1 }
  0x26   : > { %558 = vmatpush1.bf16.msra.mxu1 %v1070_v39 }
  0x27   : > { %559 = vmatprep.subr.bf16.mxu1 %v1119_v1  ;;  %799 = vperm.xlu0 %1055, %v794_v0  }
  0x28   : > { %432 = vmatpush1.bf16.msra.mxu0 %v1073_v45  ;;  %804 = vperm.xlu1 %1056, %v795_v63  }
  0x29   : > { %433 = vmatprep.subr.bf16.mxu0 %v1119_v1 }
  0x2a   : > { %560 = vmatpush1.bf16.msra.mxu1 %v1072_v47 }
  0x2b   : > { %569 = vmatprep.subr.bf16.mxu1 %v1119_v1 }
  0x2c   : > { %434 = vmatpush1.bf16.msra.mxu0 %v1075_v49  ;;  %809 = vperm.xlu1 %1056, %v796_v2   ;;  %v990_v49 = vld [vmem:[%s1418_s2] ss:$0 sm:$0xff] }
  0x2d   : > { %443 = vmatprep.subr.bf16.mxu0 %v1119_v1 }
  0x2e   : > { %570 = vmatpush2.bf16.msra.mxu1 %v1074_v50 }
  0x2f   : > { %571 = vmatprep.subr.bf16.mxu1 %v1119_v1 }
  0x30   : > { %444 = vmatpush2.bf16.msra.mxu0 %v1077_v51 }
  0x31   : > { %445 = vmatprep.subr.bf16.mxu0 %v1119_v1 }
  0x32   : > { %572 = vmatpush2.bf16.msra.mxu1 %v1076_v52 }
  0x33   : > { %573 = vmatprep.subr.bf16.mxu1 %v1119_v1 }
  0x34   : > { %446 = vmatpush2.bf16.msra.mxu0 %v1079_v53 }
  0x35   : > { %447 = vmatprep.subr.bf16.mxu0 %v1119_v1 }
  0x36   : > { %574 = vmatpush2.bf16.msra.mxu1 %v1078_v54 }
  0x37   : > { %575 = vmatprep.subr.bf16.mxu1 %v1119_v1 }
  0x38   : > { %448 = vmatpush2.bf16.msra.mxu0 %v1081_v55 }
  0x39   : > { %449 = vmatprep.subr.bf16.mxu0 %v1119_v1 }
  0x3a   : > { %576 = vmatpush2.bf16.msra.mxu1 %v1080_v56 }
  0x3b   : > { %1004 = vmatprep.subr.bf16.mxu1 %v1119_v1 }
  0x3c   : > { %450 = vmatpush2.bf16.msra.mxu0 %v1083_v57 }
  0x3d   : > { %730 = vmatprep.subr.bf16.mxu0 %v1119_v1 }
  0x91   : > { %v265_v4 = vpop.permute.xlu0 %264 }
  0x92   : > { %v1324_v5 = vsel %vm274_vm7, %v1214_v23, %v265_v4  ;;  %v602_v19 = vpop.permute.xlu1 %601 }
  0x93   : > { %578 = vmatmul.mubr.bf16.vlgmr.msra.gmra.mxu1 %v1324_v5  ;;  %v333_v9 = vrot.slane %v1324_v5, 3  ;;  %v609_v25 = vsel %vm274_vm7, %v1217_v24, %v602_v19 }
  0x94   : > { %1016 = vmatpush1.bf16.msra.mxu1 %v1082_v3  ;;  %951 = vmatprep.mubr.msk.bf16.mxu1 %vm274_vm7, %v1244_v40  ;;  %v641_v28 = vrot.slane %v609_v25, 6 }
  0x95   : > { %v267_v7 = vpop.permute.xlu0 %266  ;;  %1005 = vmatprep.subr.bf16.mxu1 %v1119_v1 }
  0x96   : > { %v279_v8 = vsel %vm274_vm7, %v1217_v24, %v267_v7  ;;  %v604_v21 = vpop.permute.xlu1 %603  ;;  %v640_v24 = vrot.slane %v1324_v5, 6 }
  0x97   : > { %v334_v10 = vrot.slane %v279_v8, 3  ;;  %v611_v23 = vsel %vm274_vm7, 0, %v604_v21 }
  0x98   : > { %1017 = vmatpush1.bf16.msra.mxu1 %v1084_v6  ;;  %v646_v26 = vrot.slane %v611_v23, 6  ;;  %v642_v30 = vsel %vm639_vm9, %v640_v24, %v641_v28 }
  0x99   : > { %v335_v12 = vsel %vm332_vm8, %v333_v9, %v334_v10  ;;  %1006 = vmatprep.subr.bf16.mxu1 %v1119_v1 }
  0x9a   : > { %452 = vmatmul.mubr.bf16.vlgmr.msra.gmra.mxu0 %v335_v12  ;;  %v647_v29 = vsel %vm639_vm9, %v641_v28, %v646_v26 }
  0x9b   : > { %731 = vmatpush1.bf16.msra.mxu0 %v1082_v3  ;;  %586 = vmatmul.mubr.bf16.gmra.mxu1 %v279_v8 }
  0x9c   : > { %1018 = vmatpush1.bf16.msra.mxu1 %v1085_v11  ;;  %732 = vmatprep.subr.bf16.mxu0 %v1119_v1 }
  0x9d   : > { %1007 = vmatprep.subr.bf16.mxu1 %v1119_v1  ;;  %937 = vmatprep.mubr.msk.bf16.mxu0 %vm274_vm7, %v337_v44 }
  0x9e   : > { %989 = vmatprep.mubr.msk.bf16.mxu1 %vm274_vm7, %v649_v60 }
  0x9f   : > { %733 = vmatpush1.bf16.msra.mxu0 %v1084_v6 }
  0xa0   : > { %1019 = vmatpush1.bf16.msra.mxu1 %v1086_v13  ;;  %734 = vmatprep.subr.bf16.mxu0 %v1119_v1 }
  0xa1   : > { %1008 = vmatprep.subr.bf16.mxu1 %v1119_v1 }
  0xa2   : > { %460 = vmatmul.mubr.bf16.gmra.mxu0 %v334_v10  ;;  %v800_v7 = vpop.permute.xlu0 %799 }
  0xa3   : > { %735 = vmatpush1.bf16.msra.mxu0 %v1085_v11  ;;  %988 = vmatprep.mubr.msk.bf16.mxu0 %vm274_vm7, %v645_v62  ;;  %v805_v46 = vpop.permute.xlu1 %804 }
  0xa4   : > { %1020 = vmatpush1.bf16.msra.mxu1 %v1087_v14  ;;  %736 = vmatprep.subr.bf16.mxu0 %v1119_v1 }
  0xa5   : > { %1009 = vmatprep.subr.bf16.mxu1 %v1119_v1 }
  0xa7   : > { %737 = vmatpush1.bf16.msra.mxu0 %v1086_v13  ;;  %v810_v54 = vpop.permute.xlu1 %809 }
  0xa8   : > { %1021 = vmatpush1.bf16.msra.mxu1 %v1088_v15  ;;  %738 = vmatprep.subr.bf16.mxu0 %v1119_v1 }
  0xa9   : > { %1010 = vmatprep.subr.bf16.mxu1 %v1119_v1 }
  0xab   : > { %739 = vmatpush1.bf16.msra.mxu0 %v1087_v14 }
  0xac   : > { %1022 = vmatpush1.bf16.msra.mxu1 %v1089_v16  ;;  %740 = vmatprep.subr.bf16.mxu0 %v1119_v1 }
  0xad   : > { %1011 = vmatprep.subr.bf16.mxu1 %v1119_v1 }
  0xaf   : > { %741 = vmatpush1.bf16.msra.mxu0 %v1088_v15 }
  0xb0   : > { %1023 = vmatpush1.bf16.msra.mxu1 %v1090_v17  ;;  %742 = vmatprep.subr.bf16.mxu0 %v1119_v1 }
  0xb1   : > { %1012 = vmatprep.subr.bf16.mxu1 %v1119_v1 }
  0xb3   : > { %743 = vmatpush1.bf16.msra.mxu0 %v1089_v16 }
  0xb4   : > { %1024 = vmatpush2.bf16.msra.mxu1 %v1091_v18  ;;  %744 = vmatprep.subr.bf16.mxu0 %v1119_v1 }
  0xb5   : > { %1013 = vmatprep.subr.bf16.mxu1 %v1119_v1 }
  0xb7   : > { %745 = vmatpush1.bf16.msra.mxu0 %v1090_v17 }
  0xb8   : > { %1025 = vmatpush2.bf16.msra.mxu1 %v1092_v20  ;;  %754 = vmatprep.subr.bf16.mxu0 %v1119_v1 }
  0xb9   : > { %1014 = vmatprep.subr.bf16.mxu1 %v1119_v1 }
  0xbb   : > { %755 = vmatpush2.bf16.msra.mxu0 %v1091_v18 }
  0xbc   : > { %1026 = vmatpush2.bf16.msra.mxu1 %v1093_v22  ;;  %756 = vmatprep.subr.bf16.mxu0 %v1119_v1 }
  0xbd   : > { %1015 = vmatprep.subr.bf16.mxu1 %v1119_v1 }
  0xbf   : > { %757 = vmatpush2.bf16.msra.mxu0 %v1092_v20 }
  0xc0   : > { %1027 = vmatpush2.bf16.msra.mxu1 %v1094_v27  ;;  %758 = vmatprep.subr.bf16.mxu0 %v1119_v1 }
  0xc3   : > { %759 = vmatpush2.bf16.msra.mxu0 %v1093_v22  ;;  %771 = vmatmul.mubr.bf16.vlgmr.msra.gmra.mxu1 %v647_v29 }
  0xc4   : > { %760 = vmatprep.subr.bf16.mxu0 %v1119_v1 }
  0xc7   : > { %761 = vmatpush2.bf16.msra.mxu0 %v1094_v27 }
  0xca   : > { %763 = vmatmul.mubr.bf16.vlgmr.msra.gmra.mxu0 %v642_v30 }
 0x153   : > { %v579_v31 = vpop.f32.mrf.mxu1 }
 0x155   : > { %v581_v32 = vpop.f32.mrf.mxu1 }
 0x157   : > { %v582_v33 = vpop.f32.mrf.mxu1 }
 0x159   : > { %v584_v34 = vpop.f32.mrf.mxu1 }
 0x15a   : > { %v453_v35 = vpop.f32.mrf.mxu0 }
 0x15b   : > { %v587_v36 = vpop.f32.mrf.mxu1  ;;  %v580_v56 = vadd.f32 %v579_v31, %v453_v35 }
 0x15c   : > { %v455_v37 = vpop.f32.mrf.mxu0 }
 0x15d   : > { %v589_v38 = vpop.f32.mrf.mxu1 }
 0x15e   : > { %v456_v39 = vpop.f32.mrf.mxu0 }
 0x15f   : > { %v590_v40 = vpop.f32.mrf.mxu1  ;;  %v583_v63 = vadd.f32 %v582_v33, %v456_v39 }
 0x160   : > { %v458_v41 = vpop.f32.mrf.mxu0 }
 0x161   : > { %v591_v42 = vpop.f32.mrf.mxu1 }
 0x162   : > { %v461_v43 = vpop.f32.mrf.mxu0 }
 0x163   : > { %v588_v47 = vadd.f32 %v587_v36, %v461_v43 }
 0x164   : > { %v463_v1 = vpop.f32.mrf.mxu0 }
 0x166   : > { %v464_v44 = vpop.f32.mrf.mxu0 }
 0x168   : > { %v465_v45 = vpop.f32.mrf.mxu0 }
 0x183   : > { %v772_v48 = vpop.f32.mrf.mxu1 }
 0x184   : > { %v780_v50 = vadd.f32 %v772_v48, %v588_v47 }
 0x185   : > { %v774_v51 = vpop.f32.mrf.mxu1 }
 0x186   : > { %v790_v52 = vadd.f32 %v990_v49, %v780_v50 }
 0x187   : > { %v775_v53 = vpop.f32.mrf.mxu1 }
 0x188   : > { %v793_v55 = vmax.f32 %v790_v52, 0.0 }
 0x189   : > { %v776_v57 = vpop.f32.mrf.mxu1 }
 0x18a   : > { %v814_v58 = vmul.f32 %v810_v54, %v793_v55  ;;  %v764_v59 = vpop.f32.mrf.mxu0 }
 0x18b   : > { %v778_v60 = vadd.f32 %v764_v59, %v580_v56 }
 0x18c   : > { %v998_v61 = vpack.c.bf16 %v814_v58, %v814_v58  ;;  %v766_v62 = vpop.f32.mrf.mxu0 }
 0x18d   : > { %v788_v0 = vadd.f32 %v990_v49, %v778_v60 }
 0x18e   : > { %830 = vst [vmem:[%s209_s21 + $0x8] sm:$0xf] %v998_v61  ;;  %v767_v2 = vpop.f32.mrf.mxu0 }
 0x18f   : > { %v779_v3 = vadd.f32 %v767_v2, %v583_v63  ;;  %v791_v6 = vmax.f32 %v788_v0, 0.0 }
 0x190   : > { %v769_v4 = vpop.f32.mrf.mxu0 }
 0x191   : > { %v789_v5 = vadd.f32 %v990_v49, %v779_v3  ;;  %v812_v10 = vmul.f32 %v800_v7, %v791_v6 }
 0x193   : > { %v792_v8 = vmax.f32 %v789_v5, 0.0 }
 0x195   : > { %v813_v9 = vmul.f32 %v805_v46, %v792_v8 }
 0x197   : > { %v1002_v11 = vpack.c.bf16 %v813_v9, %v812_v10 }
 0x199   : > { %1003 = vst [vmem:[%s209_s21] sm:$0xff] %v1002_v11  }
 0x19a PF: > { %s14_s17 = sadd.s32 1, %s1117_s17   ;;  %s1421_s15 = smov %s1113_s16 }
 0x19b   : > { %p11_p5 = scmp.ge.s32.totalorder %s14_s17, 4   ;;  %s1422_s16 = smov %s1424_s18 }
 0x19d   :  { %13 = sbr.rel (!%p11_p5) target bundleno = 2 (0x2), region = 68 }

// kernel: superpoint_forward.15
= control target key start
LH: loop header
LB: loop body
LE: loop exit
PB: predicated region body
PF: predicated region fallthrough
CT: control target
= control target key end

     0   :  { %s1900_s12 = smov 0   ;;  %s1902_s13 = smov 0   ;;  %s2253_s0 = inlined_call_operand.vmem [shape: bf16[2,48,128], index: 0, kind: input, shape index: {}]   ;;  %s2254_s1 = inlined_call_operand.vmem [shape: bf16[3,384,128], index: 1, kind: input, shape index: {}]   ;;  %s2255_s2 = inlined_call_operand.vmem [shape: f32[1,128], index: 2, kind: input, shape index: {}]   ;;  %s2256_s3 = inlined_call_operand.vmem [shape: bf16[2,24,128], index: 3, kind: output, shape index: {}]  }
   0x1   :  { %s1904_s14 = smov 0  }
   0x2 LB: > { %s25_s15 = sadd.s32 1, %s1872_s13  ;;  %p1396_p0 = scmp.ge.s32.totalorder %s1876_s14, 1  ;;  %s1876_s14 = sphi %s1904_s14, %s13_s14   ;;  %s1872_s13 = sphi %s1902_s13, %s2260_s13   ;;  %s1868_s12 = sphi %s1900_s12, %s2259_s12  }
   0x3   : > { %p27_p1 = scmp.ge.s32.totalorder %s25_s15, 2  ;;  %p149_p2 = scmp.lt.s32.totalorder %s1876_s14, 3 }
   0x5   : > { %s2262_s15 = smov (%p27_p1, %s25_s15), 0  ;;  %p150_p3 = pnand %p1396_p0, %p149_p2 }
   0x6   : > { %p173_p4 = scmp.lt.s32.totalorder (!%p150_p3), %s1868_s12, 1 }
   0x7   : > { %153 = sbr.rel (%p150_p3) target bundleno = 350 (0x15e), region = 32 }
   0xc   : > { %v1780_v0 = vld [vmem:[%s2254_s1 + $0x138] sm:$0xff]   ;;  %v1783_v3 = vld [vmem:[%s2254_s1 + $0x130] sm:$0xff]   ;;  %v1786_v6 = vld [vmem:[%s2254_s1 + $0x128] sm:$0xff]   ;;  %s2264_s12 = smov (!%p173_p4, %s1868_s12), 1  ;;  %vm215_vm0 = vcmask 1043456   ;;  %vm218_vm3 = vcmask 1047552  }
   0xd   : > { %v1781_v1 = vld [vmem:[%s2254_s1 + $0x178] sm:$0xff]   ;;  %1578 = vmatprep.subr.bf16.mxu0 %v1780_v0  ;;  %v1784_v4 = vld [vmem:[%s2254_s1 + $0x170] sm:$0xff]   ;;  %v1787_v7 = vld [vmem:[%s2254_s1 + $0x168] sm:$0xff]   ;;  %s1752_s27 = smul.u32 24, %s2264_s12  ;;  %vm195_vm1 = vsmask.f32 3328 }
   0xe   : > { %v1782_v2 = vld [vmem:[%s2254_s1 + $0xf8] sm:$0xff]   ;;  %1692 = vmatprep.subr.bf16.mxu1 %v1781_v1  ;;  %v1785_v5 = vld [vmem:[%s2254_s1 + $0xf0] sm:$0xff]   ;;  %v1788_v8 = vld [vmem:[%s2254_s1 + $0xe8] sm:$0xff]   ;;  %vm219_vm2 = vsmask.f32 7424  ;;  %vm241_vm6 = vcmask 1046528  }
   0xf   : > { %1579 = vmatpush3.bf16.msra.mxu0 %v1782_v2  ;;  %1693 = vmatpush3.bf16.msra.mxu1 %v1781_v1  ;;  %v1789_v9 = vld [vmem:[%s2254_s1 + $0x120] sm:$0xff]   ;;  %v1792_v12 = vld [vmem:[%s2254_s1 + $0x118] sm:$0xff]   ;;  %v1795_v15 = vld [vmem:[%s2254_s1 + $0x110] sm:$0xff]   ;;  %s177_s11 = scalar_lea.vmem %s2253_s0, %s1752_s27  ;;  %vm344_vm7 = vcmask 1044480   ;;  %vm900_vm8 = vcmask 1041408   ;;  %vm1256_vm9 = vcmask 1040384  }
  0x10   : > { %1580 = vmatprep.subr.bf16.mxu0 %v1783_v3  ;;  %1694 = vmatprep.subr.bf16.mxu1 %v1784_v4  ;;  %v1790_v10 = vld [vmem:[%s2254_s1 + $0x160] sm:$0xff]   ;;  %v1793_v13 = vld [vmem:[%s2254_s1 + $0x158] sm:$0xff]   ;;  %v1796_v16 = vld [vmem:[%s2254_s1 + $0x150] sm:$0xff]   ;;  %vm1257_vm10 = vcmask 1042434   ;;  %vm1259_vm12 = vcmask 1044484   ;;  %vm1261_vm13 = vcmask 1046534  }
  0x11   : > { %v1791_v11 = vld [vmem:[%s2254_s1 + $0xe0] sm:$0xff]   ;;  %v1794_v14 = vld [vmem:[%s2254_s1 + $0xd8] sm:$0xff]   ;;  %v1797_v17 = vld [vmem:[%s2254_s1 + $0xd0] sm:$0xff]   ;;  %s1753_s28 = smul.u32 12, %s2264_s12 }
  0x12   : > { %v1798_v18 = vld [vmem:[%s2254_s1 + $0x108] sm:$0xff]   ;;  %v1801_v21 = vld [vmem:[%s2254_s1 + $0x100] sm:$0xff]   ;;  %v1806_v30 = vld [vmem:[%s2254_s1 + $0x78] sm:$0xff]  }
  0x13   : > { %1581 = vmatpush3.bf16.msra.mxu0 %v1785_v5  ;;  %1695 = vmatpush3.bf16.msra.mxu1 %v1784_v4  ;;  %v1799_v19 = vld [vmem:[%s2254_s1 + $0x148] sm:$0xff]   ;;  %v1802_v22 = vld [vmem:[%s2254_s1 + $0x140] sm:$0xff]   ;;  %v1807_v31 = vld [vmem:[%s2254_s1 + $0xb8] sm:$0xff]   ;;  %s182_s4 = scalar_lea.vmem %s2256_s3, %s1753_s28 }
  0x14   : > { %1582 = vmatprep.subr.bf16.mxu0 %v1786_v6  ;;  %1696 = vmatprep.subr.bf16.mxu1 %v1787_v7  ;;  %v1800_v20 = vld [vmem:[%s2254_s1 + $0xc8] sm:$0xff]   ;;  %v1804_v23 = vld [vmem:[%s177_s11] sm:$0xff]   ;;  %vm216_vm4 = vmand %vm215_vm0, %vm195_vm1  ;;  %vm1323_vm0 = vcmask 1042432  }
  0x15   : > { %v1805_v24 = vld [vmem:[%s177_s11 + $0x8] ss:$0 sps:$4 sm:$0xff]   ;;  %v1803_v25 = vld [vmem:[%s2254_s1 + $0xc0] sm:$0xff]   ;;  %v197_v26 = vshrl.u32 %v1804_v23, 16  ;;  %v200_v27 = vshll.u32 %v1804_v23, 16  ;;  %vm220_vm5 = vmand %vm218_vm3, %vm219_vm2 }
  0x16   : > { %v205_v28 = vshrl.u32 %v1805_v24, 16  ;;  %v208_v29 = vshll.u32 %v1805_v24, 16  ;;  %v1810_v58 = vld [vmem:[%s2254_s1 + $0xb0] sm:$0xff]   ;;  %v1808_v61 = vld [vmem:[%s2254_s1 + $0x38] sm:$0xff]   ;;  %v1813_v1 = vld [vmem:[%s2254_s1 + $0xa8] sm:$0xff]  }
  0x17   : > { %1583 = vmatpush3.bf16.msra.mxu0 %v1788_v8  ;;  %1697 = vmatpush3.bf16.msra.mxu1 %v1787_v7  ;;  %v199_v32 = vrot.slane %v197_v26, 4  ;;  %v202_v33 = vrot.slane %v200_v27, 5  ;;  %v1809_v0 = vld [vmem:[%s2254_s1 + $0x70] sm:$0xff]   ;;  %v1812_v4 = vld [vmem:[%s2254_s1 + $0x68] sm:$0xff]   ;;  %v1816_v6 = vld [vmem:[%s2254_s1 + $0xa0] sm:$0xff]  }
  0x18   : > { %1584 = vmatprep.subr.bf16.mxu0 %v1789_v9  ;;  %1698 = vmatprep.subr.bf16.mxu1 %v1790_v10  ;;  %v207_v34 = vrot.slane %v205_v28, 4  ;;  %v210_v35 = vrot.slane %v208_v29, 5  ;;  %v1811_v2 = vld [vmem:[%s2254_s1 + $0x30] sm:$0xff]   ;;  %v1814_v8 = vld [vmem:[%s2254_s1 + $0x28] sm:$0xff]   ;;  %v1815_v9 = vld [vmem:[%s2254_s1 + $0x60] sm:$0xff]  }
  0x19   : > { %v203_v36 = vor.u32 %v202_v33, %v199_v32  ;;  %v1827_v24 = vld [vmem:[%s2254_s1 + $0x40] sm:$0xff]   ;;  %v1830_v29 = vld [vmem:[%s2254_s1 + $0x1f8] sm:$0xff]   ;;  %v1833_v33 = vld [vmem:[%s2254_s1 + $0x1f0] sm:$0xff]  }
  0x1a   : > { %v211_v37 = vor.u32 %v210_v35, %v207_v34  ;;  %v1829_v28 = vld [vmem:[%s2254_s1] sm:$0xff]   ;;  %v1832_v32 = vld [vmem:[%s2254_s1 + $0x1b8] sm:$0xff]   ;;  %v1837_v34 = vld [vmem:[%s2254_s1 + $0x228] sm:$0xff]  }
  0x1b   : > { %1585 = vmatpush3.bf16.msra.mxu0 %v1791_v11  ;;  %1699 = vmatpush3.bf16.msra.mxu1 %v1790_v10  ;;  %v2010_v39 = vsel %vm216_vm4, 0, %v203_v36  ;;  %v1819_v10 = vld [vmem:[%s2254_s1 + $0x98] sm:$0xff]   ;;  %v1817_v11 = vld [vmem:[%s2254_s1 + $0x20] sm:$0xff]   ;;  %vm1258_vm11 = vmor %vm1256_vm9, %vm1257_vm10 }
  0x1c   : > { %1586 = vmatprep.subr.bf16.mxu0 %v1792_v12  ;;  %1700 = vmatprep.subr.bf16.mxu1 %v1793_v13  ;;  %v212_v38 = vsel %vm195_vm1, %v203_v36, %v211_v37  ;;  %v223_v41 = vshrl.u32 %v2010_v39, 16  ;;  %v225_v42 = vshll.u32 %v2010_v39, 16  ;;  %v242_v43 = vrot.slane %v2010_v39, 1  ;;  %v1818_v12 = vld [vmem:[%s2254_s1 + $0x58] sm:$0xff]   ;;  %v1835_v36 = vld [vmem:[%s2254_s1 + $0x1b0] sm:$0xff]   ;;  %v1836_v37 = vld [vmem:[%s2254_s1 + $0x1e8] sm:$0xff]  }
  0x1d   : > { %v2012_v40 = vsel %vm220_vm5, %v212_v38, 0  ;;  %v345_v51 = vrot.slane %v2010_v39, 3  ;;  %v901_v3 = vrot.slane %v2010_v39, 6  ;;  %vm1260_vm14 = vmor %vm1258_vm11, %vm1259_vm12 }
  0x1e   : > { %v230_v44 = vshll.u32 %v2012_v40, 16  ;;  %v234_v45 = vshrl.u32 %v2012_v40, 16  ;;  %v2020_v46 = vrot.slane %v2012_v40, 1  ;;  %v227_v47 = vrot.slane %v225_v42, 1  ;;  %v1838_v42 = vld [vmem:[%s2254_s1 + $0x1a8] sm:$0xff]   ;;  %vm2224_vm15 = vmor %vm1260_vm14, %vm1261_vm13 }
  0x1f   : > { %1587 = vmatpush3.bf16.msra.mxu0 %v1794_v14  ;;  %1701 = vmatpush3.bf16.msra.mxu1 %v1793_v13  ;;  %v346_v54 = vrot.slane %v2012_v40, 3  ;;  %v902_v5 = vrot.slane %v2012_v40, 6  ;;  %v1822_v13 = vld [vmem:[%s2254_s1 + $0x90] sm:$0xff]   ;;  %v1820_v14 = vld [vmem:[%s2254_s1 + $0x18] sm:$0xff]  }
  0x20   : > { %1588 = vmatprep.subr.bf16.mxu0 %v1795_v15  ;;  %1702 = vmatprep.subr.bf16.mxu1 %v1796_v16  ;;  %v232_v48 = vrot.slane %v230_v44, 1  ;;  %v2024_v49 = vsel %vm241_vm6, %v242_v43, %v2020_v46  ;;  %v352_v50 = vrot.slane %v2020_v46, 3  ;;  %v228_v52 = vor.u32 %v227_v47, %v223_v41  ;;  %v1821_v15 = vld [vmem:[%s2254_s1 + $0x50] sm:$0xff]   ;;  %v1839_v43 = vld [vmem:[%s2254_s1 + $0x1e0] sm:$0xff]   ;;  %v1842_v47 = vld [vmem:[%s2254_s1 + $0x1d8] sm:$0xff]  }
  0x21   : > { %v351_v53 = vrot.slane %v2024_v49, 3  ;;  %v347_v62 = vsel %vm344_vm7, %v345_v51, %v346_v54  ;;  %v2067_v7 = vsel %vm900_vm8, %v901_v3, %v902_v5  ;;  %v907_v26 = vrot.slane %v2024_v49, 6  ;;  %v1849_v51 = vld [vmem:[%s2254_s1 + $0x208] sm:$0xff]  }
  0x22   : > { %v2030_v55 = vor.u32 %v234_v45, %v232_v48  ;;  %v2033_v56 = vsel %vm219_vm2, %v228_v52, %v232_v48  ;;  %v1843_v45 = vld [vmem:[%s2254_s1 + $0x218] sm:$0xff]   ;;  %v1846_v48 = vld [vmem:[%s2254_s1 + $0x210] sm:$0xff]  }
  0x23   : > { %1589 = vmatpush3.bf16.msra.mxu0 %v1797_v17  ;;  %1703 = vmatpush3.bf16.msra.mxu1 %v1796_v16  ;;  %v353_v57 = vsel %vm344_vm7, %v351_v53, %v352_v50  ;;  %v348_v59 = vrot.slane %v2033_v56, 3  ;;  %v1825_v16 = vld [vmem:[%s2254_s1 + $0x88] sm:$0xff]   ;;  %v1823_v17 = vld [vmem:[%s2254_s1 + $0x10] sm:$0xff]   ;;  %v904_v38 = vrot.slane %v2033_v56, 6 }
  0x24   : > { %1590 = vmatprep.subr.bf16.mxu0 %v1798_v18  ;;  %1704 = vmatprep.subr.bf16.mxu1 %v1799_v19  ;;  %v349_v60 = vrot.slane %v2030_v55, 3  ;;  %v1878_v18 = vmov 0   ;;  %v1847_v52 = vld [vmem:[%s2254_s1 + $0x190] sm:$0xff]   ;;  %v1848_v53 = vld [vmem:[%s2254_s1 + $0x1c8] sm:$0xff]  }
  0x25   : > { %1708 = vmatprep.mubr.bf16.mxu1 %v353_v57 }
  0x26   : > { %v350_v63 = vsel %vm344_vm7, %v348_v59, %v349_v60 }
  0x27   : > { %1591 = vmatpush3.bf16.msra.mxu0 %v1800_v20  ;;  %1705 = vmatpush3.bf16.msra.mxu1 %v1799_v19  ;;  %v2101_v19 = vrot.slane %v1878_v18, 1  ;;  %v1824_v20 = vld [vmem:[%s2254_s1 + $0x48] sm:$0xff]  }
  0x28   : > { %1592 = vmatprep.subr.bf16.mxu0 %v1801_v21  ;;  %1706 = vmatprep.subr.bf16.mxu1 %v1802_v22  ;;  %v1828_v21 = vld [vmem:[%s2254_s1 + $0x80] sm:$0xff]  }
  0x29   : > { %536 = vmatprep.mubr.bf16.mxu0 %v350_v63  ;;  %v2115_v23 = vsel %vm241_vm6, %v2020_v46, %v2101_v19  ;;  %v844_v35 = vsel %vm219_vm2, %v2030_v55, %v2101_v19  ;;  %v912_v57 = vrot.slane %v2101_v19, 6 }
  0x2a   : > { %v908_v27 = vrot.slane %v2115_v23, 6  ;;  %v905_v41 = vrot.slane %v844_v35, 6  ;;  %v1185_v35 = vlaneseq }
  0x2b   : > { %1593 = vmatpush3.bf16.msra.mxu0 %v1803_v25  ;;  %1707 = vmatpush3.bf16.msra.mxu1 %v1802_v22  ;;  %v1826_v22 = vld [vmem:[%s2254_s1 + $0x8] sm:$0xff]   ;;  %v1831_v25 = vld [vmem:[%s2254_s1 + $0x238] sm:$0xff]  }
  0x2c   : > { %1616 = vmatprep.subr.bf16.mxu0 %v1806_v30  ;;  %1712 = vmatprep.subr.bf16.mxu1 %v1807_v31  ;;  %v1834_v30 = vld [vmem:[%s2254_s1 + $0x230] sm:$0xff]   ;;  %v906_v44 = vsel %vm900_vm8, %v904_v38, %v905_v41  ;;  %v915_v59 = vsel %vm900_vm8, %v908_v27, %v912_v57 }
  0x2e   : > { %1709 = vmatmul.mubr.bf16.vlgmr.msra.gmra.mxu1 %v352_v50  ;;  %537 = vmatmul.mubr.bf16.vlgmr.msra.gmra.mxu0 %v347_v62  ;;  %v1845_v50 = vld [vmem:[%s2254_s1 + $0x1d0] sm:$0xff]  }
  0x2f   : > { %1713 = vmatpush3.bf16.msra.mxu1 %v1807_v31  ;;  %1728 = vmatprep.mubr.bf16.mxu1 %v2024_v49  ;;  %v909_v31 = vsel %vm900_vm8, %v907_v26, %v908_v27  ;;  %v1844_v49 = vld [vmem:[%s2254_s1 + $0x198] sm:$0xff]  }
  0x30   : > { %1714 = vmatprep.subr.bf16.mxu1 %v1810_v58  ;;  %1617 = vmatpush3.bf16.msra.mxu0 %v1808_v61  ;;  %v910_v61 = vrot.slane %v1878_v18, 6 }
  0x31   : > { %544 = vmatprep.mubr.bf16.mxu0 %v349_v60  ;;  %1618 = vmatprep.subr.bf16.mxu0 %v1809_v0  ;;  %v913_v60 = vsel %vm900_vm8, %v905_v41, %v912_v57 }
  0x32   : > { %v911_v62 = vsel %vm900_vm8, %v902_v5, %v910_v61 }
  0x33   : > { %1715 = vmatpush3.bf16.msra.mxu1 %v1810_v58  ;;  %v1853_v58 = vld [vmem:[%s2254_s1 + $0x180] sm:$0xff]  }
  0x34   : > { %1716 = vmatprep.subr.bf16.mxu1 %v1813_v1  ;;  %1619 = vmatpush3.bf16.msra.mxu0 %v1811_v2 }
  0x35   : > { %1620 = vmatprep.subr.bf16.mxu0 %v1812_v4 }
  0x36   : > { %545 = vmatmul.mubr.bf16.gmra.mxu0 %v346_v54  ;;  %v1852_v54 = vld [vmem:[%s2254_s1 + $0x200] sm:$0xff]  }
  0x37   : > { %1717 = vmatpush3.bf16.msra.mxu1 %v1813_v1  ;;  %776 = vmatprep.mubr.bf16.mxu0 %v2033_v56  ;;  %v1851_v56 = vld [vmem:[%s2254_s1 + $0x1c0] sm:$0xff]  }
  0x38   : > { %1718 = vmatprep.subr.bf16.mxu1 %v1816_v6  ;;  %1621 = vmatpush3.bf16.msra.mxu0 %v1814_v8 }
  0x39   : > { %1622 = vmatprep.subr.bf16.mxu0 %v1815_v9 }
  0x3b   : > { %1719 = vmatpush3.bf16.msra.mxu1 %v1816_v6 }
  0x3c   : > { %1720 = vmatprep.subr.bf16.mxu1 %v1819_v10  ;;  %1623 = vmatpush3.bf16.msra.mxu0 %v1817_v11 }
  0x3d   : > { %1624 = vmatprep.subr.bf16.mxu0 %v1818_v12 }
  0x3f   : > { %1721 = vmatpush3.bf16.msra.mxu1 %v1819_v10 }
  0x40   : > { %1722 = vmatprep.subr.bf16.mxu1 %v1822_v13  ;;  %1625 = vmatpush3.bf16.msra.mxu0 %v1820_v14 }
  0x41   : > { %1626 = vmatprep.subr.bf16.mxu0 %v1821_v15 }
  0x43   : > { %1723 = vmatpush3.bf16.msra.mxu1 %v1822_v13 }
  0x44   : > { %1724 = vmatprep.subr.bf16.mxu1 %v1825_v16  ;;  %1627 = vmatpush3.bf16.msra.mxu0 %v1823_v17 }
  0x45   : > { %1628 = vmatprep.subr.bf16.mxu0 %v1824_v20 }
  0x47   : > { %1725 = vmatpush3.bf16.msra.mxu1 %v1825_v16 }
  0x48   : > { %1726 = vmatprep.subr.bf16.mxu1 %v1828_v21  ;;  %1629 = vmatpush3.bf16.msra.mxu0 %v1826_v22 }
  0x49   : > { %1630 = vmatprep.subr.bf16.mxu0 %v1827_v24 }
  0x4b   : > { %1727 = vmatpush3.bf16.msra.mxu1 %v1828_v21 }
  0x4c   : > { %1732 = vmatprep.subr.bf16.mxu1 %v1831_v25  ;;  %1631 = vmatpush3.bf16.msra.mxu0 %v1829_v28 }
  0x4d   : > { %1654 = vmatprep.subr.bf16.mxu0 %v1830_v29 }
  0x4e   : > { %1729 = vmatmul.mubr.bf16.vlgmr.msra.gmra.mxu1 %v2020_v46  ;;  %v1841_v46 = vld [vmem:[%s2254_s1 + $0x1a0] sm:$0xff]  }
  0x4f   : > { %1733 = vmatpush3.bf16.msra.mxu1 %v1831_v25  ;;  %1748 = vmatprep.mubr.bf16.mxu1 %v909_v31  ;;  %v1879_v31 = vmov 1983009808  }
  0x50   : > { %1734 = vmatprep.subr.bf16.mxu1 %v1834_v30  ;;  %777 = vmatmul.mubr.bf16.vlgmr.msra.gmra.mxu0 %v2010_v39  ;;  %v1840_v39 = vld [vmem:[%s2254_s1 + $0x220] sm:$0xff]  }
  0x51   : > { %1655 = vmatpush3.bf16.msra.mxu0 %v1832_v32  ;;  %784 = vmatprep.mubr.bf16.mxu0 %v2030_v55  ;;  %v1850_v55 = vld [vmem:[%s2254_s1 + $0x188] sm:$0xff]   ;;  %v1183_v32 = vunpack.c.l.s4 %v1879_v31 }
  0x52   : > { %1656 = vmatprep.subr.bf16.mxu0 %v1833_v33 }
  0x53   : > { %1735 = vmatpush3.bf16.msra.mxu1 %v1834_v30 }
  0x54   : > { %1736 = vmatprep.subr.bf16.mxu1 %v1837_v34 }
  0x55   : > { %1657 = vmatpush3.bf16.msra.mxu0 %v1835_v36 }
  0x56   : > { %1658 = vmatprep.subr.bf16.mxu0 %v1836_v37 }
  0x57   : > { %1737 = vmatpush3.bf16.msra.mxu1 %v1837_v34 }
  0x58   : > { %1738 = vmatprep.subr.bf16.mxu1 %v1840_v39  ;;  %785 = vmatmul.mubr.bf16.gmra.mxu0 %v2012_v40 }
  0x59   : > { %1659 = vmatpush3.bf16.msra.mxu0 %v1838_v42  ;;  %1098 = vmatprep.mubr.bf16.mxu0 %v906_v44  ;;  %v1184_v42 = vunpack.c.0.s8 %v1183_v32 }
  0x5a   : > { %1660 = vmatprep.subr.bf16.mxu0 %v1839_v43 }
  0x5b   : > { %1739 = vmatpush3.bf16.msra.mxu1 %v1840_v39 }
  0x5c   : > { %1740 = vmatprep.subr.bf16.mxu1 %v1843_v45 }
  0x5d   : > { %1661 = vmatpush3.bf16.msra.mxu0 %v1841_v46 }
  0x5e   : > { %1662 = vmatprep.subr.bf16.mxu0 %v1842_v47  ;;  %v1186_v47 = vshrl.u32 %v1185_v35, 7 }
  0x5f   : > { %1741 = vmatpush3.bf16.msra.mxu1 %v1843_v45 }
  0x60   : > { %1742 = vmatprep.subr.bf16.mxu1 %v1846_v48  ;;  %v1187_v57 = vsub.s32 %v1184_v42, %v1186_v47  ;;  %v1303_v32 = vsub.s32 0, %v1186_v47 }
  0x61   : > { %1663 = vmatpush3.bf16.msra.mxu0 %v1844_v49 }
  0x62   : > { %1664 = vmatprep.subr.bf16.mxu0 %v1845_v50 }
  0x63   : > { %1743 = vmatpush3.bf16.msra.mxu1 %v1846_v48  ;;  %v1569_v48 = vld [vmem:[%s2255_s2] ss:$0 sm:$0xff] }
  0x64   : > { %1744 = vmatprep.subr.bf16.mxu1 %v1849_v51 }
  0x65   : > { %1665 = vmatpush3.bf16.msra.mxu0 %v1847_v52 }
  0x66   : > { %1666 = vmatprep.subr.bf16.mxu0 %v1848_v53 }
  0x67   : > { %1745 = vmatpush3.bf16.msra.mxu1 %v1849_v51 }
  0x68   : > { %1746 = vmatprep.subr.bf16.mxu1 %v1852_v54 }
  0x69   : > { %1667 = vmatpush3.bf16.msra.mxu0 %v1850_v55 }
  0x6a   : > { %1668 = vmatprep.subr.bf16.mxu0 %v1851_v56 }
  0x6b   : > { %1747 = vmatpush3.bf16.msra.mxu1 %v1852_v54 }
  0x6d   : > { %1669 = vmatpush3.bf16.msra.mxu0 %v1853_v58 }
  0x6e   : > { %1749 = vmatmul.mubr.bf16.vlgmr.msra.gmra.mxu1 %v915_v59 }
  0x70   : > { %1099 = vmatmul.mubr.bf16.vlgmr.msra.gmra.mxu0 %v2067_v7 }
  0x71   : > { %1106 = vmatprep.mubr.bf16.mxu0 %v913_v60 }
  0x78   : > { %1107 = vmatmul.mubr.bf16.gmra.mxu0 %v911_v62 }
  0xee   : > { %v1710_v63 = vpop.f32.mrf.mxu1  ;;  %v1594_v1 = vpop.f32.mrf.mxu0 }
  0xf0   : > { %v586_v0 = vpop.f32.mrf.mxu1  ;;  %v1595_v3 = vpop.f32.mrf.mxu0 }
  0xf1   : > { %v1596_v4 = vadd.f32 %v1595_v3, %v1594_v1 }
  0xf2   : > { %v1711_v2 = vpop.f32.mrf.mxu1  ;;  %v1597_v6 = vpop.f32.mrf.mxu0 }
  0xf3   : > { %v587_v8 = vadd.f32 %v1596_v4, %v586_v0 }
  0xf4   : > { %v1598_v9 = vpop.f32.mrf.mxu0  ;;  %v589_v40 = vpop.f32.mrf.mxu1 }
  0xf5   : > { %v1599_v10 = vadd.f32 %v1598_v9, %v1597_v6 }
  0xf6   : > { %v1600_v11 = vpop.f32.mrf.mxu0 }
  0xf7   : > { %v590_v38 = vadd.f32 %v1599_v10, %v589_v40 }
  0xf8   : > { %v1601_v7 = vpop.f32.mrf.mxu0 }
  0xf9   : > { %v1602_v12 = vadd.f32 %v1601_v7, %v1600_v11 }
  0xfa   : > { %v1603_v13 = vpop.f32.mrf.mxu0 }
  0xfb   : > { %v595_v14 = vadd.f32 %v1710_v63, %v1602_v12 }
  0xfc   : > { %v1604_v15 = vpop.f32.mrf.mxu0 }
 0x10e   : > { %v1730_v16 = vpop.f32.mrf.mxu1 }
 0x110   : > { %v826_v5 = vpop.f32.mrf.mxu1  ;;  %v1632_v17 = vpop.f32.mrf.mxu0 }
 0x112   : > { %v1731_v18 = vpop.f32.mrf.mxu1  ;;  %v1633_v19 = vpop.f32.mrf.mxu0 }
 0x113   : > { %v1634_v27 = vadd.f32 %v1633_v19, %v1632_v17 }
 0x114   : > { %v1635_v20 = vpop.f32.mrf.mxu0  ;;  %v829_v26 = vpop.f32.mrf.mxu1 }
 0x115   : > { %v779_v33 = vadd.f32 %v1634_v27, %v587_v8 }
 0x116   : > { %v1636_v21 = vpop.f32.mrf.mxu0 }
 0x117   : > { %v1637_v34 = vadd.f32 %v1636_v21, %v1635_v20  ;;  %v827_v44 = vadd.f32 %v826_v5, %v779_v33 }
 0x118   : > { %v1638_v22 = vpop.f32.mrf.mxu0 }
 0x119   : > { %v782_v45 = vadd.f32 %v1637_v34, %v590_v38 }
 0x11a   : > { %v1639_v23 = vpop.f32.mrf.mxu0 }
 0x11b   : > { %v1640_v39 = vadd.f32 %v1639_v23, %v1638_v22  ;;  %v830_v55 = vadd.f32 %v829_v26, %v782_v45 }
 0x11c   : > { %v1641_v24 = vpop.f32.mrf.mxu0 }
 0x11d   : > { %v787_v52 = vadd.f32 %v1640_v39, %v595_v14 }
 0x11e   : > { %v1642_v25 = vpop.f32.mrf.mxu0 }
 0x11f   : > { %v835_v63 = vadd.f32 %v1730_v16, %v787_v52 }
 0x12e   : > { %v1750_v28 = vpop.f32.mrf.mxu1 }
 0x130   : > { %v1148_v29 = vpop.f32.mrf.mxu1  ;;  %v1670_v30 = vpop.f32.mrf.mxu0 }
 0x132   : > { %v1751_v36 = vpop.f32.mrf.mxu1  ;;  %v1671_v37 = vpop.f32.mrf.mxu0 }
 0x133   : > { %v1672_v41 = vadd.f32 %v1671_v37, %v1670_v30 }
 0x134   : > { %v1673_v43 = vpop.f32.mrf.mxu0  ;;  %v1151_v53 = vpop.f32.mrf.mxu1 }
 0x135   : > { %v1149_v46 = vadd.f32 %v1672_v41, %v1148_v29 }
 0x136   : > { %v1674_v49 = vpop.f32.mrf.mxu0 }
 0x137   : > { %v1162_v50 = vadd.f32 %v1149_v46, %v827_v44  ;;  %v1675_v51 = vadd.f32 %v1674_v49, %v1673_v43 }
 0x138   : > { %v1676_v54 = vpop.f32.mrf.mxu0 }
 0x139   : > { %v1172_v56 = vadd.f32 %v1569_v48, %v1162_v50  ;;  %v1152_v58 = vadd.f32 %v1675_v51, %v1151_v53 }
 0x13a   : > { %v1677_v59 = vpop.f32.mrf.mxu0 }
 0x13b   : > { %v1175_v60 = vmax.f32 %v1172_v56, 0.0  ;;  %v1163_v61 = vadd.f32 %v1152_v58, %v830_v55  ;;  %v1678_v62 = vadd.f32 %v1677_v59, %v1676_v54 }
 0x13c   : > { %v1679_v0 = vpop.f32.mrf.mxu0 }
 0x13d   : > { %v1181_v1 = vcombine.high %v1175_v60, %v1175_v60  ;;  %v1188_v2 = vrot.slane %v1175_v60, %v1187_v57  ;;  %v1173_v3 = vadd.f32 %v1569_v48, %v1163_v61  ;;  %v1157_v4 = vadd.f32 %v1750_v28, %v1678_v62 }
 0x13e   : > { %v1680_v6 = vpop.f32.mrf.mxu0 }
 0x13f   : > { %v1195_v8 = vrot.slane %v1181_v1, %v1187_v57  ;;  %v1176_v9 = vmax.f32 %v1173_v3, 0.0  ;;  %v1164_v10 = vadd.f32 %v1157_v4, %v835_v63  ;;  %v1196_v11 = vcombine.high %v1188_v2, %v1188_v2 }
 0x141   : > { %v1197_v7 = vcombine.high %v1195_v8, %v1195_v8  ;;  %v1198_v12 = vcombine.high %v1176_v9, %v1176_v9  ;;  %v1205_v13 = vrot.slane %v1176_v9, %v1187_v57  ;;  %v1174_v14 = vadd.f32 %v1569_v48, %v1164_v10 }
 0x143   : > { %v1244_v15 = vmax.f32 %v1188_v2, %v1197_v7  ;;  %v1213_v40 = vcombine.high %v1205_v13, %v1205_v13  ;;  %v1245_v16 = vmax.f32 %v1196_v11, %v1205_v13  ;;  %v1177_v17 = vmax.f32 %v1174_v14, 0.0 }
 0x144   : > { %v1212_v19 = vrot.slane %v1198_v12, %v1187_v57 }
 0x145   : > { %v1570_v18 = vrot.slane %v1244_v15, 9  ;;  %v1246_v20 = vmax.f32 %v1195_v8, %v1213_v40  ;;  %v1265_v21 = vrot.slane %v1245_v16, 7  ;;  %v1215_v22 = vcombine.high %v1177_v17, %v1177_v17 }
 0x146   : > { %v1222_v23 = vrot.slane %v1177_v17, %v1187_v57  ;;  %v1214_v30 = vcombine.high %v1212_v19, %v1212_v19 }
 0x147   : > { %v1266_v24 = vsel %vm2224_vm15, %v1570_v18, %v1265_v21  ;;  %v1267_v25 = vrot.slane %v1265_v21, 2  ;;  %v1268_v26 = vrot.slane %v1246_v20, 7  ;;  %v1229_v28 = vrot.slane %v1215_v22, %v1187_v57 }
 0x148   : > { %v1572_v27 = vrot.slane %v1266_v24, 9  ;;  %v1230_v29 = vcombine.high %v1222_v23, %v1222_v23 }
 0x149   : > { %v1269_v31 = vsel %vm2224_vm15, %v1267_v25, %v1268_v26  ;;  %v1231_v35 = vcombine.high %v1229_v28, %v1229_v28  ;;  %v1248_v37 = vmax.f32 %v1214_v30, %v1229_v28 }
 0x14a   : > { %v1573_v33 = vrot.slane %v1269_v31, 9  ;;  %v1293_v34 = vmax.f32 %v1266_v24, %v1572_v27  ;;  %v1247_v36 = vmax.f32 %v1212_v19, %v1230_v29 }
 0x14b   : > { %v1249_v41 = vmax.f32 %v1222_v23, %v1231_v35  ;;  %v1272_v42 = vrot.slane %v1248_v37, 7 }
 0x14c   : > { %v1294_v38 = vmax.f32 %v1269_v31, %v1573_v33  ;;  %v1571_v39 = vrot.slane %v1247_v36, 9  ;;  %v1304_v43 = vrot.slane %v1293_v34, %v1303_v32 }
 0x14d   : > { %v1275_v45 = vrot.slane %v1249_v41, 7  ;;  %v1274_v48 = vrot.slane %v1272_v42, 2 }
 0x14e   : > { %v1308_v44 = vrot.slane %v1294_v38, %v1303_v32  ;;  %v1273_v46 = vsel %vm2224_vm15, %v1571_v39, %v1272_v42 }
 0x14f   : > { %v1574_v47 = vrot.slane %v1273_v46, 9  ;;  %v1276_v50 = vsel %vm2224_vm15, %v1274_v48, %v1275_v45 }
 0x150   : > { %v1317_v49 = vsel %vm1257_vm10, %v1308_v44, %v1304_v43  ;;  %v1575_v51 = vrot.slane %v1276_v50, 9 }
 0x151   : > { %v1295_v52 = vmax.f32 %v1273_v46, %v1574_v47  ;;  %v1321_v56 = vsel %vm1256_vm9, 0.0, %v1317_v49 }
 0x152   : > { %v1296_v53 = vmax.f32 %v1276_v50, %v1575_v51  ;;  %v1324_v59 = vsel %vm1323_vm0, %v1321_v56, 0.0 }
 0x153   : > { %v1312_v54 = vrot.slane %v1295_v52, %v1303_v32 }
 0x154   : > { %v1316_v55 = vrot.slane %v1296_v53, %v1303_v32 }
 0x156   : > { %v1318_v57 = vsel %vm1257_vm10, %v1316_v55, %v1312_v54 }
 0x157   : > { %v1322_v58 = vsel %vm1256_vm9, 0.0, %v1318_v57 }
 0x158   : > { %v1325_v60 = vsel %vm1323_vm0, %v1322_v58, 0.0 }
 0x159   : > { %v1328_v61 = vcombine.low %v1324_v59, %v1325_v60 }
 0x15b   : > { %v1330_v62 = vpack.c.bf16 %v1328_v61, %v1328_v61 }
 0x15d   : > { %1331 = vst [vmem:[%s182_s4] sm:$0xf] %v1330_v62 }
 0x15e PF: > { %s13_s14 = sadd.s32 1, %s1876_s14   ;;  %s2259_s12 = smov %s1872_s13 }
 0x15f   : > { %p10_p5 = scmp.ge.s32.totalorder %s13_s14, 4   ;;  %s2260_s13 = smov %s2262_s15 }
 0x161   :  { %12 = sbr.rel (!%p10_p5) target bundleno = 2 (0x2), region = 64 }

// kernel: superpoint_forward.16
= control target key start
LH: loop header
LB: loop body
LE: loop exit
PB: predicated region body
PF: predicated region fallthrough
CT: control target
= control target key end

     0   :  { %s1647_s15 = smov 0   ;;  %s1649_s16 = smov 0   ;;  %s1971_s0 = inlined_call_operand.vmem [shape: bf16[2,24,128], index: 0, kind: input, shape index: {}]   ;;  %s1972_s1 = inlined_call_operand.vmem [shape: bf16[3,384,128], index: 1, kind: input, shape index: {}]   ;;  %s1973_s2 = inlined_call_operand.vmem [shape: f32[1,128], index: 2, kind: input, shape index: {}]   ;;  %s1974_s3 = inlined_call_operand.vmem [shape: f32[8,1], index: 3, kind: input, shape index: {}]   ;;  %s1975_s4 = inlined_call_operand.vmem [shape: bf16[2,24,128], index: 4, kind: output, shape index: {}]  }
   0x1   :  { %s1651_s17 = smov 0  }
   0x2 LB: > { %s26_s18 = sadd.s32 1, %s1613_s16  ;;  %p1165_p0 = scmp.ge.s32.totalorder %s1617_s17, 1  ;;  %s1617_s17 = sphi %s1651_s17, %s14_s17   ;;  %s1613_s16 = sphi %s1649_s16, %s1977_s16   ;;  %s1609_s15 = sphi %s1647_s15, %s1976_s15  }
   0x3   : > { %p28_p1 = scmp.ge.s32.totalorder %s26_s18, 2  ;;  %p174_p2 = scmp.lt.s32.totalorder %s1617_s17, 3 }
   0x5   : > { %s1979_s18 = smov (%p28_p1, %s26_s18), 0  ;;  %p175_p3 = pnand %p1165_p0, %p174_p2 }
   0x6   : > { %p200_p4 = scmp.lt.s32.totalorder (!%p175_p3), %s1609_s15, 1 }
   0x7   : > { %178 = sbr.rel (%p175_p3) target bundleno = 321 (0x141), region = 36 }
   0xc   : > { %v1522_v0 = vld [vmem:[%s1972_s1 + $0x138] sm:$0xff]   ;;  %v1619_v1 = vmov 0.0   ;;  %vm1620_vm0 = vmmov 0   ;;  %v1525_v4 = vld [vmem:[%s1972_s1 + $0x130] sm:$0xff]   ;;  %v1528_v7 = vld [vmem:[%s1972_s1 + $0x128] sm:$0xff]   ;;  %v1621_v11 = vmov 0  }
   0xd   : > { %1433 = vmatprep.subr.bf16.mxu1 %v1619_v1  ;;  %v1523_v2 = vld [vmem:[%s1972_s1 + $0x178] sm:$0xff]   ;;  %1340 = vmatprep.subr.bf16.mxu0 %v1522_v0  ;;  %v1526_v5 = vld [vmem:[%s1972_s1 + $0x170] sm:$0xff]   ;;  %v1529_v8 = vld [vmem:[%s1972_s1 + $0x168] sm:$0xff]   ;;  %s1981_s15 = smov (!%p200_p4, %s1609_s15), 1  ;;  %vm224_vm1 = vcmask 1042432   ;;  %vm228_vm2 = vcmask 1046528  }
   0xe   : > { %v1524_v3 = vld [vmem:[%s1972_s1 + $0xf8] sm:$0xff]   ;;  %1449 = vmatprep.mubr.msk.bf16.mxu1 %vm1620_vm0, %v1619_v1  ;;  %1434 = vmatpush3.bf16.msra.mxu1 %v1523_v2  ;;  %v1527_v6 = vld [vmem:[%s1972_s1 + $0xf0] sm:$0xff]   ;;  %v1530_v9 = vld [vmem:[%s1972_s1 + $0xe8] sm:$0xff]   ;;  %s1493_s29 = smul.u32 12, %s1981_s15  ;;  %vm225_vm3 = vsmask.f32 2304 }
   0xf   : > { %1341 = vmatpush3.bf16.msra.mxu0 %v1524_v3  ;;  %1435 = vmatprep.subr.bf16.mxu1 %v1619_v1  ;;  %v1531_v10 = vld [vmem:[%s1972_s1 + $0x120] sm:$0xff]   ;;  %v1534_v14 = vld [vmem:[%s1972_s1 + $0x118] sm:$0xff]   ;;  %v1537_v17 = vld [vmem:[%s1972_s1 + $0x110] sm:$0xff]   ;;  %vm229_vm4 = vsmask.f32 6400  ;;  %v1765_v34 = vrot.slane %v1621_v11, 1 }
  0x10   : > { %1342 = vmatprep.subr.bf16.mxu0 %v1525_v4  ;;  %1521 = vset.pattern.permute.xlu0 %v1621_v11  ;;  %v1532_v12 = vld [vmem:[%s1972_s1 + $0x160] sm:$0xff]   ;;  %v1535_v15 = vld [vmem:[%s1972_s1 + $0x158] sm:$0xff]   ;;  %v1538_v18 = vld [vmem:[%s1972_s1 + $0x150] sm:$0xff]   ;;  %s204_s12 = scalar_lea.vmem %s1971_s0, %s1493_s29  ;;  %vm794_vm7 = vsmask.f32 7424  ;;  %s209_s24 = scalar_lea.vmem %s1975_s4, %s1493_s29 }
  0x11   : > { %v1533_v13 = vld [vmem:[%s1972_s1 + $0xe0] sm:$0xff]   ;;  %v1536_v16 = vld [vmem:[%s1972_s1 + $0xd8] sm:$0xff]   ;;  %v1539_v19 = vld [vmem:[%s1972_s1 + $0xd0] sm:$0xff]  }
  0x12   : > { %1436 = vmatpush3.bf16.msra.mxu1 %v1526_v5  ;;  %v1540_v20 = vld [vmem:[%s1972_s1 + $0x108] sm:$0xff]   ;;  %v1543_v23 = vld [vmem:[%s1972_s1 + $0x100] sm:$0xff]   ;;  %vm226_vm5 = vmand %vm224_vm1, %vm225_vm3 }
  0x13   : > { %1343 = vmatpush3.bf16.msra.mxu0 %v1527_v6  ;;  %1437 = vmatprep.subr.bf16.mxu1 %v1619_v1  ;;  %v1541_v21 = vld [vmem:[%s1972_s1 + $0x148] sm:$0xff]   ;;  %v1546_v24 = vld [vmem:[%s204_s12] ss:$0 sps:$4 sm:$0xff]   ;;  %v1547_v31 = vld [vmem:[%s1972_s1 + $0x78] sm:$0xff]  }
  0x14   : > { %1344 = vmatprep.subr.bf16.mxu0 %v1528_v7  ;;  %v1542_v22 = vld [vmem:[%s1972_s1 + $0xc8] sm:$0xff]   ;;  %v1544_v25 = vld [vmem:[%s1972_s1 + $0x140] sm:$0xff]   ;;  %v216_v27 = vshrl.u32 %v1546_v24, 16  ;;  %v219_v28 = vshll.u32 %v1546_v24, 16  ;;  %vm230_vm6 = vmand %vm228_vm2, %vm229_vm4 }
  0x15   : > { %v1545_v26 = vld [vmem:[%s1972_s1 + $0xc0] sm:$0xff]   ;;  %v1548_v39 = vld [vmem:[%s1972_s1 + $0xb8] sm:$0xff]   ;;  %v1551_v45 = vld [vmem:[%s1972_s1 + $0xb0] sm:$0xff]  }
  0x16   : > { %1438 = vmatpush3.bf16.msra.mxu1 %v1529_v8  ;;  %v218_v29 = vrot.slane %v216_v27, 5  ;;  %v221_v30 = vrot.slane %v219_v28, 6  ;;  %v1549_v47 = vld [vmem:[%s1972_s1 + $0x38] sm:$0xff]   ;;  %v1550_v48 = vld [vmem:[%s1972_s1 + $0x70] sm:$0xff]   ;;  %v1554_v49 = vld [vmem:[%s1972_s1 + $0xa8] sm:$0xff]  }
  0x17   : > { %1345 = vmatpush3.bf16.msra.mxu0 %v1530_v9  ;;  %1439 = vmatprep.subr.bf16.mxu1 %v1619_v1  ;;  %v1552_v50 = vld [vmem:[%s1972_s1 + $0x30] sm:$0xff]   ;;  %v1553_v51 = vld [vmem:[%s1972_s1 + $0x68] sm:$0xff]   ;;  %v1557_v52 = vld [vmem:[%s1972_s1 + $0xa0] sm:$0xff]  }
  0x18   : > { %1346 = vmatprep.subr.bf16.mxu0 %v1531_v10  ;;  %v222_v32 = vor.u32 %v221_v30, %v218_v29  ;;  %v1555_v53 = vld [vmem:[%s1972_s1 + $0x28] sm:$0xff]   ;;  %v1556_v54 = vld [vmem:[%s1972_s1 + $0x60] sm:$0xff]   ;;  %v1560_v55 = vld [vmem:[%s1972_s1 + $0x98] sm:$0xff]  }
  0x19   : > { %v1558_v56 = vld [vmem:[%s1972_s1 + $0x20] sm:$0xff]   ;;  %v1559_v57 = vld [vmem:[%s1972_s1 + $0x58] sm:$0xff]   ;;  %v1563_v58 = vld [vmem:[%s1972_s1 + $0x90] sm:$0xff]  }
  0x1a   : > { %1440 = vmatpush3.bf16.msra.mxu1 %v1532_v12  ;;  %v227_v33 = vsel %vm226_vm5, 0, %v222_v32  ;;  %v1561_v59 = vld [vmem:[%s1972_s1 + $0x18] sm:$0xff]   ;;  %v1562_v60 = vld [vmem:[%s1972_s1 + $0x50] sm:$0xff]   ;;  %v1566_v61 = vld [vmem:[%s1972_s1 + $0x88] sm:$0xff]  }
  0x1b   : > { %1347 = vmatpush3.bf16.msra.mxu0 %v1533_v13  ;;  %1441 = vmatprep.subr.bf16.mxu1 %v1619_v1  ;;  %v1767_v35 = vsel %vm230_vm6, %v227_v33, 0  ;;  %v1564_v62 = vld [vmem:[%s1972_s1 + $0x10] sm:$0xff]   ;;  %v1565_v63 = vld [vmem:[%s1972_s1 + $0x48] sm:$0xff]   ;;  %v1569_v0 = vld [vmem:[%s1972_s1 + $0x80] sm:$0xff]  }
  0x1c   : > { %1348 = vmatprep.subr.bf16.mxu0 %v1534_v14  ;;  %v233_v36 = vshrl.u32 %v1767_v35, 16  ;;  %v235_v37 = vshll.u32 %v1767_v35, 16  ;;  %v1772_v38 = vrot.slane %v1767_v35, 1  ;;  %v340_v44 = vrot.slane %v1767_v35, 2  ;;  %v1567_v2 = vld [vmem:[%s1972_s1 + $0x8] sm:$0xff]   ;;  %v1568_v3 = vld [vmem:[%s1972_s1 + $0x40] sm:$0xff]  }
  0x1d   : > { %v1572_v4 = vld [vmem:[%s1972_s1 + $0x238] sm:$0xff]   ;;  %v1570_v5 = vld [vmem:[%s1972_s1] sm:$0xff]   ;;  %v1575_v7 = vld [vmem:[%s1972_s1 + $0x230] sm:$0xff]   ;;  %v852_v33 = vrot.slane %v1767_v35, 4 }
  0x1e   : > { %1442 = vmatpush3.bf16.msra.mxu1 %v1535_v15  ;;  %v237_v40 = vrot.slane %v235_v37, 1  ;;  %v342_v41 = vrot.slane %v1772_v38, 2  ;;  %v1781_v42 = vsel %vm228_vm2, %v1772_v38, %v1765_v34  ;;  %v1571_v6 = vld [vmem:[%s1972_s1 + $0x1f8] sm:$0xff]   ;;  %v1574_v9 = vld [vmem:[%s1972_s1 + $0x1f0] sm:$0xff]   ;;  %v1092_v10 = vld [vmem:[%s1974_s3] sm:$0xff] }
  0x1f   : > { %1349 = vmatpush3.bf16.msra.mxu0 %v1536_v16  ;;  %1443 = vmatprep.subr.bf16.mxu1 %v1619_v1  ;;  %v1573_v8 = vld [vmem:[%s1972_s1 + $0x1b8] sm:$0xff]   ;;  %v1578_v11 = vld [vmem:[%s1972_s1 + $0x228] sm:$0xff]   ;;  %v1576_v13 = vld [vmem:[%s1972_s1 + $0x1b0] sm:$0xff]  }
  0x20   : > { %1350 = vmatprep.subr.bf16.mxu0 %v1537_v17  ;;  %v1783_v43 = vor.u32 %v237_v40, %v233_v36  ;;  %v1577_v15 = vld [vmem:[%s1972_s1 + $0x1e8] sm:$0xff]   ;;  %1095 = vperm.xlu0 %1521, %v1092_v10   ;;  %v1581_v16 = vld [vmem:[%s1972_s1 + $0x220] sm:$0xff]   ;;  %v1586_v24 = vld [vmem:[%s1972_s1 + $0x1d0] sm:$0xff]  }
  0x21   : > { %v1579_v17 = vld [vmem:[%s1972_s1 + $0x1a8] sm:$0xff]   ;;  %v1593_v28 = vld [vmem:[%s1972_s1 + $0x200] sm:$0xff]  }
  0x22   : > { %1444 = vmatpush3.bf16.msra.mxu1 %v1538_v18  ;;  %v341_v46 = vrot.slane %v1783_v43, 2  ;;  %v799_v12 = vsel %vm794_vm7, %v1783_v43, %v1765_v34  ;;  %v1580_v18 = vld [vmem:[%s1972_s1 + $0x1e0] sm:$0xff]   ;;  %v1589_v27 = vld [vmem:[%s1972_s1 + $0x1c8] sm:$0xff]  }
  0x23   : > { %1351 = vmatpush3.bf16.msra.mxu0 %v1539_v19  ;;  %1445 = vmatprep.subr.bf16.mxu1 %v1619_v1  ;;  %v853_v14 = vrot.slane %v799_v12, 4  ;;  %v1584_v19 = vld [vmem:[%s1972_s1 + $0x218] sm:$0xff]   ;;  %v1591_v29 = vld [vmem:[%s1972_s1 + $0x188] sm:$0xff]   ;;  %v1592_v30 = vld [vmem:[%s1972_s1 + $0x1c0] sm:$0xff]  }
  0x24   : > { %1352 = vmatprep.subr.bf16.mxu0 %v1540_v20  ;;  %522 = vmatprep.mubr.bf16.mxu0 %v341_v46  ;;  %v1582_v20 = vld [vmem:[%s1972_s1 + $0x1a0] sm:$0xff]  }
  0x25   : > { %v1594_v32 = vld [vmem:[%s1972_s1 + $0x180] sm:$0xff]  }
  0x26   : > { %1446 = vmatpush3.bf16.msra.mxu1 %v1541_v21  ;;  %v1583_v21 = vld [vmem:[%s1972_s1 + $0x1d8] sm:$0xff]  }
  0x27   : > { %1353 = vmatpush3.bf16.msra.mxu0 %v1542_v22  ;;  %1447 = vmatprep.subr.bf16.mxu1 %v1619_v1  ;;  %v1587_v22 = vld [vmem:[%s1972_s1 + $0x210] sm:$0xff]  }
  0x28   : > { %1354 = vmatprep.subr.bf16.mxu0 %v1543_v23  ;;  %v1585_v23 = vld [vmem:[%s1972_s1 + $0x198] sm:$0xff]  }
  0x2a   : > { %1448 = vmatpush3.bf16.msra.mxu1 %v1544_v25  ;;  %v1590_v25 = vld [vmem:[%s1972_s1 + $0x208] sm:$0xff]  }
  0x2b   : > { %1355 = vmatpush3.bf16.msra.mxu0 %v1545_v26  ;;  %1453 = vmatprep.subr.bf16.mxu1 %v1619_v1  ;;  %v1588_v26 = vld [vmem:[%s1972_s1 + $0x190] sm:$0xff]  }
  0x2c   : > { %1371 = vmatprep.subr.bf16.mxu0 %v1547_v31  ;;  %v854_v31 = vrot.slane %v1781_v42, 4 }
  0x2d   : > { %1450 = vmatmul.mubr.bf16.vlgmr.msra.gmra.mxu1 %v342_v41 }
  0x2e   : > { %1454 = vmatpush3.bf16.msra.mxu1 %v1548_v39  ;;  %1469 = vmatprep.mubr.msk.bf16.mxu1 %vm1620_vm0, %v1619_v1 }
  0x2f   : > { %1455 = vmatprep.subr.bf16.mxu1 %v1619_v1  ;;  %523 = vmatmul.mubr.bf16.vlgmr.msra.gmra.mxu0 %v340_v44 }
  0x30   : > { %1372 = vmatpush3.bf16.msra.mxu0 %v1549_v47  ;;  %746 = vmatprep.mubr.bf16.mxu0 %v1783_v43 }
  0x31   : > { %1373 = vmatprep.subr.bf16.mxu0 %v1550_v48 }
  0x32   : > { %1456 = vmatpush3.bf16.msra.mxu1 %v1551_v45 }
  0x33   : > { %1457 = vmatprep.subr.bf16.mxu1 %v1619_v1 }
  0x34   : > { %1374 = vmatpush3.bf16.msra.mxu0 %v1552_v50 }
  0x35   : > { %1375 = vmatprep.subr.bf16.mxu0 %v1553_v51 }
  0x36   : > { %1458 = vmatpush3.bf16.msra.mxu1 %v1554_v49 }
  0x37   : > { %1459 = vmatprep.subr.bf16.mxu1 %v1619_v1 }
  0x38   : > { %1376 = vmatpush3.bf16.msra.mxu0 %v1555_v53 }
  0x39   : > { %1377 = vmatprep.subr.bf16.mxu0 %v1556_v54 }
  0x3a   : > { %1460 = vmatpush3.bf16.msra.mxu1 %v1557_v52 }
  0x3b   : > { %1461 = vmatprep.subr.bf16.mxu1 %v1619_v1 }
  0x3c   : > { %1378 = vmatpush3.bf16.msra.mxu0 %v1558_v56 }
  0x3d   : > { %1379 = vmatprep.subr.bf16.mxu0 %v1559_v57 }
  0x3e   : > { %1462 = vmatpush3.bf16.msra.mxu1 %v1560_v55 }
  0x3f   : > { %1463 = vmatprep.subr.bf16.mxu1 %v1619_v1 }
  0x40   : > { %1380 = vmatpush3.bf16.msra.mxu0 %v1561_v59 }
  0x41   : > { %1381 = vmatprep.subr.bf16.mxu0 %v1562_v60 }
  0x42   : > { %1464 = vmatpush3.bf16.msra.mxu1 %v1563_v58 }
  0x43   : > { %1465 = vmatprep.subr.bf16.mxu1 %v1619_v1 }
  0x44   : > { %1382 = vmatpush3.bf16.msra.mxu0 %v1564_v62 }
  0x45   : > { %1383 = vmatprep.subr.bf16.mxu0 %v1565_v63 }
  0x46   : > { %1466 = vmatpush3.bf16.msra.mxu1 %v1566_v61 }
  0x47   : > { %1467 = vmatprep.subr.bf16.mxu1 %v1619_v1 }
  0x48   : > { %1384 = vmatpush3.bf16.msra.mxu0 %v1567_v2 }
  0x49   : > { %1385 = vmatprep.subr.bf16.mxu0 %v1568_v3 }
  0x4a   : > { %1468 = vmatpush3.bf16.msra.mxu1 %v1569_v0  ;;  %v1337_v0 = vld [vmem:[%s1973_s2] ss:$0 sm:$0xff] }
  0x4b   : > { %1473 = vmatprep.subr.bf16.mxu1 %v1619_v1 }
  0x4c   : > { %1386 = vmatpush3.bf16.msra.mxu0 %v1570_v5 }
  0x4d   : > { %1470 = vmatmul.mubr.bf16.vlgmr.msra.gmra.mxu1 %v1772_v38  ;;  %1402 = vmatprep.subr.bf16.mxu0 %v1571_v6 }
  0x4e   : > { %1474 = vmatpush3.bf16.msra.mxu1 %v1572_v4  ;;  %1489 = vmatprep.mubr.msk.bf16.mxu1 %vm1620_vm0, %v1619_v1 }
  0x4f   : > { %1475 = vmatprep.subr.bf16.mxu1 %v1619_v1  ;;  %747 = vmatmul.mubr.bf16.vlgmr.msra.gmra.mxu0 %v1767_v35 }
  0x50   : > { %1403 = vmatpush3.bf16.msra.mxu0 %v1573_v8  ;;  %1034 = vmatprep.mubr.bf16.mxu0 %v853_v14 }
  0x51   : > { %1404 = vmatprep.subr.bf16.mxu0 %v1574_v9 }
  0x52   : > { %1476 = vmatpush3.bf16.msra.mxu1 %v1575_v7 }
  0x53   : > { %1477 = vmatprep.subr.bf16.mxu1 %v1619_v1 }
  0x54   : > { %1405 = vmatpush3.bf16.msra.mxu0 %v1576_v13 }
  0x55   : > { %1406 = vmatprep.subr.bf16.mxu0 %v1577_v15 }
  0x56   : > { %1478 = vmatpush3.bf16.msra.mxu1 %v1578_v11 }
  0x57   : > { %1479 = vmatprep.subr.bf16.mxu1 %v1619_v1 }
  0x58   : > { %1407 = vmatpush3.bf16.msra.mxu0 %v1579_v17 }
  0x59   : > { %1408 = vmatprep.subr.bf16.mxu0 %v1580_v18 }
  0x5a   : > { %1480 = vmatpush3.bf16.msra.mxu1 %v1581_v16 }
  0x5b   : > { %1481 = vmatprep.subr.bf16.mxu1 %v1619_v1 }
  0x5c   : > { %1409 = vmatpush3.bf16.msra.mxu0 %v1582_v20 }
  0x5d   : > { %1410 = vmatprep.subr.bf16.mxu0 %v1583_v21 }
  0x5e   : > { %1482 = vmatpush3.bf16.msra.mxu1 %v1584_v19 }
  0x5f   : > { %1483 = vmatprep.subr.bf16.mxu1 %v1619_v1 }
  0x60   : > { %1411 = vmatpush3.bf16.msra.mxu0 %v1585_v23 }
  0x61   : > { %1412 = vmatprep.subr.bf16.mxu0 %v1586_v24 }
  0x62   : > { %1484 = vmatpush3.bf16.msra.mxu1 %v1587_v22 }
  0x63   : > { %1485 = vmatprep.subr.bf16.mxu1 %v1619_v1 }
  0x64   : > { %1413 = vmatpush3.bf16.msra.mxu0 %v1588_v26 }
  0x65   : > { %1414 = vmatprep.subr.bf16.mxu0 %v1589_v27 }
  0x66   : > { %1486 = vmatpush3.bf16.msra.mxu1 %v1590_v25 }
  0x67   : > { %1487 = vmatprep.subr.bf16.mxu1 %v1619_v1 }
  0x68   : > { %1415 = vmatpush3.bf16.msra.mxu0 %v1591_v29 }
  0x69   : > { %1416 = vmatprep.subr.bf16.mxu0 %v1592_v30 }
  0x6a   : > { %1488 = vmatpush3.bf16.msra.mxu1 %v1593_v28 }
  0x6c   : > { %1417 = vmatpush3.bf16.msra.mxu0 %v1594_v32 }
  0x6d   : > { %1490 = vmatmul.mubr.bf16.vlgmr.msra.gmra.mxu1 %v854_v31 }
  0x6f   : > { %1035 = vmatmul.mubr.bf16.vlgmr.msra.gmra.mxu0 %v852_v33 }
  0x9b   : > { %v1096_v4 = vpop.permute.xlu0 %1095 }
  0xed   : > { %v564_v1 = vpop.f32.mrf.mxu1 }
  0xef   : > { %v1451_v34 = vpop.f32.mrf.mxu1  ;;  %v1356_v37 = vpop.f32.mrf.mxu0 }
  0xf1   : > { %v567_v36 = vpop.f32.mrf.mxu1  ;;  %v1357_v39 = vpop.f32.mrf.mxu0 }
  0xf2   : > { %v1358_v50 = vadd.f32 %v1357_v39, %v1356_v37 }
  0xf3   : > { %v1452_v38 = vpop.f32.mrf.mxu1  ;;  %v1359_v40 = vpop.f32.mrf.mxu0 }
  0xf4   : > { %v565_v53 = vadd.f32 %v1358_v50, %v564_v1 }
  0xf5   : > { %v1360_v41 = vpop.f32.mrf.mxu0 }
 0x10d   : > { %v788_v42 = vpop.f32.mrf.mxu1 }
 0x10f   : > { %v1471_v43 = vpop.f32.mrf.mxu1  ;;  %v1387_v45 = vpop.f32.mrf.mxu0 }
 0x111   : > { %v791_v44 = vpop.f32.mrf.mxu1  ;;  %v1388_v47 = vpop.f32.mrf.mxu0 }
 0x112   : > { %v1389_v51 = vadd.f32 %v1388_v47, %v1387_v45 }
 0x113   : > { %v1472_v46 = vpop.f32.mrf.mxu1  ;;  %v1390_v48 = vpop.f32.mrf.mxu0 }
 0x114   : > { %v749_v56 = vadd.f32 %v1389_v51, %v565_v53 }
 0x115   : > { %v1391_v49 = vpop.f32.mrf.mxu0 }
 0x116   : > { %v789_v61 = vadd.f32 %v788_v42, %v749_v56 }
 0x12d   : > { %v1076_v35 = vpop.f32.mrf.mxu1 }
 0x12f   : > { %v1491_v52 = vpop.f32.mrf.mxu1  ;;  %v1418_v55 = vpop.f32.mrf.mxu0 }
 0x131   : > { %v1079_v54 = vpop.f32.mrf.mxu1  ;;  %v1419_v58 = vpop.f32.mrf.mxu0 }
 0x132   : > { %v1420_v59 = vadd.f32 %v1419_v58, %v1418_v55 }
 0x133   : > { %v1492_v57 = vpop.f32.mrf.mxu1  ;;  %v1421_v60 = vpop.f32.mrf.mxu0 }
 0x134   : > { %v1077_v62 = vadd.f32 %v1420_v59, %v1076_v35 }
 0x135   : > { %v1422_v63 = vpop.f32.mrf.mxu0 }
 0x136   : > { %v1082_v2 = vadd.f32 %v1077_v62, %v789_v61 }
 0x138   : > { %v1090_v3 = vadd.f32 %v1337_v0, %v1082_v2 }
 0x13a   : > { %v1091_v5 = vmax.f32 %v1090_v3, 0.0 }
 0x13c   : > { %v1098_v6 = vmul.f32 %v1096_v4, %v1091_v5 }
 0x13e   : > { %v1099_v7 = vpack.c.bf16 %v1098_v6, %v1098_v6 }
 0x140   : > { %1100 = vst [vmem:[%s209_s24] sm:$0xf] %v1099_v7 }
 0x141 PF: > { %s14_s17 = sadd.s32 1, %s1617_s17   ;;  %s1976_s15 = smov %s1613_s16 }
 0x142   : > { %p11_p5 = scmp.ge.s32.totalorder %s14_s17, 4   ;;  %s1977_s16 = smov %s1979_s18 }
 0x144   :  { %13 = sbr.rel (!%p11_p5) target bundleno = 2 (0x2), region = 68 }

// kernel: superpoint_forward.18
= control target key start
LH: loop header
LB: loop body
LE: loop exit
PB: predicated region body
PF: predicated region fallthrough
CT: control target
= control target key end

     0   :  { %s2263_s18 = smov 0   ;;  %s2265_s19 = smov 0   ;;  %s2823_s0 = inlined_call_operand.vmem [shape: bf16[2,24,128], index: 0, kind: input, shape index: {}]   ;;  %s2824_s1 = inlined_call_operand.vmem [shape: bf16[3,384,256], index: 1, kind: input, shape index: {}]   ;;  %s2825_s2 = inlined_call_operand.vmem [shape: f32[1,256], index: 2, kind: input, shape index: {}]   ;;  %s2826_s3 = inlined_call_operand.vmem [shape: bf16[256,128], index: 3, kind: input, shape index: {}]   ;;  %s2827_s4 = inlined_call_operand.vmem [shape: f32[1,128], index: 4, kind: input, shape index: {}]   ;;  %s2828_s5 = inlined_call_operand.vmem [shape: f32[2,24,128], index: 5, kind: output, shape index: {}]  }
   0x1   :  { %s2267_s20 = smov 0  }
   0x2 LB: > { %s27_s21 = sadd.s32 1, %s2226_s19  ;;  %p1663_p0 = scmp.ge.s32.totalorder %s2230_s20, 1  ;;  %s2230_s20 = sphi %s2267_s20, %s15_s20   ;;  %s2226_s19 = sphi %s2265_s19, %s2830_s19   ;;  %s2222_s18 = sphi %s2263_s18, %s2829_s18  }
   0x3   : > { %p29_p1 = scmp.ge.s32.totalorder %s27_s21, 2  ;;  %p199_p2 = scmp.lt.s32.totalorder %s2230_s20, 3 }
   0x5   : > { %s2832_s21 = smov (%p29_p1, %s27_s21), 0  ;;  %p200_p3 = pnand %p1663_p0, %p199_p2 }
   0x6   : > { %p227_p4 = scmp.lt.s32.totalorder (!%p200_p3), %s2222_s18, 1 }
   0x7   : > { %203 = sbr.rel (%p200_p3) target bundleno = 579 (0x243), region = 40 }
   0xc   : > { %v1975_v0 = vld [vmem:[%s2824_s1 + $0x1f4] ss:$8 sps:$4 sm:$0xff]   ;;  %v2232_v2 = vmov 0   ;;  %v1979_v3 = vld [vmem:[%s2824_s1 + $0x1f0] ss:$8 sps:$4 sm:$0xff]   ;;  %s2834_s18 = smov (!%p227_p4, %s2222_s18), 1 }
   0xd   : > { %v1977_v1 = vld [vmem:[%s2824_s1 + $0x2f4] ss:$8 sps:$4 sm:$0xff]   ;;  %686 = vmatprep.mubr.bf16.mxu1 %v2232_v2  ;;  %613 = vmatprep.subr.bf16.mxu0 %v1975_v0  ;;  %v1980_v4 = vld [vmem:[%s2824_s1 + $0x2f0] ss:$8 sps:$4 sm:$0xff]   ;;  %v1981_v5 = vld [vmem:[%s2824_s1 + $0x1e4] ss:$8 sps:$4 sm:$0xff]  }
   0xe   : > { %654 = vmatprep.subr.bf16.mxu1 %v1977_v1  ;;  %614 = vmatpush1.bf16.msra.mxu0 %v1979_v3  ;;  %v1983_v6 = vld [vmem:[%s2824_s1 + $0x2e4] ss:$8 sps:$4 sm:$0xff]   ;;  %v1985_v7 = vld [vmem:[%s2824_s1 + $0x1e0] ss:$8 sps:$4 sm:$0xff]   ;;  %v1987_v9 = vld [vmem:[%s2824_s1 + $0x1d4] ss:$8 sps:$4 sm:$0xff]  }
   0xf   : > { %655 = vmatpush1.bf16.msra.mxu1 %v1980_v4  ;;  %615 = vmatprep.subr.bf16.mxu0 %v1981_v5  ;;  %v1986_v8 = vld [vmem:[%s2824_s1 + $0x2e0] ss:$8 sps:$4 sm:$0xff]   ;;  %v1989_v10 = vld [vmem:[%s2824_s1 + $0x2d4] ss:$8 sps:$4 sm:$0xff]   ;;  %v1991_v11 = vld [vmem:[%s2824_s1 + $0x1d0] ss:$8 sps:$4 sm:$0xff]  }
  0x10   : > { %656 = vmatprep.subr.bf16.mxu1 %v1983_v6  ;;  %v1992_v12 = vld [vmem:[%s2824_s1 + $0x2d0] ss:$8 sps:$4 sm:$0xff]   ;;  %v1993_v13 = vld [vmem:[%s2824_s1 + $0x1c4] ss:$8 sps:$4 sm:$0xff]   ;;  %v1997_v15 = vld [vmem:[%s2824_s1 + $0x1c0] ss:$8 sps:$4 sm:$0xff]  }
  0x11   : > { %v1995_v14 = vld [vmem:[%s2824_s1 + $0x2c4] ss:$8 sps:$4 sm:$0xff]   ;;  %v1998_v16 = vld [vmem:[%s2824_s1 + $0x2c0] ss:$8 sps:$4 sm:$0xff]   ;;  %v1999_v17 = vld [vmem:[%s2824_s1 + $0x1b4] ss:$8 sps:$4 sm:$0xff]  }
  0x12   : > { %616 = vmatpush1.bf16.msra.mxu0 %v1985_v7  ;;  %v2001_v18 = vld [vmem:[%s2824_s1 + $0x2b4] ss:$8 sps:$4 sm:$0xff]   ;;  %v2003_v19 = vld [vmem:[%s2824_s1 + $0x1b0] ss:$8 sps:$4 sm:$0xff]   ;;  %v2005_v21 = vld [vmem:[%s2824_s1 + $0x1a4] ss:$8 sps:$4 sm:$0xff]  }
  0x13   : > { %657 = vmatpush1.bf16.msra.mxu1 %v1986_v8  ;;  %617 = vmatprep.subr.bf16.mxu0 %v1987_v9  ;;  %v2004_v20 = vld [vmem:[%s2824_s1 + $0x2b0] ss:$8 sps:$4 sm:$0xff]   ;;  %v2007_v22 = vld [vmem:[%s2824_s1 + $0x2a4] ss:$8 sps:$4 sm:$0xff]   ;;  %s1948_s24 = smul.u32 12, %s2834_s18  ;;  %vm251_vm1 = vcmask 1042432  }
  0x14   : > { %658 = vmatprep.subr.bf16.mxu1 %v1989_v10  ;;  %v2009_v23 = vld [vmem:[%s2824_s1 + $0x1a0] ss:$8 sps:$4 sm:$0xff]   ;;  %v2011_v25 = vld [vmem:[%s2824_s1 + $0x194] ss:$8 sps:$4 sm:$0xff]   ;;  %v2015_v27 = vld [vmem:[%s2824_s1 + $0x190] ss:$8 sps:$4 sm:$0xff]  }
  0x15   : > { %v2010_v24 = vld [vmem:[%s2824_s1 + $0x2a0] ss:$8 sps:$4 sm:$0xff]   ;;  %v2013_v26 = vld [vmem:[%s2824_s1 + $0x294] ss:$8 sps:$4 sm:$0xff]   ;;  %s231_s10 = scalar_lea.vmem %s2823_s0, %s1948_s24  ;;  %v2016_v28 = vld [vmem:[%s2824_s1 + $0x290] ss:$8 sps:$4 sm:$0xff]  }
  0x16   : > { %618 = vmatpush1.bf16.msra.mxu0 %v1991_v11  ;;  %vm252_vm0 = vsmask.f32 2304  ;;  %v2017_v29 = vld [vmem:[%s2824_s1 + $0x184] ss:$8 sps:$4 sm:$0xff]   ;;  %v2029_v30 = vld [vmem:[%s231_s10] ss:$0 sps:$4 sm:$0xff]  }
  0x17   : > { %659 = vmatpush1.bf16.msra.mxu1 %v1992_v12  ;;  %619 = vmatprep.subr.bf16.mxu0 %v1993_v13  ;;  %v2019_v31 = vld [vmem:[%s2824_s1 + $0x284] ss:$8 sps:$4 sm:$0xff]   ;;  %vm255_vm2 = vcmask 1046528   ;;  %v243_v32 = vshrl.u32 %v2029_v30, 16  ;;  %v246_v33 = vshll.u32 %v2029_v30, 16  ;;  %vm253_vm4 = vmand %vm251_vm1, %vm252_vm0  ;;  %v2398_v41 = vrot.slane %v2232_v2, 1 }
  0x18   : > { %660 = vmatprep.subr.bf16.mxu1 %v1995_v14  ;;  %vm256_vm3 = vsmask.f32 6400  ;;  %v2021_v34 = vld [vmem:[%s2824_s1 + $0x180] ss:$8 sps:$4 sm:$0xff]   ;;  %v2023_v36 = vld [vmem:[%s2824_s1 + $0x274] ss:$8 sps:$4 sm:$0xff]  }
  0x19   : > { %v2022_v35 = vld [vmem:[%s2824_s1 + $0x280] ss:$8 sps:$4 sm:$0xff]   ;;  %v2027_v37 = vld [vmem:[%s2824_s1 + $0x74] ss:$8 sps:$4 sm:$0xff]   ;;  %v245_v38 = vrot.slane %v243_v32, 5  ;;  %v248_v39 = vrot.slane %v246_v33, 6  ;;  %vm257_vm5 = vmand %vm255_vm2, %vm256_vm3 }
  0x1a   : > { %620 = vmatpush1.bf16.msra.mxu0 %v1997_v15  ;;  %v2028_v42 = vld [vmem:[%s2824_s1 + $0x270] ss:$8 sps:$4 sm:$0xff]   ;;  %v2030_v45 = vld [vmem:[%s2824_s1 + $0x264] ss:$8 sps:$4 sm:$0xff]   ;;  %v2035_v49 = vld [vmem:[%s2824_s1 + $0x260] ss:$8 sps:$4 sm:$0xff]  }
  0x1b   : > { %661 = vmatpush1.bf16.msra.mxu1 %v1998_v16  ;;  %621 = vmatprep.subr.bf16.mxu0 %v1999_v17  ;;  %v249_v40 = vor.u32 %v248_v39, %v245_v38  ;;  %v2025_v47 = vld [vmem:[%s2824_s1 + $0x70] ss:$8 sps:$4 sm:$0xff]   ;;  %v2034_v48 = vld [vmem:[%s2824_s1 + $0x64] ss:$8 sps:$4 sm:$0xff]   ;;  %v2036_v54 = vld [vmem:[%s2824_s1 + $0x254] ss:$8 sps:$4 sm:$0xff]  }
  0x1c   : > { %662 = vmatprep.subr.bf16.mxu1 %v2001_v18  ;;  %v2032_v56 = vld [vmem:[%s2824_s1 + $0x60] ss:$8 sps:$4 sm:$0xff]   ;;  %v2040_v57 = vld [vmem:[%s2824_s1 + $0x54] ss:$8 sps:$4 sm:$0xff]   ;;  %v2041_v58 = vld [vmem:[%s2824_s1 + $0x250] ss:$8 sps:$4 sm:$0xff]  }
  0x1d   : > { %v254_v43 = vsel %vm253_vm4, 0, %v249_v40  ;;  %v2042_v60 = vld [vmem:[%s2824_s1 + $0x244] ss:$8 sps:$4 sm:$0xff]   ;;  %v2038_v62 = vld [vmem:[%s2824_s1 + $0x50] ss:$8 sps:$4 sm:$0xff]   ;;  %s1949_s8 = smul.u32 24, %s2834_s18 }
  0x1e   : > { %622 = vmatpush1.bf16.msra.mxu0 %v2003_v19  ;;  %v2403_v44 = vsel %vm257_vm5, %v254_v43, 0  ;;  %v2046_v63 = vld [vmem:[%s2824_s1 + $0x44] ss:$8 sps:$4 sm:$0xff]   ;;  %v2047_v0 = vld [vmem:[%s2824_s1 + $0x240] ss:$8 sps:$4 sm:$0xff]  }
  0x1f   : > { %663 = vmatpush1.bf16.msra.mxu1 %v2004_v20  ;;  %623 = vmatprep.subr.bf16.mxu0 %v2005_v21  ;;  %v2409_v46 = vrot.slane %v2403_v44, 1  ;;  %v260_v51 = vshrl.u32 %v2403_v44, 16  ;;  %v262_v52 = vshll.u32 %v2403_v44, 16  ;;  %v2048_v1 = vld [vmem:[%s2824_s1 + $0x234] ss:$8 sps:$4 sm:$0xff]   ;;  %v367_v20 = vrot.slane %v2403_v44, 2  ;;  %s236_s13 = scalar_lea.vmem %s2828_s5, %s1949_s8 }
  0x20   : > { %664 = vmatprep.subr.bf16.mxu1 %v2007_v22  ;;  %v2044_v3 = vld [vmem:[%s2824_s1 + $0x40] ss:$8 sps:$4 sm:$0xff]   ;;  %v2052_v4 = vld [vmem:[%s2824_s1 + $0x34] ss:$8 sps:$4 sm:$0xff]   ;;  %v2053_v5 = vld [vmem:[%s2824_s1 + $0x230] ss:$8 sps:$4 sm:$0xff]  }
  0x21   : > { %v369_v50 = vrot.slane %v2409_v46, 2  ;;  %v2426_v53 = vsel %vm255_vm2, %v2409_v46, %v2398_v41  ;;  %v264_v55 = vrot.slane %v262_v52, 1  ;;  %v2054_v6 = vld [vmem:[%s2824_s1 + $0x224] ss:$8 sps:$4 sm:$0xff]   ;;  %v2050_v7 = vld [vmem:[%s2824_s1 + $0x30] ss:$8 sps:$4 sm:$0xff]  }
  0x22   : > { %624 = vmatpush1.bf16.msra.mxu0 %v2009_v23  ;;  %v2058_v8 = vld [vmem:[%s2824_s1 + $0x24] ss:$8 sps:$4 sm:$0xff]   ;;  %v2059_v9 = vld [vmem:[%s2824_s1 + $0x220] ss:$8 sps:$4 sm:$0xff]   ;;  %v2060_v10 = vld [vmem:[%s2824_s1 + $0x214] ss:$8 sps:$4 sm:$0xff]  }
  0x23   : > { %665 = vmatpush1.bf16.msra.mxu1 %v2010_v24  ;;  %625 = vmatprep.subr.bf16.mxu0 %v2011_v25  ;;  %v2440_v59 = vor.u32 %v264_v55, %v260_v51  ;;  %v2056_v11 = vld [vmem:[%s2824_s1 + $0x20] ss:$8 sps:$4 sm:$0xff]   ;;  %v2064_v12 = vld [vmem:[%s2824_s1 + $0x14] ss:$8 sps:$4 sm:$0xff]   ;;  %v2065_v13 = vld [vmem:[%s2824_s1 + $0x210] ss:$8 sps:$4 sm:$0xff]  }
  0x24   : > { %666 = vmatprep.subr.bf16.mxu1 %v2013_v26  ;;  %v2066_v14 = vld [vmem:[%s2824_s1 + $0x204] ss:$8 sps:$4 sm:$0xff]   ;;  %v2062_v15 = vld [vmem:[%s2824_s1 + $0x10] ss:$8 sps:$4 sm:$0xff]   ;;  %v2071_v17 = vld [vmem:[%s2824_s1 + $0x200] ss:$8 sps:$4 sm:$0xff]  }
  0x25   : > { %v368_v61 = vrot.slane %v2440_v59, 2  ;;  %v2070_v16 = vld [vmem:[%s2824_s1 + $0x4] ss:$8 sps:$4 sm:$0xff]   ;;  %v2077_v18 = vld [vmem:[%s2824_s1 + $0x174] ss:$8 sps:$4 sm:$0xff]  }
  0x26   : > { %626 = vmatpush1.bf16.msra.mxu0 %v2015_v27  ;;  %v2068_v19 = vld [vmem:[%s2824_s1] ss:$8 sps:$4 sm:$0xff]   ;;  %v2074_v21 = vld [vmem:[%s2824_s1 + $0xf4] ss:$8 sps:$4 sm:$0xff]   ;;  %v2075_v22 = vld [vmem:[%s2824_s1 + $0x170] ss:$8 sps:$4 sm:$0xff]  }
  0x27   : > { %667 = vmatpush1.bf16.msra.mxu1 %v2016_v28  ;;  %627 = vmatprep.subr.bf16.mxu0 %v2017_v29  ;;  %v2083_v23 = vld [vmem:[%s2824_s1 + $0x164] ss:$8 sps:$4 sm:$0xff]   ;;  %v2072_v24 = vld [vmem:[%s2824_s1 + $0xf0] ss:$8 sps:$4 sm:$0xff]   ;;  %v2081_v26 = vld [vmem:[%s2824_s1 + $0x160] ss:$8 sps:$4 sm:$0xff]  }
  0x28   : > { %668 = vmatprep.subr.bf16.mxu1 %v2019_v31  ;;  %645 = vmatprep.mubr.bf16.mxu0 %v368_v61  ;;  %v2080_v25 = vld [vmem:[%s2824_s1 + $0xe4] ss:$8 sps:$4 sm:$0xff]   ;;  %v2089_v27 = vld [vmem:[%s2824_s1 + $0x154] ss:$8 sps:$4 sm:$0xff]   ;;  %v2078_v28 = vld [vmem:[%s2824_s1 + $0xe0] ss:$8 sps:$4 sm:$0xff]  }
  0x29   : > { %v2086_v29 = vld [vmem:[%s2824_s1 + $0xd4] ss:$8 sps:$4 sm:$0xff]   ;;  %v2087_v30 = vld [vmem:[%s2824_s1 + $0x150] ss:$8 sps:$4 sm:$0xff]   ;;  %v2095_v31 = vld [vmem:[%s2824_s1 + $0x144] ss:$8 sps:$4 sm:$0xff]  }
  0x2a   : > { %628 = vmatpush1.bf16.msra.mxu0 %v2021_v34  ;;  %v2084_v32 = vld [vmem:[%s2824_s1 + $0xd0] ss:$8 sps:$4 sm:$0xff]   ;;  %v2092_v33 = vld [vmem:[%s2824_s1 + $0xc4] ss:$8 sps:$4 sm:$0xff]   ;;  %v2093_v34 = vld [vmem:[%s2824_s1 + $0x140] ss:$8 sps:$4 sm:$0xff]  }
  0x2b   : > { %669 = vmatpush1.bf16.msra.mxu1 %v2022_v35  ;;  %629 = vmatprep.subr.bf16.mxu0 %v2023_v36  ;;  %v2101_v35 = vld [vmem:[%s2824_s1 + $0x134] ss:$8 sps:$4 sm:$0xff]   ;;  %v2090_v36 = vld [vmem:[%s2824_s1 + $0xc0] ss:$8 sps:$4 sm:$0xff]   ;;  %v2099_v38 = vld [vmem:[%s2824_s1 + $0x130] ss:$8 sps:$4 sm:$0xff]  }
  0x2c   : > { %935 = vmatprep.subr.bf16.mxu1 %v2027_v37  ;;  %v2098_v37 = vld [vmem:[%s2824_s1 + $0xb4] ss:$8 sps:$4 sm:$0xff]   ;;  %v2107_v39 = vld [vmem:[%s2824_s1 + $0x124] ss:$8 sps:$4 sm:$0xff]   ;;  %v2096_v40 = vld [vmem:[%s2824_s1 + $0xb0] ss:$8 sps:$4 sm:$0xff]  }
  0x2d   : > { %v2105_v43 = vld [vmem:[%s2824_s1 + $0x120] ss:$8 sps:$4 sm:$0xff]   ;;  %vm1017_vm6 = vsmask.f32 7424  ;;  %v2108_v51 = vld [vmem:[%s2824_s1 + $0x90] ss:$8 sps:$4 sm:$0xff]  }
  0x2e   : > { %630 = vmatpush2.bf16.msra.mxu0 %v2028_v42  ;;  %687 = vmatmul.mubr.bf16.vlgmr.msra.gmra.mxu1 %v369_v50  ;;  %v2104_v42 = vld [vmem:[%s2824_s1 + $0xa4] ss:$8 sps:$4 sm:$0xff]   ;;  %v2122_v55 = vld [vmem:[%s2824_s1 + $0x374] ss:$8 sps:$4 sm:$0xff]  }
  0x2f   : > { %631 = vmatprep.subr.bf16.mxu0 %v2030_v45  ;;  %936 = vmatpush1.bf16.msra.mxu1 %v2025_v47  ;;  %v2113_v45 = vld [vmem:[%s2824_s1 + $0x114] ss:$8 sps:$4 sm:$0xff]   ;;  %v2102_v47 = vld [vmem:[%s2824_s1 + $0xa0] ss:$8 sps:$4 sm:$0xff]   ;;  %v2119_v50 = vld [vmem:[%s2824_s1 + $0x104] ss:$8 sps:$4 sm:$0xff]  }
  0x30   : > { %937 = vmatprep.subr.bf16.mxu1 %v2034_v48  ;;  %967 = vmatprep.mubr.bf16.mxu1 %v2440_v59  ;;  %v2110_v48 = vld [vmem:[%s2824_s1 + $0x94] ss:$8 sps:$4 sm:$0xff]   ;;  %v2116_v52 = vld [vmem:[%s2824_s1 + $0x84] ss:$8 sps:$4 sm:$0xff]  }
  0x31   : > { %v2143_v61 = vld [vmem:[%s2824_s1 + $0x474] ss:$8 sps:$4 sm:$0xff]  }
  0x32   : > { %632 = vmatpush2.bf16.msra.mxu0 %v2035_v49  ;;  %v2111_v49 = vld [vmem:[%s2824_s1 + $0x110] ss:$8 sps:$4 sm:$0xff]  }
  0x33   : > { %633 = vmatprep.subr.bf16.mxu0 %v2036_v54  ;;  %938 = vmatpush1.bf16.msra.mxu1 %v2032_v56  ;;  %v2117_v54 = vld [vmem:[%s2824_s1 + $0x100] ss:$8 sps:$4 sm:$0xff]   ;;  %v1022_v56 = vsel %vm1017_vm6, %v2440_v59, %v2398_v41  ;;  %v2141_v59 = vld [vmem:[%s2824_s1 + $0x470] ss:$8 sps:$4 sm:$0xff]  }
  0x34   : > { %939 = vmatprep.subr.bf16.mxu1 %v2040_v57  ;;  %v2114_v57 = vld [vmem:[%s2824_s1 + $0x80] ss:$8 sps:$4 sm:$0xff]   ;;  %v1076_v41 = vrot.slane %v1022_v56, 4  ;;  %v2203_v56 = vld [vmem:[%s2826_s3 + $0x10] sm:$0xff]  }
  0x36   : > { %634 = vmatpush2.bf16.msra.mxu0 %v2041_v58  ;;  %v2120_v58 = vld [vmem:[%s2824_s1 + $0x370] ss:$8 sps:$4 sm:$0xff]  }
  0x37   : > { %635 = vmatprep.subr.bf16.mxu0 %v2042_v60  ;;  %940 = vmatpush1.bf16.msra.mxu1 %v2038_v62  ;;  %v2125_v60 = vld [vmem:[%s2824_s1 + $0x364] ss:$8 sps:$4 sm:$0xff]   ;;  %v2123_v62 = vld [vmem:[%s2824_s1 + $0x360] ss:$8 sps:$4 sm:$0xff]  }
  0x38   : > { %941 = vmatprep.subr.bf16.mxu1 %v2046_v63  ;;  %v2149_v63 = vld [vmem:[%s2824_s1 + $0x464] ss:$8 sps:$4 sm:$0xff]  }
  0x3a   : > { %636 = vmatpush2.bf16.msra.mxu0 %v2047_v0  ;;  %v2128_v0 = vld [vmem:[%s2824_s1 + $0x354] ss:$8 sps:$4 sm:$0xff]  }
  0x3b   : > { %637 = vmatprep.subr.bf16.mxu0 %v2048_v1  ;;  %942 = vmatpush1.bf16.msra.mxu1 %v2044_v3  ;;  %v2147_v1 = vld [vmem:[%s2824_s1 + $0x460] ss:$8 sps:$4 sm:$0xff]   ;;  %v2126_v3 = vld [vmem:[%s2824_s1 + $0x350] ss:$8 sps:$4 sm:$0xff]  }
  0x3c   : > { %943 = vmatprep.subr.bf16.mxu1 %v2052_v4  ;;  %v2131_v4 = vld [vmem:[%s2824_s1 + $0x344] ss:$8 sps:$4 sm:$0xff]  }
  0x3e   : > { %638 = vmatpush2.bf16.msra.mxu0 %v2053_v5  ;;  %v2153_v5 = vld [vmem:[%s2824_s1 + $0x450] ss:$8 sps:$4 sm:$0xff]  }
  0x3f   : > { %639 = vmatprep.subr.bf16.mxu0 %v2054_v6  ;;  %944 = vmatpush1.bf16.msra.mxu1 %v2050_v7  ;;  %v2129_v6 = vld [vmem:[%s2824_s1 + $0x340] ss:$8 sps:$4 sm:$0xff]   ;;  %v2161_v7 = vld [vmem:[%s2824_s1 + $0x444] ss:$8 sps:$4 sm:$0xff]  }
  0x40   : > { %945 = vmatprep.subr.bf16.mxu1 %v2058_v8  ;;  %v2159_v8 = vld [vmem:[%s2824_s1 + $0x440] ss:$8 sps:$4 sm:$0xff]  }
  0x42   : > { %640 = vmatpush2.bf16.msra.mxu0 %v2059_v9  ;;  %v2132_v9 = vld [vmem:[%s2824_s1 + $0x330] ss:$8 sps:$4 sm:$0xff]  }
  0x43   : > { %641 = vmatprep.subr.bf16.mxu0 %v2060_v10  ;;  %946 = vmatpush1.bf16.msra.mxu1 %v2056_v11  ;;  %v2167_v10 = vld [vmem:[%s2824_s1 + $0x434] ss:$8 sps:$4 sm:$0xff]   ;;  %v2137_v11 = vld [vmem:[%s2824_s1 + $0x324] ss:$8 sps:$4 sm:$0xff]  }
  0x44   : > { %947 = vmatprep.subr.bf16.mxu1 %v2064_v12  ;;  %v2165_v12 = vld [vmem:[%s2824_s1 + $0x430] ss:$8 sps:$4 sm:$0xff]  }
  0x46   : > { %642 = vmatpush2.bf16.msra.mxu0 %v2065_v13  ;;  %v2135_v13 = vld [vmem:[%s2824_s1 + $0x320] ss:$8 sps:$4 sm:$0xff]  }
  0x47   : > { %643 = vmatprep.subr.bf16.mxu0 %v2066_v14  ;;  %948 = vmatpush1.bf16.msra.mxu1 %v2062_v15  ;;  %v2173_v14 = vld [vmem:[%s2824_s1 + $0x424] ss:$8 sps:$4 sm:$0xff]   ;;  %v2140_v15 = vld [vmem:[%s2824_s1 + $0x314] ss:$8 sps:$4 sm:$0xff]  }
  0x48   : > { %949 = vmatprep.subr.bf16.mxu1 %v2070_v16  ;;  %v2171_v16 = vld [vmem:[%s2824_s1 + $0x420] ss:$8 sps:$4 sm:$0xff]  }
  0x4a   : > { %644 = vmatpush2.bf16.msra.mxu0 %v2071_v17  ;;  %v2138_v17 = vld [vmem:[%s2824_s1 + $0x310] ss:$8 sps:$4 sm:$0xff]  }
  0x4b   : > { %976 = vmatprep.subr.bf16.mxu0 %v2077_v18  ;;  %950 = vmatpush1.bf16.msra.mxu1 %v2068_v19  ;;  %v2179_v18 = vld [vmem:[%s2824_s1 + $0x414] ss:$8 sps:$4 sm:$0xff]   ;;  %v2146_v19 = vld [vmem:[%s2824_s1 + $0x304] ss:$8 sps:$4 sm:$0xff]  }
  0x4c   : > { %951 = vmatprep.subr.bf16.mxu1 %v2074_v21  ;;  %v2144_v21 = vld [vmem:[%s2824_s1 + $0x300] ss:$8 sps:$4 sm:$0xff]  }
  0x4d   : > { %646 = vmatmul.mubr.bf16.vlgmr.msra.gmra.mxu0 %v367_v20  ;;  %v2177_v20 = vld [vmem:[%s2824_s1 + $0x410] ss:$8 sps:$4 sm:$0xff]  }
  0x4e   : > { %977 = vmatpush1.bf16.msra.mxu0 %v2075_v22  ;;  %1008 = vmatprep.mubr.bf16.mxu0 %v2232_v2  ;;  %v2185_v22 = vld [vmem:[%s2824_s1 + $0x404] ss:$8 sps:$4 sm:$0xff]  }
  0x4f   : > { %978 = vmatprep.subr.bf16.mxu0 %v2083_v23  ;;  %952 = vmatpush2.bf16.msra.mxu1 %v2072_v24  ;;  %v2152_v23 = vld [vmem:[%s2824_s1 + $0x3f4] ss:$8 sps:$4 sm:$0xff]   ;;  %v2183_v24 = vld [vmem:[%s2824_s1 + $0x400] ss:$8 sps:$4 sm:$0xff]  }
  0x50   : > { %953 = vmatprep.subr.bf16.mxu1 %v2080_v25  ;;  %v2150_v25 = vld [vmem:[%s2824_s1 + $0x3f0] ss:$8 sps:$4 sm:$0xff]  }
  0x52   : > { %979 = vmatpush1.bf16.msra.mxu0 %v2081_v26  ;;  %v2158_v26 = vld [vmem:[%s2824_s1 + $0x3e4] ss:$8 sps:$4 sm:$0xff]  }
  0x53   : > { %980 = vmatprep.subr.bf16.mxu0 %v2089_v27  ;;  %954 = vmatpush2.bf16.msra.mxu1 %v2078_v28  ;;  %v1077_v27 = vrot.slane %v2426_v53, 4  ;;  %v2156_v28 = vld [vmem:[%s2824_s1 + $0x3e0] ss:$8 sps:$4 sm:$0xff]   ;;  %v2170_v53 = vld [vmem:[%s2824_s1 + $0x3c4] ss:$8 sps:$4 sm:$0xff]  }
  0x54   : > { %955 = vmatprep.subr.bf16.mxu1 %v2086_v29  ;;  %v2164_v29 = vld [vmem:[%s2824_s1 + $0x3d4] ss:$8 sps:$4 sm:$0xff]  }
  0x56   : > { %981 = vmatpush1.bf16.msra.mxu0 %v2087_v30  ;;  %v2162_v30 = vld [vmem:[%s2824_s1 + $0x3d0] ss:$8 sps:$4 sm:$0xff]  }
  0x57   : > { %982 = vmatprep.subr.bf16.mxu0 %v2095_v31  ;;  %956 = vmatpush2.bf16.msra.mxu1 %v2084_v32  ;;  %v2168_v31 = vld [vmem:[%s2824_s1 + $0x3c0] ss:$8 sps:$4 sm:$0xff]   ;;  %v2176_v32 = vld [vmem:[%s2824_s1 + $0x3b4] ss:$8 sps:$4 sm:$0xff]  }
  0x58   : > { %957 = vmatprep.subr.bf16.mxu1 %v2092_v33  ;;  %v2174_v33 = vld [vmem:[%s2824_s1 + $0x3b0] ss:$8 sps:$4 sm:$0xff]  }
  0x5a   : > { %983 = vmatpush1.bf16.msra.mxu0 %v2093_v34  ;;  %v2182_v34 = vld [vmem:[%s2824_s1 + $0x3a4] ss:$8 sps:$4 sm:$0xff]  }
  0x5b   : > { %984 = vmatprep.subr.bf16.mxu0 %v2101_v35  ;;  %958 = vmatpush2.bf16.msra.mxu1 %v2090_v36  ;;  %v2180_v35 = vld [vmem:[%s2824_s1 + $0x3a0] ss:$8 sps:$4 sm:$0xff]   ;;  %v2188_v36 = vld [vmem:[%s2824_s1 + $0x394] ss:$8 sps:$4 sm:$0xff]  }
  0x5c   : > { %959 = vmatprep.subr.bf16.mxu1 %v2098_v37  ;;  %v2186_v37 = vld [vmem:[%s2824_s1 + $0x390] ss:$8 sps:$4 sm:$0xff]  }
  0x5e   : > { %985 = vmatpush1.bf16.msra.mxu0 %v2099_v38  ;;  %v2191_v38 = vld [vmem:[%s2824_s1 + $0x384] ss:$8 sps:$4 sm:$0xff]  }
  0x5f   : > { %986 = vmatprep.subr.bf16.mxu0 %v2107_v39  ;;  %960 = vmatpush2.bf16.msra.mxu1 %v2096_v40  ;;  %v2189_v39 = vld [vmem:[%s2824_s1 + $0x380] ss:$8 sps:$4 sm:$0xff]   ;;  %v1075_v40 = vrot.slane %v2403_v44, 4 }
  0x60   : > { %961 = vmatprep.subr.bf16.mxu1 %v2104_v42  ;;  %v2192_v42 = vld [vmem:[%s2826_s3 + $0x78] sm:$0xff]  }
  0x62   : > { %987 = vmatpush1.bf16.msra.mxu0 %v2105_v43  ;;  %v2193_v43 = vld [vmem:[%s2826_s3 + $0x38] sm:$0xff]  }
  0x63   : > { %988 = vmatprep.subr.bf16.mxu0 %v2113_v45  ;;  %962 = vmatpush2.bf16.msra.mxu1 %v2102_v47  ;;  %v2194_v45 = vld [vmem:[%s2826_s3 + $0x70] sm:$0xff]   ;;  %v2196_v47 = vld [vmem:[%s2826_s3 + $0x68] sm:$0xff]  }
  0x64   : > { %963 = vmatprep.subr.bf16.mxu1 %v2110_v48  ;;  %v2197_v48 = vld [vmem:[%s2826_s3 + $0x28] sm:$0xff]  }
  0x66   : > { %989 = vmatpush1.bf16.msra.mxu0 %v2111_v49  ;;  %v2198_v49 = vld [vmem:[%s2826_s3 + $0x60] sm:$0xff]  }
  0x67   : > { %990 = vmatprep.subr.bf16.mxu0 %v2119_v50  ;;  %964 = vmatpush2.bf16.msra.mxu1 %v2108_v51  ;;  %v2199_v50 = vld [vmem:[%s2826_s3 + $0x20] sm:$0xff]   ;;  %v2200_v51 = vld [vmem:[%s2826_s3 + $0x58] sm:$0xff]  }
  0x68   : > { %965 = vmatprep.subr.bf16.mxu1 %v2116_v52  ;;  %v2201_v52 = vld [vmem:[%s2826_s3 + $0x18] sm:$0xff]  }
  0x6a   : > { %991 = vmatpush1.bf16.msra.mxu0 %v2117_v54 }
  0x6b   : > { %1321 = vmatprep.subr.bf16.mxu0 %v2122_v55  ;;  %966 = vmatpush2.bf16.msra.mxu1 %v2114_v57  ;;  %v2202_v55 = vld [vmem:[%s2826_s3 + $0x50] sm:$0xff]  }
  0x6c   : > { %1362 = vmatprep.subr.bf16.mxu1 %v2143_v61  ;;  %v2205_v61 = vld [vmem:[%s2826_s3 + $0x8] sm:$0xff]  }
  0x6d   : > { %1009 = vmatmul.mubr.bf16.vlgmr.msra.gmra.mxu0 %v2409_v46  ;;  %v2155_v46 = vld [vmem:[%s2824_s1 + $0x454] ss:$8 sps:$4 sm:$0xff]  }
  0x6e   : > { %1322 = vmatpush1.bf16.msra.mxu0 %v2120_v58  ;;  %1353 = vmatprep.mubr.bf16.mxu0 %v1076_v41 }
  0x6f   : > { %1323 = vmatprep.subr.bf16.mxu0 %v2125_v60  ;;  %968 = vmatmul.mubr.bf16.vlgmr.msra.gmra.mxu1 %v2403_v44  ;;  %v2195_v44 = vld [vmem:[%s2826_s3 + $0x30] sm:$0xff]   ;;  %v2204_v60 = vld [vmem:[%s2826_s3 + $0x48] sm:$0xff]  }
  0x70   : > { %1363 = vmatpush1.bf16.msra.mxu1 %v2141_v59  ;;  %1394 = vmatprep.mubr.bf16.mxu1 %v2232_v2  ;;  %v2134_v2 = vld [vmem:[%s2824_s1 + $0x334] ss:$8 sps:$4 sm:$0xff]   ;;  %v2206_v59 = vld [vmem:[%s2826_s3 + $0x40] sm:$0xff]  }
  0x71   : > { %1364 = vmatprep.subr.bf16.mxu1 %v2149_v63 }
  0x72   : > { %1324 = vmatpush1.bf16.msra.mxu0 %v2123_v62  ;;  %v2207_v62 = vld [vmem:[%s2826_s3] sm:$0xff]  }
  0x73   : > { %1325 = vmatprep.subr.bf16.mxu0 %v2128_v0 }
  0x74   : > { %1365 = vmatpush1.bf16.msra.mxu1 %v2147_v1 }
  0x75   : > { %1366 = vmatprep.subr.bf16.mxu1 %v2155_v46 }
  0x76   : > { %1326 = vmatpush1.bf16.msra.mxu0 %v2126_v3 }
  0x77   : > { %1327 = vmatprep.subr.bf16.mxu0 %v2131_v4 }
  0x78   : > { %1367 = vmatpush1.bf16.msra.mxu1 %v2153_v5 }
  0x79   : > { %1368 = vmatprep.subr.bf16.mxu1 %v2161_v7 }
  0x7a   : > { %1328 = vmatpush1.bf16.msra.mxu0 %v2129_v6 }
  0x7b   : > { %1329 = vmatprep.subr.bf16.mxu0 %v2134_v2 }
  0x7c   : > { %1369 = vmatpush1.bf16.msra.mxu1 %v2159_v8 }
  0x7d   : > { %1370 = vmatprep.subr.bf16.mxu1 %v2167_v10 }
  0x7e   : > { %1330 = vmatpush1.bf16.msra.mxu0 %v2132_v9 }
  0x7f   : > { %1331 = vmatprep.subr.bf16.mxu0 %v2137_v11 }
  0x80   : > { %1371 = vmatpush1.bf16.msra.mxu1 %v2165_v12 }
  0x81   : > { %1372 = vmatprep.subr.bf16.mxu1 %v2173_v14 }
  0x82   : > { %1332 = vmatpush1.bf16.msra.mxu0 %v2135_v13 }
  0x83   : > { %1333 = vmatprep.subr.bf16.mxu0 %v2140_v15 }
  0x84   : > { %1373 = vmatpush1.bf16.msra.mxu1 %v2171_v16 }
  0x85   : > { %1374 = vmatprep.subr.bf16.mxu1 %v2179_v18 }
  0x86   : > { %1334 = vmatpush1.bf16.msra.mxu0 %v2138_v17 }
  0x87   : > { %1335 = vmatprep.subr.bf16.mxu0 %v2146_v19 }
  0x88   : > { %1375 = vmatpush1.bf16.msra.mxu1 %v2177_v20  ;;  %v1407_v20 = vlaneseq }
  0x89   : > { %1376 = vmatprep.subr.bf16.mxu1 %v2185_v22 }
  0x8a   : > { %1336 = vmatpush1.bf16.msra.mxu0 %v2144_v21  ;;  %v1408_v21 = vshrl.u32 %v1407_v20, 7 }
  0x8b   : > { %1337 = vmatprep.subr.bf16.mxu0 %v2152_v23  ;;  %v1405_v23 = vld [vmem:[%s2825_s2] sm:$0x3] }
  0x8c   : > { %1377 = vmatpush1.bf16.msra.mxu1 %v2183_v24  ;;  %v1409_v22 = vsub.s32 0, %v1408_v21  ;;  %v1413_v24 = vsub.s32 1, %v1408_v21 }
  0x8d   : > { %1926 = vmatprep.subr.bf16.mxu1 %v2192_v42  ;;  %v1907_v42 = vld [vmem:[%s2827_s4] ss:$0 sm:$0xff] }
  0x8e   : > { %1338 = vmatpush2.bf16.msra.mxu0 %v2150_v25 }
  0x8f   : > { %1339 = vmatprep.subr.bf16.mxu0 %v2158_v26  ;;  %1395 = vmatmul.mubr.bf16.vlgmr.msra.gmra.mxu1 %v1077_v27  ;;  %v1410_v27 = vrot.slane %v1405_v23, %v1409_v22 }
  0x90   : > { %1927 = vmatpush3.bf16.msra.mxu1 %v2193_v43 }
  0x91   : > { %1928 = vmatprep.subr.bf16.mxu1 %v2194_v45 }
  0x92   : > { %1340 = vmatpush2.bf16.msra.mxu0 %v2156_v28 }
  0x93   : > { %1341 = vmatprep.subr.bf16.mxu0 %v2164_v29 }
  0x94   : > { %1929 = vmatpush3.bf16.msra.mxu1 %v2195_v44 }
  0x95   : > { %1930 = vmatprep.subr.bf16.mxu1 %v2196_v47 }
  0x96   : > { %1342 = vmatpush2.bf16.msra.mxu0 %v2162_v30 }
  0x97   : > { %1343 = vmatprep.subr.bf16.mxu0 %v2170_v53  ;;  %v1414_v53 = vrot.slane %v1405_v23, %v1413_v24 }
  0x98   : > { %1931 = vmatpush3.bf16.msra.mxu1 %v2197_v48 }
  0x99   : > { %1932 = vmatprep.subr.bf16.mxu1 %v2198_v49 }
  0x9a   : > { %1344 = vmatpush2.bf16.msra.mxu0 %v2168_v31 }
  0x9b   : > { %1345 = vmatprep.subr.bf16.mxu0 %v2176_v32 }
  0x9c   : > { %1933 = vmatpush3.bf16.msra.mxu1 %v2199_v50 }
  0x9d   : > { %1934 = vmatprep.subr.bf16.mxu1 %v2200_v51 }
  0x9e   : > { %1346 = vmatpush2.bf16.msra.mxu0 %v2174_v33 }
  0x9f   : > { %1347 = vmatprep.subr.bf16.mxu0 %v2182_v34 }
  0xa0   : > { %1935 = vmatpush3.bf16.msra.mxu1 %v2201_v52 }
  0xa1   : > { %1936 = vmatprep.subr.bf16.mxu1 %v2202_v55 }
  0xa2   : > { %1348 = vmatpush2.bf16.msra.mxu0 %v2180_v35 }
  0xa3   : > { %1349 = vmatprep.subr.bf16.mxu0 %v2188_v36 }
  0xa4   : > { %1937 = vmatpush3.bf16.msra.mxu1 %v2203_v56 }
  0xa5   : > { %1938 = vmatprep.subr.bf16.mxu1 %v2204_v60 }
  0xa6   : > { %1350 = vmatpush2.bf16.msra.mxu0 %v2186_v37 }
  0xa7   : > { %1351 = vmatprep.subr.bf16.mxu0 %v2191_v38 }
  0xa8   : > { %1939 = vmatpush3.bf16.msra.mxu1 %v2205_v61 }
  0xa9   : > { %1940 = vmatprep.subr.bf16.mxu1 %v2206_v59 }
  0xaa   : > { %1352 = vmatpush2.bf16.msra.mxu0 %v2189_v39 }
  0xac   : > { %1941 = vmatpush3.bf16.msra.mxu1 %v2207_v62 }
  0xad   : > { %1354 = vmatmul.mubr.bf16.vlgmr.msra.gmra.mxu0 %v1075_v40 }
  0xee   : > { %v688_v54 = vpop.f32.mrf.mxu1 }
  0xf0   : > { %v690_v57 = vpop.f32.mrf.mxu1 }
  0xf2   : > { %v692_v58 = vpop.f32.mrf.mxu1 }
  0xf4   : > { %v693_v41 = vpop.f32.mrf.mxu1 }
 0x10d   : > { %v647_v63 = vpop.f32.mrf.mxu0 }
 0x10e   : > { %v689_v0 = vadd.f32 %v688_v54, %v647_v63 }
 0x10f   : > { %v649_v1 = vpop.f32.mrf.mxu0 }
 0x110   : > { %v691_v3 = vadd.f32 %v690_v57, %v649_v1 }
 0x111   : > { %v651_v46 = vpop.f32.mrf.mxu0 }
 0x113   : > { %v652_v4 = vpop.f32.mrf.mxu0 }
 0x12d   : > { %v1010_v5 = vpop.f32.mrf.mxu0 }
 0x12f   : > { %v1012_v6 = vpop.f32.mrf.mxu0  ;;  %v969_v7 = vpop.f32.mrf.mxu1 }
 0x130   : > { %v970_v2 = vadd.f32 %v969_v7, %v689_v0 }
 0x131   : > { %v1014_v8 = vpop.f32.mrf.mxu0  ;;  %v971_v9 = vpop.f32.mrf.mxu1 }
 0x132   : > { %v1011_v10 = vadd.f32 %v1010_v5, %v970_v2  ;;  %v972_v11 = vadd.f32 %v971_v9, %v691_v3 }
 0x133   : > { %v1015_v12 = vpop.f32.mrf.mxu0  ;;  %v973_v13 = vpop.f32.mrf.mxu1 }
 0x134   : > { %v1013_v14 = vadd.f32 %v1012_v6, %v972_v11 }
 0x135   : > { %v974_v15 = vpop.f32.mrf.mxu1 }
 0x14f   : > { %v1396_v16 = vpop.f32.mrf.mxu1 }
 0x151   : > { %v1398_v17 = vpop.f32.mrf.mxu1 }
 0x153   : > { %v1400_v18 = vpop.f32.mrf.mxu1 }
 0x155   : > { %v1401_v19 = vpop.f32.mrf.mxu1 }
 0x16d   : > { %v1355_v25 = vpop.f32.mrf.mxu0 }
 0x16e   : > { %v1397_v26 = vadd.f32 %v1396_v16, %v1355_v25 }
 0x16f   : > { %v1357_v28 = vpop.f32.mrf.mxu0 }
 0x170   : > { %v1403_v29 = vadd.f32 %v1397_v26, %v1011_v10  ;;  %v1399_v30 = vadd.f32 %v1398_v17, %v1357_v28 }
 0x171   : > { %v1359_v31 = vpop.f32.mrf.mxu0 }
 0x172   : > { %v1417_v32 = vadd.f32 %v1410_v27, %v1403_v29  ;;  %v1404_v33 = vadd.f32 %v1399_v30, %v1013_v14 }
 0x173   : > { %v1360_v34 = vpop.f32.mrf.mxu0 }
 0x174   : > { %v1418_v35 = vadd.f32 %v1414_v53, %v1404_v33  ;;  %v1419_v36 = vmax.f32 %v1417_v32, 0.0 }
 0x176   : > { %v1420_v37 = vmax.f32 %v1418_v35, 0.0  ;;  %v1421_v39 = vpack.c.bf16 %v1419_v36, %v1419_v36 }
 0x178   : > { %v1422_v38 = vpack.c.bf16 %v1420_v37, %v1420_v37 }
 0x17a   : > { %1590 = vmatprep.mubr.bf16.mxu1 %v1422_v38 }
 0x17b   : > { %1591 = vmatmul.mubr.bf16.vlgmr.msra.gmra.mxu1 %v1421_v39 }
 0x23b   : > { %v1942_v40 = vpop.f32.mrf.mxu1 }
 0x23d   : > { %v1943_v43 = vpop.f32.mrf.mxu1 }
 0x23e   : > { %v1944_v45 = vadd.f32 %v1943_v43, %v1942_v40 }
 0x23f   : > { %v1945_v44 = vpop.f32.mrf.mxu1 }
 0x240   : > { %v1593_v47 = vadd.f32 %v1944_v45, %v1907_v42 }
 0x241   : > { %v1946_v48 = vpop.f32.mrf.mxu1 }
 0x242   : > { %1598 = vst [vmem:[%s236_s13] sm:$0xff] %v1593_v47 }
 0x243 PF: > { %s15_s20 = sadd.s32 1, %s2230_s20   ;;  %s2829_s18 = smov %s2226_s19 }
 0x244   : > { %p12_p5 = scmp.ge.s32.totalorder %s15_s20, 4   ;;  %s2830_s19 = smov %s2832_s21 }
 0x246   :  { %14 = sbr.rel (!%p12_p5) target bundleno = 2 (0x2), region = 72 }

// kernel: superpoint_forward.19
= control target key start
LH: loop header
LB: loop body
LE: loop exit
PB: predicated region body
PF: predicated region fallthrough
CT: control target
= control target key end

     0   :  { %s2370_s18 = smov 0   ;;  %s2372_s19 = smov 0   ;;  %s2978_s0 = inlined_call_operand.vmem [shape: bf16[2,24,128], index: 0, kind: input, shape index: {}]   ;;  %s2979_s1 = inlined_call_operand.vmem [shape: bf16[3,384,256], index: 1, kind: input, shape index: {}]   ;;  %s2980_s2 = inlined_call_operand.vmem [shape: f32[1,256], index: 2, kind: input, shape index: {}]   ;;  %s2981_s3 = inlined_call_operand.vmem [shape: bf16[256,256], index: 3, kind: input, shape index: {}]   ;;  %s2982_s4 = inlined_call_operand.vmem [shape: f32[1,256], index: 4, kind: input, shape index: {}]   ;;  %s2983_s5 = inlined_call_operand.vmem [shape: f32[2,24,256], index: 5, kind: output, shape index: {}]  }
   0x1   :  { %s2374_s20 = smov 0  }
   0x2 LB: > { %s27_s21 = sadd.s32 1, %s2333_s19  ;;  %p1743_p0 = scmp.ge.s32.totalorder %s2337_s20, 1  ;;  %s2337_s20 = sphi %s2374_s20, %s15_s20   ;;  %s2333_s19 = sphi %s2372_s19, %s2985_s19   ;;  %s2329_s18 = sphi %s2370_s18, %s2984_s18  }
   0x3   : > { %p29_p1 = scmp.ge.s32.totalorder %s27_s21, 2  ;;  %p199_p2 = scmp.lt.s32.totalorder %s2337_s20, 3 }
   0x5   : > { %s2987_s21 = smov (%p29_p1, %s27_s21), 0  ;;  %p200_p3 = pnand %p1743_p0, %p199_p2 }
   0x6   : > { %p227_p4 = scmp.lt.s32.totalorder (!%p200_p3), %s2329_s18, 1 }
   0x7   : > { %203 = sbr.rel (%p200_p3) target bundleno = 737 (0x2e1), region = 40 }
   0xc   : > { %v2048_v0 = vld [vmem:[%s2979_s1 + $0x1f4] ss:$8 sps:$4 sm:$0xff]   ;;  %v2339_v2 = vmov 0   ;;  %v2052_v3 = vld [vmem:[%s2979_s1 + $0x1f0] ss:$8 sps:$4 sm:$0xff]   ;;  %s2989_s18 = smov (!%p227_p4, %s2329_s18), 1 }
   0xd   : > { %v2050_v1 = vld [vmem:[%s2979_s1 + $0x2f4] ss:$8 sps:$4 sm:$0xff]   ;;  %686 = vmatprep.mubr.bf16.mxu1 %v2339_v2  ;;  %613 = vmatprep.subr.bf16.mxu0 %v2048_v0  ;;  %v2053_v4 = vld [vmem:[%s2979_s1 + $0x2f0] ss:$8 sps:$4 sm:$0xff]   ;;  %v2054_v5 = vld [vmem:[%s2979_s1 + $0x1e4] ss:$8 sps:$4 sm:$0xff]  }
   0xe   : > { %654 = vmatprep.subr.bf16.mxu1 %v2050_v1  ;;  %614 = vmatpush1.bf16.msra.mxu0 %v2052_v3  ;;  %v2056_v6 = vld [vmem:[%s2979_s1 + $0x2e4] ss:$8 sps:$4 sm:$0xff]   ;;  %v2058_v7 = vld [vmem:[%s2979_s1 + $0x1e0] ss:$8 sps:$4 sm:$0xff]   ;;  %v2060_v9 = vld [vmem:[%s2979_s1 + $0x1d4] ss:$8 sps:$4 sm:$0xff]  }
   0xf   : > { %655 = vmatpush1.bf16.msra.mxu1 %v2053_v4  ;;  %615 = vmatprep.subr.bf16.mxu0 %v2054_v5  ;;  %v2059_v8 = vld [vmem:[%s2979_s1 + $0x2e0] ss:$8 sps:$4 sm:$0xff]   ;;  %v2062_v10 = vld [vmem:[%s2979_s1 + $0x2d4] ss:$8 sps:$4 sm:$0xff]   ;;  %v2064_v11 = vld [vmem:[%s2979_s1 + $0x1d0] ss:$8 sps:$4 sm:$0xff]  }
  0x10   : > { %656 = vmatprep.subr.bf16.mxu1 %v2056_v6  ;;  %v2065_v12 = vld [vmem:[%s2979_s1 + $0x2d0] ss:$8 sps:$4 sm:$0xff]   ;;  %v2066_v13 = vld [vmem:[%s2979_s1 + $0x1c4] ss:$8 sps:$4 sm:$0xff]   ;;  %v2070_v15 = vld [vmem:[%s2979_s1 + $0x1c0] ss:$8 sps:$4 sm:$0xff]  }
  0x11   : > { %v2068_v14 = vld [vmem:[%s2979_s1 + $0x2c4] ss:$8 sps:$4 sm:$0xff]   ;;  %v2071_v16 = vld [vmem:[%s2979_s1 + $0x2c0] ss:$8 sps:$4 sm:$0xff]   ;;  %v2072_v17 = vld [vmem:[%s2979_s1 + $0x1b4] ss:$8 sps:$4 sm:$0xff]  }
  0x12   : > { %616 = vmatpush1.bf16.msra.mxu0 %v2058_v7  ;;  %v2074_v18 = vld [vmem:[%s2979_s1 + $0x2b4] ss:$8 sps:$4 sm:$0xff]   ;;  %v2076_v19 = vld [vmem:[%s2979_s1 + $0x1b0] ss:$8 sps:$4 sm:$0xff]   ;;  %v2078_v21 = vld [vmem:[%s2979_s1 + $0x1a4] ss:$8 sps:$4 sm:$0xff]  }
  0x13   : > { %657 = vmatpush1.bf16.msra.mxu1 %v2059_v8  ;;  %617 = vmatprep.subr.bf16.mxu0 %v2060_v9  ;;  %v2077_v20 = vld [vmem:[%s2979_s1 + $0x2b0] ss:$8 sps:$4 sm:$0xff]   ;;  %v2080_v22 = vld [vmem:[%s2979_s1 + $0x2a4] ss:$8 sps:$4 sm:$0xff]   ;;  %s2021_s24 = smul.u32 12, %s2989_s18  ;;  %vm251_vm1 = vcmask 1042432  }
  0x14   : > { %658 = vmatprep.subr.bf16.mxu1 %v2062_v10  ;;  %v2082_v23 = vld [vmem:[%s2979_s1 + $0x1a0] ss:$8 sps:$4 sm:$0xff]   ;;  %v2084_v25 = vld [vmem:[%s2979_s1 + $0x194] ss:$8 sps:$4 sm:$0xff]   ;;  %v2088_v27 = vld [vmem:[%s2979_s1 + $0x190] ss:$8 sps:$4 sm:$0xff]  }
  0x15   : > { %v2083_v24 = vld [vmem:[%s2979_s1 + $0x2a0] ss:$8 sps:$4 sm:$0xff]   ;;  %v2086_v26 = vld [vmem:[%s2979_s1 + $0x294] ss:$8 sps:$4 sm:$0xff]   ;;  %s231_s10 = scalar_lea.vmem %s2978_s0, %s2021_s24  ;;  %v2089_v28 = vld [vmem:[%s2979_s1 + $0x290] ss:$8 sps:$4 sm:$0xff]  }
  0x16   : > { %618 = vmatpush1.bf16.msra.mxu0 %v2064_v11  ;;  %vm252_vm0 = vsmask.f32 2304  ;;  %v2090_v29 = vld [vmem:[%s2979_s1 + $0x184] ss:$8 sps:$4 sm:$0xff]   ;;  %v2102_v30 = vld [vmem:[%s231_s10] ss:$0 sps:$4 sm:$0xff]  }
  0x17   : > { %659 = vmatpush1.bf16.msra.mxu1 %v2065_v12  ;;  %619 = vmatprep.subr.bf16.mxu0 %v2066_v13  ;;  %v2092_v31 = vld [vmem:[%s2979_s1 + $0x284] ss:$8 sps:$4 sm:$0xff]   ;;  %vm255_vm2 = vcmask 1046528   ;;  %v243_v32 = vshrl.u32 %v2102_v30, 16  ;;  %v246_v33 = vshll.u32 %v2102_v30, 16  ;;  %vm253_vm4 = vmand %vm251_vm1, %vm252_vm0  ;;  %v2505_v41 = vrot.slane %v2339_v2, 1 }
  0x18   : > { %660 = vmatprep.subr.bf16.mxu1 %v2068_v14  ;;  %vm256_vm3 = vsmask.f32 6400  ;;  %v2094_v34 = vld [vmem:[%s2979_s1 + $0x180] ss:$8 sps:$4 sm:$0xff]   ;;  %v2096_v36 = vld [vmem:[%s2979_s1 + $0x274] ss:$8 sps:$4 sm:$0xff]  }
  0x19   : > { %v2095_v35 = vld [vmem:[%s2979_s1 + $0x280] ss:$8 sps:$4 sm:$0xff]   ;;  %v2100_v37 = vld [vmem:[%s2979_s1 + $0x74] ss:$8 sps:$4 sm:$0xff]   ;;  %v245_v38 = vrot.slane %v243_v32, 5  ;;  %v248_v39 = vrot.slane %v246_v33, 6  ;;  %vm257_vm5 = vmand %vm255_vm2, %vm256_vm3 }
  0x1a   : > { %620 = vmatpush1.bf16.msra.mxu0 %v2070_v15  ;;  %v2101_v42 = vld [vmem:[%s2979_s1 + $0x270] ss:$8 sps:$4 sm:$0xff]   ;;  %v2103_v45 = vld [vmem:[%s2979_s1 + $0x264] ss:$8 sps:$4 sm:$0xff]   ;;  %v2108_v49 = vld [vmem:[%s2979_s1 + $0x260] ss:$8 sps:$4 sm:$0xff]  }
  0x1b   : > { %661 = vmatpush1.bf16.msra.mxu1 %v2071_v16  ;;  %621 = vmatprep.subr.bf16.mxu0 %v2072_v17  ;;  %v249_v40 = vor.u32 %v248_v39, %v245_v38  ;;  %v2098_v47 = vld [vmem:[%s2979_s1 + $0x70] ss:$8 sps:$4 sm:$0xff]   ;;  %v2107_v48 = vld [vmem:[%s2979_s1 + $0x64] ss:$8 sps:$4 sm:$0xff]   ;;  %v2109_v54 = vld [vmem:[%s2979_s1 + $0x254] ss:$8 sps:$4 sm:$0xff]  }
  0x1c   : > { %662 = vmatprep.subr.bf16.mxu1 %v2074_v18  ;;  %v2105_v56 = vld [vmem:[%s2979_s1 + $0x60] ss:$8 sps:$4 sm:$0xff]   ;;  %v2113_v57 = vld [vmem:[%s2979_s1 + $0x54] ss:$8 sps:$4 sm:$0xff]   ;;  %v2114_v58 = vld [vmem:[%s2979_s1 + $0x250] ss:$8 sps:$4 sm:$0xff]  }
  0x1d   : > { %v254_v43 = vsel %vm253_vm4, 0, %v249_v40  ;;  %v2115_v60 = vld [vmem:[%s2979_s1 + $0x244] ss:$8 sps:$4 sm:$0xff]   ;;  %v2111_v62 = vld [vmem:[%s2979_s1 + $0x50] ss:$8 sps:$4 sm:$0xff]   ;;  %s2022_s25 = smul.u32 48, %s2989_s18 }
  0x1e   : > { %622 = vmatpush1.bf16.msra.mxu0 %v2076_v19  ;;  %v2510_v44 = vsel %vm257_vm5, %v254_v43, 0  ;;  %v2119_v63 = vld [vmem:[%s2979_s1 + $0x44] ss:$8 sps:$4 sm:$0xff]   ;;  %v2120_v0 = vld [vmem:[%s2979_s1 + $0x240] ss:$8 sps:$4 sm:$0xff]  }
  0x1f   : > { %663 = vmatpush1.bf16.msra.mxu1 %v2077_v20  ;;  %623 = vmatprep.subr.bf16.mxu0 %v2078_v21  ;;  %v2516_v46 = vrot.slane %v2510_v44, 1  ;;  %v260_v51 = vshrl.u32 %v2510_v44, 16  ;;  %v262_v52 = vshll.u32 %v2510_v44, 16  ;;  %v2121_v1 = vld [vmem:[%s2979_s1 + $0x234] ss:$8 sps:$4 sm:$0xff]   ;;  %v367_v20 = vrot.slane %v2510_v44, 2  ;;  %s236_s28 = scalar_lea.vmem %s2983_s5, %s2022_s25 }
  0x20   : > { %664 = vmatprep.subr.bf16.mxu1 %v2080_v22  ;;  %v2117_v3 = vld [vmem:[%s2979_s1 + $0x40] ss:$8 sps:$4 sm:$0xff]   ;;  %v2125_v4 = vld [vmem:[%s2979_s1 + $0x34] ss:$8 sps:$4 sm:$0xff]   ;;  %v2126_v5 = vld [vmem:[%s2979_s1 + $0x230] ss:$8 sps:$4 sm:$0xff]  }
  0x21   : > { %v369_v50 = vrot.slane %v2516_v46, 2  ;;  %v2533_v53 = vsel %vm255_vm2, %v2516_v46, %v2505_v41  ;;  %v264_v55 = vrot.slane %v262_v52, 1  ;;  %v2127_v6 = vld [vmem:[%s2979_s1 + $0x224] ss:$8 sps:$4 sm:$0xff]   ;;  %v2123_v7 = vld [vmem:[%s2979_s1 + $0x30] ss:$8 sps:$4 sm:$0xff]  }
  0x22   : > { %624 = vmatpush1.bf16.msra.mxu0 %v2082_v23  ;;  %v2131_v8 = vld [vmem:[%s2979_s1 + $0x24] ss:$8 sps:$4 sm:$0xff]   ;;  %v2132_v9 = vld [vmem:[%s2979_s1 + $0x220] ss:$8 sps:$4 sm:$0xff]   ;;  %v2133_v10 = vld [vmem:[%s2979_s1 + $0x214] ss:$8 sps:$4 sm:$0xff]  }
  0x23   : > { %665 = vmatpush1.bf16.msra.mxu1 %v2083_v24  ;;  %625 = vmatprep.subr.bf16.mxu0 %v2084_v25  ;;  %v2547_v59 = vor.u32 %v264_v55, %v260_v51  ;;  %v2129_v11 = vld [vmem:[%s2979_s1 + $0x20] ss:$8 sps:$4 sm:$0xff]   ;;  %v2137_v12 = vld [vmem:[%s2979_s1 + $0x14] ss:$8 sps:$4 sm:$0xff]   ;;  %v2138_v13 = vld [vmem:[%s2979_s1 + $0x210] ss:$8 sps:$4 sm:$0xff]  }
  0x24   : > { %666 = vmatprep.subr.bf16.mxu1 %v2086_v26  ;;  %v2139_v14 = vld [vmem:[%s2979_s1 + $0x204] ss:$8 sps:$4 sm:$0xff]   ;;  %v2135_v15 = vld [vmem:[%s2979_s1 + $0x10] ss:$8 sps:$4 sm:$0xff]   ;;  %v2144_v17 = vld [vmem:[%s2979_s1 + $0x200] ss:$8 sps:$4 sm:$0xff]  }
  0x25   : > { %v368_v61 = vrot.slane %v2547_v59, 2  ;;  %v2143_v16 = vld [vmem:[%s2979_s1 + $0x4] ss:$8 sps:$4 sm:$0xff]   ;;  %v2150_v18 = vld [vmem:[%s2979_s1 + $0x174] ss:$8 sps:$4 sm:$0xff]  }
  0x26   : > { %626 = vmatpush1.bf16.msra.mxu0 %v2088_v27  ;;  %v2141_v19 = vld [vmem:[%s2979_s1] ss:$8 sps:$4 sm:$0xff]   ;;  %v2147_v21 = vld [vmem:[%s2979_s1 + $0xf4] ss:$8 sps:$4 sm:$0xff]   ;;  %v2148_v22 = vld [vmem:[%s2979_s1 + $0x170] ss:$8 sps:$4 sm:$0xff]  }
  0x27   : > { %667 = vmatpush1.bf16.msra.mxu1 %v2089_v28  ;;  %627 = vmatprep.subr.bf16.mxu0 %v2090_v29  ;;  %v2156_v23 = vld [vmem:[%s2979_s1 + $0x164] ss:$8 sps:$4 sm:$0xff]   ;;  %v2145_v24 = vld [vmem:[%s2979_s1 + $0xf0] ss:$8 sps:$4 sm:$0xff]   ;;  %v2154_v26 = vld [vmem:[%s2979_s1 + $0x160] ss:$8 sps:$4 sm:$0xff]  }
  0x28   : > { %668 = vmatprep.subr.bf16.mxu1 %v2092_v31  ;;  %645 = vmatprep.mubr.bf16.mxu0 %v368_v61  ;;  %v2153_v25 = vld [vmem:[%s2979_s1 + $0xe4] ss:$8 sps:$4 sm:$0xff]   ;;  %v2162_v27 = vld [vmem:[%s2979_s1 + $0x154] ss:$8 sps:$4 sm:$0xff]   ;;  %v2151_v28 = vld [vmem:[%s2979_s1 + $0xe0] ss:$8 sps:$4 sm:$0xff]  }
  0x29   : > { %v2159_v29 = vld [vmem:[%s2979_s1 + $0xd4] ss:$8 sps:$4 sm:$0xff]   ;;  %v2160_v30 = vld [vmem:[%s2979_s1 + $0x150] ss:$8 sps:$4 sm:$0xff]   ;;  %v2168_v31 = vld [vmem:[%s2979_s1 + $0x144] ss:$8 sps:$4 sm:$0xff]  }
  0x2a   : > { %628 = vmatpush1.bf16.msra.mxu0 %v2094_v34  ;;  %v2157_v32 = vld [vmem:[%s2979_s1 + $0xd0] ss:$8 sps:$4 sm:$0xff]   ;;  %v2165_v33 = vld [vmem:[%s2979_s1 + $0xc4] ss:$8 sps:$4 sm:$0xff]   ;;  %v2166_v34 = vld [vmem:[%s2979_s1 + $0x140] ss:$8 sps:$4 sm:$0xff]  }
  0x2b   : > { %669 = vmatpush1.bf16.msra.mxu1 %v2095_v35  ;;  %629 = vmatprep.subr.bf16.mxu0 %v2096_v36  ;;  %v2174_v35 = vld [vmem:[%s2979_s1 + $0x134] ss:$8 sps:$4 sm:$0xff]   ;;  %v2163_v36 = vld [vmem:[%s2979_s1 + $0xc0] ss:$8 sps:$4 sm:$0xff]   ;;  %v2172_v38 = vld [vmem:[%s2979_s1 + $0x130] ss:$8 sps:$4 sm:$0xff]  }
  0x2c   : > { %935 = vmatprep.subr.bf16.mxu1 %v2100_v37  ;;  %v2171_v37 = vld [vmem:[%s2979_s1 + $0xb4] ss:$8 sps:$4 sm:$0xff]   ;;  %v2180_v39 = vld [vmem:[%s2979_s1 + $0x124] ss:$8 sps:$4 sm:$0xff]   ;;  %v2169_v40 = vld [vmem:[%s2979_s1 + $0xb0] ss:$8 sps:$4 sm:$0xff]  }
  0x2d   : > { %v2178_v43 = vld [vmem:[%s2979_s1 + $0x120] ss:$8 sps:$4 sm:$0xff]   ;;  %vm1017_vm6 = vsmask.f32 7424  ;;  %v2181_v51 = vld [vmem:[%s2979_s1 + $0x90] ss:$8 sps:$4 sm:$0xff]  }
  0x2e   : > { %630 = vmatpush2.bf16.msra.mxu0 %v2101_v42  ;;  %687 = vmatmul.mubr.bf16.vlgmr.msra.gmra.mxu1 %v369_v50  ;;  %v2177_v42 = vld [vmem:[%s2979_s1 + $0xa4] ss:$8 sps:$4 sm:$0xff]   ;;  %v2195_v55 = vld [vmem:[%s2979_s1 + $0x374] ss:$8 sps:$4 sm:$0xff]  }
  0x2f   : > { %631 = vmatprep.subr.bf16.mxu0 %v2103_v45  ;;  %936 = vmatpush1.bf16.msra.mxu1 %v2098_v47  ;;  %v2186_v45 = vld [vmem:[%s2979_s1 + $0x114] ss:$8 sps:$4 sm:$0xff]   ;;  %v2175_v47 = vld [vmem:[%s2979_s1 + $0xa0] ss:$8 sps:$4 sm:$0xff]   ;;  %v2192_v50 = vld [vmem:[%s2979_s1 + $0x104] ss:$8 sps:$4 sm:$0xff]  }
  0x30   : > { %937 = vmatprep.subr.bf16.mxu1 %v2107_v48  ;;  %967 = vmatprep.mubr.bf16.mxu1 %v2547_v59  ;;  %v2183_v48 = vld [vmem:[%s2979_s1 + $0x94] ss:$8 sps:$4 sm:$0xff]   ;;  %v2189_v52 = vld [vmem:[%s2979_s1 + $0x84] ss:$8 sps:$4 sm:$0xff]  }
  0x31   : > { %v2216_v61 = vld [vmem:[%s2979_s1 + $0x474] ss:$8 sps:$4 sm:$0xff]  }
  0x32   : > { %632 = vmatpush2.bf16.msra.mxu0 %v2108_v49  ;;  %v2184_v49 = vld [vmem:[%s2979_s1 + $0x110] ss:$8 sps:$4 sm:$0xff]  }
  0x33   : > { %633 = vmatprep.subr.bf16.mxu0 %v2109_v54  ;;  %938 = vmatpush1.bf16.msra.mxu1 %v2105_v56  ;;  %v2190_v54 = vld [vmem:[%s2979_s1 + $0x100] ss:$8 sps:$4 sm:$0xff]  }
  0x34   : > { %939 = vmatprep.subr.bf16.mxu1 %v2113_v57  ;;  %v2187_v56 = vld [vmem:[%s2979_s1 + $0x80] ss:$8 sps:$4 sm:$0xff]   ;;  %v1022_v57 = vsel %vm1017_vm6, %v2547_v59, %v2505_v41  ;;  %v2214_v41 = vld [vmem:[%s2979_s1 + $0x470] ss:$8 sps:$4 sm:$0xff]  }
  0x35   : > { %v1076_v59 = vrot.slane %v1022_v57, 4  ;;  %v2283_v57 = vld [vmem:[%s2981_s3 + $0x10] ss:$8 sps:$4 sm:$0xff]  }
  0x36   : > { %634 = vmatpush2.bf16.msra.mxu0 %v2114_v58  ;;  %v2193_v58 = vld [vmem:[%s2979_s1 + $0x370] ss:$8 sps:$4 sm:$0xff]  }
  0x37   : > { %635 = vmatprep.subr.bf16.mxu0 %v2115_v60  ;;  %940 = vmatpush1.bf16.msra.mxu1 %v2111_v62  ;;  %v2198_v60 = vld [vmem:[%s2979_s1 + $0x364] ss:$8 sps:$4 sm:$0xff]   ;;  %v2196_v62 = vld [vmem:[%s2979_s1 + $0x360] ss:$8 sps:$4 sm:$0xff]  }
  0x38   : > { %941 = vmatprep.subr.bf16.mxu1 %v2119_v63  ;;  %v2222_v63 = vld [vmem:[%s2979_s1 + $0x464] ss:$8 sps:$4 sm:$0xff]  }
  0x3a   : > { %636 = vmatpush2.bf16.msra.mxu0 %v2120_v0  ;;  %v2201_v0 = vld [vmem:[%s2979_s1 + $0x354] ss:$8 sps:$4 sm:$0xff]  }
  0x3b   : > { %637 = vmatprep.subr.bf16.mxu0 %v2121_v1  ;;  %942 = vmatpush1.bf16.msra.mxu1 %v2117_v3  ;;  %v2220_v1 = vld [vmem:[%s2979_s1 + $0x460] ss:$8 sps:$4 sm:$0xff]   ;;  %v2199_v3 = vld [vmem:[%s2979_s1 + $0x350] ss:$8 sps:$4 sm:$0xff]  }
  0x3c   : > { %943 = vmatprep.subr.bf16.mxu1 %v2125_v4  ;;  %v2204_v4 = vld [vmem:[%s2979_s1 + $0x344] ss:$8 sps:$4 sm:$0xff]  }
  0x3e   : > { %638 = vmatpush2.bf16.msra.mxu0 %v2126_v5  ;;  %v2226_v5 = vld [vmem:[%s2979_s1 + $0x450] ss:$8 sps:$4 sm:$0xff]  }
  0x3f   : > { %639 = vmatprep.subr.bf16.mxu0 %v2127_v6  ;;  %944 = vmatpush1.bf16.msra.mxu1 %v2123_v7  ;;  %v2202_v6 = vld [vmem:[%s2979_s1 + $0x340] ss:$8 sps:$4 sm:$0xff]   ;;  %v2234_v7 = vld [vmem:[%s2979_s1 + $0x444] ss:$8 sps:$4 sm:$0xff]  }
  0x40   : > { %945 = vmatprep.subr.bf16.mxu1 %v2131_v8  ;;  %v2232_v8 = vld [vmem:[%s2979_s1 + $0x440] ss:$8 sps:$4 sm:$0xff]  }
  0x42   : > { %640 = vmatpush2.bf16.msra.mxu0 %v2132_v9  ;;  %v2205_v9 = vld [vmem:[%s2979_s1 + $0x330] ss:$8 sps:$4 sm:$0xff]  }
  0x43   : > { %641 = vmatprep.subr.bf16.mxu0 %v2133_v10  ;;  %946 = vmatpush1.bf16.msra.mxu1 %v2129_v11  ;;  %v2240_v10 = vld [vmem:[%s2979_s1 + $0x434] ss:$8 sps:$4 sm:$0xff]   ;;  %v2210_v11 = vld [vmem:[%s2979_s1 + $0x324] ss:$8 sps:$4 sm:$0xff]  }
  0x44   : > { %947 = vmatprep.subr.bf16.mxu1 %v2137_v12  ;;  %v2238_v12 = vld [vmem:[%s2979_s1 + $0x430] ss:$8 sps:$4 sm:$0xff]  }
  0x46   : > { %642 = vmatpush2.bf16.msra.mxu0 %v2138_v13  ;;  %v2208_v13 = vld [vmem:[%s2979_s1 + $0x320] ss:$8 sps:$4 sm:$0xff]  }
  0x47   : > { %643 = vmatprep.subr.bf16.mxu0 %v2139_v14  ;;  %948 = vmatpush1.bf16.msra.mxu1 %v2135_v15  ;;  %v2246_v14 = vld [vmem:[%s2979_s1 + $0x424] ss:$8 sps:$4 sm:$0xff]   ;;  %v2213_v15 = vld [vmem:[%s2979_s1 + $0x314] ss:$8 sps:$4 sm:$0xff]  }
  0x48   : > { %949 = vmatprep.subr.bf16.mxu1 %v2143_v16  ;;  %v2244_v16 = vld [vmem:[%s2979_s1 + $0x420] ss:$8 sps:$4 sm:$0xff]  }
  0x4a   : > { %644 = vmatpush2.bf16.msra.mxu0 %v2144_v17  ;;  %v2211_v17 = vld [vmem:[%s2979_s1 + $0x310] ss:$8 sps:$4 sm:$0xff]  }
  0x4b   : > { %976 = vmatprep.subr.bf16.mxu0 %v2150_v18  ;;  %950 = vmatpush1.bf16.msra.mxu1 %v2141_v19  ;;  %v2252_v18 = vld [vmem:[%s2979_s1 + $0x414] ss:$8 sps:$4 sm:$0xff]   ;;  %v2219_v19 = vld [vmem:[%s2979_s1 + $0x304] ss:$8 sps:$4 sm:$0xff]  }
  0x4c   : > { %951 = vmatprep.subr.bf16.mxu1 %v2147_v21  ;;  %v2217_v21 = vld [vmem:[%s2979_s1 + $0x300] ss:$8 sps:$4 sm:$0xff]  }
  0x4d   : > { %646 = vmatmul.mubr.bf16.vlgmr.msra.gmra.mxu0 %v367_v20  ;;  %v2250_v20 = vld [vmem:[%s2979_s1 + $0x410] ss:$8 sps:$4 sm:$0xff]  }
  0x4e   : > { %977 = vmatpush1.bf16.msra.mxu0 %v2148_v22  ;;  %1008 = vmatprep.mubr.bf16.mxu0 %v2339_v2  ;;  %v2258_v22 = vld [vmem:[%s2979_s1 + $0x404] ss:$8 sps:$4 sm:$0xff]  }
  0x4f   : > { %978 = vmatprep.subr.bf16.mxu0 %v2156_v23  ;;  %952 = vmatpush2.bf16.msra.mxu1 %v2145_v24  ;;  %v2225_v23 = vld [vmem:[%s2979_s1 + $0x3f4] ss:$8 sps:$4 sm:$0xff]   ;;  %v2256_v24 = vld [vmem:[%s2979_s1 + $0x400] ss:$8 sps:$4 sm:$0xff]  }
  0x50   : > { %953 = vmatprep.subr.bf16.mxu1 %v2153_v25  ;;  %v2223_v25 = vld [vmem:[%s2979_s1 + $0x3f0] ss:$8 sps:$4 sm:$0xff]  }
  0x52   : > { %979 = vmatpush1.bf16.msra.mxu0 %v2154_v26  ;;  %v2231_v26 = vld [vmem:[%s2979_s1 + $0x3e4] ss:$8 sps:$4 sm:$0xff]  }
  0x53   : > { %980 = vmatprep.subr.bf16.mxu0 %v2162_v27  ;;  %954 = vmatpush2.bf16.msra.mxu1 %v2151_v28  ;;  %v1077_v27 = vrot.slane %v2533_v53, 4  ;;  %v2229_v28 = vld [vmem:[%s2979_s1 + $0x3e0] ss:$8 sps:$4 sm:$0xff]   ;;  %v2243_v53 = vld [vmem:[%s2979_s1 + $0x3c4] ss:$8 sps:$4 sm:$0xff]  }
  0x54   : > { %955 = vmatprep.subr.bf16.mxu1 %v2159_v29  ;;  %v2237_v29 = vld [vmem:[%s2979_s1 + $0x3d4] ss:$8 sps:$4 sm:$0xff]  }
  0x56   : > { %981 = vmatpush1.bf16.msra.mxu0 %v2160_v30  ;;  %v2235_v30 = vld [vmem:[%s2979_s1 + $0x3d0] ss:$8 sps:$4 sm:$0xff]  }
  0x57   : > { %982 = vmatprep.subr.bf16.mxu0 %v2168_v31  ;;  %956 = vmatpush2.bf16.msra.mxu1 %v2157_v32  ;;  %v2241_v31 = vld [vmem:[%s2979_s1 + $0x3c0] ss:$8 sps:$4 sm:$0xff]   ;;  %v2249_v32 = vld [vmem:[%s2979_s1 + $0x3b4] ss:$8 sps:$4 sm:$0xff]  }
  0x58   : > { %957 = vmatprep.subr.bf16.mxu1 %v2165_v33  ;;  %v2247_v33 = vld [vmem:[%s2979_s1 + $0x3b0] ss:$8 sps:$4 sm:$0xff]  }
  0x5a   : > { %983 = vmatpush1.bf16.msra.mxu0 %v2166_v34  ;;  %v2255_v34 = vld [vmem:[%s2979_s1 + $0x3a4] ss:$8 sps:$4 sm:$0xff]  }
  0x5b   : > { %984 = vmatprep.subr.bf16.mxu0 %v2174_v35  ;;  %958 = vmatpush2.bf16.msra.mxu1 %v2163_v36  ;;  %v2253_v35 = vld [vmem:[%s2979_s1 + $0x3a0] ss:$8 sps:$4 sm:$0xff]   ;;  %v2261_v36 = vld [vmem:[%s2979_s1 + $0x394] ss:$8 sps:$4 sm:$0xff]  }
  0x5c   : > { %959 = vmatprep.subr.bf16.mxu1 %v2171_v37  ;;  %v2259_v37 = vld [vmem:[%s2979_s1 + $0x390] ss:$8 sps:$4 sm:$0xff]  }
  0x5e   : > { %985 = vmatpush1.bf16.msra.mxu0 %v2172_v38  ;;  %v2264_v38 = vld [vmem:[%s2979_s1 + $0x384] ss:$8 sps:$4 sm:$0xff]  }
  0x5f   : > { %986 = vmatprep.subr.bf16.mxu0 %v2180_v39  ;;  %960 = vmatpush2.bf16.msra.mxu1 %v2169_v40  ;;  %v2262_v39 = vld [vmem:[%s2979_s1 + $0x380] ss:$8 sps:$4 sm:$0xff]   ;;  %v1075_v40 = vrot.slane %v2510_v44, 4 }
  0x60   : > { %961 = vmatprep.subr.bf16.mxu1 %v2177_v42  ;;  %v2265_v42 = vld [vmem:[%s2981_s3 + $0x70] ss:$8 sps:$4 sm:$0xff]  }
  0x62   : > { %987 = vmatpush1.bf16.msra.mxu0 %v2178_v43  ;;  %v2267_v43 = vld [vmem:[%s2981_s3 + $0x74] ss:$8 sps:$4 sm:$0xff]  }
  0x63   : > { %988 = vmatprep.subr.bf16.mxu0 %v2186_v45  ;;  %962 = vmatpush2.bf16.msra.mxu1 %v2175_v47  ;;  %v2270_v45 = vld [vmem:[%s2981_s3 + $0x64] ss:$8 sps:$4 sm:$0xff]   ;;  %v2273_v47 = vld [vmem:[%s2981_s3 + $0x54] ss:$8 sps:$4 sm:$0xff]  }
  0x64   : > { %963 = vmatprep.subr.bf16.mxu1 %v2183_v48  ;;  %v2271_v48 = vld [vmem:[%s2981_s3 + $0x50] ss:$8 sps:$4 sm:$0xff]  }
  0x66   : > { %989 = vmatpush1.bf16.msra.mxu0 %v2184_v49  ;;  %v2276_v49 = vld [vmem:[%s2981_s3 + $0x44] ss:$8 sps:$4 sm:$0xff]  }
  0x67   : > { %990 = vmatprep.subr.bf16.mxu0 %v2192_v50  ;;  %964 = vmatpush2.bf16.msra.mxu1 %v2181_v51  ;;  %v2274_v50 = vld [vmem:[%s2981_s3 + $0x40] ss:$8 sps:$4 sm:$0xff]   ;;  %v2279_v51 = vld [vmem:[%s2981_s3 + $0x34] ss:$8 sps:$4 sm:$0xff]  }
  0x68   : > { %965 = vmatprep.subr.bf16.mxu1 %v2189_v52  ;;  %v2277_v52 = vld [vmem:[%s2981_s3 + $0x30] ss:$8 sps:$4 sm:$0xff]  }
  0x6a   : > { %991 = vmatpush1.bf16.msra.mxu0 %v2190_v54  ;;  %v2282_v54 = vld [vmem:[%s2981_s3 + $0x24] ss:$8 sps:$4 sm:$0xff]  }
  0x6b   : > { %1321 = vmatprep.subr.bf16.mxu0 %v2195_v55  ;;  %966 = vmatpush2.bf16.msra.mxu1 %v2187_v56  ;;  %v2280_v55 = vld [vmem:[%s2981_s3 + $0x20] ss:$8 sps:$4 sm:$0xff]   ;;  %v2285_v56 = vld [vmem:[%s2981_s3 + $0x14] ss:$8 sps:$4 sm:$0xff]  }
  0x6c   : > { %1362 = vmatprep.subr.bf16.mxu1 %v2216_v61  ;;  %v2291_v61 = vld [vmem:[%s2981_s3 + $0xf4] ss:$8 sps:$4 sm:$0xff]  }
  0x6d   : > { %1009 = vmatmul.mubr.bf16.vlgmr.msra.gmra.mxu0 %v2516_v46  ;;  %v2228_v46 = vld [vmem:[%s2979_s1 + $0x454] ss:$8 sps:$4 sm:$0xff]  }
  0x6e   : > { %1322 = vmatpush1.bf16.msra.mxu0 %v2193_v58  ;;  %1353 = vmatprep.mubr.bf16.mxu0 %v1076_v59  ;;  %v2288_v58 = vld [vmem:[%s2981_s3 + $0x4] ss:$8 sps:$4 sm:$0xff]  }
  0x6f   : > { %1323 = vmatprep.subr.bf16.mxu0 %v2198_v60  ;;  %968 = vmatmul.mubr.bf16.vlgmr.msra.gmra.mxu1 %v2510_v44  ;;  %v2268_v44 = vld [vmem:[%s2981_s3 + $0x60] ss:$8 sps:$4 sm:$0xff]   ;;  %v2294_v59 = vld [vmem:[%s2981_s3 + $0xe4] ss:$8 sps:$4 sm:$0xff]  }
  0x70   : > { %1363 = vmatpush1.bf16.msra.mxu1 %v2214_v41  ;;  %1394 = vmatprep.mubr.bf16.mxu1 %v2339_v2  ;;  %v2207_v2 = vld [vmem:[%s2979_s1 + $0x334] ss:$8 sps:$4 sm:$0xff]   ;;  %v2286_v60 = vld [vmem:[%s2981_s3] ss:$8 sps:$4 sm:$0xff]   ;;  %v2289_v41 = vld [vmem:[%s2981_s3 + $0xf0] ss:$8 sps:$4 sm:$0xff]  }
  0x71   : > { %1364 = vmatprep.subr.bf16.mxu1 %v2222_v63  ;;  %v2297_v63 = vld [vmem:[%s2981_s3 + $0xd4] ss:$8 sps:$4 sm:$0xff]  }
  0x72   : > { %1324 = vmatpush1.bf16.msra.mxu0 %v2196_v62  ;;  %v2292_v62 = vld [vmem:[%s2981_s3 + $0xe0] ss:$8 sps:$4 sm:$0xff]  }
  0x73   : > { %1325 = vmatprep.subr.bf16.mxu0 %v2201_v0  ;;  %v2295_v0 = vld [vmem:[%s2981_s3 + $0xd0] ss:$8 sps:$4 sm:$0xff]  }
  0x74   : > { %1365 = vmatpush1.bf16.msra.mxu1 %v2220_v1  ;;  %v2300_v1 = vld [vmem:[%s2981_s3 + $0xc4] ss:$8 sps:$4 sm:$0xff]  }
  0x75   : > { %1366 = vmatprep.subr.bf16.mxu1 %v2228_v46  ;;  %v2303_v46 = vld [vmem:[%s2981_s3 + $0xb4] ss:$8 sps:$4 sm:$0xff]  }
  0x76   : > { %1326 = vmatpush1.bf16.msra.mxu0 %v2199_v3  ;;  %v2298_v3 = vld [vmem:[%s2981_s3 + $0xc0] ss:$8 sps:$4 sm:$0xff]  }
  0x77   : > { %1327 = vmatprep.subr.bf16.mxu0 %v2204_v4  ;;  %v2301_v4 = vld [vmem:[%s2981_s3 + $0xb0] ss:$8 sps:$4 sm:$0xff]  }
  0x78   : > { %1367 = vmatpush1.bf16.msra.mxu1 %v2226_v5 }
  0x79   : > { %1368 = vmatprep.subr.bf16.mxu1 %v2234_v7  ;;  %v2304_v7 = vld [vmem:[%s2981_s3 + $0xa0] ss:$8 sps:$4 sm:$0xff]  }
  0x7a   : > { %1328 = vmatpush1.bf16.msra.mxu0 %v2202_v6  ;;  %v2306_v6 = vld [vmem:[%s2981_s3 + $0xa4] ss:$8 sps:$4 sm:$0xff]  }
  0x7b   : > { %1329 = vmatprep.subr.bf16.mxu0 %v2207_v2 }
  0x7c   : > { %1369 = vmatpush1.bf16.msra.mxu1 %v2232_v8 }
  0x7d   : > { %1370 = vmatprep.subr.bf16.mxu1 %v2240_v10  ;;  %v2307_v10 = vld [vmem:[%s2981_s3 + $0x90] ss:$8 sps:$4 sm:$0xff]  }
  0x7e   : > { %1330 = vmatpush1.bf16.msra.mxu0 %v2205_v9  ;;  %v2309_v9 = vld [vmem:[%s2981_s3 + $0x94] ss:$8 sps:$4 sm:$0xff]  }
  0x7f   : > { %1331 = vmatprep.subr.bf16.mxu0 %v2210_v11 }
  0x80   : > { %1371 = vmatpush1.bf16.msra.mxu1 %v2238_v12  ;;  %v2312_v12 = vld [vmem:[%s2981_s3 + $0x84] ss:$8 sps:$4 sm:$0xff]  }
  0x81   : > { %1372 = vmatprep.subr.bf16.mxu1 %v2246_v14 }
  0x82   : > { %1332 = vmatpush1.bf16.msra.mxu0 %v2208_v13  ;;  %v2310_v13 = vld [vmem:[%s2981_s3 + $0x80] ss:$8 sps:$4 sm:$0xff]  }
  0x83   : > { %1333 = vmatprep.subr.bf16.mxu0 %v2213_v15 }
  0x84   : > { %1373 = vmatpush1.bf16.msra.mxu1 %v2244_v16 }
  0x85   : > { %1374 = vmatprep.subr.bf16.mxu1 %v2252_v18 }
  0x86   : > { %1334 = vmatpush1.bf16.msra.mxu0 %v2211_v17 }
  0x87   : > { %1335 = vmatprep.subr.bf16.mxu0 %v2219_v19 }
  0x88   : > { %1375 = vmatpush1.bf16.msra.mxu1 %v2250_v20 }
  0x89   : > { %1376 = vmatprep.subr.bf16.mxu1 %v2258_v22 }
  0x8a   : > { %1336 = vmatpush1.bf16.msra.mxu0 %v2217_v21 }
  0x8b   : > { %1337 = vmatprep.subr.bf16.mxu0 %v2225_v23 }
  0x8c   : > { %1377 = vmatpush1.bf16.msra.mxu1 %v2256_v24 }
  0x8d   : > { %1627 = vmatprep.subr.bf16.mxu1 %v2267_v43 }
  0x8e   : > { %1338 = vmatpush2.bf16.msra.mxu0 %v2223_v25 }
  0x8f   : > { %1339 = vmatprep.subr.bf16.mxu0 %v2231_v26  ;;  %1395 = vmatmul.mubr.bf16.vlgmr.msra.gmra.mxu1 %v1077_v27 }
  0x90   : > { %1628 = vmatpush1.bf16.msra.mxu1 %v2265_v42 }
  0x91   : > { %1629 = vmatprep.subr.bf16.mxu1 %v2270_v45 }
  0x92   : > { %1340 = vmatpush2.bf16.msra.mxu0 %v2229_v28 }
  0x93   : > { %1341 = vmatprep.subr.bf16.mxu0 %v2237_v29 }
  0x94   : > { %1630 = vmatpush1.bf16.msra.mxu1 %v2268_v44 }
  0x95   : > { %1631 = vmatprep.subr.bf16.mxu1 %v2273_v47 }
  0x96   : > { %1342 = vmatpush2.bf16.msra.mxu0 %v2235_v30 }
  0x97   : > { %1343 = vmatprep.subr.bf16.mxu0 %v2243_v53 }
  0x98   : > { %1632 = vmatpush1.bf16.msra.mxu1 %v2271_v48 }
  0x99   : > { %1633 = vmatprep.subr.bf16.mxu1 %v2276_v49 }
  0x9a   : > { %1344 = vmatpush2.bf16.msra.mxu0 %v2241_v31 }
  0x9b   : > { %1345 = vmatprep.subr.bf16.mxu0 %v2249_v32 }
  0x9c   : > { %1634 = vmatpush1.bf16.msra.mxu1 %v2274_v50 }
  0x9d   : > { %1635 = vmatprep.subr.bf16.mxu1 %v2279_v51 }
  0x9e   : > { %1346 = vmatpush2.bf16.msra.mxu0 %v2247_v33 }
  0x9f   : > { %1347 = vmatprep.subr.bf16.mxu0 %v2255_v34 }
  0xa0   : > { %1636 = vmatpush1.bf16.msra.mxu1 %v2277_v52 }
  0xa1   : > { %1637 = vmatprep.subr.bf16.mxu1 %v2282_v54 }
  0xa2   : > { %1348 = vmatpush2.bf16.msra.mxu0 %v2253_v35  ;;  %v1407_v35 = vlaneseq }
  0xa3   : > { %1349 = vmatprep.subr.bf16.mxu0 %v2261_v36 }
  0xa4   : > { %1638 = vmatpush1.bf16.msra.mxu1 %v2280_v55  ;;  %v1408_v36 = vshrl.u32 %v1407_v35, 7 }
  0xa5   : > { %1639 = vmatprep.subr.bf16.mxu1 %v2285_v56 }
  0xa6   : > { %1350 = vmatpush2.bf16.msra.mxu0 %v2259_v37  ;;  %v1409_v37 = vsub.s32 0, %v1408_v36 }
  0xa7   : > { %1351 = vmatprep.subr.bf16.mxu0 %v2264_v38  ;;  %v1405_v38 = vld [vmem:[%s2980_s2] sm:$0x3] }
  0xa8   : > { %1640 = vmatpush1.bf16.msra.mxu1 %v2283_v57  ;;  %v1410_v43 = vrot.slane %v1405_v38, %v1409_v37 }
  0xa9   : > { %1641 = vmatprep.subr.bf16.mxu1 %v2288_v58 }
  0xaa   : > { %1352 = vmatpush2.bf16.msra.mxu0 %v2262_v39  ;;  %v1413_v39 = vsub.s32 1, %v1408_v36 }
  0xac   : > { %1642 = vmatpush1.bf16.msra.mxu1 %v2286_v60  ;;  %v1414_v48 = vrot.slane %v1405_v38, %v1413_v39  ;;  %v1455_v60 = vld [vmem:[%s2982_s4] sm:$0x3] }
  0xad   : > { %1354 = vmatmul.mubr.bf16.vlgmr.msra.gmra.mxu0 %v1075_v40  ;;  %1643 = vmatprep.subr.bf16.mxu1 %v2291_v61  ;;  %v1460_v61 = vrot.slane %v1455_v60, %v1409_v37 }
  0xb0   : > { %1644 = vmatpush2.bf16.msra.mxu1 %v2289_v41  ;;  %v1464_v41 = vrot.slane %v1455_v60, %v1413_v39 }
  0xb1   : > { %1645 = vmatprep.subr.bf16.mxu1 %v2294_v59 }
  0xb4   : > { %1646 = vmatpush2.bf16.msra.mxu1 %v2292_v62 }
  0xb5   : > { %1647 = vmatprep.subr.bf16.mxu1 %v2297_v63 }
  0xb8   : > { %1648 = vmatpush2.bf16.msra.mxu1 %v2295_v0 }
  0xb9   : > { %1649 = vmatprep.subr.bf16.mxu1 %v2300_v1 }
  0xbc   : > { %1650 = vmatpush2.bf16.msra.mxu1 %v2298_v3 }
  0xbd   : > { %1651 = vmatprep.subr.bf16.mxu1 %v2303_v46 }
  0xc0   : > { %1652 = vmatpush2.bf16.msra.mxu1 %v2301_v4 }
  0xc1   : > { %1653 = vmatprep.subr.bf16.mxu1 %v2306_v6 }
  0xc4   : > { %1654 = vmatpush2.bf16.msra.mxu1 %v2304_v7 }
  0xc5   : > { %1655 = vmatprep.subr.bf16.mxu1 %v2309_v9 }
  0xc8   : > { %1656 = vmatpush2.bf16.msra.mxu1 %v2307_v10 }
  0xc9   : > { %1657 = vmatprep.subr.bf16.mxu1 %v2312_v12 }
  0xcc   : > { %1658 = vmatpush2.bf16.msra.mxu1 %v2310_v13 }
  0xee   : > { %v688_v5 = vpop.f32.mrf.mxu1 }
  0xf0   : > { %v690_v2 = vpop.f32.mrf.mxu1 }
  0xf2   : > { %v692_v8 = vpop.f32.mrf.mxu1 }
  0xf4   : > { %v693_v11 = vpop.f32.mrf.mxu1 }
 0x10d   : > { %v647_v14 = vpop.f32.mrf.mxu0 }
 0x10e   : > { %v689_v15 = vadd.f32 %v688_v5, %v647_v14 }
 0x10f   : > { %v649_v16 = vpop.f32.mrf.mxu0 }
 0x110   : > { %v691_v17 = vadd.f32 %v690_v2, %v649_v16 }
 0x111   : > { %v651_v18 = vpop.f32.mrf.mxu0 }
 0x113   : > { %v652_v19 = vpop.f32.mrf.mxu0 }
 0x12d   : > { %v1010_v20 = vpop.f32.mrf.mxu0 }
 0x12f   : > { %v1012_v21 = vpop.f32.mrf.mxu0  ;;  %v969_v22 = vpop.f32.mrf.mxu1 }
 0x130   : > { %v970_v23 = vadd.f32 %v969_v22, %v689_v15 }
 0x131   : > { %v1014_v24 = vpop.f32.mrf.mxu0  ;;  %v971_v25 = vpop.f32.mrf.mxu1 }
 0x132   : > { %v1011_v26 = vadd.f32 %v1010_v20, %v970_v23  ;;  %v972_v27 = vadd.f32 %v971_v25, %v691_v17 }
 0x133   : > { %v1015_v28 = vpop.f32.mrf.mxu0  ;;  %v973_v29 = vpop.f32.mrf.mxu1 }
 0x134   : > { %v1013_v30 = vadd.f32 %v1012_v21, %v972_v27 }
 0x135   : > { %v974_v53 = vpop.f32.mrf.mxu1 }
 0x14f   : > { %v1396_v31 = vpop.f32.mrf.mxu1 }
 0x151   : > { %v1398_v32 = vpop.f32.mrf.mxu1 }
 0x153   : > { %v1400_v33 = vpop.f32.mrf.mxu1 }
 0x155   : > { %v1401_v34 = vpop.f32.mrf.mxu1 }
 0x16d   : > { %v1355_v40 = vpop.f32.mrf.mxu0 }
 0x16e   : > { %v1397_v42 = vadd.f32 %v1396_v31, %v1355_v40 }
 0x16f   : > { %v1357_v45 = vpop.f32.mrf.mxu0 }
 0x170   : > { %v1403_v44 = vadd.f32 %v1397_v42, %v1011_v26  ;;  %v1399_v47 = vadd.f32 %v1398_v32, %v1357_v45 }
 0x171   : > { %v1359_v49 = vpop.f32.mrf.mxu0 }
 0x172   : > { %v1417_v50 = vadd.f32 %v1410_v43, %v1403_v44  ;;  %v1404_v51 = vadd.f32 %v1399_v47, %v1013_v30 }
 0x173   : > { %v1360_v52 = vpop.f32.mrf.mxu0 }
 0x174   : > { %v1418_v54 = vadd.f32 %v1414_v48, %v1404_v51  ;;  %v1419_v55 = vmax.f32 %v1417_v50, 0.0 }
 0x176   : > { %v1420_v56 = vmax.f32 %v1418_v54, 0.0  ;;  %v1421_v58 = vpack.c.bf16 %v1419_v55, %v1419_v55 }
 0x178   : > { %v1422_v57 = vpack.c.bf16 %v1420_v56, %v1420_v56 }
 0x17a   : > { %1659 = vmatprep.mubr.bf16.mxu1 %v1422_v57 }
 0x17b   : > { %1660 = vmatmul.mubr.bf16.vlgmr.msra.gmra.mxu1 %v1421_v58 }
 0x23b   : > { %v1661_v59 = vpop.f32.mrf.mxu1 }
 0x23c   : > { %v1662_v62 = vadd.f32 %v1661_v59, %v1460_v61 }
 0x23d   : > { %v1663_v63 = vpop.f32.mrf.mxu1 }
 0x23e   : > { %v1664_v0 = vadd.f32 %v1663_v63, %v1464_v41  ;;  %v1668_v3 = vmul.f32 %v1662_v62, %v1662_v62 }
 0x23f   : > { %v1665_v1 = vpop.f32.mrf.mxu1 }
 0x240   : > { %v1669_v46 = vmul.f32 %v1664_v0, %v1664_v0 }
 0x241   : > { %v1666_v4 = vpop.f32.mrf.mxu1 }
 0x242   : > { %v1670_v5 = vadd.f32 %v1669_v46, %v1668_v3 }
 0x244   : > { %1671 = vadd.xlane.f32.xlu0 %v1670_v5 }
 0x2cd   : > { %v1672_v6 = vpop.xlane.xlu0 %1671 }
 0x2ce   : > { %v1673_v7 = vadd.f32 1e-12, %v1672_v6 }
 0x2d0   : > { %2313 = vrsqrt.f32 %v1673_v7 }
 0x2dd   : > { %v2314_v2 = vpop.eup %2313 }
 0x2de   : > { %v1675_v8 = vmul.f32 %v2314_v2, %v1662_v62  ;;  %v1676_v9 = vmul.f32 %v2314_v2, %v1664_v0 }
 0x2e0   : > { %1677 = vst [vmem:[%s236_s28] sm:$0xff] %v1675_v8  ;;  %1678 = vst [vmem:[%s236_s28 + $0x8] sm:$0xff] %v1676_v9 }
 0x2e1 PF: > { %s15_s20 = sadd.s32 1, %s2337_s20   ;;  %s2984_s18 = smov %s2333_s19 }
 0x2e2   : > { %p12_p5 = scmp.ge.s32.totalorder %s15_s20, 4   ;;  %s2985_s19 = smov %s2987_s21 }
 0x2e4   :  { %14 = sbr.rel (!%p12_p5) target bundleno = 2 (0x2), region = 72 }

</bundles_post_ra>
